<compile_context>
chip_gen: v5e
topology: v5e:2x2
jax: 0.10.0
libtpu: 0.0.40
codegen_flags: <defaults>
</compile_context>

<pallas_src>
import functools

import jax
import jax.numpy as jnp
import numpy as np
from jax.experimental import pallas as pl
from jax.experimental.pallas import tpu as pltpu

# small, self-consistent captcha settings (IMAGE_* must be divisible by 8)
IMAGE_HEIGHT = 16
IMAGE_WIDTH = 16
MAX_CAPTCHA = 4
ALL_CHAR_SET_LEN = 10
BN_EPS = 1e-5

C1, C2, C3 = 32, 64, 64      # conv output channels
CPAD = 128                   # per-tap channel block padded to one lane tile


def _round8(n):
    return -(-n // 8) * 8


def _derive(H1):
    """Static layout constants shared by the wrapper and the kernel."""
    H2 = W2 = H1 // 2          # layer-2 input spatial size
    H3 = W3 = H1 // 4          # layer-3 input spatial size
    # Zero-padded inter-layer buffers use a row stride (Sp) that is a
    # multiple of 8 and an interior start (T) that is a multiple of 8, so
    # every pooled-row scatter store is sublane aligned.  The unused slot
    # columns double as the conv zero padding.
    Sp2 = _round8(W2 + 2)
    Sp3 = _round8(W3 + 2)
    T2, T3 = Sp2 + 8, Sp3 + 8            # first interior row (8-aligned)
    B2, B3 = T2 - Sp2 - 1, T3 - Sp3 - 1  # tap read base offsets
    pad2_rows = _round8(T2 + Sp2 + 1 + H2 * Sp2)
    pad3_rows = _round8(T3 + Sp3 + 1 + H3 * Sp3)
    return dict(H2=H2, W2=W2, H3=H3, W3=W3, Sp2=Sp2, Sp3=Sp3, T2=T2, T3=T3,
                B2=B2, B3=B3, pad2_rows=pad2_rows, pad3_rows=pad3_rows,
                n_sp=(H3 // 2) * (W3 // 2))


# ----------------------------------------------------------------------------
# Fused whole-network kernel (one grid step == one image)
# ----------------------------------------------------------------------------
def _cnn_fused_kernel(x_ref, w1_ref, aff1_ref, w2_ref, aff2_ref, w3_ref,
                      aff3_ref, fcw_ref, fcb_ref, rw_ref, rb_ref, r2w_ref,
                      r2b_ref, o_ref,
                      pad2_buf, pad3_buf, slab2_buf, slab3_buf,
                      acc1_buf, acc2_buf, acc3_buf, feats_buf, *, H1):
    d = _derive(H1)
    W1 = H1
    H2, W2, H3, W3 = d["H2"], d["W2"], d["H3"], d["W3"]
    Sp2, Sp3 = d["Sp2"], d["Sp3"]
    T2, T3, B2, B3 = d["T2"], d["T3"], d["B2"], d["B3"]
    M2, M3 = H2 * Sp2, H3 * Sp3          # conv-2/3 matmul M (slot-padded width)

    # Zero the padded staging buffers and the feature row every grid step
    # (the zero border/slot columns ARE the conv padding; the interiors are
    # overwritten below).  ~120 KiB of VMEM stores -> negligible.
    pad2_buf[...] = jnp.zeros_like(pad2_buf)
    pad3_buf[...] = jnp.zeros_like(pad3_buf)
    feats_buf[...] = jnp.zeros_like(feats_buf)

    def bn_relu(acc, aff_ref):
        # folded BatchNorm(eval) affine (includes conv bias) + ReLU, in f32
        return jnp.maximum(acc * aff_ref[0:1, :] + aff_ref[1:2, :], 0.0)

    def pool_row(acc_ref, r0, r1, n):
        # one pooled output row: max over the 2x2 window == 4 stride-2 reads
        return jnp.maximum(
            jnp.maximum(acc_ref[pl.ds(r0, n, 2), :],
                        acc_ref[pl.ds(r0 + 1, n, 2), :]),
            jnp.maximum(acc_ref[pl.ds(r1, n, 2), :],
                        acc_ref[pl.ds(r1 + 1, n, 2), :]))

    # ---- layer 1: 3x3 conv (1->32) == one (H*W, 9) x (9, 32) matmul --------
    y = jnp.dot(x_ref[0], w1_ref[...], preferred_element_type=jnp.float32)
    acc1_buf[...] = bn_relu(y, aff1_ref)
    # fused 2x2 max-pool + scatter into the layer-2 zero-padded row slots
    for i in range(H2):
        r = pool_row(acc1_buf, (2 * i) * W1, (2 * i + 1) * W1, W2)
        pad2_buf[pl.ds(T2 + i * Sp2, W2), 0:C1] = r

    # ---- layer 2: 3x3 conv (32->64), stacked-tap im2col + one matmul -------
    for k in range(9):       # each tap gets its own 128-lane tile in the slab
        dy, dx = divmod(k, 3)
        slab2_buf[:, k * CPAD:(k + 1) * CPAD] = (
            pad2_buf[pl.ds(B2 + dy * Sp2 + dx, M2), :].astype(jnp.bfloat16))
    y = jnp.dot(slab2_buf[...], w2_ref[...],
                preferred_element_type=jnp.float32)
    acc2_buf[...] = bn_relu(y, aff2_ref)
    for i in range(H3):
        r = pool_row(acc2_buf, (2 * i) * Sp2, (2 * i + 1) * Sp2, W3)
        pad3_buf[pl.ds(T3 + i * Sp3, W3), 0:C2] = r

    # ---- layer 3: 3x3 conv (64->64), stacked-tap im2col + one matmul -------
    for k in range(9):
        dy, dx = divmod(k, 3)
        slab3_buf[:, k * CPAD:(k + 1) * CPAD] = (
            pad3_buf[pl.ds(B3 + dy * Sp3 + dx, M3), :].astype(jnp.bfloat16))
    y = jnp.dot(slab3_buf[...], w3_ref[...],
                preferred_element_type=jnp.float32)
    acc3_buf[...] = bn_relu(y, aff3_ref)
    # final 2x2 pool straight into a lane-dense feature row, (h, w, c)-major
    # with each spatial position in its own 128-lane tile; the fc weight rows
    # were permuted / zero-padded to match, so no transpose is needed.
    for i in range(H3 // 2):
        for j in range(W3 // 2):
            r0 = (2 * i) * Sp3 + 2 * j
            r1 = (2 * i + 1) * Sp3 + 2 * j
            r = jnp.maximum(
                jnp.maximum(acc3_buf[r0:r0 + 1, :],
                            acc3_buf[r0 + 1:r0 + 2, :]),
                jnp.maximum(acc3_buf[r1:r1 + 1, :],
                            acc3_buf[r1 + 1:r1 + 2, :]))
            s = i * (W3 // 2) + j
            feats_buf[0:1, s * CPAD:s * CPAD + C3] = r

    # ---- MLP head: fc(1024)+ReLU, rfc(256)+ReLU, rfc2(out). Dropout == id. --
    h = jnp.dot(feats_buf[...].astype(jnp.bfloat16), fcw_ref[...],
                preferred_element_type=jnp.float32) + fcb_ref[...]
    h = jnp.maximum(h, 0.0)
    h = jnp.dot(h.astype(jnp.bfloat16), rw_ref[...],
                preferred_element_type=jnp.float32) + rb_ref[...]
    h = jnp.maximum(h, 0.0)
    out = jnp.dot(h.astype(jnp.bfloat16), r2w_ref[...],
                  preferred_element_type=jnp.float32) + r2b_ref[...]
    o_ref[0] = out


# ----------------------------------------------------------------------------
# Parameter preparation (done once, outside the kernel)
# ----------------------------------------------------------------------------
def _prep_params(p, H1):
    """Fold BN into scale/shift, stack conv taps into zero-padded 128-lane
    tap tiles, fold the NCHW flatten permutation into the fc weight, and
    cast MXU weight operands to bf16."""
    def aff(l):
        sc = l["gamma"] / jnp.sqrt(l["var"] + BN_EPS)
        sh = l["beta"] + (l["b"] - l["mean"]) * sc
        return jnp.stack([sc, sh]).astype(jnp.float32)           # (2, C)

    def conv_w(l, cin):
        wp = jnp.pad(l["w"], ((0, 0), (0, 0), (0, CPAD - cin), (0, 0)))
        return wp.reshape(9 * CPAD, -1).astype(jnp.bfloat16)     # (1152, Cout)

    d = _derive(H1)
    fh, fw = d["H3"] // 2, d["W3"] // 2             # 2 x 2 feature map
    fc4 = p["fc_w"].reshape(C3, fh, fw, -1)         # torch rows: c*fh*fw+i*fw+j
    fc4 = jnp.transpose(fc4, (1, 2, 0, 3))          # -> (i, j, c, :)
    fc4 = jnp.pad(fc4, ((0, 0), (0, 0), (0, CPAD - C3), (0, 0)))
    fcw = fc4.reshape(fh * fw * CPAD, -1).astype(jnp.bfloat16)   # (512, 1024)

    return dict(
        w1=p["l1"]["w"].reshape(9, C1).astype(jnp.float32),      # layer-1 f32
        aff1=aff(p["l1"]),
        w2=conv_w(p["l2"], C1), aff2=aff(p["l2"]),
        w3=conv_w(p["l3"], C2), aff3=aff(p["l3"]),
        fcw=fcw,
        fcb=p["fc_b"].reshape(1, -1).astype(jnp.float32),
        rw=p["rfc_w"].astype(jnp.bfloat16),
        rb=p["rfc_b"].reshape(1, -1).astype(jnp.float32),
        r2w=p["rfc2_w"].astype(jnp.bfloat16),
        r2b=p["rfc2_b"].reshape(1, -1).astype(jnp.float32),
    )


# ----------------------------------------------------------------------------
# Full forward (NCHW in, logits out) — one pallas_call for the whole network
# ----------------------------------------------------------------------------
@jax.jit
def cnn_forward(x_nchw, p):
    N, _, H1, W1in = x_nchw.shape
    assert H1 == W1in and H1 % 8 == 0
    d = _derive(H1)
    out_dim = p["rfc2_w"].shape[-1]
    q = _prep_params(p, H1)

    # layer-1 im2col (a few KiB) prepared once in the wrapper; everything
    # else happens inside the single fused kernel.
    img = x_nchw[:, 0, :, :].astype(jnp.float32)
    xp = jnp.pad(img, ((0, 0), (1, 1), (1, 1)))
    slab1 = jnp.stack([xp[:, dy:dy + H1, dx:dx + H1]
                       for dy in range(3) for dx in range(3)],
                      axis=-1).reshape(N, H1 * H1, 9)

    rep_names = ("w1", "aff1", "w2", "aff2", "w3", "aff3",
                 "fcw", "fcb", "rw", "rb", "r2w", "r2b")
    rep_args = [q[k] for k in rep_names]
    rep_specs = [pl.BlockSpec(a.shape, lambda n: (0, 0)) for a in rep_args]

    out = pl.pallas_call(
        functools.partial(_cnn_fused_kernel, H1=H1),
        out_shape=jax.ShapeDtypeStruct((N, 1, out_dim), jnp.float32),
        grid=(N,),
        in_specs=[pl.BlockSpec((1, H1 * H1, 9), lambda n: (n, 0, 0))]
                 + rep_specs,
        out_specs=pl.BlockSpec((1, 1, out_dim), lambda n: (n, 0, 0)),
        scratch_shapes=[
            pltpu.VMEM((d["pad2_rows"], CPAD), jnp.float32),         # pad2
            pltpu.VMEM((d["pad3_rows"], CPAD), jnp.float32),         # pad3
            pltpu.VMEM((d["H2"] * d["Sp2"], 9 * CPAD), jnp.bfloat16),  # slab2
            pltpu.VMEM((d["H3"] * d["Sp3"], 9 * CPAD), jnp.bfloat16),  # slab3
            pltpu.VMEM((H1 * H1, C1), jnp.float32),                  # acc1
            pltpu.VMEM((d["H2"] * d["Sp2"], C2), jnp.float32),       # acc2
            pltpu.VMEM((d["H3"] * d["Sp3"], C3), jnp.float32),       # acc3
            pltpu.VMEM((1, d["n_sp"] * CPAD), jnp.float32),          # feats
        ],
        compiler_params=pltpu.CompilerParams(
            dimension_semantics=("parallel",)),
    )(slab1, *rep_args)
    return out[:, 0, :]


# ----------------------------------------------------------------------------
# Parameters (deterministic, synthetic)
# ----------------------------------------------------------------------------
def init_params(key):
    ks = jax.random.split(key, 24)

    def rnd(i, shape, s):
        return jax.random.normal(ks[i], shape, jnp.float32) * s

    def conv_layer(i0, cin, cout):
        return dict(
            w=rnd(i0, (3, 3, cin, cout), 0.1),
            b=rnd(i0 + 1, (cout,), 0.1),
            gamma=1.0 + rnd(i0 + 2, (cout,), 0.1),
            beta=rnd(i0 + 3, (cout,), 0.1),
            mean=rnd(i0 + 4, (cout,), 0.1),
            var=1.0 + jnp.abs(rnd(i0 + 5, (cout,), 0.1)),
        )

    feat = (IMAGE_WIDTH // 8) * (IMAGE_HEIGHT // 8) * 64
    out_dim = MAX_CAPTCHA * ALL_CHAR_SET_LEN
    return {
        "l1": conv_layer(0, 1, C1),
        "l2": conv_layer(6, C1, C2),
        "l3": conv_layer(12, C2, C3),
        "fc_w": rnd(18, (feat, 1024), 0.05),
        "fc_b": rnd(19, (1024,), 0.05),
        "rfc_w": rnd(20, (1024, 256), 0.05),
        "rfc_b": rnd(21, (256,), 0.05),
        "rfc2_w": rnd(22, (256, out_dim), 0.05),
        "rfc2_b": rnd(23, (out_dim,), 0.05),
    }


# ----------------------------------------------------------------------------
# Pure-JAX f32 reference (for correctness check)
# ----------------------------------------------------------------------------
def _ref_conv_block(x_nchw, l):
    wt = jnp.transpose(l["w"], (3, 2, 0, 1))   # OIHW
    y = jax.lax.conv_general_dilated(
        x_nchw, wt, window_strides=(1, 1), padding=((1, 1), (1, 1)),
        dimension_numbers=("NCHW", "OIHW", "NCHW"))
    y = y + l["b"][None, :, None, None]
    inv = (l["gamma"] / jnp.sqrt(l["var"] + BN_EPS))[None, :, None, None]
    y = (y - l["mean"][None, :, None, None]) * inv + l["beta"][None, :, None, None]
    y = jnp.maximum(y, 0.0)
    n, c, h, w = y.shape
    return y.reshape(n, c, h // 2, 2, w // 2, 2).max(axis=(3, 5))


def ref_forward(x_nchw, p):
    y = x_nchw.astype(jnp.float32)
    for name in ("l1", "l2", "l3"):
        y = _ref_conv_block(y, p[name])
    y = y.reshape(y.shape[0], -1)
    y = jnp.maximum(y @ p["fc_w"] + p["fc_b"], 0.0)
    y = jnp.maximum(y @ p["rfc_w"] + p["rfc_b"], 0.0)
    return y @ p["rfc2_w"] + p["rfc2_b"]


if __name__ == "__main__":
    key = jax.random.PRNGKey(0)
    kp, kx = jax.random.split(key)
    params = init_params(kp)
    x = jax.random.normal(kx, (2, 1, IMAGE_HEIGHT, IMAGE_WIDTH), jnp.float32)

    out = cnn_forward(x, params)
    jax.block_until_ready(out)
    assert out.shape == (2, MAX_CAPTCHA * ALL_CHAR_SET_LEN)

    ref = ref_forward(x, params)
    # conv2/conv3/MLP run with bf16 MXU operands (f32 accumulation), so the
    # tolerance vs. the pure-f32 reference is a bit looser than before.
    np.testing.assert_allclose(np.asarray(out), np.asarray(ref),
                               rtol=2e-2, atol=2e-2)
    print("KERNEL_OK")
</pallas_src>

<mosaic_0001>
module attributes {stable_mosaic.version = 11 : i64} {
  func.func @_cnn_fused_kernel(%arg0: i32, %arg1: memref<1x256x9xf32, #tpu.memory_space<vmem>>, %arg2: memref<9x32xf32, #tpu.memory_space<vmem>>, %arg3: memref<2x32xf32, #tpu.memory_space<vmem>>, %arg4: memref<1152x64xbf16, #tpu.memory_space<vmem>>, %arg5: memref<2x64xf32, #tpu.memory_space<vmem>>, %arg6: memref<1152x64xbf16, #tpu.memory_space<vmem>>, %arg7: memref<2x64xf32, #tpu.memory_space<vmem>>, %arg8: memref<512x1024xbf16, #tpu.memory_space<vmem>>, %arg9: memref<1x1024xf32, #tpu.memory_space<vmem>>, %arg10: memref<1024x256xbf16, #tpu.memory_space<vmem>>, %arg11: memref<1x256xf32, #tpu.memory_space<vmem>>, %arg12: memref<256x40xbf16, #tpu.memory_space<vmem>>, %arg13: memref<1x40xf32, #tpu.memory_space<vmem>>, %arg14: memref<1x1x40xf32, #tpu.memory_space<vmem>>, %arg15: memref<176x128xf32, #tpu.memory_space<vmem>>, %arg16: memref<64x128xf32, #tpu.memory_space<vmem>>, %arg17: memref<128x1152xbf16, #tpu.memory_space<vmem>>, %arg18: memref<32x1152xbf16, #tpu.memory_space<vmem>>, %arg19: memref<256x32xf32, #tpu.memory_space<vmem>>, %arg20: memref<128x64xf32, #tpu.memory_space<vmem>>, %arg21: memref<32x64xf32, #tpu.memory_space<vmem>>, %arg22: memref<1x512xf32, #tpu.memory_space<vmem>>) attributes {dimension_semantics = [#tpu.dimension_semantics<parallel>], iteration_bounds = array<i64: 2>, scalar_prefetch = 0 : i64, scratch_operands = 8 : i64, tpu.core_type = #tpu.core_type<tc>, window_params = [{transform_indices = @transform_0, window_bounds = array<i64: 1, 256, 9>}, {pipeline_mode = #tpu.pipeline_mode<synchronous>, transform_indices = @transform_1, window_bounds = array<i64: 9, 32>}, {pipeline_mode = #tpu.pipeline_mode<synchronous>, transform_indices = @transform_2, window_bounds = array<i64: 2, 32>}, {pipeline_mode = #tpu.pipeline_mode<synchronous>, transform_indices = @transform_3, window_bounds = array<i64: 1152, 64>}, {pipeline_mode = #tpu.pipeline_mode<synchronous>, transform_indices = @transform_4, window_bounds = array<i64: 2, 64>}, {pipeline_mode = #tpu.pipeline_mode<synchronous>, transform_indices = @transform_5, window_bounds = array<i64: 1152, 64>}, {pipeline_mode = #tpu.pipeline_mode<synchronous>, transform_indices = @transform_6, window_bounds = array<i64: 2, 64>}, {pipeline_mode = #tpu.pipeline_mode<synchronous>, transform_indices = @transform_7, window_bounds = array<i64: 512, 1024>}, {pipeline_mode = #tpu.pipeline_mode<synchronous>, transform_indices = @transform_8, window_bounds = array<i64: 1, 1024>}, {pipeline_mode = #tpu.pipeline_mode<synchronous>, transform_indices = @transform_9, window_bounds = array<i64: 1024, 256>}, {pipeline_mode = #tpu.pipeline_mode<synchronous>, transform_indices = @transform_10, window_bounds = array<i64: 1, 256>}, {pipeline_mode = #tpu.pipeline_mode<synchronous>, transform_indices = @transform_11, window_bounds = array<i64: 256, 40>}, {pipeline_mode = #tpu.pipeline_mode<synchronous>, transform_indices = @transform_12, window_bounds = array<i64: 1, 40>}, {transform_indices = @transform_13, window_bounds = array<i64: 1, 1, 40>}]} {
    %cst = arith.constant 0.000000e+00 : f32
    %0 = vector.broadcast %cst : f32 to vector<176x128xf32>
    %c0 = arith.constant 0 : index
    %c0_0 = arith.constant 0 : index
    %1 = vector.load %arg15[%c0, %c0_0] : memref<176x128xf32, #tpu.memory_space<vmem>>, vector<176x128xf32>
    tpu.vector_store %arg15[%c0, %c0_0], %0 {strides = array<i32>} : memref<176x128xf32, #tpu.memory_space<vmem>>, vector<176x128xf32>,
    %cst_1 = arith.constant 0.000000e+00 : f32
    %2 = vector.broadcast %cst_1 : f32 to vector<64x128xf32>
    %c0_2 = arith.constant 0 : index
    %c0_3 = arith.constant 0 : index
    %3 = vector.load %arg16[%c0_2, %c0_3] : memref<64x128xf32, #tpu.memory_space<vmem>>, vector<64x128xf32>
    tpu.vector_store %arg16[%c0_2, %c0_3], %2 {strides = array<i32>} : memref<64x128xf32, #tpu.memory_space<vmem>>, vector<64x128xf32>,
    %cst_4 = arith.constant 0.000000e+00 : f32
    %4 = vector.broadcast %cst_4 : f32 to vector<1x512xf32>
    %c0_5 = arith.constant 0 : index
    %c0_6 = arith.constant 0 : index
    %5 = vector.load %arg22[%c0_5, %c0_6] : memref<1x512xf32, #tpu.memory_space<vmem>>, vector<1x512xf32>
    tpu.vector_store %arg22[%c0_5, %c0_6], %4 {strides = array<i32>} : memref<1x512xf32, #tpu.memory_space<vmem>>, vector<1x512xf32>,
    %c0_7 = arith.constant 0 : index
    %c0_8 = arith.constant 0 : index
    %c0_9 = arith.constant 0 : index
    %6 = vector.load %arg1[%c0_7, %c0_8, %c0_9] : memref<1x256x9xf32, #tpu.memory_space<vmem>>, vector<1x256x9xf32>
    %7 = vector.shape_cast %6 : vector<1x256x9xf32> to vector<256x9xf32>
    %c0_10 = arith.constant 0 : index
    %c0_11 = arith.constant 0 : index
    %8 = vector.load %arg2[%c0_10, %c0_11] : memref<9x32xf32, #tpu.memory_space<vmem>>, vector<9x32xf32>
    %cst_12 = arith.constant dense<0.000000e+00> : vector<256x32xf32>
    %9 = tpu.matmul %7, %8, %cst_12 {dimension_numbers = #tpu.dot_dimension_numbers<[1], [0], [0], [1], [0, 0, 1, 1], [], []>} : vector<256x9xf32>, vector<9x32xf32>, vector<256x32xf32> -> vector<256x32xf32>
    %c0_13 = arith.constant 0 : index
    %c0_14 = arith.constant 0 : index
    %10 = vector.load %arg3[%c0_13, %c0_14] : memref<2x32xf32, #tpu.memory_space<vmem>>, vector<1x32xf32>
    %11 = vector.broadcast %10 : vector<1x32xf32> to vector<256x32xf32>
    %12 = arith.mulf %9, %11 : vector<256x32xf32>
    %c1 = arith.constant 1 : index
    %c0_15 = arith.constant 0 : index
    %13 = vector.load %arg3[%c1, %c0_15] : memref<2x32xf32, #tpu.memory_space<vmem>>, vector<1x32xf32>
    %14 = vector.broadcast %13 : vector<1x32xf32> to vector<256x32xf32>
    %15 = arith.addf %12, %14 : vector<256x32xf32>
    %cst_16 = arith.constant 0.000000e+00 : f32
    %16 = vector.broadcast %cst_16 : f32 to vector<256x32xf32>
    %17 = arith.maximumf %15, %16 : vector<256x32xf32>
    %c0_17 = arith.constant 0 : index
    %c0_18 = arith.constant 0 : index
    %18 = vector.load %arg19[%c0_17, %c0_18] : memref<256x32xf32, #tpu.memory_space<vmem>>, vector<256x32xf32>
    tpu.vector_store %arg19[%c0_17, %c0_18], %17 {strides = array<i32>} : memref<256x32xf32, #tpu.memory_space<vmem>>, vector<256x32xf32>,
    %c0_19 = arith.constant 0 : index
    %c0_20 = arith.constant 0 : index
    %19 = tpu.strided_load %arg19[%c0_19, %c0_20] {strides = array<i32: 2, 1>} : memref<256x32xf32, #tpu.memory_space<vmem>>, vector<8x32xf32>
    %c1_21 = arith.constant 1 : index
    %c0_22 = arith.constant 0 : index
    %20 = tpu.strided_load %arg19[%c1_21, %c0_22] {strides = array<i32: 2, 1>} : memref<256x32xf32, #tpu.memory_space<vmem>>, vector<8x32xf32>
    %21 = arith.maximumf %19, %20 : vector<8x32xf32>
    %c16 = arith.constant 16 : index
    %c0_23 = arith.constant 0 : index
    %22 = tpu.strided_load %arg19[%c16, %c0_23] {strides = array<i32: 2, 1>} : memref<256x32xf32, #tpu.memory_space<vmem>>, vector<8x32xf32>
    %c17 = arith.constant 17 : index
    %c0_24 = arith.constant 0 : index
    %23 = tpu.strided_load %arg19[%c17, %c0_24] {strides = array<i32: 2, 1>} : memref<256x32xf32, #tpu.memory_space<vmem>>, vector<8x32xf32>
    %24 = arith.maximumf %22, %23 : vector<8x32xf32>
    %25 = arith.maximumf %21, %24 : vector<8x32xf32>
    %c24 = arith.constant 24 : index
    %c0_25 = arith.constant 0 : index
    %26 = vector.load %arg15[%c24, %c0_25] : memref<176x128xf32, #tpu.memory_space<vmem>>, vector<8x32xf32>
    tpu.vector_store %arg15[%c24, %c0_25], %25 {strides = array<i32>} : memref<176x128xf32, #tpu.memory_space<vmem>>, vector<8x32xf32>,
    %c32 = arith.constant 32 : index
    %c0_26 = arith.constant 0 : index
    %27 = tpu.strided_load %arg19[%c32, %c0_26] {strides = array<i32: 2, 1>} : memref<256x32xf32, #tpu.memory_space<vmem>>, vector<8x32xf32>
    %c33 = arith.constant 33 : index
    %c0_27 = arith.constant 0 : index
    %28 = tpu.strided_load %arg19[%c33, %c0_27] {strides = array<i32: 2, 1>} : memref<256x32xf32, #tpu.memory_space<vmem>>, vector<8x32xf32>
    %29 = arith.maximumf %27, %28 : vector<8x32xf32>
    %c48 = arith.constant 48 : index
    %c0_28 = arith.constant 0 : index
    %30 = tpu.strided_load %arg19[%c48, %c0_28] {strides = array<i32: 2, 1>} : memref<256x32xf32, #tpu.memory_space<vmem>>, vector<8x32xf32>
    %c49 = arith.constant 49 : index
    %c0_29 = arith.constant 0 : index
    %31 = tpu.strided_load %arg19[%c49, %c0_29] {strides = array<i32: 2, 1>} : memref<256x32xf32, #tpu.memory_space<vmem>>, vector<8x32xf32>
    %32 = arith.maximumf %30, %31 : vector<8x32xf32>
    %33 = arith.maximumf %29, %32 : vector<8x32xf32>
    %c40 = arith.constant 40 : index
    %c0_30 = arith.constant 0 : index
    %34 = vector.load %arg15[%c40, %c0_30] : memref<176x128xf32, #tpu.memory_space<vmem>>, vector<8x32xf32>
    tpu.vector_store %arg15[%c40, %c0_30], %33 {strides = array<i32>} : memref<176x128xf32, #tpu.memory_space<vmem>>, vector<8x32xf32>,
    %c64 = arith.constant 64 : index
    %c0_31 = arith.constant 0 : index
    %35 = tpu.strided_load %arg19[%c64, %c0_31] {strides = array<i32: 2, 1>} : memref<256x32xf32, #tpu.memory_space<vmem>>, vector<8x32xf32>
    %c65 = arith.constant 65 : index
    %c0_32 = arith.constant 0 : index
    %36 = tpu.strided_load %arg19[%c65, %c0_32] {strides = array<i32: 2, 1>} : memref<256x32xf32, #tpu.memory_space<vmem>>, vector<8x32xf32>
    %37 = arith.maximumf %35, %36 : vector<8x32xf32>
    %c80 = arith.constant 80 : index
    %c0_33 = arith.constant 0 : index
    %38 = tpu.strided_load %arg19[%c80, %c0_33] {strides = array<i32: 2, 1>} : memref<256x32xf32, #tpu.memory_space<vmem>>, vector<8x32xf32>
    %c81 = arith.constant 81 : index
    %c0_34 = arith.constant 0 : index
    %39 = tpu.strided_load %arg19[%c81, %c0_34] {strides = array<i32: 2, 1>} : memref<256x32xf32, #tpu.memory_space<vmem>>, vector<8x32xf32>
    %40 = arith.maximumf %38, %39 : vector<8x32xf32>
    %41 = arith.maximumf %37, %40 : vector<8x32xf32>
    %c56 = arith.constant 56 : index
    %c0_35 = arith.constant 0 : index
    %42 = vector.load %arg15[%c56, %c0_35] : memref<176x128xf32, #tpu.memory_space<vmem>>, vector<8x32xf32>
    tpu.vector_store %arg15[%c56, %c0_35], %41 {strides = array<i32>} : memref<176x128xf32, #tpu.memory_space<vmem>>, vector<8x32xf32>,
    %c96 = arith.constant 96 : index
    %c0_36 = arith.constant 0 : index
    %43 = tpu.strided_load %arg19[%c96, %c0_36] {strides = array<i32: 2, 1>} : memref<256x32xf32, #tpu.memory_space<vmem>>, vector<8x32xf32>
    %c97 = arith.constant 97 : index
    %c0_37 = arith.constant 0 : index
    %44 = tpu.strided_load %arg19[%c97, %c0_37] {strides = array<i32: 2, 1>} : memref<256x32xf32, #tpu.memory_space<vmem>>, vector<8x32xf32>
    %45 = arith.maximumf %43, %44 : vector<8x32xf32>
    %c112 = arith.constant 112 : index
    %c0_38 = arith.constant 0 : index
    %46 = tpu.strided_load %arg19[%c112, %c0_38] {strides = array<i32: 2, 1>} : memref<256x32xf32, #tpu.memory_space<vmem>>, vector<8x32xf32>
    %c113 = arith.constant 113 : index
    %c0_39 = arith.constant 0 : index
    %47 = tpu.strided_load %arg19[%c113, %c0_39] {strides = array<i32: 2, 1>} : memref<256x32xf32, #tpu.memory_space<vmem>>, vector<8x32xf32>
    %48 = arith.maximumf %46, %47 : vector<8x32xf32>
    %49 = arith.maximumf %45, %48 : vector<8x32xf32>
    %c72 = arith.constant 72 : index
    %c0_40 = arith.constant 0 : index
    %50 = vector.load %arg15[%c72, %c0_40] : memref<176x128xf32, #tpu.memory_space<vmem>>, vector<8x32xf32>
    tpu.vector_store %arg15[%c72, %c0_40], %49 {strides = array<i32>} : memref<176x128xf32, #tpu.memory_space<vmem>>, vector<8x32xf32>,
    %c128 = arith.constant 128 : index
    %c0_41 = arith.constant 0 : index
    %51 = tpu.strided_load %arg19[%c128, %c0_41] {strides = array<i32: 2, 1>} : memref<256x32xf32, #tpu.memory_space<vmem>>, vector<8x32xf32>
    %c129 = arith.constant 129 : index
    %c0_42 = arith.constant 0 : index
    %52 = tpu.strided_load %arg19[%c129, %c0_42] {strides = array<i32: 2, 1>} : memref<256x32xf32, #tpu.memory_space<vmem>>, vector<8x32xf32>
    %53 = arith.maximumf %51, %52 : vector<8x32xf32>
    %c144 = arith.constant 144 : index
    %c0_43 = arith.constant 0 : index
    %54 = tpu.strided_load %arg19[%c144, %c0_43] {strides = array<i32: 2, 1>} : memref<256x32xf32, #tpu.memory_space<vmem>>, vector<8x32xf32>
    %c145 = arith.constant 145 : index
    %c0_44 = arith.constant 0 : index
    %55 = tpu.strided_load %arg19[%c145, %c0_44] {strides = array<i32: 2, 1>} : memref<256x32xf32, #tpu.memory_space<vmem>>, vector<8x32xf32>
    %56 = arith.maximumf %54, %55 : vector<8x32xf32>
    %57 = arith.maximumf %53, %56 : vector<8x32xf32>
    %c88 = arith.constant 88 : index
    %c0_45 = arith.constant 0 : index
    %58 = vector.load %arg15[%c88, %c0_45] : memref<176x128xf32, #tpu.memory_space<vmem>>, vector<8x32xf32>
    tpu.vector_store %arg15[%c88, %c0_45], %57 {strides = array<i32>} : memref<176x128xf32, #tpu.memory_space<vmem>>, vector<8x32xf32>,
    %c160 = arith.constant 160 : index
    %c0_46 = arith.constant 0 : index
    %59 = tpu.strided_load %arg19[%c160, %c0_46] {strides = array<i32: 2, 1>} : memref<256x32xf32, #tpu.memory_space<vmem>>, vector<8x32xf32>
    %c161 = arith.constant 161 : index
    %c0_47 = arith.constant 0 : index
    %60 = tpu.strided_load %arg19[%c161, %c0_47] {strides = array<i32: 2, 1>} : memref<256x32xf32, #tpu.memory_space<vmem>>, vector<8x32xf32>
    %61 = arith.maximumf %59, %60 : vector<8x32xf32>
    %c176 = arith.constant 176 : index
    %c0_48 = arith.constant 0 : index
    %62 = tpu.strided_load %arg19[%c176, %c0_48] {strides = array<i32: 2, 1>} : memref<256x32xf32, #tpu.memory_space<vmem>>, vector<8x32xf32>
    %c177 = arith.constant 177 : index
    %c0_49 = arith.constant 0 : index
    %63 = tpu.strided_load %arg19[%c177, %c0_49] {strides = array<i32: 2, 1>} : memref<256x32xf32, #tpu.memory_space<vmem>>, vector<8x32xf32>
    %64 = arith.maximumf %62, %63 : vector<8x32xf32>
    %65 = arith.maximumf %61, %64 : vector<8x32xf32>
    %c104 = arith.constant 104 : index
    %c0_50 = arith.constant 0 : index
    %66 = vector.load %arg15[%c104, %c0_50] : memref<176x128xf32, #tpu.memory_space<vmem>>, vector<8x32xf32>
    tpu.vector_store %arg15[%c104, %c0_50], %65 {strides = array<i32>} : memref<176x128xf32, #tpu.memory_space<vmem>>, vector<8x32xf32>,
    %c192 = arith.constant 192 : index
    %c0_51 = arith.constant 0 : index
    %67 = tpu.strided_load %arg19[%c192, %c0_51] {strides = array<i32: 2, 1>} : memref<256x32xf32, #tpu.memory_space<vmem>>, vector<8x32xf32>
    %c193 = arith.constant 193 : index
    %c0_52 = arith.constant 0 : index
    %68 = tpu.strided_load %arg19[%c193, %c0_52] {strides = array<i32: 2, 1>} : memref<256x32xf32, #tpu.memory_space<vmem>>, vector<8x32xf32>
    %69 = arith.maximumf %67, %68 : vector<8x32xf32>
    %c208 = arith.constant 208 : index
    %c0_53 = arith.constant 0 : index
    %70 = tpu.strided_load %arg19[%c208, %c0_53] {strides = array<i32: 2, 1>} : memref<256x32xf32, #tpu.memory_space<vmem>>, vector<8x32xf32>
    %c209 = arith.constant 209 : index
    %c0_54 = arith.constant 0 : index
    %71 = tpu.strided_load %arg19[%c209, %c0_54] {strides = array<i32: 2, 1>} : memref<256x32xf32, #tpu.memory_space<vmem>>, vector<8x32xf32>
    %72 = arith.maximumf %70, %71 : vector<8x32xf32>
    %73 = arith.maximumf %69, %72 : vector<8x32xf32>
    %c120 = arith.constant 120 : index
    %c0_55 = arith.constant 0 : index
    %74 = vector.load %arg15[%c120, %c0_55] : memref<176x128xf32, #tpu.memory_space<vmem>>, vector<8x32xf32>
    tpu.vector_store %arg15[%c120, %c0_55], %73 {strides = array<i32>} : memref<176x128xf32, #tpu.memory_space<vmem>>, vector<8x32xf32>,
    %c224 = arith.constant 224 : index
    %c0_56 = arith.constant 0 : index
    %75 = tpu.strided_load %arg19[%c224, %c0_56] {strides = array<i32: 2, 1>} : memref<256x32xf32, #tpu.memory_space<vmem>>, vector<8x32xf32>
    %c225 = arith.constant 225 : index
    %c0_57 = arith.constant 0 : index
    %76 = tpu.strided_load %arg19[%c225, %c0_57] {strides = array<i32: 2, 1>} : memref<256x32xf32, #tpu.memory_space<vmem>>, vector<8x32xf32>
    %77 = arith.maximumf %75, %76 : vector<8x32xf32>
    %c240 = arith.constant 240 : index
    %c0_58 = arith.constant 0 : index
    %78 = tpu.strided_load %arg19[%c240, %c0_58] {strides = array<i32: 2, 1>} : memref<256x32xf32, #tpu.memory_space<vmem>>, vector<8x32xf32>
    %c241 = arith.constant 241 : index
    %c0_59 = arith.constant 0 : index
    %79 = tpu.strided_load %arg19[%c241, %c0_59] {strides = array<i32: 2, 1>} : memref<256x32xf32, #tpu.memory_space<vmem>>, vector<8x32xf32>
    %80 = arith.maximumf %78, %79 : vector<8x32xf32>
    %81 = arith.maximumf %77, %80 : vector<8x32xf32>
    %c136 = arith.constant 136 : index
    %c0_60 = arith.constant 0 : index
    %82 = vector.load %arg15[%c136, %c0_60] : memref<176x128xf32, #tpu.memory_space<vmem>>, vector<8x32xf32>
    tpu.vector_store %arg15[%c136, %c0_60], %81 {strides = array<i32>} : memref<176x128xf32, #tpu.memory_space<vmem>>, vector<8x32xf32>,
    %c7 = arith.constant 7 : index
    %c0_61 = arith.constant 0 : index
    %83 = vector.load %arg15[%c7, %c0_61] : memref<176x128xf32, #tpu.memory_space<vmem>>, vector<128x128xf32>
    %84 = arith.truncf %83 : vector<128x128xf32> to vector<128x128xbf16>
    %c0_62 = arith.constant 0 : index
    %c0_63 = arith.constant 0 : index
    %85 = vector.load %arg17[%c0_62, %c0_63] : memref<128x1152xbf16, #tpu.memory_space<vmem>>, vector<128x128xbf16>
    tpu.vector_store %arg17[%c0_62, %c0_63], %84 {strides = array<i32>} : memref<128x1152xbf16, #tpu.memory_space<vmem>>, vector<128x128xbf16>,
    %c8 = arith.constant 8 : index
    %c0_64 = arith.constant 0 : index
    %86 = vector.load %arg15[%c8, %c0_64] : memref<176x128xf32, #tpu.memory_space<vmem>>, vector<128x128xf32>
    %87 = arith.truncf %86 : vector<128x128xf32> to vector<128x128xbf16>
    %c0_65 = arith.constant 0 : index
    %c128_66 = arith.constant 128 : index
    %88 = vector.load %arg17[%c0_65, %c128_66] : memref<128x1152xbf16, #tpu.memory_space<vmem>>, vector<128x128xbf16>
    tpu.vector_store %arg17[%c0_65, %c128_66], %87 {strides = array<i32>} : memref<128x1152xbf16, #tpu.memory_space<vmem>>, vector<128x128xbf16>,
    %c9 = arith.constant 9 : index
    %c0_67 = arith.constant 0 : index
    %89 = vector.load %arg15[%c9, %c0_67] : memref<176x128xf32, #tpu.memory_space<vmem>>, vector<128x128xf32>
    %90 = arith.truncf %89 : vector<128x128xf32> to vector<128x128xbf16>
    %c0_68 = arith.constant 0 : index
    %c256 = arith.constant 256 : index
    %91 = vector.load %arg17[%c0_68, %c256] : memref<128x1152xbf16, #tpu.memory_space<vmem>>, vector<128x128xbf16>
    tpu.vector_store %arg17[%c0_68, %c256], %90 {strides = array<i32>} : memref<128x1152xbf16, #tpu.memory_space<vmem>>, vector<128x128xbf16>,
    %c23 = arith.constant 23 : index
    %c0_69 = arith.constant 0 : index
    %92 = vector.load %arg15[%c23, %c0_69] : memref<176x128xf32, #tpu.memory_space<vmem>>, vector<128x128xf32>
    %93 = arith.truncf %92 : vector<128x128xf32> to vector<128x128xbf16>
    %c0_70 = arith.constant 0 : index
    %c384 = arith.constant 384 : index
    %94 = vector.load %arg17[%c0_70, %c384] : memref<128x1152xbf16, #tpu.memory_space<vmem>>, vector<128x128xbf16>
    tpu.vector_store %arg17[%c0_70, %c384], %93 {strides = array<i32>} : memref<128x1152xbf16, #tpu.memory_space<vmem>>, vector<128x128xbf16>,
    %c24_71 = arith.constant 24 : index
    %c0_72 = arith.constant 0 : index
    %95 = vector.load %arg15[%c24_71, %c0_72] : memref<176x128xf32, #tpu.memory_space<vmem>>, vector<128x128xf32>
    %96 = arith.truncf %95 : vector<128x128xf32> to vector<128x128xbf16>
    %c0_73 = arith.constant 0 : index
    %c512 = arith.constant 512 : index
    %97 = vector.load %arg17[%c0_73, %c512] : memref<128x1152xbf16, #tpu.memory_space<vmem>>, vector<128x128xbf16>
    tpu.vector_store %arg17[%c0_73, %c512], %96 {strides = array<i32>} : memref<128x1152xbf16, #tpu.memory_space<vmem>>, vector<128x128xbf16>,
    %c25 = arith.constant 25 : index
    %c0_74 = arith.constant 0 : index
    %98 = vector.load %arg15[%c25, %c0_74] : memref<176x128xf32, #tpu.memory_space<vmem>>, vector<128x128xf32>
    %99 = arith.truncf %98 : vector<128x128xf32> to vector<128x128xbf16>
    %c0_75 = arith.constant 0 : index
    %c640 = arith.constant 640 : index
    %100 = vector.load %arg17[%c0_75, %c640] : memref<128x1152xbf16, #tpu.memory_space<vmem>>, vector<128x128xbf16>
    tpu.vector_store %arg17[%c0_75, %c640], %99 {strides = array<i32>} : memref<128x1152xbf16, #tpu.memory_space<vmem>>, vector<128x128xbf16>,
    %c39 = arith.constant 39 : index
    %c0_76 = arith.constant 0 : index
    %101 = vector.load %arg15[%c39, %c0_76] : memref<176x128xf32, #tpu.memory_space<vmem>>, vector<128x128xf32>
    %102 = arith.truncf %101 : vector<128x128xf32> to vector<128x128xbf16>
    %c0_77 = arith.constant 0 : index
    %c768 = arith.constant 768 : index
    %103 = vector.load %arg17[%c0_77, %c768] : memref<128x1152xbf16, #tpu.memory_space<vmem>>, vector<128x128xbf16>
    tpu.vector_store %arg17[%c0_77, %c768], %102 {strides = array<i32>} : memref<128x1152xbf16, #tpu.memory_space<vmem>>, vector<128x128xbf16>,
    %c40_78 = arith.constant 40 : index
    %c0_79 = arith.constant 0 : index
    %104 = vector.load %arg15[%c40_78, %c0_79] : memref<176x128xf32, #tpu.memory_space<vmem>>, vector<128x128xf32>
    %105 = arith.truncf %104 : vector<128x128xf32> to vector<128x128xbf16>
    %c0_80 = arith.constant 0 : index
    %c896 = arith.constant 896 : index
    %106 = vector.load %arg17[%c0_80, %c896] : memref<128x1152xbf16, #tpu.memory_space<vmem>>, vector<128x128xbf16>
    tpu.vector_store %arg17[%c0_80, %c896], %105 {strides = array<i32>} : memref<128x1152xbf16, #tpu.memory_space<vmem>>, vector<128x128xbf16>,
    %c41 = arith.constant 41 : index
    %c0_81 = arith.constant 0 : index
    %107 = vector.load %arg15[%c41, %c0_81] : memref<176x128xf32, #tpu.memory_space<vmem>>, vector<128x128xf32>
    %108 = arith.truncf %107 : vector<128x128xf32> to vector<128x128xbf16>
    %c0_82 = arith.constant 0 : index
    %c1024 = arith.constant 1024 : index
    %109 = vector.load %arg17[%c0_82, %c1024] : memref<128x1152xbf16, #tpu.memory_space<vmem>>, vector<128x128xbf16>
    tpu.vector_store %arg17[%c0_82, %c1024], %108 {strides = array<i32>} : memref<128x1152xbf16, #tpu.memory_space<vmem>>, vector<128x128xbf16>,
    %c0_83 = arith.constant 0 : index
    %c0_84 = arith.constant 0 : index
    %110 = vector.load %arg17[%c0_83, %c0_84] : memref<128x1152xbf16, #tpu.memory_space<vmem>>, vector<128x1152xbf16>
    %c0_85 = arith.constant 0 : index
    %c0_86 = arith.constant 0 : index
    %111 = vector.load %arg4[%c0_85, %c0_86] : memref<1152x64xbf16, #tpu.memory_space<vmem>>, vector<1152x64xbf16>
    %cst_87 = arith.constant dense<0.000000e+00> : vector<128x64xf32>
    %112 = tpu.matmul %110, %111, %cst_87 {dimension_numbers = #tpu.dot_dimension_numbers<[1], [0], [0], [1], [0, 0, 1, 1], [], []>} : vector<128x1152xbf16>, vector<1152x64xbf16>, vector<128x64xf32> -> vector<128x64xf32>
    %c0_88 = arith.constant 0 : index
    %c0_89 = arith.constant 0 : index
    %113 = vector.load %arg5[%c0_88, %c0_89] : memref<2x64xf32, #tpu.memory_space<vmem>>, vector<1x64xf32>
    %114 = vector.broadcast %113 : vector<1x64xf32> to vector<128x64xf32>
    %115 = arith.mulf %112, %114 : vector<128x64xf32>
    %c1_90 = arith.constant 1 : index
    %c0_91 = arith.constant 0 : index
    %116 = vector.load %arg5[%c1_90, %c0_91] : memref<2x64xf32, #tpu.memory_space<vmem>>, vector<1x64xf32>
    %117 = vector.broadcast %116 : vector<1x64xf32> to vector<128x64xf32>
    %118 = arith.addf %115, %117 : vector<128x64xf32>
    %cst_92 = arith.constant 0.000000e+00 : f32
    %119 = vector.broadcast %cst_92 : f32 to vector<128x64xf32>
    %120 = arith.maximumf %118, %119 : vector<128x64xf32>
    %c0_93 = arith.constant 0 : index
    %c0_94 = arith.constant 0 : index
    %121 = vector.load %arg20[%c0_93, %c0_94] : memref<128x64xf32, #tpu.memory_space<vmem>>, vector<128x64xf32>
    tpu.vector_store %arg20[%c0_93, %c0_94], %120 {strides = array<i32>} : memref<128x64xf32, #tpu.memory_space<vmem>>, vector<128x64xf32>,
    %c0_95 = arith.constant 0 : index
    %c0_96 = arith.constant 0 : index
    %122 = tpu.strided_load %arg20[%c0_95, %c0_96] {strides = array<i32: 2, 1>} : memref<128x64xf32, #tpu.memory_space<vmem>>, vector<4x64xf32>
    %c1_97 = arith.constant 1 : index
    %c0_98 = arith.constant 0 : index
    %123 = tpu.strided_load %arg20[%c1_97, %c0_98] {strides = array<i32: 2, 1>} : memref<128x64xf32, #tpu.memory_space<vmem>>, vector<4x64xf32>
    %124 = arith.maximumf %122, %123 : vector<4x64xf32>
    %c16_99 = arith.constant 16 : index
    %c0_100 = arith.constant 0 : index
    %125 = tpu.strided_load %arg20[%c16_99, %c0_100] {strides = array<i32: 2, 1>} : memref<128x64xf32, #tpu.memory_space<vmem>>, vector<4x64xf32>
    %c17_101 = arith.constant 17 : index
    %c0_102 = arith.constant 0 : index
    %126 = tpu.strided_load %arg20[%c17_101, %c0_102] {strides = array<i32: 2, 1>} : memref<128x64xf32, #tpu.memory_space<vmem>>, vector<4x64xf32>
    %127 = arith.maximumf %125, %126 : vector<4x64xf32>
    %128 = arith.maximumf %124, %127 : vector<4x64xf32>
    %c16_103 = arith.constant 16 : index
    %c0_104 = arith.constant 0 : index
    %129 = vector.load %arg16[%c16_103, %c0_104] : memref<64x128xf32, #tpu.memory_space<vmem>>, vector<4x64xf32>
    tpu.vector_store %arg16[%c16_103, %c0_104], %128 {strides = array<i32>} : memref<64x128xf32, #tpu.memory_space<vmem>>, vector<4x64xf32>,
    %c32_105 = arith.constant 32 : index
    %c0_106 = arith.constant 0 : index
    %130 = tpu.strided_load %arg20[%c32_105, %c0_106] {strides = array<i32: 2, 1>} : memref<128x64xf32, #tpu.memory_space<vmem>>, vector<4x64xf32>
    %c33_107 = arith.constant 33 : index
    %c0_108 = arith.constant 0 : index
    %131 = tpu.strided_load %arg20[%c33_107, %c0_108] {strides = array<i32: 2, 1>} : memref<128x64xf32, #tpu.memory_space<vmem>>, vector<4x64xf32>
    %132 = arith.maximumf %130, %131 : vector<4x64xf32>
    %c48_109 = arith.constant 48 : index
    %c0_110 = arith.constant 0 : index
    %133 = tpu.strided_load %arg20[%c48_109, %c0_110] {strides = array<i32: 2, 1>} : memref<128x64xf32, #tpu.memory_space<vmem>>, vector<4x64xf32>
    %c49_111 = arith.constant 49 : index
    %c0_112 = arith.constant 0 : index
    %134 = tpu.strided_load %arg20[%c49_111, %c0_112] {strides = array<i32: 2, 1>} : memref<128x64xf32, #tpu.memory_space<vmem>>, vector<4x64xf32>
    %135 = arith.maximumf %133, %134 : vector<4x64xf32>
    %136 = arith.maximumf %132, %135 : vector<4x64xf32>
    %c24_113 = arith.constant 24 : index
    %c0_114 = arith.constant 0 : index
    %137 = vector.load %arg16[%c24_113, %c0_114] : memref<64x128xf32, #tpu.memory_space<vmem>>, vector<4x64xf32>
    tpu.vector_store %arg16[%c24_113, %c0_114], %136 {strides = array<i32>} : memref<64x128xf32, #tpu.memory_space<vmem>>, vector<4x64xf32>,
    %c64_115 = arith.constant 64 : index
    %c0_116 = arith.constant 0 : index
    %138 = tpu.strided_load %arg20[%c64_115, %c0_116] {strides = array<i32: 2, 1>} : memref<128x64xf32, #tpu.memory_space<vmem>>, vector<4x64xf32>
    %c65_117 = arith.constant 65 : index
    %c0_118 = arith.constant 0 : index
    %139 = tpu.strided_load %arg20[%c65_117, %c0_118] {strides = array<i32: 2, 1>} : memref<128x64xf32, #tpu.memory_space<vmem>>, vector<4x64xf32>
    %140 = arith.maximumf %138, %139 : vector<4x64xf32>
    %c80_119 = arith.constant 80 : index
    %c0_120 = arith.constant 0 : index
    %141 = tpu.strided_load %arg20[%c80_119, %c0_120] {strides = array<i32: 2, 1>} : memref<128x64xf32, #tpu.memory_space<vmem>>, vector<4x64xf32>
    %c81_121 = arith.constant 81 : index
    %c0_122 = arith.constant 0 : index
    %142 = tpu.strided_load %arg20[%c81_121, %c0_122] {strides = array<i32: 2, 1>} : memref<128x64xf32, #tpu.memory_space<vmem>>, vector<4x64xf32>
    %143 = arith.maximumf %141, %142 : vector<4x64xf32>
    %144 = arith.maximumf %140, %143 : vector<4x64xf32>
    %c32_123 = arith.constant 32 : index
    %c0_124 = arith.constant 0 : index
    %145 = vector.load %arg16[%c32_123, %c0_124] : memref<64x128xf32, #tpu.memory_space<vmem>>, vector<4x64xf32>
    tpu.vector_store %arg16[%c32_123, %c0_124], %144 {strides = array<i32>} : memref<64x128xf32, #tpu.memory_space<vmem>>, vector<4x64xf32>,
    %c96_125 = arith.constant 96 : index
    %c0_126 = arith.constant 0 : index
    %146 = tpu.strided_load %arg20[%c96_125, %c0_126] {strides = array<i32: 2, 1>} : memref<128x64xf32, #tpu.memory_space<vmem>>, vector<4x64xf32>
    %c97_127 = arith.constant 97 : index
    %c0_128 = arith.constant 0 : index
    %147 = tpu.strided_load %arg20[%c97_127, %c0_128] {strides = array<i32: 2, 1>} : memref<128x64xf32, #tpu.memory_space<vmem>>, vector<4x64xf32>
    %148 = arith.maximumf %146, %147 : vector<4x64xf32>
    %c112_129 = arith.constant 112 : index
    %c0_130 = arith.constant 0 : index
    %149 = tpu.strided_load %arg20[%c112_129, %c0_130] {strides = array<i32: 2, 1>} : memref<128x64xf32, #tpu.memory_space<vmem>>, vector<4x64xf32>
    %c113_131 = arith.constant 113 : index
    %c0_132 = arith.constant 0 : index
    %150 = tpu.strided_load %arg20[%c113_131, %c0_132] {strides = array<i32: 2, 1>} : memref<128x64xf32, #tpu.memory_space<vmem>>, vector<4x64xf32>
    %151 = arith.maximumf %149, %150 : vector<4x64xf32>
    %152 = arith.maximumf %148, %151 : vector<4x64xf32>
    %c40_133 = arith.constant 40 : index
    %c0_134 = arith.constant 0 : index
    %153 = vector.load %arg16[%c40_133, %c0_134] : memref<64x128xf32, #tpu.memory_space<vmem>>, vector<4x64xf32>
    tpu.vector_store %arg16[%c40_133, %c0_134], %152 {strides = array<i32>} : memref<64x128xf32, #tpu.memory_space<vmem>>, vector<4x64xf32>,
    %c7_135 = arith.constant 7 : index
    %c0_136 = arith.constant 0 : index
    %154 = vector.load %arg16[%c7_135, %c0_136] : memref<64x128xf32, #tpu.memory_space<vmem>>, vector<32x128xf32>
    %155 = arith.truncf %154 : vector<32x128xf32> to vector<32x128xbf16>
    %c0_137 = arith.constant 0 : index
    %c0_138 = arith.constant 0 : index
    %156 = vector.load %arg18[%c0_137, %c0_138] : memref<32x1152xbf16, #tpu.memory_space<vmem>>, vector<32x128xbf16>
    tpu.vector_store %arg18[%c0_137, %c0_138], %155 {strides = array<i32>} : memref<32x1152xbf16, #tpu.memory_space<vmem>>, vector<32x128xbf16>,
    %c8_139 = arith.constant 8 : index
    %c0_140 = arith.constant 0 : index
    %157 = vector.load %arg16[%c8_139, %c0_140] : memref<64x128xf32, #tpu.memory_space<vmem>>, vector<32x128xf32>
    %158 = arith.truncf %157 : vector<32x128xf32> to vector<32x128xbf16>
    %c0_141 = arith.constant 0 : index
    %c128_142 = arith.constant 128 : index
    %159 = vector.load %arg18[%c0_141, %c128_142] : memref<32x1152xbf16, #tpu.memory_space<vmem>>, vector<32x128xbf16>
    tpu.vector_store %arg18[%c0_141, %c128_142], %158 {strides = array<i32>} : memref<32x1152xbf16, #tpu.memory_space<vmem>>, vector<32x128xbf16>,
    %c9_143 = arith.constant 9 : index
    %c0_144 = arith.constant 0 : index
    %160 = vector.load %arg16[%c9_143, %c0_144] : memref<64x128xf32, #tpu.memory_space<vmem>>, vector<32x128xf32>
    %161 = arith.truncf %160 : vector<32x128xf32> to vector<32x128xbf16>
    %c0_145 = arith.constant 0 : index
    %c256_146 = arith.constant 256 : index
    %162 = vector.load %arg18[%c0_145, %c256_146] : memref<32x1152xbf16, #tpu.memory_space<vmem>>, vector<32x128xbf16>
    tpu.vector_store %arg18[%c0_145, %c256_146], %161 {strides = array<i32>} : memref<32x1152xbf16, #tpu.memory_space<vmem>>, vector<32x128xbf16>,
    %c15 = arith.constant 15 : index
    %c0_147 = arith.constant 0 : index
    %163 = vector.load %arg16[%c15, %c0_147] : memref<64x128xf32, #tpu.memory_space<vmem>>, vector<32x128xf32>
    %164 = arith.truncf %163 : vector<32x128xf32> to vector<32x128xbf16>
    %c0_148 = arith.constant 0 : index
    %c384_149 = arith.constant 384 : index
    %165 = vector.load %arg18[%c0_148, %c384_149] : memref<32x1152xbf16, #tpu.memory_space<vmem>>, vector<32x128xbf16>
    tpu.vector_store %arg18[%c0_148, %c384_149], %164 {strides = array<i32>} : memref<32x1152xbf16, #tpu.memory_space<vmem>>, vector<32x128xbf16>,
    %c16_150 = arith.constant 16 : index
    %c0_151 = arith.constant 0 : index
    %166 = vector.load %arg16[%c16_150, %c0_151] : memref<64x128xf32, #tpu.memory_space<vmem>>, vector<32x128xf32>
    %167 = arith.truncf %166 : vector<32x128xf32> to vector<32x128xbf16>
    %c0_152 = arith.constant 0 : index
    %c512_153 = arith.constant 512 : index
    %168 = vector.load %arg18[%c0_152, %c512_153] : memref<32x1152xbf16, #tpu.memory_space<vmem>>, vector<32x128xbf16>
    tpu.vector_store %arg18[%c0_152, %c512_153], %167 {strides = array<i32>} : memref<32x1152xbf16, #tpu.memory_space<vmem>>, vector<32x128xbf16>,
    %c17_154 = arith.constant 17 : index
    %c0_155 = arith.constant 0 : index
    %169 = vector.load %arg16[%c17_154, %c0_155] : memref<64x128xf32, #tpu.memory_space<vmem>>, vector<32x128xf32>
    %170 = arith.truncf %169 : vector<32x128xf32> to vector<32x128xbf16>
    %c0_156 = arith.constant 0 : index
    %c640_157 = arith.constant 640 : index
    %171 = vector.load %arg18[%c0_156, %c640_157] : memref<32x1152xbf16, #tpu.memory_space<vmem>>, vector<32x128xbf16>
    tpu.vector_store %arg18[%c0_156, %c640_157], %170 {strides = array<i32>} : memref<32x1152xbf16, #tpu.memory_space<vmem>>, vector<32x128xbf16>,
    %c23_158 = arith.constant 23 : index
    %c0_159 = arith.constant 0 : index
    %172 = vector.load %arg16[%c23_158, %c0_159] : memref<64x128xf32, #tpu.memory_space<vmem>>, vector<32x128xf32>
    %173 = arith.truncf %172 : vector<32x128xf32> to vector<32x128xbf16>
    %c0_160 = arith.constant 0 : index
    %c768_161 = arith.constant 768 : index
    %174 = vector.load %arg18[%c0_160, %c768_161] : memref<32x1152xbf16, #tpu.memory_space<vmem>>, vector<32x128xbf16>
    tpu.vector_store %arg18[%c0_160, %c768_161], %173 {strides = array<i32>} : memref<32x1152xbf16, #tpu.memory_space<vmem>>, vector<32x128xbf16>,
    %c24_162 = arith.constant 24 : index
    %c0_163 = arith.constant 0 : index
    %175 = vector.load %arg16[%c24_162, %c0_163] : memref<64x128xf32, #tpu.memory_space<vmem>>, vector<32x128xf32>
    %176 = arith.truncf %175 : vector<32x128xf32> to vector<32x128xbf16>
    %c0_164 = arith.constant 0 : index
    %c896_165 = arith.constant 896 : index
    %177 = vector.load %arg18[%c0_164, %c896_165] : memref<32x1152xbf16, #tpu.memory_space<vmem>>, vector<32x128xbf16>
    tpu.vector_store %arg18[%c0_164, %c896_165], %176 {strides = array<i32>} : memref<32x1152xbf16, #tpu.memory_space<vmem>>, vector<32x128xbf16>,
    %c25_166 = arith.constant 25 : index
    %c0_167 = arith.constant 0 : index
    %178 = vector.load %arg16[%c25_166, %c0_167] : memref<64x128xf32, #tpu.memory_space<vmem>>, vector<32x128xf32>
    %179 = arith.truncf %178 : vector<32x128xf32> to vector<32x128xbf16>
    %c0_168 = arith.constant 0 : index
    %c1024_169 = arith.constant 1024 : index
    %180 = vector.load %arg18[%c0_168, %c1024_169] : memref<32x1152xbf16, #tpu.memory_space<vmem>>, vector<32x128xbf16>
    tpu.vector_store %arg18[%c0_168, %c1024_169], %179 {strides = array<i32>} : memref<32x1152xbf16, #tpu.memory_space<vmem>>, vector<32x128xbf16>,
    %c0_170 = arith.constant 0 : index
    %c0_171 = arith.constant 0 : index
    %181 = vector.load %arg18[%c0_170, %c0_171] : memref<32x1152xbf16, #tpu.memory_space<vmem>>, vector<32x1152xbf16>
    %c0_172 = arith.constant 0 : index
    %c0_173 = arith.constant 0 : index
    %182 = vector.load %arg6[%c0_172, %c0_173] : memref<1152x64xbf16, #tpu.memory_space<vmem>>, vector<1152x64xbf16>
    %cst_174 = arith.constant dense<0.000000e+00> : vector<32x64xf32>
    %183 = tpu.matmul %181, %182, %cst_174 {dimension_numbers = #tpu.dot_dimension_numbers<[1], [0], [0], [1], [0, 0, 1, 1], [], []>} : vector<32x1152xbf16>, vector<1152x64xbf16>, vector<32x64xf32> -> vector<32x64xf32>
    %c0_175 = arith.constant 0 : index
    %c0_176 = arith.constant 0 : index
    %184 = vector.load %arg7[%c0_175, %c0_176] : memref<2x64xf32, #tpu.memory_space<vmem>>, vector<1x64xf32>
    %185 = vector.broadcast %184 : vector<1x64xf32> to vector<32x64xf32>
    %186 = arith.mulf %183, %185 : vector<32x64xf32>
    %c1_177 = arith.constant 1 : index
    %c0_178 = arith.constant 0 : index
    %187 = vector.load %arg7[%c1_177, %c0_178] : memref<2x64xf32, #tpu.memory_space<vmem>>, vector<1x64xf32>
    %188 = vector.broadcast %187 : vector<1x64xf32> to vector<32x64xf32>
    %189 = arith.addf %186, %188 : vector<32x64xf32>
    %cst_179 = arith.constant 0.000000e+00 : f32
    %190 = vector.broadcast %cst_179 : f32 to vector<32x64xf32>
    %191 = arith.maximumf %189, %190 : vector<32x64xf32>
    %c0_180 = arith.constant 0 : index
    %c0_181 = arith.constant 0 : index
    %192 = vector.load %arg21[%c0_180, %c0_181] : memref<32x64xf32, #tpu.memory_space<vmem>>, vector<32x64xf32>
    tpu.vector_store %arg21[%c0_180, %c0_181], %191 {strides = array<i32>} : memref<32x64xf32, #tpu.memory_space<vmem>>, vector<32x64xf32>,
    %c0_182 = arith.constant 0 : index
    %c0_183 = arith.constant 0 : index
    %193 = vector.load %arg21[%c0_182, %c0_183] : memref<32x64xf32, #tpu.memory_space<vmem>>, vector<1x64xf32>
    %c1_184 = arith.constant 1 : index
    %c0_185 = arith.constant 0 : index
    %194 = vector.load %arg21[%c1_184, %c0_185] : memref<32x64xf32, #tpu.memory_space<vmem>>, vector<1x64xf32>
    %195 = arith.maximumf %193, %194 : vector<1x64xf32>
    %c8_186 = arith.constant 8 : index
    %c0_187 = arith.constant 0 : index
    %196 = vector.load %arg21[%c8_186, %c0_187] : memref<32x64xf32, #tpu.memory_space<vmem>>, vector<1x64xf32>
    %c9_188 = arith.constant 9 : index
    %c0_189 = arith.constant 0 : index
    %197 = vector.load %arg21[%c9_188, %c0_189] : memref<32x64xf32, #tpu.memory_space<vmem>>, vector<1x64xf32>
    %198 = arith.maximumf %196, %197 : vector<1x64xf32>
    %199 = arith.maximumf %195, %198 : vector<1x64xf32>
    %c0_190 = arith.constant 0 : index
    %c0_191 = arith.constant 0 : index
    %200 = vector.load %arg22[%c0_190, %c0_191] : memref<1x512xf32, #tpu.memory_space<vmem>>, vector<1x64xf32>
    tpu.vector_store %arg22[%c0_190, %c0_191], %199 {strides = array<i32>} : memref<1x512xf32, #tpu.memory_space<vmem>>, vector<1x64xf32>,
    %c2 = arith.constant 2 : index
    %c0_192 = arith.constant 0 : index
    %201 = vector.load %arg21[%c2, %c0_192] : memref<32x64xf32, #tpu.memory_space<vmem>>, vector<1x64xf32>
    %c3 = arith.constant 3 : index
    %c0_193 = arith.constant 0 : index
    %202 = vector.load %arg21[%c3, %c0_193] : memref<32x64xf32, #tpu.memory_space<vmem>>, vector<1x64xf32>
    %203 = arith.maximumf %201, %202 : vector<1x64xf32>
    %c10 = arith.constant 10 : index
    %c0_194 = arith.constant 0 : index
    %204 = vector.load %arg21[%c10, %c0_194] : memref<32x64xf32, #tpu.memory_space<vmem>>, vector<1x64xf32>
    %c11 = arith.constant 11 : index
    %c0_195 = arith.constant 0 : index
    %205 = vector.load %arg21[%c11, %c0_195] : memref<32x64xf32, #tpu.memory_space<vmem>>, vector<1x64xf32>
    %206 = arith.maximumf %204, %205 : vector<1x64xf32>
    %207 = arith.maximumf %203, %206 : vector<1x64xf32>
    %c0_196 = arith.constant 0 : index
    %c128_197 = arith.constant 128 : index
    %208 = vector.load %arg22[%c0_196, %c128_197] : memref<1x512xf32, #tpu.memory_space<vmem>>, vector<1x64xf32>
    tpu.vector_store %arg22[%c0_196, %c128_197], %207 {strides = array<i32>} : memref<1x512xf32, #tpu.memory_space<vmem>>, vector<1x64xf32>,
    %c16_198 = arith.constant 16 : index
    %c0_199 = arith.constant 0 : index
    %209 = vector.load %arg21[%c16_198, %c0_199] : memref<32x64xf32, #tpu.memory_space<vmem>>, vector<1x64xf32>
    %c17_200 = arith.constant 17 : index
    %c0_201 = arith.constant 0 : index
    %210 = vector.load %arg21[%c17_200, %c0_201] : memref<32x64xf32, #tpu.memory_space<vmem>>, vector<1x64xf32>
    %211 = arith.maximumf %209, %210 : vector<1x64xf32>
    %c24_202 = arith.constant 24 : index
    %c0_203 = arith.constant 0 : index
    %212 = vector.load %arg21[%c24_202, %c0_203] : memref<32x64xf32, #tpu.memory_space<vmem>>, vector<1x64xf32>
    %c25_204 = arith.constant 25 : index
    %c0_205 = arith.constant 0 : index
    %213 = vector.load %arg21[%c25_204, %c0_205] : memref<32x64xf32, #tpu.memory_space<vmem>>, vector<1x64xf32>
    %214 = arith.maximumf %212, %213 : vector<1x64xf32>
    %215 = arith.maximumf %211, %214 : vector<1x64xf32>
    %c0_206 = arith.constant 0 : index
    %c256_207 = arith.constant 256 : index
    %216 = vector.load %arg22[%c0_206, %c256_207] : memref<1x512xf32, #tpu.memory_space<vmem>>, vector<1x64xf32>
    tpu.vector_store %arg22[%c0_206, %c256_207], %215 {strides = array<i32>} : memref<1x512xf32, #tpu.memory_space<vmem>>, vector<1x64xf32>,
    %c18 = arith.constant 18 : index
    %c0_208 = arith.constant 0 : index
    %217 = vector.load %arg21[%c18, %c0_208] : memref<32x64xf32, #tpu.memory_space<vmem>>, vector<1x64xf32>
    %c19 = arith.constant 19 : index
    %c0_209 = arith.constant 0 : index
    %218 = vector.load %arg21[%c19, %c0_209] : memref<32x64xf32, #tpu.memory_space<vmem>>, vector<1x64xf32>
    %219 = arith.maximumf %217, %218 : vector<1x64xf32>
    %c26 = arith.constant 26 : index
    %c0_210 = arith.constant 0 : index
    %220 = vector.load %arg21[%c26, %c0_210] : memref<32x64xf32, #tpu.memory_space<vmem>>, vector<1x64xf32>
    %c27 = arith.constant 27 : index
    %c0_211 = arith.constant 0 : index
    %221 = vector.load %arg21[%c27, %c0_211] : memref<32x64xf32, #tpu.memory_space<vmem>>, vector<1x64xf32>
    %222 = arith.maximumf %220, %221 : vector<1x64xf32>
    %223 = arith.maximumf %219, %222 : vector<1x64xf32>
    %c0_212 = arith.constant 0 : index
    %c384_213 = arith.constant 384 : index
    %224 = vector.load %arg22[%c0_212, %c384_213] : memref<1x512xf32, #tpu.memory_space<vmem>>, vector<1x64xf32>
    tpu.vector_store %arg22[%c0_212, %c384_213], %223 {strides = array<i32>} : memref<1x512xf32, #tpu.memory_space<vmem>>, vector<1x64xf32>,
    %c0_214 = arith.constant 0 : index
    %c0_215 = arith.constant 0 : index
    %225 = vector.load %arg22[%c0_214, %c0_215] : memref<1x512xf32, #tpu.memory_space<vmem>>, vector<1x512xf32>
    %226 = arith.truncf %225 : vector<1x512xf32> to vector<1x512xbf16>
    %c0_216 = arith.constant 0 : index
    %c0_217 = arith.constant 0 : index
    %227 = vector.load %arg8[%c0_216, %c0_217] : memref<512x1024xbf16, #tpu.memory_space<vmem>>, vector<512x1024xbf16>
    %cst_218 = arith.constant dense<0.000000e+00> : vector<1x1024xf32>
    %228 = tpu.matmul %226, %227, %cst_218 {dimension_numbers = #tpu.dot_dimension_numbers<[1], [0], [0], [1], [0, 0, 1, 1], [], []>} : vector<1x512xbf16>, vector<512x1024xbf16>, vector<1x1024xf32> -> vector<1x1024xf32>
    %c0_219 = arith.constant 0 : index
    %c0_220 = arith.constant 0 : index
    %229 = vector.load %arg9[%c0_219, %c0_220] : memref<1x1024xf32, #tpu.memory_space<vmem>>, vector<1x1024xf32>
    %230 = arith.addf %228, %229 : vector<1x1024xf32>
    %cst_221 = arith.constant 0.000000e+00 : f32
    %231 = vector.broadcast %cst_221 : f32 to vector<1x1024xf32>
    %232 = arith.maximumf %230, %231 : vector<1x1024xf32>
    %233 = arith.truncf %232 : vector<1x1024xf32> to vector<1x1024xbf16>
    %c0_222 = arith.constant 0 : index
    %c0_223 = arith.constant 0 : index
    %234 = vector.load %arg10[%c0_222, %c0_223] : memref<1024x256xbf16, #tpu.memory_space<vmem>>, vector<1024x256xbf16>
    %cst_224 = arith.constant dense<0.000000e+00> : vector<1x256xf32>
    %235 = tpu.matmul %233, %234, %cst_224 {dimension_numbers = #tpu.dot_dimension_numbers<[1], [0], [0], [1], [0, 0, 1, 1], [], []>} : vector<1x1024xbf16>, vector<1024x256xbf16>, vector<1x256xf32> -> vector<1x256xf32>
    %c0_225 = arith.constant 0 : index
    %c0_226 = arith.constant 0 : index
    %236 = vector.load %arg11[%c0_225, %c0_226] : memref<1x256xf32, #tpu.memory_space<vmem>>, vector<1x256xf32>
    %237 = arith.addf %235, %236 : vector<1x256xf32>
    %cst_227 = arith.constant 0.000000e+00 : f32
    %238 = vector.broadcast %cst_227 : f32 to vector<1x256xf32>
    %239 = arith.maximumf %237, %238 : vector<1x256xf32>
    %240 = arith.truncf %239 : vector<1x256xf32> to vector<1x256xbf16>
    %c0_228 = arith.constant 0 : index
    %c0_229 = arith.constant 0 : index
    %241 = vector.load %arg12[%c0_228, %c0_229] : memref<256x40xbf16, #tpu.memory_space<vmem>>, vector<256x40xbf16>
    %cst_230 = arith.constant dense<0.000000e+00> : vector<1x40xf32>
    %242 = tpu.matmul %240, %241, %cst_230 {dimension_numbers = #tpu.dot_dimension_numbers<[1], [0], [0], [1], [0, 0, 1, 1], [], []>} : vector<1x256xbf16>, vector<256x40xbf16>, vector<1x40xf32> -> vector<1x40xf32>
    %c0_231 = arith.constant 0 : index
    %c0_232 = arith.constant 0 : index
    %243 = vector.load %arg13[%c0_231, %c0_232] : memref<1x40xf32, #tpu.memory_space<vmem>>, vector<1x40xf32>
    %244 = arith.addf %242, %243 : vector<1x40xf32>
    %c0_233 = arith.constant 0 : index
    %c0_234 = arith.constant 0 : index
    %c0_235 = arith.constant 0 : index
    %245 = vector.load %arg14[%c0_233, %c0_234, %c0_235] : memref<1x1x40xf32, #tpu.memory_space<vmem>>, vector<1x1x40xf32>
    %246 = vector.shape_cast %245 : vector<1x1x40xf32> to vector<1x40xf32>
    %247 = vector.shape_cast %244 : vector<1x40xf32> to vector<1x1x40xf32>
    tpu.vector_store %arg14[%c0_233, %c0_234, %c0_235], %247 {strides = array<i32>} : memref<1x1x40xf32, #tpu.memory_space<vmem>>, vector<1x1x40xf32>,
    return
  }
  func.func @transform_0(%arg0: i32) -> (i32, i32, i32) {
    %c0_i32 = arith.constant 0 : i32
    %c0_i32_0 = arith.constant 0 : i32
    %c0_i32_1 = arith.constant 0 : i32
    return %arg0, %c0_i32, %c0_i32_0 : i32, i32, i32
  }
  func.func @transform_1(%arg0: i32) -> (i32, i32) {
    %c0_i32 = arith.constant 0 : i32
    %c0_i32_0 = arith.constant 0 : i32
    %c0_i32_1 = arith.constant 0 : i32
    return %c0_i32, %c0_i32_0 : i32, i32
  }
  func.func @transform_2(%arg0: i32) -> (i32, i32) {
    %c0_i32 = arith.constant 0 : i32
    %c0_i32_0 = arith.constant 0 : i32
    %c0_i32_1 = arith.constant 0 : i32
    return %c0_i32, %c0_i32_0 : i32, i32
  }
  func.func @transform_3(%arg0: i32) -> (i32, i32) {
    %c0_i32 = arith.constant 0 : i32
    %c0_i32_0 = arith.constant 0 : i32
    %c0_i32_1 = arith.constant 0 : i32
    return %c0_i32, %c0_i32_0 : i32, i32
  }
  func.func @transform_4(%arg0: i32) -> (i32, i32) {
    %c0_i32 = arith.constant 0 : i32
    %c0_i32_0 = arith.constant 0 : i32
    %c0_i32_1 = arith.constant 0 : i32
    return %c0_i32, %c0_i32_0 : i32, i32
  }
  func.func @transform_5(%arg0: i32) -> (i32, i32) {
    %c0_i32 = arith.constant 0 : i32
    %c0_i32_0 = arith.constant 0 : i32
    %c0_i32_1 = arith.constant 0 : i32
    return %c0_i32, %c0_i32_0 : i32, i32
  }
  func.func @transform_6(%arg0: i32) -> (i32, i32) {
    %c0_i32 = arith.constant 0 : i32
    %c0_i32_0 = arith.constant 0 : i32
    %c0_i32_1 = arith.constant 0 : i32
    return %c0_i32, %c0_i32_0 : i32, i32
  }
  func.func @transform_7(%arg0: i32) -> (i32, i32) {
    %c0_i32 = arith.constant 0 : i32
    %c0_i32_0 = arith.constant 0 : i32
    %c0_i32_1 = arith.constant 0 : i32
    return %c0_i32, %c0_i32_0 : i32, i32
  }
  func.func @transform_8(%arg0: i32) -> (i32, i32) {
    %c0_i32 = arith.constant 0 : i32
    %c0_i32_0 = arith.constant 0 : i32
    %c0_i32_1 = arith.constant 0 : i32
    return %c0_i32, %c0_i32_0 : i32, i32
  }
  func.func @transform_9(%arg0: i32) -> (i32, i32) {
    %c0_i32 = arith.constant 0 : i32
    %c0_i32_0 = arith.constant 0 : i32
    %c0_i32_1 = arith.constant 0 : i32
    return %c0_i32, %c0_i32_0 : i32, i32
  }
  func.func @transform_10(%arg0: i32) -> (i32, i32) {
    %c0_i32 = arith.constant 0 : i32
    %c0_i32_0 = arith.constant 0 : i32
    %c0_i32_1 = arith.constant 0 : i32
    return %c0_i32, %c0_i32_0 : i32, i32
  }
  func.func @transform_11(%arg0: i32) -> (i32, i32) {
    %c0_i32 = arith.constant 0 : i32
    %c0_i32_0 = arith.constant 0 : i32
    %c0_i32_1 = arith.constant 0 : i32
    return %c0_i32, %c0_i32_0 : i32, i32
  }
  func.func @transform_12(%arg0: i32) -> (i32, i32) {
    %c0_i32 = arith.constant 0 : i32
    %c0_i32_0 = arith.constant 0 : i32
    %c0_i32_1 = arith.constant 0 : i32
    return %c0_i32, %c0_i32_0 : i32, i32
  }
  func.func @transform_13(%arg0: i32) -> (i32, i32, i32) {
    %c0_i32 = arith.constant 0 : i32
    %c0_i32_0 = arith.constant 0 : i32
    %c0_i32_1 = arith.constant 0 : i32
    return %arg0, %c0_i32, %c0_i32_0 : i32, i32, i32
  }
}

</mosaic_0001>

<bundles_post_ra>
// kernel: cnn_forward.1
= control target key start
LH: loop header
LB: loop body
LE: loop exit
PB: predicated region body
PF: predicated region fallthrough
CT: control target
= control target key end

     0   :  { %s14014_s0 = inlined_call_operand.vmem [shape: f32[2,256,9], index: 0, kind: input, shape index: {}]   ;;  %s14015_s1 = inlined_call_operand.vmem [shape: f32[9,32], index: 1, kind: input, shape index: {}]   ;;  %s14016_s2 = inlined_call_operand.vmem [shape: f32[2,32], index: 2, kind: input, shape index: {}]   ;;  %s14017_s3 = inlined_call_operand.vmem [shape: bf16[1152,64], index: 3, kind: input, shape index: {}]   ;;  %s14018_s4 = inlined_call_operand.vmem [shape: f32[2,64], index: 4, kind: input, shape index: {}]   ;;  %s14019_s5 = inlined_call_operand.vmem [shape: bf16[1152,64], index: 5, kind: input, shape index: {}]   ;;  %s14020_s6 = inlined_call_operand.vmem [shape: f32[2,64], index: 6, kind: input, shape index: {}]   ;;  %s14021_s7 = inlined_call_operand.vmem [shape: bf16[512,1024], index: 7, kind: input, shape index: {}]   ;;  %s14022_s8 = inlined_call_operand.vmem [shape: f32[1,1024], index: 8, kind: input, shape index: {}]   ;;  %s14023_s9 = inlined_call_operand.vmem [shape: bf16[1024,256], index: 9, kind: input, shape index: {}]   ;;  %s14024_s10 = inlined_call_operand.vmem [shape: f32[1,256], index: 10, kind: input, shape index: {}]   ;;  %s14025_s11 = inlined_call_operand.vmem [shape: bf16[256,40], index: 11, kind: input, shape index: {}]   ;;  %s14026_s12 = inlined_call_operand.vmem [shape: f32[1,40], index: 12, kind: input, shape index: {}]   ;;  %s14027_s13 = inlined_call_operand.hbm [shape: f32[2,1,40], index: 13, kind: output, shape index: {}]  }
   0x1   :  { %14028 = sst [smem:[#allocation14_spill]] %s14014_s0 }
   0x2   :  { %14029 = sst [smem:[#allocation15_spill]] %s14015_s1 }
   0x3   :  { %14030 = sst [smem:[#allocation16_spill]] %s14016_s2 }
   0x4   :  { %18 = vsyncpa [#allocation11], 0 }
   0x5   :  { %20 = vsyncpa [#allocation11 + $0x1], 0  ;;  %s10594_s25 = smov 0   ;;  %s10596_s26 = smov 0  }
   0x6   :  { %s10598_s27 = smov 0   ;;  %s10600_s28 = smov 0  }
   0x7 LB: > { %s10615_s29 = sadd.s32 4294967295, %s10520_s28   ;;  %s7195_s30 = sadd.s32 4294967294, %s10520_s28   ;;  %s10520_s28 = sphi %s10600_s28, %s14043_s28   ;;  %s10516_s27 = sphi %s10598_s27, %s14042_s27   ;;  %s10512_s26 = sphi %s10596_s26, %s14041_s26   ;;  %s10508_s25 = sphi %s10594_s25, %s14040_s25  }
   0x8   : > { %s10619_s14 = sadd.s32 1, %s10520_s28   ;;  %s311_s15 = sadd.s32 1, %s10516_s27 }
   0x9   : > { %s308_s16 = ssub.s32 %s10520_s28, %s10619_s14  ;;  %p321_p0 = scmp.ne.s32.totalorder %s10516_s27, %s10512_s26 }
   0xa   : > { %p309_p1 = scmp.eq.s32.totalorder %s308_s16, 0  ;;  %p322_p2 = scmp.eq.s32.totalorder %s10615_s29, 1 }
   0xb   : > { %p327_p3 = scmp.ne.s32.totalorder %s10512_s26, %s10508_s25  ;;  %p328_p4 = scmp.eq.s32.totalorder %s7195_s30, 1 }
   0xc   : > { %s10630_s17 = scalar_select %p309_p1, %s10516_s27, %s311_s15  }
   0xd   : > { %p10632_p5 = por %p322_p2, %p321_p0  ;;  %p10636_p6 = por %p328_p4, %p327_p3 }
   0xe   : > { %14031 = sst [smem:[#allocation13_spill]] %s10630_s17  ;;  %p7198_p7 = scmp.ge.s32.totalorder %s10520_s28, 1 }
   0xf   : > { %p390_p8 = scmp.lt.s32.totalorder %s10520_s28, 3 }
  0x11   : > { %p391_p9 = pnand %p7198_p7, %p390_p8 }
  0x12   : > { %s14034_s1 = sld [smem:[#allocation15_spill]] (!%p391_p9)  ;;  %p433_p10 = scmp.lt.s32.totalorder (!%p391_p9), %s10615_s29, 1 }
  0x13   : > { %394 = sbr.rel (%p391_p9) target bundleno = 1752 (0x6d8), region = 72  ;;  %s14035_s0 = sld [smem:[#allocation14_spill]] (!%p391_p9) }
  0x14   : > { %s14036_s2 = sld [smem:[#allocation16_spill]] (!%p391_p9)  ;;  %s7136_s16 = scalar_lea.hbm (!%p391_p9), %s14027_s13, %s10615_s29 }
  0x15   : > { %s10478_s15 = scalar_lea.hbm (!%p391_p9), %s14027_s13, 2 }
  0x18   : > { %v506_v0 = vld [vmem:[%s14034_s1 + $0x8] sm:$0x1]  ;;  %vm604_vm0 = vcmask 1040384   ;;  %v505_v1 = vld [vmem:[%s14034_s1] sm:$0xff]  ;;  %s434_s24 = scalar_select %p433_p10, %s10615_s29, 1  ;;  %vm507_vm1 = vcmask 72704  }
  0x19   : > { %7201 = vmatpush.msk.msra.mxu0 %vm604_vm0, %v506_v0  ;;  %v9852_v16 = vld [vmem:[%s14017_s3 + $0x38] sm:$0xff]  ;;  %v9851_v19 = vld [vmem:[%s14017_s3 + $0x30] sm:$0xff]  ;;  %v9850_v21 = vld [vmem:[%s14017_s3 + $0x28] sm:$0xff]  ;;  %v10522_v24 = vmov 0.0   ;;  %vm821_vm2 = vcmask 261120   ;;  %vm2898_vm3 = vcmask 523264  }
  0x1a   : > { %s9772_s30 = sshll.u32 %s434_s24, 8  ;;  %v9860_v17 = vld [vmem:[%s14017_s3 + $0x78] sm:$0xff]  ;;  %2405 = vmatpush.bf16.msra.mxu1 %v9852_v16  ;;  %v9859_v20 = vld [vmem:[%s14017_s3 + $0x70] sm:$0xff]  ;;  %v9858_v22 = vld [vmem:[%s14017_s3 + $0x68] sm:$0xff]  ;;  %441 = vst [vmem:[#allocation2 + $0x18] sm:$0xff] %v10522_v24  ;;  %vm2925_vm4 = vcmask 519168  }
  0x1b   : > { %623 = vmatpush.msra.mxu0 %v505_v1  ;;  %s10653_s17 = scalar_lea.vmem %s14035_s0, %s9772_s30  ;;  %2454 = vmatpush.bf16.msra.mxu2 %v9860_v17  ;;  %438 = vst [vmem:[#allocation2] sm:$0xff] %v10522_v24  ;;  %v9849_v25 = vld [vmem:[%s14017_s3 + $0x20] sm:$0xff]  ;;  %v9848_v28 = vld [vmem:[%s14017_s3 + $0x18] sm:$0xff]  ;;  %v9847_v35 = vld [vmem:[%s14017_s3 + $0x10] sm:$0xff]  ;;  %s431_s30 = sand.u32 1, %s10512_s26   ;;  %vm7125_vm7 = vcmask 319488  }
  0x1c   : > { %v473_v2 = vld [vmem:[%s10653_s17] sm:$0xff]  ;;  %v474_v3 = vld [vmem:[%s10653_s17 + $0x8] sm:$0xff]  ;;  %v475_v4 = vld [vmem:[%s10653_s17 + $0x10] sm:$0xff]  ;;  %439 = vst [vmem:[#allocation2 + $0x8] sm:$0xff] %v10522_v24  ;;  %s432_s22 = scalar_lea.vmem [#allocation10], %s431_s30  ;;  %s7128_s23 = scalar_lea.sflag [#allocation11], %s431_s30 }
  0x1d   : > { %7202 = vmatmul.msk.f32.vlgmr.msra.gmra.mxu0 %vm507_vm1, %v473_v2  ;;  %v476_v5 = vld [vmem:[%s10653_s17 + $0x18] sm:$0xff]  ;;  %v477_v6 = vld [vmem:[%s10653_s17 + $0x20] sm:$0xff]  ;;  %v478_v7 = vld [vmem:[%s10653_s17 + $0x28] sm:$0xff]  ;;  %440 = vst [vmem:[#allocation2 + $0x10] sm:$0xff] %v10522_v24  ;;  %s7138_s0 = sshll.u32 %s432_s22, 4  ;;  %s7139_s0 = int_to_ptr.vmem [resolvable:$true] %s7138_s0 }
  0x1e   : > { %v479_v8 = vld [vmem:[%s10653_s17 + $0x30] sm:$0xff]  ;;  %v480_v9 = vld [vmem:[%s10653_s17 + $0x38] sm:$0xff]  ;;  %v481_v10 = vld [vmem:[%s10653_s17 + $0x40] sm:$0xff]  ;;  %2406 = vmatpush.bf16.msra.mxu1 %v9851_v19  ;;  %442 = vst [vmem:[#allocation2 + $0x20] sm:$0xff] %v10522_v24 }
  0x1f   : > { %v482_v11 = vld [vmem:[%s10653_s17 + $0x48] sm:$0xff]  ;;  %v483_v12 = vld [vmem:[%s10653_s17 + $0x50] sm:$0xff]  ;;  %v484_v13 = vld [vmem:[%s10653_s17 + $0x58] sm:$0xff]  ;;  %2455 = vmatpush.bf16.msra.mxu2 %v9859_v20  ;;  %443 = vst [vmem:[#allocation2 + $0x28] sm:$0xff] %v10522_v24 }
  0x20   : > { %v485_v14 = vld [vmem:[%s10653_s17 + $0x60] sm:$0xff]  ;;  %v486_v15 = vld [vmem:[%s10653_s17 + $0x68] sm:$0xff]  ;;  %v487_v18 = vld [vmem:[%s10653_s17 + $0x70] sm:$0xff]  ;;  %444 = vst [vmem:[#allocation2 + $0x30] sm:$0xff] %v10522_v24 }
  0x21   : > { %v488_v23 = vld [vmem:[%s10653_s17 + $0x78] sm:$0xff]  ;;  %v9857_v26 = vld [vmem:[%s14017_s3 + $0x60] sm:$0xff]  ;;  %445 = vst [vmem:[#allocation2 + $0x38] sm:$0xff] %v10522_v24  ;;  %v9855_v36 = vld [vmem:[%s14017_s3 + $0x50] sm:$0xff] }
  0x22   : > { %2407 = vmatpush.bf16.msra.mxu1 %v9850_v21  ;;  %v10719_v27 = vld [vmem:[%s14036_s2] ss:$0 sm:$0xff]  ;;  %v9856_v29 = vld [vmem:[%s14017_s3 + $0x58] sm:$0xff]  ;;  %v10735_v31 = vld [vmem:[%s14036_s2 + $0x1] ss:$0 sm:$0xff]  ;;  %446 = vst [vmem:[#allocation2 + $0x40] sm:$0xff] %v10522_v24 }
  0x23   : > { %2456 = vmatpush.bf16.msra.mxu2 %v9858_v22  ;;  %v9868_v30 = vld [vmem:[%s14017_s3 + $0xb8] sm:$0xff]  ;;  %v489_v33 = vld [vmem:[%s10653_s17 + $0x80] sm:$0xff]  ;;  %447 = vst [vmem:[#allocation2 + $0x48] sm:$0xff] %v10522_v24  ;;  %v9867_v38 = vld [vmem:[%s14017_s3 + $0xb0] sm:$0xff] }
  0x24   : > { %2503 = vmatpush.bf16.msra.mxu3 %v9868_v30  ;;  %448 = vst [vmem:[#allocation2 + $0x50] sm:$0xff] %v10522_v24  ;;  %v9846_v40 = vld [vmem:[%s14017_s3 + $0x8] sm:$0xff]  ;;  %v9845_v46 = vld [vmem:[%s14017_s3] sm:$0xff]  ;;  %v9864_v51 = vld [vmem:[%s14017_s3 + $0x98] sm:$0xff] }
  0x25   : > { %7203 = vmatmul.msk.f32.gmra.mxu0 %vm507_vm1, %v474_v3  ;;  %449 = vst [vmem:[#allocation2 + $0x58] sm:$0xff] %v10522_v24  ;;  %v9854_v41 = vld [vmem:[%s14017_s3 + $0x48] sm:$0xff]  ;;  %v9853_v47 = vld [vmem:[%s14017_s3 + $0x40] sm:$0xff]  ;;  %v491_v53 = vld [vmem:[%s10653_s17 + $0x90] sm:$0xff] }
  0x26   : > { %2408 = vmatpush.bf16.msra.mxu1 %v9849_v25  ;;  %450 = vst [vmem:[#allocation2 + $0x60] sm:$0xff] %v10522_v24  ;;  %v9866_v42 = vld [vmem:[%s14017_s3 + $0xa8] sm:$0xff]  ;;  %v9865_v49 = vld [vmem:[%s14017_s3 + $0xa0] sm:$0xff]  ;;  %v9863_v56 = vld [vmem:[%s14017_s3 + $0x90] sm:$0xff] }
  0x27   : > { %2457 = vmatpush.bf16.msra.mxu2 %v9857_v26  ;;  %451 = vst [vmem:[#allocation2 + $0x68] sm:$0xff] %v10522_v24  ;;  %v490_v44 = vld [vmem:[%s10653_s17 + $0x88] sm:$0xff]  ;;  %v492_v1 = vld [vmem:[%s10653_s17 + $0x98] sm:$0xff]  ;;  %v9861_v3 = vld [vmem:[%s14017_s3 + $0x80] sm:$0xff] }
  0x28   : > { %2504 = vmatpush.bf16.msra.mxu3 %v9867_v38  ;;  %452 = vst [vmem:[#allocation2 + $0x70] sm:$0xff] %v10522_v24  ;;  %v949_v55 = vld [vmem:[#allocation2 + $0x7] sm:$0xff]  ;;  %v950_v58 = vld [vmem:[#allocation2 + $0xf] sm:$0xff] }
  0x29   : > { %453 = vst [vmem:[#allocation2 + $0x78] sm:$0xff] %v10522_v24  ;;  %v965_v60 = vpack.c.bf16 %v949_v55, %v949_v55  ;;  %v966_v61 = vpack.c.bf16 %v950_v58, %v950_v58  ;;  %v9862_v62 = vld [vmem:[%s14017_s3 + $0x88] sm:$0xff] }
  0x2a   : > { %2409 = vmatpush.bf16.msra.mxu1 %v9848_v28  ;;  %454 = vst [vmem:[#allocation2 + $0x80] sm:$0xff] %v10522_v24  ;;  %v1045_v63 = vld [vmem:[#allocation2 + $0x9] sm:$0xff] }
  0x2b   : > { %2458 = vmatpush.bf16.msra.mxu2 %v9856_v29  ;;  %455 = vst [vmem:[#allocation2 + $0x88] sm:$0xff] %v10522_v24  ;;  %v494_v26 = vld [vmem:[%s10653_s17 + $0xa8] sm:$0xff] }
  0x2c   : > { %2505 = vmatpush.bf16.msra.mxu3 %v9866_v42  ;;  %456 = vst [vmem:[#allocation2 + $0x90] sm:$0xff] %v10522_v24 }
  0x2d   : > { %7204 = vmatmul.msk.f32.gmra.mxu0 %vm507_vm1, %v475_v4  ;;  %457 = vst [vmem:[#allocation2 + $0x98] sm:$0xff] %v10522_v24  ;;  %v1061_v4 = vpack.c.bf16 %v1045_v63, %v1045_v63 }
  0x2e   : > { %2410 = vmatpush.bf16.msra.mxu1 %v9847_v35  ;;  %458 = vst [vmem:[#allocation2 + $0xa0] sm:$0xff] %v10522_v24 }
  0x2f   : > { %2459 = vmatpush.bf16.msra.mxu2 %v9855_v36  ;;  %459 = vst [vmem:[#allocation2 + $0xa8] sm:$0xff] %v10522_v24 }
  0x30   : > { %2506 = vmatpush.bf16.msra.mxu3 %v9865_v49  ;;  %460 = vst [vmem:[#allocation3] sm:$0xff] %v10522_v24 }
  0x31   : > { %461 = vst [vmem:[#allocation3 + $0x8] sm:$0xff] %v10522_v24 }
  0x32   : > { %2411 = vmatpush.bf16.msra.mxu1 %v9846_v40  ;;  %462 = vst [vmem:[#allocation3 + $0x10] sm:$0xff] %v10522_v24 }
  0x33   : > { %2460 = vmatpush.bf16.msra.mxu2 %v9854_v41  ;;  %463 = vst [vmem:[#allocation3 + $0x18] sm:$0xff] %v10522_v24 }
  0x34   : > { %2507 = vmatpush.bf16.msra.mxu3 %v9864_v51  ;;  %464 = vst [vmem:[#allocation3 + $0x20] sm:$0xff] %v10522_v24 }
  0x35   : > { %7205 = vmatmul.msk.f32.gmra.mxu0 %vm507_vm1, %v476_v5  ;;  %465 = vst [vmem:[#allocation3 + $0x28] sm:$0xff] %v10522_v24 }
  0x36   : > { %2412 = vmatpush.bf16.msra.mxu1 %v9845_v46  ;;  %466 = vst [vmem:[#allocation3 + $0x30] sm:$0xff] %v10522_v24 }
  0x37   : > { %2461 = vmatpush.bf16.msra.mxu2 %v9853_v47  ;;  %467 = vst [vmem:[#allocation3 + $0x38] sm:$0xff] %v10522_v24 }
  0x38   : > { %2508 = vmatpush.bf16.msra.mxu3 %v9863_v56  ;;  %981 = vst [vmem:[#allocation4] sm:$0xf] %v965_v60 }
  0x39   : > { %982 = vst [vmem:[#allocation4 + $0x24] sm:$0xf] %v966_v61 }
  0x3a   : > { %1077 = vst [vmem:[#allocation4 + $0x8] sm:$0xf] %v1061_v4 }
  0x3c   : > { %2509 = vmatpush.bf16.msra.mxu3 %v9862_v62 }
  0x3d   : > { %7206 = vmatmul.msk.f32.gmra.mxu0 %vm507_vm1, %v477_v6  ;;  %v10523_v6 = vmov 0.0|0.0  }
  0x3e   : > { %1029 = vst [vmem:[#allocation4 + $0x4] sm:$0xf] %v10523_v6 }
  0x3f   : > { %1030 = vst [vmem:[#allocation4 + $0x28] sm:$0xf] %v10523_v6 }
  0x40   : > { %2510 = vmatpush.bf16.msra.mxu3 %v9861_v3  ;;  %1032 = vst [vmem:[#allocation4 + $0x70] sm:$0xf] %v10523_v6 }
  0x41   : > { %1034 = vst [vmem:[#allocation4 + $0xb8] sm:$0xf] %v10523_v6 }
  0x42   : > { %1036 = vst [vmem:[#allocation4 + $0x100] sm:$0xf] %v10523_v6 }
  0x43   : > { %1038 = vst [vmem:[#allocation4 + $0x148] sm:$0xf] %v10523_v6 }
  0x44   : > { %1040 = vst [vmem:[#allocation4 + $0x190] sm:$0xf] %v10523_v6 }
  0x45   : > { %7207 = vmatmul.msk.f32.gmra.mxu0 %vm507_vm1, %v478_v7  ;;  %1042 = vst [vmem:[#allocation4 + $0x1d8] sm:$0xf] %v10523_v6 }
  0x46   : > { %v7238_v16 = vld [vmem:[#allocation4 + $0x24] sm:$0xf0]  ;;  %1044 = vst [vmem:[#allocation4 + $0x220] sm:$0xf] %v10523_v6 }
  0x47   : > { %1174 = vst [vmem:[#allocation4 + $0x34] sm:$0xf] %v10523_v6  ;;  %v7274_v61 = vld [vmem:[#allocation4 + $0x6c] sm:$0xf0] }
  0x48   : > { %1176 = vst [vmem:[#allocation4 + $0x7c] sm:$0xf] %v10523_v6 }
  0x49   : > { %1178 = vst [vmem:[#allocation4 + $0xc4] sm:$0xf] %v10523_v6 }
  0x4a   : > { %1180 = vst [vmem:[#allocation4 + $0x10c] sm:$0xf] %v10523_v6 }
  0x4b   : > { %1182 = vst [vmem:[#allocation4 + $0x154] sm:$0xf] %v10523_v6 }
  0x4c   : > { %1184 = vst [vmem:[#allocation4 + $0x19c] sm:$0xf] %v10523_v6 }
  0x4d   : > { %7208 = vmatmul.msk.f32.gmra.mxu0 %vm507_vm1, %v479_v8  ;;  %1186 = vst [vmem:[#allocation4 + $0x1e4] sm:$0xf] %v10523_v6 }
  0x4e   : > { %1188 = vst [vmem:[#allocation4 + $0x22c] sm:$0xf] %v10523_v6 }
  0x4f   : > { %1318 = vst [vmem:[#allocation4 + $0x40] sm:$0xf] %v10523_v6 }
  0x50   : > { %1320 = vst [vmem:[#allocation4 + $0x88] sm:$0xf] %v10523_v6 }
  0x51   : > { %1322 = vst [vmem:[#allocation4 + $0xd0] sm:$0xf] %v10523_v6 }
  0x52   : > { %1324 = vst [vmem:[#allocation4 + $0x118] sm:$0xf] %v10523_v6 }
  0x53   : > { %1326 = vst [vmem:[#allocation4 + $0x160] sm:$0xf] %v10523_v6 }
  0x54   : > { %1328 = vst [vmem:[#allocation4 + $0x1a8] sm:$0xf] %v10523_v6 }
  0x55   : > { %7209 = vmatmul.msk.f32.gmra.mxu0 %vm507_vm1, %v480_v9  ;;  %v493_v9 = vld [vmem:[%s10653_s17 + $0xa0] sm:$0xff]  ;;  %1330 = vst [vmem:[#allocation4 + $0x1f0] sm:$0xf] %v10523_v6 }
  0x56   : > { %1331 = vst [vmem:[#allocation4 + $0x214] sm:$0xf] %v10523_v6 }
  0x57   : > { %1332 = vst [vmem:[#allocation4 + $0x238] sm:$0xf] %v10523_v6 }
  0x5d   : > { %7210 = vmatmul.msk.f32.gmra.mxu0 %vm507_vm1, %v481_v10  ;;  %v7236_v10 = vld [vmem:[#allocation4] sm:$0xf] }
  0x65   : > { %7211 = vmatmul.msk.f32.gmra.mxu0 %vm507_vm1, %v482_v11 }
  0x6d   : > { %7212 = vmatmul.msk.f32.gmra.mxu0 %vm507_vm1, %v483_v12  ;;  %v9777_v12 = vld [vmem:[#allocation4 + $0x20] sm:$0xf0] }
  0x75   : > { %7213 = vmatmul.msk.f32.gmra.mxu0 %vm507_vm1, %v484_v13  ;;  %v7237_v13 = vor.u32 %v9777_v12, %v7236_v10 }
  0x77   : > { %2413 = vmatmul.bf16.vlgmr.msra.gmra.mxu1 %v7237_v13 }
  0x7d   : > { %7214 = vmatmul.msk.f32.gmra.mxu0 %vm507_vm1, %v485_v14  ;;  %v9773_v14 = vld [vmem:[#allocation4 + $0x4] sm:$0xf] }
  0x7e   : > { %v7241_v19 = vor.u32 %v9773_v14, %v7238_v16 }
  0x80   : > { %2462 = vmatmul.bf16.vlgmr.msra.gmra.mxu2 %v7241_v19 }
  0x85   : > { %7215 = vmatmul.msk.f32.gmra.mxu0 %vm507_vm1, %v486_v15 }
  0x8d   : > { %7216 = vmatmul.msk.f32.gmra.mxu0 %vm507_vm1, %v487_v18 }
  0x95   : > { %7217 = vmatmul.msk.f32.gmra.mxu0 %vm507_vm1, %v488_v23 }
  0x9a   : > { %v625_v32 = vpop.f32.mrf.mxu0 }
  0x9b   : > { %v723_v34 = vmul.f32 %v10719_v27, %v625_v32 }
  0x9d   : > { %v757_v37 = vadd.f32 %v10735_v31, %v723_v34  ;;  %7218 = vmatmul.msk.f32.gmra.mxu0 %vm507_vm1, %v489_v33  ;;  %v495_v34 = vld [vmem:[%s10653_s17 + $0xb0] sm:$0xff] }
  0x9f   : > { %v789_v39 = vmax.f32 %v757_v37, 0.0 }
  0xa1   : > { %822 = vst.msk [vmem:[#allocation6] sm:$0xff] %vm821_vm2, %v789_v39 }
  0xa2   : > { %v628_v43 = vpop.f32.mrf.mxu0 }
  0xa3   : > { %v724_v45 = vmul.f32 %v10719_v27, %v628_v43 }
  0xa5   : > { %v758_v48 = vadd.f32 %v10735_v31, %v724_v45  ;;  %7219 = vmatmul.msk.f32.gmra.mxu0 %vm507_vm1, %v490_v44 }
  0xa7   : > { %v790_v50 = vmax.f32 %v758_v48, 0.0 }
  0xa9   : > { %823 = vst.msk [vmem:[#allocation6 + $0x8] sm:$0xff] %vm821_vm2, %v790_v50 }
  0xaa   : > { %v631_v52 = vpop.f32.mrf.mxu0 }
  0xab   : > { %v725_v54 = vmul.f32 %v10719_v27, %v631_v52 }
  0xad   : > { %v759_v57 = vadd.f32 %v10735_v31, %v725_v54  ;;  %7220 = vmatmul.msk.f32.gmra.mxu0 %vm507_vm1, %v491_v53  ;;  %v496_v54 = vld [vmem:[%s10653_s17 + $0xb8] sm:$0xff] }
  0xaf   : > { %v791_v59 = vmax.f32 %v759_v57, 0.0 }
  0xb0   : > { %v854_v17 = vld [vmem:[#allocation6] ss:$2 sm:$0xff]  ;;  %v856_v18 = vld [vmem:[#allocation6 + $0x1] ss:$2 sm:$0xff] }
  0xb1   : > { %824 = vst.msk [vmem:[#allocation6 + $0x10] sm:$0xff] %vm821_vm2, %v791_v59  ;;  %v857_v23 = vmax.f32 %v854_v17, %v856_v18  ;;  %v9900_v18 = vld [vmem:[%s14017_s3 + $0x1b8] sm:$0xff] }
  0xb2   : > { %v634_v0 = vpop.f32.mrf.mxu0  ;;  %2699 = vmatpush.bf16.msrb.mxu0 %v9900_v18 }
  0xb3   : > { %v726_v2 = vmul.f32 %v10719_v27, %v634_v0 }
  0xb5   : > { %v760_v5 = vadd.f32 %v10735_v31, %v726_v2  ;;  %7221 = vmatmul.msk.f32.gmra.mxu0 %vm507_vm1, %v492_v1  ;;  %v7244_v1 = vld [vmem:[#allocation4 + $0x8] sm:$0xf] }
  0xb7   : > { %v792_v7 = vmax.f32 %v760_v5, 0.0 }
  0xb9   : > { %825 = vst.msk [vmem:[#allocation6 + $0x18] sm:$0xff] %vm821_vm2, %v792_v7  ;;  %v497_v7 = vld [vmem:[%s10653_s17 + $0xc0] sm:$0xff] }
  0xba   : > { %v637_v8 = vpop.f32.mrf.mxu0 }
  0xbb   : > { %v727_v11 = vmul.f32 %v10719_v27, %v637_v8 }
  0xbd   : > { %v761_v15 = vadd.f32 %v10735_v31, %v727_v11  ;;  %7222 = vmatmul.msk.f32.gmra.mxu0 %vm507_vm1, %v493_v9 }
  0xbf   : > { %v793_v20 = vmax.f32 %v761_v15, 0.0 }
  0xc0   : > { %v859_v21 = vld [vmem:[#allocation6 + $0x10] ss:$2 sm:$0xff]  ;;  %v861_v22 = vld [vmem:[#allocation6 + $0x11] ss:$2 sm:$0xff] }
  0xc1   : > { %v862_v24 = vmax.f32 %v859_v21, %v861_v22  ;;  %826 = vst.msk [vmem:[#allocation6 + $0x20] sm:$0xff] %vm821_vm2, %v793_v20  ;;  %v498_v20 = vld [vmem:[%s10653_s17 + $0xc8] sm:$0xff] }
  0xc2   : > { %v640_v25 = vpop.f32.mrf.mxu0 }
  0xc3   : > { %v863_v28 = vmax.f32 %v857_v23, %v862_v24  ;;  %v728_v29 = vmul.f32 %v10719_v27, %v640_v25  ;;  %v9899_v24 = vld [vmem:[%s14017_s3 + $0x1b0] sm:$0xff] }
  0xc4   : > { %2700 = vmatpush.bf16.msrb.mxu0 %v9899_v24 }
  0xc5   : > { %864 = vst.msk [vmem:[#allocation2 + $0x18] sm:$0xff] %vm821_vm2, %v863_v28  ;;  %v762_v30 = vadd.f32 %v10735_v31, %v728_v29  ;;  %7223 = vmatmul.msk.f32.gmra.mxu0 %vm507_vm1, %v494_v26  ;;  %v9898_v26 = vld [vmem:[%s14017_s3 + $0x1a8] sm:$0xff]  ;;  %v499_v29 = vld [vmem:[%s10653_s17 + $0xd0] sm:$0xff] }
  0xc7   : > { %v794_v32 = vmax.f32 %v762_v30, 0.0 }
  0xc8   : > { %2701 = vmatpush.bf16.msrb.mxu0 %v9898_v26 }
  0xc9   : > { %827 = vst.msk [vmem:[#allocation6 + $0x28] sm:$0xff] %vm821_vm2, %v794_v32 }
  0xca   : > { %v643_v33 = vpop.f32.mrf.mxu0 }
  0xcb   : > { %v729_v35 = vmul.f32 %v10719_v27, %v643_v33 }
  0xcc   : > { %v951_v36 = vld [vmem:[#allocation2 + $0x17] sm:$0xff]  ;;  %v952_v37 = vld [vmem:[#allocation2 + $0x1f] sm:$0xff] }
  0xcd   : > { %v999_v38 = vld [vmem:[#allocation2 + $0x18] sm:$0xff]  ;;  %v763_v39 = vadd.f32 %v10735_v31, %v729_v35  ;;  %7224 = vmatmul.msk.f32.gmra.mxu0 %vm507_vm1, %v495_v34  ;;  %v967_v40 = vpack.c.bf16 %v951_v36, %v951_v36  ;;  %v968_v41 = vpack.c.bf16 %v952_v37, %v952_v37 }
  0xce   : > { %v1046_v42 = vld [vmem:[#allocation2 + $0x11] sm:$0xff]  ;;  %v1047_v43 = vld [vmem:[#allocation2 + $0x19] sm:$0xff]  ;;  %v1015_v44 = vpack.c.bf16 %v999_v38, %v999_v38 }
  0xcf   : > { %v1093_v45 = vld [vmem:[#allocation2 + $0x17] sm:$0xff]  ;;  %v795_v46 = vmax.f32 %v763_v39, 0.0  ;;  %983 = vst [vmem:[#allocation4 + $0x48] sm:$0xf] %v967_v40  ;;  %v1062_v47 = vpack.c.bf16 %v1046_v42, %v1046_v42  ;;  %v1094_v48 = vld [vmem:[#allocation2 + $0x1f] sm:$0xff]  ;;  %v1063_v49 = vpack.c.bf16 %v1047_v43, %v1047_v43 }
  0xd0   : > { %984 = vst [vmem:[#allocation4 + $0x6c] sm:$0xf] %v968_v41  ;;  %v1141_v50 = vld [vmem:[#allocation2 + $0x18] sm:$0xff]  ;;  %v1109_v51 = vpack.c.bf16 %v1093_v45, %v1093_v45  ;;  %v1110_v55 = vpack.c.bf16 %v1094_v48, %v1094_v48  ;;  %v866_v11 = vld [vmem:[#allocation6 + $0x20] ss:$2 sm:$0xff] }
  0xd1   : > { %828 = vst.msk [vmem:[#allocation6 + $0x30] sm:$0xff] %vm821_vm2, %v795_v46  ;;  %v1189_v52 = vld [vmem:[#allocation2 + $0x19] sm:$0xff]  ;;  %v1157_v57 = vpack.c.bf16 %v1141_v50, %v1141_v50  ;;  %v868_v12 = vld [vmem:[#allocation6 + $0x21] ss:$2 sm:$0xff] }
  0xd2   : > { %v646_v53 = vpop.f32.mrf.mxu0  ;;  %1031 = vst [vmem:[#allocation4 + $0x4c] sm:$0xf] %v1015_v44  ;;  %v1205_v58 = vpack.c.bf16 %v1189_v52, %v1189_v52  ;;  %v869_v16 = vmax.f32 %v866_v11, %v868_v12  ;;  %v9897_v39 = vld [vmem:[%s14017_s3 + $0x1a0] sm:$0xff]  ;;  %v9896_v46 = vld [vmem:[%s14017_s3 + $0x198] sm:$0xff] }
  0xd3   : > { %v730_v56 = vmul.f32 %v10719_v27, %v646_v53  ;;  %1078 = vst [vmem:[#allocation4 + $0x2c] sm:$0xf] %v1062_v47  ;;  %2702 = vmatpush.bf16.msrb.mxu0 %v9897_v39 }
  0xd4   : > { %1079 = vst [vmem:[#allocation4 + $0x50] sm:$0xf] %v1063_v49  ;;  %v500_v49 = vld [vmem:[%s10653_s17 + $0xd8] sm:$0xff] }
  0xd5   : > { %v764_v59 = vadd.f32 %v10735_v31, %v730_v56  ;;  %7225 = vmatmul.msk.f32.gmra.mxu0 %vm507_vm1, %v496_v54  ;;  %1125 = vst [vmem:[#allocation4 + $0xc] sm:$0xf] %v1109_v51  ;;  %v9895_v56 = vld [vmem:[%s14017_s3 + $0x190] sm:$0xff] }
  0xd6   : > { %v7272_v60 = vld [vmem:[#allocation4 + $0x48] sm:$0xf]  ;;  %1126 = vst [vmem:[#allocation4 + $0x30] sm:$0xf] %v1110_v55 }
  0xd7   : > { %v796_v62 = vmax.f32 %v764_v59, 0.0  ;;  %v9786_v63 = vld [vmem:[#allocation4 + $0x68] sm:$0xf0]  ;;  %1173 = vst [vmem:[#allocation4 + $0x10] sm:$0xf] %v1157_v57  ;;  %2703 = vmatpush.bf16.msrb.mxu0 %v9896_v46 }
  0xd8   : > { %v7273_v0 = vor.u32 %v9786_v63, %v7272_v60  ;;  %1221 = vst [vmem:[#allocation4 + $0x14] sm:$0xf] %v1205_v58  ;;  %v7310_v59 = vld [vmem:[#allocation4 + $0xb4] sm:$0xf0]  ;;  %v504_v46 = vld [vmem:[%s10653_s17 + $0xf8] sm:$0xff] }
  0xd9   : > { %829 = vst.msk [vmem:[#allocation6 + $0x38] sm:$0xff] %vm821_vm2, %v796_v62  ;;  %v9782_v2 = vld [vmem:[#allocation4 + $0x4c] sm:$0xf] }
  0xda   : > { %2418 = vmatmul.bf16.gmra.mxu1 %v7273_v0  ;;  %v7277_v3 = vor.u32 %v9782_v2, %v7274_v61  ;;  %v9778_v4 = vld [vmem:[#allocation4 + $0x28] sm:$0xf0]  ;;  %v649_v5 = vpop.f32.mrf.mxu0 }
  0xdb   : > { %v7245_v8 = vor.u32 %v9778_v4, %v7244_v1  ;;  %v731_v9 = vmul.f32 %v10719_v27, %v649_v5  ;;  %2704 = vmatpush.bf16.msrb.mxu0 %v9895_v56  ;;  %v9894_v4 = vld [vmem:[%s14017_s3 + $0x188] sm:$0xff]  ;;  %v7346_v56 = vld [vmem:[#allocation4 + $0xfc] sm:$0xf0] }
  0xdc   : > { %2467 = vmatmul.bf16.gmra.mxu2 %v7277_v3  ;;  %v7280_v3 = vld [vmem:[#allocation4 + $0x50] sm:$0xf] }
  0xdd   : > { %2511 = vmatmul.bf16.vlgmr.msra.gmra.mxu3 %v7245_v8  ;;  %v765_v10 = vadd.f32 %v10735_v31, %v731_v9  ;;  %7226 = vmatmul.msk.f32.gmra.mxu0 %vm507_vm1, %v497_v7  ;;  %v501_v9 = vld [vmem:[%s10653_s17 + $0xe0] sm:$0xff] }
  0xdf   : > { %v797_v13 = vmax.f32 %v765_v10, 0.0  ;;  %2705 = vmatpush.bf16.msrb.mxu0 %v9894_v4 }
  0xe0   : > { %v871_v14 = vld [vmem:[#allocation6 + $0x30] ss:$2 sm:$0xff]  ;;  %v873_v15 = vld [vmem:[#allocation6 + $0x31] ss:$2 sm:$0xff] }
  0xe1   : > { %v874_v17 = vmax.f32 %v871_v14, %v873_v15  ;;  %830 = vst.msk [vmem:[#allocation6 + $0x40] sm:$0xff] %vm821_vm2, %v797_v13  ;;  %v9893_v13 = vld [vmem:[%s14017_s3 + $0x180] sm:$0xff] }
  0xe2   : > { %v652_v19 = vpop.f32.mrf.mxu0 }
  0xe3   : > { %v875_v21 = vmax.f32 %v869_v16, %v874_v17  ;;  %v732_v22 = vmul.f32 %v10719_v27, %v652_v19  ;;  %2706 = vmatpush.bf16.msrb.mxu0 %v9893_v13 }
  0xe5   : > { %876 = vst.msk [vmem:[#allocation2 + $0x28] sm:$0xff] %vm821_vm2, %v875_v21  ;;  %v766_v23 = vadd.f32 %v10735_v31, %v732_v22  ;;  %7227 = vmatmul.msk.f32.gmra.mxu0 %vm507_vm1, %v498_v20  ;;  %v502_v22 = vld [vmem:[%s10653_s17 + $0xe8] sm:$0xff] }
  0xe7   : > { %v798_v25 = vmax.f32 %v766_v23, 0.0 }
  0xe9   : > { %831 = vst.msk [vmem:[#allocation6 + $0x48] sm:$0xff] %vm821_vm2, %v798_v25 }
  0xea   : > { %v655_v28 = vpop.f32.mrf.mxu0 }
  0xeb   : > { %v733_v30 = vmul.f32 %v10719_v27, %v655_v28 }
  0xec   : > { %v953_v32 = vld [vmem:[#allocation2 + $0x27] sm:$0xff]  ;;  %v954_v33 = vld [vmem:[#allocation2 + $0x2f] sm:$0xff] }
  0xed   : > { %v1001_v34 = vld [vmem:[#allocation2 + $0x28] sm:$0xff]  ;;  %v767_v35 = vadd.f32 %v10735_v31, %v733_v30  ;;  %7228 = vmatmul.msk.f32.gmra.mxu0 %vm507_vm1, %v499_v29  ;;  %v969_v36 = vpack.c.bf16 %v953_v32, %v953_v32  ;;  %v970_v37 = vpack.c.bf16 %v954_v33, %v954_v33  ;;  %v503_v29 = vld [vmem:[%s10653_s17 + $0xf0] sm:$0xff] }
  0xee   : > { %v1048_v38 = vld [vmem:[#allocation2 + $0x21] sm:$0xff]  ;;  %v1049_v40 = vld [vmem:[#allocation2 + $0x29] sm:$0xff]  ;;  %v1017_v41 = vpack.c.bf16 %v1001_v34, %v1001_v34 }
  0xef   : > { %v799_v42 = vmax.f32 %v767_v35, 0.0  ;;  %985 = vst [vmem:[#allocation4 + $0x90] sm:$0xf] %v969_v36  ;;  %v1064_v43 = vpack.c.bf16 %v1048_v38, %v1048_v38  ;;  %v1065_v44 = vpack.c.bf16 %v1049_v40, %v1049_v40  ;;  %v1095_v45 = vld [vmem:[#allocation2 + $0x27] sm:$0xff]  ;;  %v1096_v47 = vld [vmem:[#allocation2 + $0x2f] sm:$0xff] }
  0xf0   : > { %986 = vst [vmem:[#allocation4 + $0xb4] sm:$0xf] %v970_v37  ;;  %v1111_v51 = vpack.c.bf16 %v1095_v45, %v1095_v45  ;;  %v1143_v52 = vld [vmem:[#allocation2 + $0x28] sm:$0xff]  ;;  %v1112_v53 = vpack.c.bf16 %v1096_v47, %v1096_v47 }
  0xf1   : > { %832 = vst.msk [vmem:[#allocation6 + $0x50] sm:$0xff] %vm821_vm2, %v799_v42  ;;  %v1190_v54 = vld [vmem:[#allocation2 + $0x21] sm:$0xff]  ;;  %v1191_v57 = vld [vmem:[#allocation2 + $0x29] sm:$0xff]  ;;  %v1159_v60 = vpack.c.bf16 %v1143_v52, %v1143_v52 }
  0xf2   : > { %v658_v48 = vpop.f32.mrf.mxu0  ;;  %1033 = vst [vmem:[#allocation4 + $0x94] sm:$0xf] %v1017_v41  ;;  %v1206_v63 = vpack.c.bf16 %v1190_v54, %v1190_v54  ;;  %v1207_v1 = vpack.c.bf16 %v1191_v57, %v1191_v57  ;;  %v878_v14 = vld [vmem:[#allocation6 + $0x40] ss:$2 sm:$0xff]  ;;  %v880_v15 = vld [vmem:[#allocation6 + $0x41] ss:$2 sm:$0xff] }
  0xf3   : > { %v734_v50 = vmul.f32 %v10719_v27, %v658_v48  ;;  %1080 = vst [vmem:[#allocation4 + $0x74] sm:$0xf] %v1064_v43  ;;  %v881_v19 = vmax.f32 %v878_v14, %v880_v15 }
  0xf4   : > { %1081 = vst [vmem:[#allocation4 + $0x98] sm:$0xf] %v1065_v44 }
  0xf5   : > { %v768_v55 = vadd.f32 %v10735_v31, %v734_v50  ;;  %7229 = vmatmul.msk.f32.gmra.mxu0 %vm507_vm1, %v500_v49  ;;  %1269 = vst [vmem:[#allocation4 + $0x18] sm:$0xf] %v969_v36 }
  0xf6   : > { %v7308_v58 = vld [vmem:[#allocation4 + $0x90] sm:$0xf]  ;;  %1270 = vst [vmem:[#allocation4 + $0x3c] sm:$0xf] %v970_v37 }
  0xf7   : > { %v800_v61 = vmax.f32 %v768_v55, 0.0  ;;  %v9795_v62 = vld [vmem:[#allocation4 + $0xb0] sm:$0xf0]  ;;  %1127 = vst [vmem:[#allocation4 + $0x54] sm:$0xf] %v1111_v51 }
  0xf8   : > { %v7309_v0 = vor.u32 %v9795_v62, %v7308_v58  ;;  %1128 = vst [vmem:[#allocation4 + $0x78] sm:$0xf] %v1112_v53 }
  0xf9   : > { %833 = vst.msk [vmem:[#allocation6 + $0x58] sm:$0xff] %vm821_vm2, %v800_v61  ;;  %v9791_v2 = vld [vmem:[#allocation4 + $0x94] sm:$0xf] }
  0xfa   : > { %2423 = vmatmul.bf16.gmra.mxu1 %v7309_v0  ;;  %v7313_v5 = vor.u32 %v9791_v2, %v7310_v59  ;;  %v9787_v7 = vld [vmem:[#allocation4 + $0x70] sm:$0xf0]  ;;  %v661_v8 = vpop.f32.mrf.mxu0  ;;  %1175 = vst [vmem:[#allocation4 + $0x58] sm:$0xf] %v1159_v60 }
  0xfb   : > { %v7281_v10 = vor.u32 %v9787_v7, %v7280_v3  ;;  %v735_v11 = vmul.f32 %v10719_v27, %v661_v8  ;;  %1222 = vst [vmem:[#allocation4 + $0x38] sm:$0xf] %v1206_v63  ;;  %v7316_v3 = vld [vmem:[#allocation4 + $0x98] sm:$0xf] }
  0xfc   : > { %2472 = vmatmul.bf16.gmra.mxu2 %v7313_v5  ;;  %1223 = vst [vmem:[#allocation4 + $0x5c] sm:$0xf] %v1207_v1  ;;  %v7260_v62 = vld [vmem:[#allocation4 + $0x18] sm:$0xf] }
  0xfd   : > { %2516 = vmatmul.bf16.gmra.mxu3 %v7281_v10  ;;  %v769_v12 = vadd.f32 %v10735_v31, %v735_v11  ;;  %7230 = vmatmul.msk.f32.gmra.mxu0 %vm507_vm1, %v501_v9  ;;  %1317 = vst [vmem:[#allocation4 + $0x1c] sm:$0xf] %v1159_v60  ;;  %v9780_v63 = vld [vmem:[#allocation4 + $0x38] sm:$0xf0] }
  0xfe   : > { %1365 = vst [vmem:[#allocation4 + $0x20] sm:$0xf] %v1207_v1  ;;  %v7261_v9 = vor.u32 %v9780_v63, %v7260_v62 }
  0xff   : > { %v801_v16 = vmax.f32 %v769_v12, 0.0 }
 0x100   : > { %v883_v17 = vld [vmem:[#allocation6 + $0x50] ss:$2 sm:$0xff]  ;;  %v885_v18 = vld [vmem:[#allocation6 + $0x51] ss:$2 sm:$0xff] }
 0x101   : > { %v886_v20 = vmax.f32 %v883_v17, %v885_v18  ;;  %834 = vst.msk [vmem:[#allocation6 + $0x60] sm:$0xff] %vm821_vm2, %v801_v16 }
 0x102   : > { %v664_v21 = vpop.f32.mrf.mxu0 }
 0x103   : > { %v887_v23 = vmax.f32 %v881_v19, %v886_v20  ;;  %v736_v24 = vmul.f32 %v10719_v27, %v664_v21 }
 0x105   : > { %888 = vst.msk [vmem:[#allocation2 + $0x38] sm:$0xff] %vm821_vm2, %v887_v23  ;;  %v770_v25 = vadd.f32 %v10735_v31, %v736_v24  ;;  %7231 = vmatmul.msk.f32.gmra.mxu0 %vm507_vm1, %v502_v22 }
 0x107   : > { %v802_v26 = vmax.f32 %v770_v25, 0.0 }
 0x109   : > { %835 = vst.msk [vmem:[#allocation6 + $0x68] sm:$0xff] %vm821_vm2, %v802_v26 }
 0x10a   : > { %v667_v28 = vpop.f32.mrf.mxu0 }
 0x10b   : > { %v737_v30 = vmul.f32 %v10719_v27, %v667_v28 }
 0x10c   : > { %v955_v32 = vld [vmem:[#allocation2 + $0x37] sm:$0xff]  ;;  %v956_v33 = vld [vmem:[#allocation2 + $0x3f] sm:$0xff] }
 0x10d   : > { %v1003_v34 = vld [vmem:[#allocation2 + $0x38] sm:$0xff]  ;;  %v771_v35 = vadd.f32 %v10735_v31, %v737_v30  ;;  %7232 = vmatmul.msk.f32.gmra.mxu0 %vm507_vm1, %v503_v29  ;;  %v971_v36 = vpack.c.bf16 %v955_v32, %v955_v32  ;;  %v972_v37 = vpack.c.bf16 %v956_v33, %v956_v33 }
 0x10e   : > { %v1050_v38 = vld [vmem:[#allocation2 + $0x31] sm:$0xff]  ;;  %v1019_v39 = vpack.c.bf16 %v1003_v34, %v1003_v34  ;;  %v1051_v42 = vld [vmem:[#allocation2 + $0x39] sm:$0xff] }
 0x10f   : > { %v803_v40 = vmax.f32 %v771_v35, 0.0  ;;  %987 = vst [vmem:[#allocation4 + $0xd8] sm:$0xf] %v971_v36  ;;  %v1066_v41 = vpack.c.bf16 %v1050_v38, %v1050_v38  ;;  %v1097_v43 = vld [vmem:[#allocation2 + $0x37] sm:$0xff]  ;;  %v1098_v44 = vld [vmem:[#allocation2 + $0x3f] sm:$0xff]  ;;  %v1067_v47 = vpack.c.bf16 %v1051_v42, %v1051_v42 }
 0x110   : > { %988 = vst [vmem:[#allocation4 + $0xfc] sm:$0xf] %v972_v37  ;;  %v1113_v49 = vpack.c.bf16 %v1097_v43, %v1097_v43  ;;  %v1145_v50 = vld [vmem:[#allocation2 + $0x38] sm:$0xff]  ;;  %v1114_v51 = vpack.c.bf16 %v1098_v44, %v1098_v44  ;;  %v890_v11 = vld [vmem:[#allocation6 + $0x60] ss:$2 sm:$0xff] }
 0x111   : > { %836 = vst.msk [vmem:[#allocation6 + $0x70] sm:$0xff] %vm821_vm2, %v803_v40  ;;  %v1192_v52 = vld [vmem:[#allocation2 + $0x31] sm:$0xff]  ;;  %v1193_v54 = vld [vmem:[#allocation2 + $0x39] sm:$0xff]  ;;  %v1161_v57 = vpack.c.bf16 %v1145_v50, %v1145_v50  ;;  %v892_v12 = vld [vmem:[#allocation6 + $0x61] ss:$2 sm:$0xff] }
 0x112   : > { %v670_v45 = vpop.f32.mrf.mxu0  ;;  %1035 = vst [vmem:[#allocation4 + $0xdc] sm:$0xf] %v1019_v39  ;;  %v1208_v60 = vpack.c.bf16 %v1192_v52, %v1192_v52  ;;  %v1209_v0 = vpack.c.bf16 %v1193_v54, %v1193_v54  ;;  %v893_v16 = vmax.f32 %v890_v11, %v892_v12 }
 0x113   : > { %v738_v48 = vmul.f32 %v10719_v27, %v670_v45  ;;  %1082 = vst [vmem:[#allocation4 + $0xbc] sm:$0xf] %v1066_v41 }
 0x114   : > { %1271 = vst [vmem:[#allocation4 + $0x60] sm:$0xf] %v971_v36 }
 0x115   : > { %v772_v53 = vadd.f32 %v10735_v31, %v738_v48  ;;  %7233 = vmatmul.msk.f32.gmra.mxu0 %vm507_vm1, %v504_v46  ;;  %1272 = vst [vmem:[#allocation4 + $0x84] sm:$0xf] %v972_v37  ;;  %v7382_v46 = vld [vmem:[#allocation4 + $0x144] sm:$0xf0] }
 0x116   : > { %v7344_v55 = vld [vmem:[#allocation4 + $0xd8] sm:$0xf]  ;;  %1083 = vst [vmem:[#allocation4 + $0xe0] sm:$0xf] %v1067_v47 }
 0x117   : > { %v804_v58 = vmax.f32 %v772_v53, 0.0  ;;  %v9804_v59 = vld [vmem:[#allocation4 + $0xf8] sm:$0xf0]  ;;  %1129 = vst [vmem:[#allocation4 + $0x9c] sm:$0xf] %v1113_v49 }
 0x118   : > { %v7345_v61 = vor.u32 %v9804_v59, %v7344_v55  ;;  %1130 = vst [vmem:[#allocation4 + $0xc0] sm:$0xf] %v1114_v51 }
 0x119   : > { %837 = vst.msk [vmem:[#allocation6 + $0x78] sm:$0xff] %vm821_vm2, %v804_v58  ;;  %v9800_v1 = vld [vmem:[#allocation4 + $0xdc] sm:$0xf] }
 0x11a   : > { %2428 = vmatmul.bf16.gmra.mxu1 %v7345_v61  ;;  %v7349_v2 = vor.u32 %v9800_v1, %v7346_v56  ;;  %v9796_v4 = vld [vmem:[#allocation4 + $0xb8] sm:$0xf0]  ;;  %v673_v5 = vpop.f32.mrf.mxu0  ;;  %1177 = vst [vmem:[#allocation4 + $0xa0] sm:$0xf] %v1161_v57 }
 0x11b   : > { %v7317_v7 = vor.u32 %v9796_v4, %v7316_v3  ;;  %v739_v8 = vmul.f32 %v10719_v27, %v673_v5  ;;  %1224 = vst [vmem:[#allocation4 + $0x80] sm:$0xf] %v1208_v60  ;;  %v7296_v23 = vld [vmem:[#allocation4 + $0x60] sm:$0xf] }
 0x11c   : > { %2477 = vmatmul.bf16.gmra.mxu2 %v7349_v2  ;;  %1225 = vst [vmem:[#allocation4 + $0xa4] sm:$0xf] %v1209_v0  ;;  %v9789_v24 = vld [vmem:[#allocation4 + $0x80] sm:$0xf0] }
 0x11d   : > { %2521 = vmatmul.bf16.gmra.mxu3 %v7317_v7  ;;  %v773_v10 = vadd.f32 %v10735_v31, %v739_v8  ;;  %2707 = vmatmul.bf16.vlgmr.msrb.gmra.mxu0 %v7261_v9  ;;  %1366 = vst [vmem:[#allocation4 + $0x44] sm:$0xf] %v1208_v60  ;;  %v7297_v28 = vor.u32 %v9789_v24, %v7296_v23  ;;  %v7352_v55 = vld [vmem:[#allocation4 + $0xe0] sm:$0xf] }
 0x11e   : > { %1319 = vst [vmem:[#allocation4 + $0x64] sm:$0xf] %v1161_v57 }
 0x11f   : > { %v805_v13 = vmax.f32 %v773_v10, 0.0  ;;  %1367 = vst [vmem:[#allocation4 + $0x68] sm:$0xf] %v1209_v0 }
 0x120   : > { %v895_v14 = vld [vmem:[#allocation6 + $0x70] ss:$2 sm:$0xff]  ;;  %v897_v15 = vld [vmem:[#allocation6 + $0x71] ss:$2 sm:$0xff] }
 0x121   : > { %v898_v17 = vmax.f32 %v895_v14, %v897_v15  ;;  %838 = vst.msk [vmem:[#allocation6 + $0x80] sm:$0xff] %vm821_vm2, %v805_v13  ;;  %v2414_v13 = vpop.f32.mrf.mxu1  ;;  %v2463_v14 = vpop.f32.mrf.mxu2 }
 0x122   : > { %v676_v18 = vpop.f32.mrf.mxu0  ;;  %v10949_v15 = vadd.f32 %v2463_v14, %v2414_v13 }
 0x123   : > { %v899_v19 = vmax.f32 %v893_v16, %v898_v17  ;;  %v740_v20 = vmul.f32 %v10719_v27, %v676_v18 }
 0x125   : > { %900 = vst.msk [vmem:[#allocation2 + $0x48] sm:$0xff] %vm821_vm2, %v899_v19  ;;  %v774_v21 = vadd.f32 %v10735_v31, %v740_v20 }
 0x127   : > { %v806_v22 = vmax.f32 %v774_v21, 0.0 }
 0x129   : > { %839 = vst.msk [vmem:[#allocation6 + $0x88] sm:$0xff] %vm821_vm2, %v806_v22 }
 0x12a   : > { %v679_v25 = vpop.f32.mrf.mxu0 }
 0x12b   : > { %v741_v26 = vmul.f32 %v10719_v27, %v679_v25 }
 0x12c   : > { %v957_v29 = vld [vmem:[#allocation2 + $0x47] sm:$0xff]  ;;  %v958_v30 = vld [vmem:[#allocation2 + $0x4f] sm:$0xff] }
 0x12d   : > { %v1005_v32 = vld [vmem:[#allocation2 + $0x48] sm:$0xff]  ;;  %v775_v33 = vadd.f32 %v10735_v31, %v741_v26  ;;  %2712 = vmatmul.bf16.gmra.mxu0 %v7297_v28  ;;  %v973_v34 = vpack.c.bf16 %v957_v29, %v957_v29  ;;  %v974_v35 = vpack.c.bf16 %v958_v30, %v958_v30 }
 0x12e   : > { %v1052_v36 = vld [vmem:[#allocation2 + $0x41] sm:$0xff]  ;;  %v1021_v37 = vpack.c.bf16 %v1005_v32, %v1005_v32  ;;  %v1053_v6 = vld [vmem:[#allocation2 + $0x49] sm:$0xff] }
 0x12f   : > { %v807_v38 = vmax.f32 %v775_v33, 0.0  ;;  %989 = vst [vmem:[#allocation4 + $0x120] sm:$0xf] %v973_v34  ;;  %v1068_v39 = vpack.c.bf16 %v1052_v36, %v1052_v36  ;;  %v1069_v41 = vpack.c.bf16 %v1053_v6, %v1053_v6  ;;  %v1194_v43 = vld [vmem:[#allocation2 + $0x41] sm:$0xff]  ;;  %v1337_v52 = vld [vmem:[#allocation2 + $0x49] sm:$0xff]  ;;  %v9876_v33 = vld [vmem:[%s14017_s3 + $0xf8] sm:$0xff]  ;;  %v2465_v6 = vpop.f32.mrf.mxu2 }
 0x130   : > { %990 = vst [vmem:[#allocation4 + $0x144] sm:$0xf] %v974_v35  ;;  %v1210_v49 = vpack.c.bf16 %v1194_v43, %v1194_v43  ;;  %v1289_v50 = vld [vmem:[#allocation2 + $0x48] sm:$0xff]  ;;  %v1353_v62 = vpack.c.bf16 %v1337_v52, %v1337_v52  ;;  %2552 = vmatpush.bf16.msrb.mxu1 %v9876_v33 }
 0x131   : > { %840 = vst.msk [vmem:[#allocation6 + $0x90] sm:$0xff] %vm821_vm2, %v807_v38  ;;  %v1305_v58 = vpack.c.bf16 %v1289_v50, %v1289_v50  ;;  %v902_v2 = vld [vmem:[#allocation6 + $0x80] ss:$2 sm:$0xff]  ;;  %v904_v3 = vld [vmem:[#allocation6 + $0x81] ss:$2 sm:$0xff] }
 0x132   : > { %v682_v40 = vpop.f32.mrf.mxu0  ;;  %1037 = vst [vmem:[#allocation4 + $0x124] sm:$0xf] %v1021_v37  ;;  %v905_v8 = vmax.f32 %v902_v2, %v904_v3  ;;  %v10972_v38 = vld [vmem:[%s14036_s2 + $0x1] ss:$0 sm:$0xff]  ;;  %v9874_v33 = vld [vmem:[%s14017_s3 + $0xe8] sm:$0xff] }
 0x133   : > { %v742_v42 = vmul.f32 %v10719_v27, %v682_v40  ;;  %1084 = vst [vmem:[#allocation4 + $0x104] sm:$0xf] %v1068_v39  ;;  %v7418_v40 = vld [vmem:[#allocation4 + $0x18c] sm:$0xf0] }
 0x134   : > { %1273 = vst [vmem:[#allocation4 + $0xa8] sm:$0xf] %v973_v34 }
 0x135   : > { %v776_v44 = vadd.f32 %v10735_v31, %v742_v42  ;;  %1274 = vst [vmem:[#allocation4 + $0xcc] sm:$0xf] %v974_v35 }
 0x136   : > { %v7380_v45 = vld [vmem:[#allocation4 + $0x120] sm:$0xf]  ;;  %1085 = vst [vmem:[#allocation4 + $0x128] sm:$0xf] %v1069_v41 }
 0x137   : > { %v808_v47 = vmax.f32 %v776_v44, 0.0  ;;  %v9813_v48 = vld [vmem:[#allocation4 + $0x140] sm:$0xf0]  ;;  %1131 = vst [vmem:[#allocation4 + $0xe4] sm:$0xf] %v973_v34 }
 0x138   : > { %v7381_v51 = vor.u32 %v9813_v48, %v7380_v45  ;;  %1132 = vst [vmem:[#allocation4 + $0x108] sm:$0xf] %v974_v35  ;;  %v10966_v35 = vld [vmem:[%s14036_s2] ss:$0 sm:$0xff]  ;;  %s7140_s2 = sshll.u32 %s7136_s16, 4  ;;  %s7141_s2 = int_to_ptr.hbm [resolvable:$true] %s7140_s2 }
 0x139   : > { %841 = vst.msk [vmem:[#allocation6 + $0x98] sm:$0xff] %vm821_vm2, %v808_v47  ;;  %v9809_v53 = vld [vmem:[#allocation4 + $0x124] sm:$0xf]  ;;  %s10472_s1 = sshra.s32 %s7141_s2, 4  ;;  %s10473_s1 = int_to_ptr.hbm [resolvable:$true] %s10472_s1 }
 0x13a   : > { %2433 = vmatmul.bf16.gmra.mxu1 %v7381_v51  ;;  %v7385_v54 = vor.u32 %v9809_v53, %v7382_v46  ;;  %v9805_v56 = vld [vmem:[#allocation4 + $0x100] sm:$0xf0]  ;;  %v685_v57 = vpop.f32.mrf.mxu0  ;;  %1179 = vst [vmem:[#allocation4 + $0xe8] sm:$0xf] %v1021_v37  ;;  %v2416_v37 = vpop.f32.mrf.mxu1  ;;  %s10474_s24 = scalar_lea.hbm %s10473_s1, 1  ;;  %p10479_p0 = scmp.lt.s32.totalorder %s10473_s1, %s14027_s13 }
 0x13b   : > { %v7353_v59 = vor.u32 %v9805_v56, %v7352_v55  ;;  %v743_v60 = vmul.f32 %v10719_v27, %v685_v57  ;;  %v7332_v61 = vld [vmem:[#allocation4 + $0xa8] sm:$0xf]  ;;  %1226 = vst [vmem:[#allocation4 + $0xc8] sm:$0xf] %v1210_v49  ;;  %p10475_p11 = scmp.ne.s32.totalorder %s10473_s1, %s10474_s24  ;;  %p10480_p1 = scmp.lt.s32.totalorder %s10478_s15, %s10474_s24 }
 0x13c   : > { %2482 = vmatmul.bf16.gmra.mxu2 %v7385_v54  ;;  %v9798_v63 = vld [vmem:[#allocation4 + $0xc8] sm:$0xf0]  ;;  %1227 = vst [vmem:[#allocation4 + $0xec] sm:$0xf] %v1069_v41 }
 0x13d   : > { %2526 = vmatmul.bf16.gmra.mxu3 %v7353_v59  ;;  %v777_v0 = vadd.f32 %v10735_v31, %v743_v60  ;;  %v7333_v1 = vor.u32 %v9798_v63, %v7332_v61  ;;  %1368 = vst [vmem:[#allocation4 + $0x8c] sm:$0xf] %v1210_v49  ;;  %v7388_v51 = vld [vmem:[#allocation4 + $0x128] sm:$0xf]  ;;  %p10476_p12 = pnand %p10475_p11, %p10632_p5  ;;  %p10481_p2 = por %p10480_p1, %p10479_p0 }
 0x13e   : > { %1321 = vst [vmem:[#allocation4 + $0xac] sm:$0xf] %v1305_v58 }
 0x13f   : > { %v809_v4 = vmax.f32 %v777_v0, 0.0  ;;  %2717 = vmatmul.bf16.gmra.mxu0 %v7333_v1  ;;  %1369 = vst [vmem:[#allocation4 + $0xb0] sm:$0xf] %v1353_v62  ;;  %p10477_p13 = pneg %p10476_p12 }
 0x140   : > { %v907_v5 = vld [vmem:[#allocation6 + $0x90] ss:$2 sm:$0xff]  ;;  %v909_v7 = vld [vmem:[#allocation6 + $0x91] ss:$2 sm:$0xff] }
 0x141   : > { %v910_v9 = vmax.f32 %v907_v5, %v909_v7  ;;  %842 = vst.msk [vmem:[#allocation6 + $0xa0] sm:$0xff] %vm821_vm2, %v809_v4  ;;  %p10482_p3 = pnand %p10481_p2, %p10477_p13 }
 0x142   : > { %v688_v10 = vpop.f32.mrf.mxu0 }
 0x143   : > { %v911_v11 = vmax.f32 %v905_v8, %v910_v9  ;;  %v744_v12 = vmul.f32 %v10719_v27, %v688_v10 }
 0x145   : > { %912 = vst.msk [vmem:[#allocation2 + $0x58] sm:$0xff] %vm821_vm2, %v911_v11  ;;  %v778_v16 = vadd.f32 %v10735_v31, %v744_v12 }
 0x147   : > { %v810_v17 = vmax.f32 %v778_v16, 0.0  ;;  %v9883_v16 = vld [vmem:[%s14017_s3 + $0x130] sm:$0xff] }
 0x149   : > { %843 = vst.msk [vmem:[#allocation6 + $0xa8] sm:$0xff] %vm821_vm2, %v810_v17  ;;  %v9875_v17 = vld [vmem:[%s14017_s3 + $0xf0] sm:$0xff] }
 0x14a   : > { %v691_v18 = vpop.f32.mrf.mxu0  ;;  %2553 = vmatpush.bf16.msrb.mxu1 %v9875_v17 }
 0x14b   : > { %v745_v19 = vmul.f32 %v10719_v27, %v691_v18  ;;  %v9884_v27 = vld [vmem:[%s14017_s3 + $0x138] sm:$0xff] }
 0x14c   : > { %v959_v20 = vld [vmem:[#allocation2 + $0x57] sm:$0xff]  ;;  %v960_v21 = vld [vmem:[#allocation2 + $0x5f] sm:$0xff]  ;;  %2601 = vmatpush.bf16.msrb.mxu2 %v9884_v27  ;;  %v9882_v27 = vld [vmem:[%s14017_s3 + $0x128] sm:$0xff] }
 0x14d   : > { %v1007_v22 = vld [vmem:[#allocation2 + $0x58] sm:$0xff]  ;;  %v779_v23 = vadd.f32 %v10735_v31, %v745_v19  ;;  %v975_v24 = vpack.c.bf16 %v959_v20, %v959_v20  ;;  %v976_v25 = vpack.c.bf16 %v960_v21, %v960_v21 }
 0x14e   : > { %v1054_v26 = vld [vmem:[#allocation2 + $0x51] sm:$0xff]  ;;  %v1023_v28 = vpack.c.bf16 %v1007_v22, %v1007_v22  ;;  %v1055_v32 = vld [vmem:[#allocation2 + $0x59] sm:$0xff]  ;;  %2554 = vmatpush.bf16.msrb.mxu1 %v9874_v33 }
 0x14f   : > { %v811_v29 = vmax.f32 %v779_v23, 0.0  ;;  %991 = vst [vmem:[#allocation4 + $0x168] sm:$0xf] %v975_v24  ;;  %v1070_v30 = vpack.c.bf16 %v1054_v26, %v1054_v26  ;;  %v1071_v34 = vpack.c.bf16 %v1055_v32, %v1055_v32  ;;  %v1338_v42 = vld [vmem:[#allocation2 + $0x51] sm:$0xff]  ;;  %v1339_v47 = vld [vmem:[#allocation2 + $0x59] sm:$0xff] }
 0x150   : > { %992 = vst [vmem:[#allocation4 + $0x18c] sm:$0xf] %v976_v25  ;;  %v1291_v45 = vld [vmem:[#allocation2 + $0x58] sm:$0xff]  ;;  %v1354_v49 = vpack.c.bf16 %v1338_v42, %v1338_v42  ;;  %v1355_v58 = vpack.c.bf16 %v1339_v47, %v1339_v47  ;;  %v914_v62 = vld [vmem:[#allocation6 + $0xa0] ss:$2 sm:$0xff]  ;;  %2602 = vmatpush.bf16.msrb.mxu2 %v9883_v16 }
 0x151   : > { %844 = vst.msk [vmem:[#allocation6 + $0xb0] sm:$0xff] %vm821_vm2, %v811_v29  ;;  %v1307_v54 = vpack.c.bf16 %v1291_v45, %v1291_v45  ;;  %v916_v63 = vld [vmem:[#allocation6 + $0xa1] ss:$2 sm:$0xff] }
 0x152   : > { %v694_v31 = vpop.f32.mrf.mxu0  ;;  %1039 = vst [vmem:[#allocation4 + $0x16c] sm:$0xf] %v1023_v28  ;;  %v917_v8 = vmax.f32 %v914_v62, %v916_v63 }
 0x153   : > { %v746_v36 = vmul.f32 %v10966_v35, %v694_v31  ;;  %1086 = vst [vmem:[#allocation4 + $0x14c] sm:$0xf] %v1070_v30 }
 0x154   : > { %1275 = vst [vmem:[#allocation4 + $0xf0] sm:$0xf] %v975_v24  ;;  %2603 = vmatpush.bf16.msrb.mxu2 %v9882_v27 }
 0x155   : > { %v780_v39 = vadd.f32 %v10972_v38, %v746_v36  ;;  %1276 = vst [vmem:[#allocation4 + $0x114] sm:$0xf] %v976_v25 }
 0x156   : > { %v7416_v41 = vld [vmem:[#allocation4 + $0x168] sm:$0xf]  ;;  %1087 = vst [vmem:[#allocation4 + $0x170] sm:$0xf] %v1071_v34 }
 0x157   : > { %v812_v43 = vmax.f32 %v780_v39, 0.0  ;;  %v9822_v44 = vld [vmem:[#allocation4 + $0x188] sm:$0xf0]  ;;  %1133 = vst [vmem:[#allocation4 + $0x12c] sm:$0xf] %v975_v24  ;;  %v2419_v0 = vpop.f32.mrf.mxu1 }
 0x158   : > { %v7417_v46 = vor.u32 %v9822_v44, %v7416_v41  ;;  %1134 = vst [vmem:[#allocation4 + $0x150] sm:$0xf] %v976_v25  ;;  %v7454_v39 = vld [vmem:[#allocation4 + $0x1d4] sm:$0xf0] }
 0x159   : > { %845 = vst.msk [vmem:[#allocation6 + $0xb8] sm:$0xff] %vm821_vm2, %v812_v43  ;;  %v9818_v48 = vld [vmem:[#allocation4 + $0x16c] sm:$0xf] }
 0x15a   : > { %2438 = vmatmul.bf16.gmra.mxu1 %v7417_v46  ;;  %v7421_v50 = vor.u32 %v9818_v48, %v7418_v40  ;;  %v9814_v52 = vld [vmem:[#allocation4 + $0x148] sm:$0xf0]  ;;  %v697_v53 = vpop.f32.mrf.mxu0  ;;  %1181 = vst [vmem:[#allocation4 + $0x130] sm:$0xf] %v1023_v28 }
 0x15b   : > { %v7389_v55 = vor.u32 %v9814_v52, %v7388_v51  ;;  %v7368_v56 = vld [vmem:[#allocation4 + $0xf0] sm:$0xf]  ;;  %v747_v57 = vmul.f32 %v10966_v35, %v697_v53  ;;  %1228 = vst [vmem:[#allocation4 + $0x110] sm:$0xf] %v1070_v30 }
 0x15c   : > { %2487 = vmatmul.bf16.gmra.mxu2 %v7421_v50  ;;  %v9807_v59 = vld [vmem:[#allocation4 + $0x110] sm:$0xf0]  ;;  %1229 = vst [vmem:[#allocation4 + $0x134] sm:$0xf] %v1071_v34 }
 0x15d   : > { %2531 = vmatmul.bf16.gmra.mxu3 %v7389_v55  ;;  %v7369_v60 = vor.u32 %v9807_v59, %v7368_v56  ;;  %v781_v61 = vadd.f32 %v10972_v38, %v747_v57  ;;  %1370 = vst [vmem:[#allocation4 + $0xd4] sm:$0xf] %v1354_v49  ;;  %v7424_v52 = vld [vmem:[#allocation4 + $0x170] sm:$0xf] }
 0x15e   : > { %1323 = vst [vmem:[#allocation4 + $0xf4] sm:$0xf] %v1307_v54  ;;  %v9873_v59 = vld [vmem:[%s14017_s3 + $0xe0] sm:$0xff] }
 0x15f   : > { %2722 = vmatmul.bf16.gmra.mxu0 %v7369_v60  ;;  %v813_v1 = vmax.f32 %v781_v61, 0.0  ;;  %v2468_v2 = vpop.f32.mrf.mxu2  ;;  %1371 = vst [vmem:[#allocation4 + $0xf8] sm:$0xf] %v1355_v58  ;;  %v2421_v41 = vpop.f32.mrf.mxu1  ;;  %v9881_v60 = vld [vmem:[%s14017_s3 + $0x120] sm:$0xff]  ;;  %2555 = vmatpush.bf16.msrb.mxu1 %v9873_v59 }
 0x160   : > { %v919_v3 = vld [vmem:[#allocation6 + $0xb0] ss:$2 sm:$0xff]  ;;  %v921_v4 = vld [vmem:[#allocation6 + $0xb1] ss:$2 sm:$0xff]  ;;  %v10978_v5 = vadd.f32 %v2468_v2, %v2419_v0  ;;  %v2512_v7 = vpop.f32.mrf.mxu3  ;;  %2604 = vmatpush.bf16.msrb.mxu2 %v9881_v60 }
 0x161   : > { %v922_v9 = vmax.f32 %v919_v3, %v921_v4  ;;  %846 = vst.msk [vmem:[#allocation6 + $0xc0] sm:$0xff] %vm821_vm2, %v813_v1  ;;  %v10982_v10 = vadd.f32 %v2512_v7, %v10949_v15 }
 0x162   : > { %v700_v11 = vpop.f32.mrf.mxu0 }
 0x163   : > { %v923_v12 = vmax.f32 %v917_v8, %v922_v9  ;;  %v748_v13 = vmul.f32 %v10966_v35, %v700_v11  ;;  %v9872_v8 = vld [vmem:[%s14017_s3 + $0xd8] sm:$0xff] }
 0x164   : > { %v9880_v9 = vld [vmem:[%s14017_s3 + $0x118] sm:$0xff]  ;;  %2556 = vmatpush.bf16.msrb.mxu1 %v9872_v8 }
 0x165   : > { %924 = vst.msk [vmem:[#allocation2 + $0x68] sm:$0xff] %vm821_vm2, %v923_v12  ;;  %v782_v14 = vadd.f32 %v10972_v38, %v748_v13  ;;  %2605 = vmatpush.bf16.msrb.mxu2 %v9880_v9  ;;  %v9888_v9 = vld [vmem:[%s14017_s3 + $0x158] sm:$0xff] }
 0x167   : > { %v814_v18 = vmax.f32 %v782_v14, 0.0  ;;  %v2470_v42 = vpop.f32.mrf.mxu2 }
 0x168   : > { %v2514_v46 = vpop.f32.mrf.mxu3  ;;  %v9891_v42 = vld [vmem:[%s14017_s3 + $0x170] sm:$0xff] }
 0x169   : > { %847 = vst.msk [vmem:[#allocation6 + $0xc8] sm:$0xff] %vm821_vm2, %v814_v18 }
 0x16a   : > { %v703_v15 = vpop.f32.mrf.mxu0 }
 0x16b   : > { %v749_v19 = vmul.f32 %v10966_v35, %v703_v15 }
 0x16c   : > { %v961_v20 = vld [vmem:[#allocation2 + $0x67] sm:$0xff]  ;;  %v962_v21 = vld [vmem:[#allocation2 + $0x6f] sm:$0xff] }
 0x16d   : > { %v1009_v22 = vld [vmem:[#allocation2 + $0x68] sm:$0xff]  ;;  %v783_v23 = vadd.f32 %v10972_v38, %v749_v19  ;;  %v977_v24 = vpack.c.bf16 %v961_v20, %v961_v20  ;;  %v978_v25 = vpack.c.bf16 %v962_v21, %v962_v21  ;;  %v9871_v21 = vld [vmem:[%s14017_s3 + $0xd0] sm:$0xff] }
 0x16e   : > { %v1056_v26 = vld [vmem:[#allocation2 + $0x61] sm:$0xff]  ;;  %v1025_v28 = vpack.c.bf16 %v1009_v22, %v1009_v22  ;;  %v1057_v32 = vld [vmem:[#allocation2 + $0x69] sm:$0xff]  ;;  %2557 = vmatpush.bf16.msrb.mxu1 %v9871_v21 }
 0x16f   : > { %v815_v29 = vmax.f32 %v783_v23, 0.0  ;;  %993 = vst [vmem:[#allocation4 + $0x1b0] sm:$0xf] %v977_v24  ;;  %v1072_v30 = vpack.c.bf16 %v1056_v26, %v1056_v26  ;;  %v1073_v34 = vpack.c.bf16 %v1057_v32, %v1057_v32  ;;  %v1340_v40 = vld [vmem:[#allocation2 + $0x61] sm:$0xff]  ;;  %v1341_v50 = vld [vmem:[#allocation2 + $0x69] sm:$0xff] }
 0x170   : > { %994 = vst [vmem:[#allocation4 + $0x1d4] sm:$0xf] %v978_v25  ;;  %v1293_v45 = vld [vmem:[#allocation2 + $0x68] sm:$0xff]  ;;  %v1356_v49 = vpack.c.bf16 %v1340_v40, %v1340_v40  ;;  %v1357_v62 = vpack.c.bf16 %v1341_v50, %v1341_v50  ;;  %v9879_v22 = vld [vmem:[%s14017_s3 + $0x110] sm:$0xff]  ;;  %v9869_v26 = vld [vmem:[%s14017_s3 + $0xc0] sm:$0xff] }
 0x171   : > { %848 = vst.msk [vmem:[#allocation6 + $0xd0] sm:$0xff] %vm821_vm2, %v815_v29  ;;  %v1309_v55 = vpack.c.bf16 %v1293_v45, %v1293_v45  ;;  %v926_v1 = vld [vmem:[#allocation6 + $0xc0] ss:$2 sm:$0xff]  ;;  %v928_v2 = vld [vmem:[#allocation6 + $0xc1] ss:$2 sm:$0xff]  ;;  %2606 = vmatpush.bf16.msrb.mxu2 %v9879_v22 }
 0x172   : > { %v706_v31 = vpop.f32.mrf.mxu0  ;;  %1041 = vst [vmem:[#allocation4 + $0x1b4] sm:$0xf] %v1025_v28  ;;  %v929_v16 = vmax.f32 %v926_v1, %v928_v2  ;;  %v9877_v29 = vld [vmem:[%s14017_s3 + $0x100] sm:$0xff] }
 0x173   : > { %v750_v36 = vmul.f32 %v10966_v35, %v706_v31  ;;  %1088 = vst [vmem:[#allocation4 + $0x194] sm:$0xf] %v1072_v30 }
 0x174   : > { %1277 = vst [vmem:[#allocation4 + $0x138] sm:$0xf] %v977_v24 }
 0x175   : > { %v784_v37 = vadd.f32 %v10972_v38, %v750_v36  ;;  %1278 = vst [vmem:[#allocation4 + $0x15c] sm:$0xf] %v978_v25 }
 0x176   : > { %v7452_v6 = vld [vmem:[#allocation4 + $0x1b0] sm:$0xf]  ;;  %1089 = vst [vmem:[#allocation4 + $0x1b8] sm:$0xf] %v1073_v34 }
 0x177   : > { %v816_v43 = vmax.f32 %v784_v37, 0.0  ;;  %v9831_v44 = vld [vmem:[#allocation4 + $0x1d0] sm:$0xf0]  ;;  %1135 = vst [vmem:[#allocation4 + $0x174] sm:$0xf] %v977_v24  ;;  %v2424_v3 = vpop.f32.mrf.mxu1  ;;  %v9878_v24 = vld [vmem:[%s14017_s3 + $0x108] sm:$0xff] }
 0x178   : > { %v7453_v47 = vor.u32 %v9831_v44, %v7452_v6  ;;  %1136 = vst [vmem:[#allocation4 + $0x198] sm:$0xf] %v978_v25  ;;  %2607 = vmatpush.bf16.msrb.mxu2 %v9878_v24  ;;  %v9886_v24 = vld [vmem:[%s14017_s3 + $0x148] sm:$0xff] }
 0x179   : > { %849 = vst.msk [vmem:[#allocation6 + $0xd8] sm:$0xff] %vm821_vm2, %v816_v43  ;;  %v9827_v48 = vld [vmem:[#allocation4 + $0x1b4] sm:$0xf] }
 0x17a   : > { %2443 = vmatmul.bf16.gmra.mxu1 %v7453_v47  ;;  %v7457_v51 = vor.u32 %v9827_v48, %v7454_v39  ;;  %v9823_v53 = vld [vmem:[#allocation4 + $0x190] sm:$0xf0]  ;;  %v709_v54 = vpop.f32.mrf.mxu0  ;;  %1183 = vst [vmem:[#allocation4 + $0x178] sm:$0xf] %v1025_v28  ;;  %v9892_v39 = vld [vmem:[%s14017_s3 + $0x178] sm:$0xff]  ;;  %v9890_v47 = vld [vmem:[%s14017_s3 + $0x168] sm:$0xff] }
 0x17b   : > { %v7425_v56 = vor.u32 %v9823_v53, %v7424_v52  ;;  %v7404_v57 = vld [vmem:[#allocation4 + $0x138] sm:$0xf]  ;;  %v751_v58 = vmul.f32 %v10966_v35, %v709_v54  ;;  %1230 = vst [vmem:[#allocation4 + $0x158] sm:$0xf] %v1072_v30  ;;  %2650 = vmatpush.bf16.msrb.mxu3 %v9892_v39 }
 0x17c   : > { %2492 = vmatmul.bf16.gmra.mxu2 %v7457_v51  ;;  %v9816_v61 = vld [vmem:[#allocation4 + $0x158] sm:$0xf0]  ;;  %1231 = vst [vmem:[#allocation4 + $0x17c] sm:$0xf] %v1073_v34 }
 0x17d   : > { %2536 = vmatmul.bf16.gmra.mxu3 %v7425_v56  ;;  %v7405_v63 = vor.u32 %v9816_v61, %v7404_v57  ;;  %v785_v0 = vadd.f32 %v10972_v38, %v751_v58  ;;  %1372 = vst [vmem:[#allocation4 + $0x11c] sm:$0xf] %v1356_v49  ;;  %2608 = vmatpush.bf16.msrb.mxu2 %v9877_v29  ;;  %v7490_v49 = vld [vmem:[#allocation4 + $0x21c] sm:$0xf0]  ;;  %v7460_v60 = vld [vmem:[#allocation4 + $0x1b8] sm:$0xf] }
 0x17e   : > { %1325 = vst [vmem:[#allocation4 + $0x13c] sm:$0xf] %v1309_v55  ;;  %v9779_v29 = vld [vmem:[#allocation4 + $0x30] sm:$0xf0] }
 0x17f   : > { %2727 = vmatmul.bf16.gmra.mxu0 %v7405_v63  ;;  %v817_v4 = vmax.f32 %v785_v0, 0.0  ;;  %v2473_v7 = vpop.f32.mrf.mxu2  ;;  %1373 = vst [vmem:[#allocation4 + $0x140] sm:$0xf] %v1357_v62  ;;  %2651 = vmatpush.bf16.msrb.mxu3 %v9891_v42  ;;  %v2426_v53 = vpop.f32.mrf.mxu1 }
 0x180   : > { %v931_v11 = vld [vmem:[#allocation6 + $0xd0] ss:$2 sm:$0xff]  ;;  %v933_v12 = vld [vmem:[#allocation6 + $0xd1] ss:$2 sm:$0xff]  ;;  %v11020_v13 = vadd.f32 %v2473_v7, %v2424_v3  ;;  %v2517_v14 = vpop.f32.mrf.mxu3  ;;  %v7254_v53 = vld [vmem:[#allocation4 + $0x34] sm:$0xf0] }
 0x181   : > { %v934_v17 = vmax.f32 %v931_v11, %v933_v12  ;;  %850 = vst.msk [vmem:[#allocation6 + $0xe0] sm:$0xff] %vm821_vm2, %v817_v4  ;;  %v11024_v18 = vadd.f32 %v2517_v14, %v10978_v5  ;;  %v9870_v5 = vld [vmem:[%s14017_s3 + $0xc8] sm:$0xff] }
 0x182   : > { %v712_v15 = vpop.f32.mrf.mxu0  ;;  %2558 = vmatpush.bf16.msrb.mxu1 %v9870_v5 }
 0x183   : > { %v935_v19 = vmax.f32 %v929_v16, %v934_v17  ;;  %v752_v20 = vmul.f32 %v10966_v35, %v712_v15  ;;  %2652 = vmatpush.bf16.msrb.mxu3 %v9890_v47 }
 0x185   : > { %936 = vst.msk [vmem:[#allocation2 + $0x78] sm:$0xff] %vm821_vm2, %v935_v19  ;;  %v786_v23 = vadd.f32 %v10972_v38, %v752_v20 }
 0x186   : > { %2559 = vmatpush.bf16.msrb.mxu1 %v9869_v26  ;;  %v7246_v26 = vld [vmem:[#allocation4 + $0x2c] sm:$0xf0] }
 0x187   : > { %v818_v25 = vmax.f32 %v786_v23, 0.0  ;;  %v2475_v54 = vpop.f32.mrf.mxu2  ;;  %v9887_v23 = vld [vmem:[%s14017_s3 + $0x150] sm:$0xff] }
 0x188   : > { %v2519_v57 = vpop.f32.mrf.mxu3  ;;  %v9792_v54 = vld [vmem:[#allocation4 + $0x9c] sm:$0xf] }
 0x189   : > { %851 = vst.msk [vmem:[#allocation6 + $0xe8] sm:$0xff] %vm821_vm2, %v818_v25  ;;  %v9774_v25 = vld [vmem:[#allocation4 + $0xc] sm:$0xf]  ;;  %v9797_v57 = vld [vmem:[#allocation4 + $0xc0] sm:$0xf0] }
 0x18a   : > { %v715_v28 = vpop.f32.mrf.mxu0 }
 0x18b   : > { %v753_v30 = vmul.f32 %v10966_v35, %v715_v28  ;;  %v7252_v28 = vld [vmem:[#allocation4 + $0x10] sm:$0xf] }
 0x18c   : > { %v963_v32 = vld [vmem:[#allocation2 + $0x77] sm:$0xff]  ;;  %v964_v27 = vld [vmem:[#allocation2 + $0x7f] sm:$0xff] }
 0x18d   : > { %v1011_v33 = vld [vmem:[#allocation2 + $0x78] sm:$0xff]  ;;  %v787_v31 = vadd.f32 %v10972_v38, %v753_v30  ;;  %v979_v34 = vpack.c.bf16 %v963_v32, %v963_v32  ;;  %v980_v36 = vpack.c.bf16 %v964_v27, %v964_v27  ;;  %v7249_v30 = vor.u32 %v9774_v25, %v7246_v26 }
 0x18e   : > { %v1058_v37 = vld [vmem:[#allocation2 + $0x71] sm:$0xff]  ;;  %v1027_v6 = vpack.c.bf16 %v1011_v33, %v1011_v33  ;;  %v1059_v43 = vld [vmem:[#allocation2 + $0x79] sm:$0xff]  ;;  %v7253_v32 = vor.u32 %v9779_v29, %v7252_v28 }
 0x18f   : > { %v819_v40 = vmax.f32 %v787_v31, 0.0  ;;  %995 = vst [vmem:[#allocation4 + $0x1f8] sm:$0xf] %v979_v34  ;;  %v1074_v41 = vpack.c.bf16 %v1058_v37, %v1058_v37  ;;  %v1075_v45 = vpack.c.bf16 %v1059_v43, %v1059_v43  ;;  %v1342_v51 = vld [vmem:[#allocation2 + $0x71] sm:$0xff]  ;;  %v7282_v37 = vld [vmem:[#allocation4 + $0x74] sm:$0xf0] }
 0x190   : > { %996 = vst [vmem:[#allocation4 + $0x21c] sm:$0xf] %v980_v36  ;;  %v1295_v52 = vld [vmem:[#allocation2 + $0x78] sm:$0xff]  ;;  %v1358_v61 = vpack.c.bf16 %v1342_v51, %v1342_v51  ;;  %v938_v62 = vld [vmem:[#allocation6 + $0xe0] ss:$2 sm:$0xff] }
 0x191   : > { %852 = vst.msk [vmem:[#allocation6 + $0xf0] sm:$0xff] %vm821_vm2, %v819_v40  ;;  %v1311_v1 = vpack.c.bf16 %v1295_v52, %v1295_v52  ;;  %v940_v2 = vld [vmem:[#allocation6 + $0xe1] ss:$2 sm:$0xff]  ;;  %v1204_v26 = vld [vmem:[#allocation2 + $0x91] sm:$0xff] }
 0x192   : > { %v718_v44 = vpop.f32.mrf.mxu0  ;;  %1043 = vst [vmem:[#allocation4 + $0x1fc] sm:$0xf] %v1027_v6  ;;  %v941_v12 = vmax.f32 %v938_v62, %v940_v2  ;;  %v7288_v43 = vld [vmem:[#allocation4 + $0x58] sm:$0xf]  ;;  %v7290_v2 = vld [vmem:[#allocation4 + $0x7c] sm:$0xf0]  ;;  %v1220_v29 = vpack.c.bf16 %v1204_v26, %v1204_v26 }
 0x193   : > { %v754_v46 = vmul.f32 %v10966_v35, %v718_v44  ;;  %1090 = vst [vmem:[#allocation4 + $0x1dc] sm:$0xf] %v1074_v41  ;;  %v9889_v35 = vld [vmem:[%s14017_s3 + $0x160] sm:$0xff]  ;;  %v9788_v44 = vld [vmem:[#allocation4 + $0x78] sm:$0xf0] }
 0x194   : > { %1279 = vst [vmem:[#allocation4 + $0x180] sm:$0xf] %v979_v34  ;;  %2653 = vmatpush.bf16.msrb.mxu3 %v9889_v35  ;;  %v7289_v47 = vor.u32 %v9788_v44, %v7288_v43  ;;  %v7324_v35 = vld [vmem:[#allocation4 + $0xa0] sm:$0xf]  ;;  %v9914_v44 = vld [vmem:[%s14017_s3 + $0x228] sm:$0xff] }
 0x195   : > { %v788_v48 = vadd.f32 %v10972_v38, %v754_v46  ;;  %1280 = vst [vmem:[#allocation4 + $0x1a4] sm:$0xf] %v980_v36  ;;  %v1343_v38 = vld [vmem:[#allocation2 + $0x79] sm:$0xff]  ;;  %v9820_v26 = vld [vmem:[#allocation4 + $0x17c] sm:$0xf] }
 0x196   : > { %v7488_v50 = vld [vmem:[#allocation4 + $0x1f8] sm:$0xf]  ;;  %1091 = vst [vmem:[#allocation4 + $0x200] sm:$0xf] %v1075_v45  ;;  %v1359_v7 = vpack.c.bf16 %v1343_v38, %v1343_v38 }
 0x197   : > { %v820_v55 = vmax.f32 %v788_v48, 0.0  ;;  %v9840_v56 = vld [vmem:[#allocation4 + $0x218] sm:$0xf0]  ;;  %1137 = vst [vmem:[#allocation4 + $0x1bc] sm:$0xf] %v979_v34  ;;  %v2429_v14 = vpop.f32.mrf.mxu1 }
 0x198   : > { %v7489_v58 = vor.u32 %v9840_v56, %v7488_v50  ;;  %1138 = vst [vmem:[#allocation4 + $0x1e0] sm:$0xf] %v980_v36  ;;  %2654 = vmatpush.bf16.msrb.mxu3 %v9888_v9  ;;  %v9783_v36 = vld [vmem:[#allocation4 + $0x54] sm:$0xf] }
 0x199   : > { %853 = vst.msk [vmem:[#allocation6 + $0xf8] sm:$0xff] %vm821_vm2, %v820_v55  ;;  %v9836_v59 = vld [vmem:[#allocation4 + $0x1fc] sm:$0xf]  ;;  %v7285_v46 = vor.u32 %v9783_v36, %v7282_v37  ;;  %v7318_v55 = vld [vmem:[#allocation4 + $0xbc] sm:$0xf0] }
 0x19a   : > { %2448 = vmatmul.bf16.gmra.mxu1 %v7489_v58  ;;  %v7493_v63 = vor.u32 %v9836_v59, %v7490_v49  ;;  %v9832_v0 = vld [vmem:[#allocation4 + $0x1d8] sm:$0xf0]  ;;  %1185 = vst [vmem:[#allocation4 + $0x1c0] sm:$0xf] %v1027_v6  ;;  %v9775_v56 = vld [vmem:[#allocation4 + $0x14] sm:$0xf]  ;;  %v7321_v38 = vor.u32 %v9792_v54, %v7318_v55  ;;  %v7325_v59 = vor.u32 %v9797_v57, %v7324_v35 }
 0x19b   : > { %v7461_v3 = vor.u32 %v9832_v0, %v7460_v60  ;;  %v7440_v4 = vld [vmem:[#allocation4 + $0x180] sm:$0xf]  ;;  %1232 = vst [vmem:[#allocation4 + $0x1a0] sm:$0xf] %v1074_v41  ;;  %v7257_v58 = vor.u32 %v9775_v56, %v7254_v53  ;;  %v9916_v60 = vld [vmem:[%s14017_s3 + $0x238] sm:$0xff] }
 0x19c   : > { %2497 = vmatmul.bf16.gmra.mxu2 %v7493_v63  ;;  %v9825_v8 = vld [vmem:[#allocation4 + $0x1a0] sm:$0xf0]  ;;  %1233 = vst [vmem:[#allocation4 + $0x1c4] sm:$0xf] %v1075_v45  ;;  %2655 = vmatpush.bf16.msrb.mxu3 %v9887_v23  ;;  %v9810_v36 = vld [vmem:[#allocation4 + $0x12c] sm:$0xf] }
 0x19d   : > { %2541 = vmatmul.bf16.gmra.mxu3 %v7461_v3  ;;  %v7441_v11 = vor.u32 %v9825_v8, %v7440_v4  ;;  %1374 = vst [vmem:[#allocation4 + $0x164] sm:$0xf] %v1358_v61  ;;  %v7496_v39 = vld [vmem:[#allocation4 + $0x200] sm:$0xf]  ;;  %v9908_v61 = vld [vmem:[%s14017_s3 + $0x1f8] sm:$0xff]  ;;  %2797 = vmatpush.bf16.msra.mxu2 %v9916_v60 }
 0x19e   : > { %1327 = vst [vmem:[#allocation4 + $0x184] sm:$0xf] %v1311_v1  ;;  %2748 = vmatpush.bf16.msra.mxu1 %v9908_v61  ;;  %v9801_v3 = vld [vmem:[#allocation4 + $0xe4] sm:$0xf]  ;;  %v7354_v4 = vld [vmem:[#allocation4 + $0x104] sm:$0xf0] }
 0x19f   : > { %2732 = vmatmul.bf16.gmra.mxu0 %v7441_v11  ;;  %v2478_v16 = vpop.f32.mrf.mxu2  ;;  %1375 = vst [vmem:[#allocation4 + $0x188] sm:$0xf] %v1359_v7  ;;  %v2431_v40 = vpop.f32.mrf.mxu1  ;;  %v9784_v7 = vld [vmem:[#allocation4 + $0x5c] sm:$0xf]  ;;  %v7390_v37 = vld [vmem:[#allocation4 + $0x14c] sm:$0xf0] }
 0x1a0   : > { %v943_v17 = vld [vmem:[#allocation6 + $0xf0] ss:$2 sm:$0xff]  ;;  %v945_v15 = vld [vmem:[#allocation6 + $0xf1] ss:$2 sm:$0xff]  ;;  %v2479_v19 = vadd.f32 %v2478_v16, %v2429_v14  ;;  %v2522_v20 = vpop.f32.mrf.mxu3  ;;  %2656 = vmatpush.bf16.msrb.mxu3 %v9886_v24  ;;  %v7293_v16 = vor.u32 %v9784_v7, %v7290_v2  ;;  %1236 = vst [vmem:[#allocation4 + $0x230] sm:$0xf] %v1220_v29 }
 0x1a1   : > { %v946_v21 = vmax.f32 %v943_v17, %v945_v15  ;;  %v11070_v22 = vadd.f32 %v2522_v20, %v11020_v13  ;;  %v9885_v13 = vld [vmem:[%s14017_s3 + $0x140] sm:$0xff]  ;;  %v9806_v14 = vld [vmem:[#allocation4 + $0x108] sm:$0xf0]  ;;  %1378 = vst [vmem:[#allocation4 + $0x1f4] sm:$0xf] %v1220_v29 }
 0x1a2   : > { %v9815_v40 = vld [vmem:[#allocation4 + $0x150] sm:$0xf0]  ;;  %v7432_v53 = vld [vmem:[#allocation4 + $0x178] sm:$0xf]  ;;  %v9824_v54 = vld [vmem:[#allocation4 + $0x198] sm:$0xf0] }
 0x1a3   : > { %v947_v5 = vmax.f32 %v941_v12, %v946_v21  ;;  %v7360_v12 = vld [vmem:[#allocation4 + $0xe8] sm:$0xf]  ;;  %v7433_v57 = vor.u32 %v9824_v54, %v7432_v53  ;;  %v7398_v2 = vld [vmem:[#allocation4 + $0x154] sm:$0xf0]  ;;  %v9828_v7 = vld [vmem:[#allocation4 + $0x1bc] sm:$0xf] }
 0x1a4   : > { %2657 = vmatpush.bf16.msrb.mxu3 %v9885_v13  ;;  %v7361_v21 = vor.u32 %v9806_v14, %v7360_v12  ;;  %v9912_v60 = vld [vmem:[%s14017_s3 + $0x218] sm:$0xff]  ;;  %v7468_v12 = vld [vmem:[#allocation4 + $0x1c0] sm:$0xf]  ;;  %v9833_v14 = vld [vmem:[#allocation4 + $0x1e0] sm:$0xf0] }
 0x1a5   : > { %948 = vst.msk [vmem:[#allocation2 + $0x88] sm:$0xff] %vm821_vm2, %v947_v5  ;;  %v9915_v5 = vld [vmem:[%s14017_s3 + $0x230] sm:$0xff] }
 0x1a6   : > { %2798 = vmatpush.bf16.msra.mxu2 %v9915_v5  ;;  %v7434_v5 = vld [vmem:[#allocation4 + $0x19c] sm:$0xf0]  ;;  %v9781_v53 = vld [vmem:[#allocation4 + $0x40] sm:$0xf0] }
 0x1a7   : > { %v2480_v41 = vpop.f32.mrf.mxu2 }
 0x1a8   : > { %v2524_v45 = vpop.f32.mrf.mxu3 }
 0x1a9   : > { %v9906_v45 = vld [vmem:[%s14017_s3 + $0x1e8] sm:$0xff] }
 0x1aa   : > { %2560 = vmatmul.bf16.vlgmr.msrb.gmra.mxu1 %v7249_v30  ;;  %2799 = vmatpush.bf16.msra.mxu2 %v9914_v44 }
 0x1ac   : > { %2609 = vmatmul.bf16.vlgmr.msrb.gmra.mxu2 %v7253_v32  ;;  %v1060_v27 = vld [vmem:[#allocation2 + $0x81] sm:$0xff]  ;;  %v1250_v63 = vld [vmem:[#allocation2 + $0x8f] sm:$0xff] }
 0x1ad   : > { %v1344_v33 = vld [vmem:[#allocation2 + $0x81] sm:$0xff]  ;;  %v1076_v31 = vpack.c.bf16 %v1060_v27, %v1060_v27  ;;  %v1266_v1 = vpack.c.bf16 %v1250_v63, %v1250_v63  ;;  %v1203_v25 = vld [vmem:[#allocation2 + $0x89] sm:$0xff] }
 0x1ae   : > { %v1360_v34 = vpack.c.bf16 %v1344_v33, %v1344_v33  ;;  %v1249_v62 = vld [vmem:[#allocation2 + $0x87] sm:$0xff]  ;;  %v1219_v28 = vpack.c.bf16 %v1203_v25, %v1203_v25 }
 0x1af   : > { %1092 = vst [vmem:[#allocation4 + $0x224] sm:$0xf] %v1076_v31  ;;  %v1265_v0 = vpack.c.bf16 %v1249_v62, %v1249_v62  ;;  %v1155_v23 = vld [vmem:[#allocation2 + $0x88] sm:$0xff] }
 0x1b0   : > { %1234 = vst [vmem:[#allocation4 + $0x1e8] sm:$0xf] %v1076_v31  ;;  %v1171_v24 = vpack.c.bf16 %v1155_v23, %v1155_v23  ;;  %v9907_v31 = vld [vmem:[%s14017_s3 + $0x1f0] sm:$0xff] }
 0x1b1   : > { %1376 = vst [vmem:[#allocation4 + $0x1ac] sm:$0xf] %v1360_v34  ;;  %2749 = vmatpush.bf16.msra.mxu1 %v9907_v31  ;;  %v7326_v34 = vld [vmem:[#allocation4 + $0xc4] sm:$0xf0] }
 0x1b2   : > { %1281 = vst [vmem:[#allocation4 + $0x1c8] sm:$0xf] %v1265_v0 }
 0x1b3   : > { %1282 = vst [vmem:[#allocation4 + $0x1ec] sm:$0xf] %v1266_v1 }
 0x1b4   : > { %1139 = vst [vmem:[#allocation4 + $0x204] sm:$0xf] %v1265_v0 }
 0x1b5   : > { %1140 = vst [vmem:[#allocation4 + $0x228] sm:$0xf] %v1266_v1  ;;  %2750 = vmatpush.bf16.msra.mxu1 %v9906_v45 }
 0x1b6   : > { %v9841_v6 = vld [vmem:[#allocation4 + $0x220] sm:$0xf0]  ;;  %1187 = vst [vmem:[#allocation4 + $0x208] sm:$0xf] %v1171_v24 }
 0x1b7   : > { %v7497_v42 = vor.u32 %v9841_v6, %v7496_v39  ;;  %v2434_v48 = vpop.f32.mrf.mxu1  ;;  %1329 = vst [vmem:[#allocation4 + $0x1cc] sm:$0xf] %v1171_v24  ;;  %v9793_v39 = vld [vmem:[#allocation4 + $0xa4] sm:$0xf]  ;;  %v7396_v6 = vld [vmem:[#allocation4 + $0x130] sm:$0xf] }
 0x1b8   : > { %1235 = vst [vmem:[#allocation4 + $0x20c] sm:$0xf] %v1219_v28  ;;  %v7329_v41 = vor.u32 %v9793_v39, %v7326_v34  ;;  %v7397_v43 = vor.u32 %v9815_v40, %v7396_v6  ;;  %v1251_v40 = vld [vmem:[#allocation2 + $0x97] sm:$0xff] }
 0x1b9   : > { %2546 = vmatmul.bf16.gmra.mxu3 %v7497_v42  ;;  %v7476_v8 = vld [vmem:[#allocation4 + $0x1c8] sm:$0xf]  ;;  %1377 = vst [vmem:[#allocation4 + $0x1d0] sm:$0xf] %v1219_v28  ;;  %v7393_v42 = vor.u32 %v9810_v36, %v7390_v37 }
 0x1ba   : > { %2565 = vmatmul.bf16.gmra.mxu1 %v7285_v46  ;;  %v9834_v17 = vld [vmem:[#allocation4 + $0x1e8] sm:$0xf0]  ;;  %v7362_v46 = vld [vmem:[#allocation4 + $0x10c] sm:$0xf0]  ;;  %v7470_v45 = vld [vmem:[#allocation4 + $0x1e4] sm:$0xf0] }
 0x1bb   : > { %v7477_v20 = vor.u32 %v9834_v17, %v7476_v8  ;;  %v7462_v8 = vld [vmem:[#allocation4 + $0x1dc] sm:$0xf0]  ;;  %v9902_v17 = vld [vmem:[%s14017_s3 + $0x1c8] sm:$0xff]  ;;  %v9837_v24 = vld [vmem:[#allocation4 + $0x204] sm:$0xf] }
 0x1bc   : > { %2614 = vmatmul.bf16.gmra.mxu2 %v7289_v47  ;;  %v9819_v47 = vld [vmem:[#allocation4 + $0x174] sm:$0xf]  ;;  %v7498_v25 = vld [vmem:[#allocation4 + $0x224] sm:$0xf0] }
 0x1bd   : > { %2737 = vmatmul.bf16.gmra.mxu0 %v7477_v20  ;;  %v9909_v20 = vld [vmem:[%s14017_s3 + $0x200] sm:$0xff]  ;;  %v7501_v31 = vor.u32 %v9837_v24, %v7498_v25 }
 0x1be   : > { %v9799_v25 = vld [vmem:[#allocation4 + $0xd0] sm:$0xf0] }
 0x1bf   : > { %v2483_v49 = vpop.f32.mrf.mxu2  ;;  %v2436_v9 = vpop.f32.mrf.mxu1 }
 0x1c0   : > { %v2484_v50 = vadd.f32 %v2483_v49, %v2434_v48  ;;  %v2527_v51 = vpop.f32.mrf.mxu3  ;;  %v7426_v48 = vld [vmem:[#allocation4 + $0x194] sm:$0xf0]  ;;  %v9802_v49 = vld [vmem:[#allocation4 + $0xec] sm:$0xf]  ;;  %v9811_v9 = vld [vmem:[#allocation4 + $0x134] sm:$0xf] }
 0x1c1   : > { %v11082_v52 = vadd.f32 %v2527_v51, %v2479_v19  ;;  %v7357_v19 = vor.u32 %v9801_v3, %v7354_v4  ;;  %v7365_v55 = vor.u32 %v9802_v49, %v7362_v46  ;;  %v7429_v35 = vor.u32 %v9819_v47, %v7426_v48  ;;  %v9903_v3 = vld [vmem:[%s14017_s3 + $0x1d0] sm:$0xff]  ;;  %v9776_v46 = vld [vmem:[#allocation4 + $0x1c] sm:$0xf] }
 0x1c2   : > { %v9911_v4 = vld [vmem:[%s14017_s3 + $0x210] sm:$0xff] }
 0x1c3   : > { %v7262_v47 = vld [vmem:[#allocation4 + $0x3c] sm:$0xf0]  ;;  %v9829_v48 = vld [vmem:[#allocation4 + $0x1c4] sm:$0xf] }
 0x1c7   : > { %v2485_v11 = vpop.f32.mrf.mxu2 }
 0x1c8   : > { %v2529_v15 = vpop.f32.mrf.mxu3  ;;  %v9910_v11 = vld [vmem:[%s14017_s3 + $0x208] sm:$0xff] }
 0x1c9   : > { %2658 = vmatmul.bf16.vlgmr.msrb.gmra.mxu3 %v7257_v58  ;;  %v9905_v58 = vld [vmem:[%s14017_s3 + $0x1e0] sm:$0xff]  ;;  %v7465_v15 = vor.u32 %v9828_v7, %v7462_v8  ;;  %v9790_v8 = vld [vmem:[#allocation4 + $0x88] sm:$0xf0] }
 0x1ca   : > { %2570 = vmatmul.bf16.gmra.mxu1 %v7321_v38  ;;  %v9913_v38 = vld [vmem:[%s14017_s3 + $0x220] sm:$0xff] }
 0x1cb   : > { %2751 = vmatpush.bf16.msra.mxu1 %v9905_v58  ;;  %2800 = vmatpush.bf16.msra.mxu2 %v9913_v38 }
 0x1cc   : > { %2619 = vmatmul.bf16.gmra.mxu2 %v7325_v59  ;;  %v9904_v59 = vld [vmem:[%s14017_s3 + $0x1d8] sm:$0xff] }
 0x1cf   : > { %2752 = vmatpush.bf16.msra.mxu1 %v9904_v59  ;;  %2801 = vmatpush.bf16.msra.mxu2 %v9912_v60 }
 0x1d3   : > { %2753 = vmatpush.bf16.msra.mxu1 %v9903_v3  ;;  %2802 = vmatpush.bf16.msra.mxu2 %v9911_v4  ;;  %v7298_v3 = vld [vmem:[#allocation4 + $0x84] sm:$0xf0] }
 0x1d7   : > { %v2439_v30 = vpop.f32.mrf.mxu1  ;;  %2803 = vmatpush.bf16.msra.mxu2 %v9910_v11  ;;  %2754 = vmatpush.bf16.msra.mxu1 %v9902_v17 }
 0x1d9   : > { %2663 = vmatmul.bf16.gmra.mxu3 %v7293_v16  ;;  %v7401_v16 = vor.u32 %v9811_v9, %v7398_v2  ;;  %v9785_v2 = vld [vmem:[#allocation4 + $0x64] sm:$0xf] }
 0x1da   : > { %2575 = vmatmul.bf16.gmra.mxu1 %v7357_v19  ;;  %v7469_v19 = vor.u32 %v9833_v14, %v7468_v12  ;;  %v7301_v11 = vor.u32 %v9785_v2, %v7298_v3  ;;  %v7304_v12 = vld [vmem:[#allocation4 + $0x68] sm:$0xf]  ;;  %v1348_v2 = vld [vmem:[#allocation2 + $0xa1] sm:$0xff] }
 0x1db   : > { %2804 = vmatpush.bf16.msra.mxu2 %v9909_v20  ;;  %v7305_v14 = vor.u32 %v9790_v8, %v7304_v12  ;;  %v7478_v12 = vld [vmem:[#allocation4 + $0x1ec] sm:$0xf0] }
 0x1dc   : > { %2624 = vmatmul.bf16.gmra.mxu2 %v7361_v21  ;;  %v9901_v21 = vld [vmem:[%s14017_s3 + $0x1c0] sm:$0xff] }
 0x1dd   : > { %2755 = vmatpush.bf16.msra.mxu1 %v9901_v21  ;;  %v9794_v21 = vld [vmem:[#allocation4 + $0xac] sm:$0xf] }
 0x1df   : > { %v2488_v13 = vpop.f32.mrf.mxu2 }
 0x1e0   : > { %v2489_v32 = vadd.f32 %v2488_v13, %v2439_v30  ;;  %v2532_v27 = vpop.f32.mrf.mxu3  ;;  %v7504_v30 = vld [vmem:[#allocation4 + $0x208] sm:$0xf]  ;;  %v9842_v13 = vld [vmem:[#allocation4 + $0x228] sm:$0xf0] }
 0x1e1   : > { %v11093_v33 = vadd.f32 %v2532_v27, %v2484_v50  ;;  %v2441_v50 = vpop.f32.mrf.mxu1  ;;  %v7505_v34 = vor.u32 %v9842_v13, %v7504_v30 }
 0x1e7   : > { %v2490_v51 = vpop.f32.mrf.mxu2 }
 0x1e8   : > { %v2534_v56 = vpop.f32.mrf.mxu3  ;;  %v7473_v51 = vor.u32 %v9829_v48, %v7470_v45  ;;  %v9812_v45 = vld [vmem:[#allocation4 + $0x13c] sm:$0xf] }
 0x1e9   : > { %2668 = vmatmul.bf16.gmra.mxu3 %v7329_v41  ;;  %v1252_v41 = vld [vmem:[#allocation2 + $0x9f] sm:$0xff]  ;;  %v7268_v56 = vld [vmem:[#allocation4 + $0x20] sm:$0xf] }
 0x1ea   : > { %2580 = vmatmul.bf16.gmra.mxu1 %v7393_v42  ;;  %v1268_v44 = vpack.c.bf16 %v1252_v41, %v1252_v41 }
 0x1ec   : > { %2629 = vmatmul.bf16.gmra.mxu2 %v7397_v43  ;;  %v1267_v43 = vpack.c.bf16 %v1251_v40, %v1251_v40  ;;  %1284 = vst [vmem:[#allocation4 + $0x234] sm:$0xf] %v1268_v44  ;;  %v7376_v40 = vld [vmem:[#allocation4 + $0xf8] sm:$0xf] }
 0x1ee   : > { %1283 = vst [vmem:[#allocation4 + $0x210] sm:$0xf] %v1267_v43 }
 0x1f3   : > { %v9843_v58 = vld [vmem:[#allocation4 + $0x230] sm:$0xf0] }
 0x1f7   : > { %v2444_v61 = vpop.f32.mrf.mxu1 }
 0x1f9   : > { %2673 = vmatmul.bf16.gmra.mxu3 %v7365_v55  ;;  %v7265_v55 = vor.u32 %v9776_v46, %v7262_v47  ;;  %v7406_v46 = vld [vmem:[#allocation4 + $0x15c] sm:$0xf0] }
 0x1fa   : > { %2585 = vmatmul.bf16.gmra.mxu1 %v7429_v35  ;;  %v7269_v35 = vor.u32 %v9781_v53, %v7268_v56  ;;  %v7412_v53 = vld [vmem:[#allocation4 + $0x140] sm:$0xf] }
 0x1fc   : > { %2634 = vmatmul.bf16.gmra.mxu2 %v7433_v57  ;;  %v7512_v57 = vld [vmem:[#allocation4 + $0x210] sm:$0xf] }
 0x1fd   : > { %v7513_v38 = vor.u32 %v9843_v58, %v7512_v57  ;;  %v7442_v57 = vld [vmem:[#allocation4 + $0x1a4] sm:$0xf0] }
 0x1ff   : > { %v2493_v62 = vpop.f32.mrf.mxu2  ;;  %v2446_v23 = vpop.f32.mrf.mxu1  ;;  %2742 = vmatmul.bf16.gmra.mxu0 %v7513_v38 }
 0x200   : > { %v2494_v63 = vadd.f32 %v2493_v62, %v2444_v61  ;;  %v2537_v0 = vpop.f32.mrf.mxu3  ;;  %v7334_v23 = vld [vmem:[#allocation4 + $0xcc] sm:$0xf0] }
 0x201   : > { %v11116_v1 = vadd.f32 %v2537_v0, %v2489_v32  ;;  %v7437_v32 = vor.u32 %v9820_v26, %v7434_v5  ;;  %v7506_v0 = vld [vmem:[#allocation4 + $0x22c] sm:$0xf0]  ;;  %v7337_v26 = vor.u32 %v9794_v21, %v7334_v23 }
 0x207   : > { %v2495_v28 = vpop.f32.mrf.mxu2 }
 0x208   : > { %v2539_v27 = vpop.f32.mrf.mxu3  ;;  %v7340_v28 = vld [vmem:[#allocation4 + $0xb0] sm:$0xf] }
 0x209   : > { %2678 = vmatmul.bf16.gmra.mxu3 %v7401_v16  ;;  %v9803_v27 = vld [vmem:[#allocation4 + $0xf4] sm:$0xf] }
 0x20a   : > { %2590 = vmatmul.bf16.gmra.mxu1 %v7465_v15 }
 0x20c   : > { %2639 = vmatmul.bf16.gmra.mxu2 %v7469_v19 }
 0x217   : > { %v2449_v29 = vpop.f32.mrf.mxu1 }
 0x219   : > { %2683 = vmatmul.bf16.gmra.mxu3 %v7437_v32 }
 0x21a   : > { %2595 = vmatmul.bf16.gmra.mxu1 %v7501_v31  ;;  %v7370_v31 = vld [vmem:[#allocation4 + $0x114] sm:$0xf0] }
 0x21c   : > { %2644 = vmatmul.bf16.gmra.mxu2 %v7505_v34 }
 0x21f   : > { %v2498_v36 = vpop.f32.mrf.mxu2  ;;  %v2451_v37 = vpop.f32.mrf.mxu1 }
 0x220   : > { %v2499_v39 = vadd.f32 %v2498_v36, %v2449_v29  ;;  %v2542_v6 = vpop.f32.mrf.mxu3  ;;  %v7341_v29 = vor.u32 %v9799_v25, %v7340_v28  ;;  %v9808_v37 = vld [vmem:[#allocation4 + $0x118] sm:$0xf0]  ;;  %v9839_v28 = vld [vmem:[#allocation4 + $0x214] sm:$0xf] }
 0x221   : > { %v11136_v42 = vadd.f32 %v2542_v6, %v2494_v63  ;;  %v9838_v63 = vld [vmem:[#allocation4 + $0x20c] sm:$0xf]  ;;  %v7373_v6 = vor.u32 %v9803_v27, %v7370_v31 }
 0x222   : > { %v7509_v7 = vor.u32 %v9838_v63, %v7506_v0  ;;  %v7448_v63 = vld [vmem:[#allocation4 + $0x188] sm:$0xf] }
 0x223   : > { %v1347_v0 = vld [vmem:[#allocation2 + $0x99] sm:$0xff] }
 0x224   : > { %v1363_v3 = vpack.c.bf16 %v1347_v0, %v1347_v0 }
 0x226   : > { %1379 = vst [vmem:[#allocation4 + $0x218] sm:$0xf] %v1363_v3  ;;  %v9940_v3 = vld [vmem:[%s14019_s5 + $0x28] sm:$0xff] }
 0x227   : > { %v2500_v49 = vpop.f32.mrf.mxu2  ;;  %v2561_v50 = vpop.f32.mrf.mxu1 }
 0x228   : > { %v2562_v54 = vadd.f32 %v2561_v50, %v10982_v10  ;;  %v2544_v62 = vpop.f32.mrf.mxu3  ;;  %v9817_v49 = vld [vmem:[#allocation4 + $0x160] sm:$0xf0] }
 0x229   : > { %2688 = vmatmul.bf16.gmra.mxu3 %v7473_v51  ;;  %v7409_v51 = vor.u32 %v9812_v45, %v7406_v46 }
 0x22a   : > { %2756 = vmatmul.bf16.vlgmr.msra.gmra.mxu1 %v7265_v55 }
 0x22c   : > { %2805 = vmatmul.bf16.vlgmr.msra.gmra.mxu2 %v7269_v35  ;;  %v9821_v35 = vld [vmem:[#allocation4 + $0x184] sm:$0xf] }
 0x22d   : > { %v7445_v62 = vor.u32 %v9821_v35, %v7442_v57 }
 0x22f   : > { %v2610_v59 = vpop.f32.mrf.mxu2  ;;  %v2563_v60 = vpop.f32.mrf.mxu1 }
 0x230   : > { %v11139_v61 = vadd.f32 %v2610_v59, %v2562_v54  ;;  %v9826_v59 = vld [vmem:[#allocation4 + $0x1a8] sm:$0xf0] }
 0x237   : > { %v2612_v10 = vpop.f32.mrf.mxu2  ;;  %v2566_v4 = vpop.f32.mrf.mxu1 }
 0x238   : > { %v2567_v9 = vadd.f32 %v2566_v4, %v11024_v18  ;;  %v1364_v10 = vpack.c.bf16 %v1348_v2, %v1348_v2 }
 0x239   : > { %2693 = vmatmul.bf16.gmra.mxu3 %v7509_v7 }
 0x23a   : > { %2761 = vmatmul.bf16.gmra.mxu1 %v7301_v11  ;;  %1380 = vst [vmem:[#allocation4 + $0x23c] sm:$0xf] %v1364_v10  ;;  %v9830_v11 = vld [vmem:[#allocation4 + $0x1cc] sm:$0xf] }
 0x23b   : > { %v7481_v23 = vor.u32 %v9830_v11, %v7478_v12  ;;  %v9939_v11 = vld [vmem:[%s14019_s5 + $0x20] sm:$0xff] }
 0x23c   : > { %2810 = vmatmul.bf16.gmra.mxu2 %v7305_v14  ;;  %v2547_v16 = vpop.f32.mrf.mxu3 }
 0x23d   : > { %v11142_v17 = vadd.f32 %v2547_v16, %v2499_v39 }
 0x23f   : > { %v2615_v15 = vpop.f32.mrf.mxu2  ;;  %v2568_v19 = vpop.f32.mrf.mxu1 }
 0x240   : > { %v11144_v20 = vadd.f32 %v2615_v15, %v2567_v9  ;;  %v7484_v15 = vld [vmem:[#allocation4 + $0x1d0] sm:$0xf]  ;;  %v9835_v19 = vld [vmem:[#allocation4 + $0x1f0] sm:$0xf0] }
 0x241   : > { %v9844_v27 = vld [vmem:[#allocation4 + $0x238] sm:$0xf0] }
 0x244   : > { %v2549_v4 = vpop.f32.mrf.mxu3 }
 0x247   : > { %v2617_v5 = vpop.f32.mrf.mxu2  ;;  %v2571_v24 = vpop.f32.mrf.mxu1 }
 0x248   : > { %v2572_v18 = vadd.f32 %v2571_v24, %v11070_v22  ;;  %v7377_v22 = vor.u32 %v9808_v37, %v7376_v40  ;;  %v7485_v5 = vor.u32 %v9835_v19, %v7484_v15 }
 0x24a   : > { %2766 = vmatmul.bf16.gmra.mxu1 %v7337_v26 }
 0x24c   : > { %2815 = vmatmul.bf16.gmra.mxu2 %v7341_v29  ;;  %v2659_v14 = vpop.f32.mrf.mxu3  ;;  %v7514_v29 = vld [vmem:[#allocation4 + $0x234] sm:$0xf0] }
 0x24d   : > { %v7517_v31 = vor.u32 %v9839_v28, %v7514_v29 }
 0x24f   : > { %v2620_v30 = vpop.f32.mrf.mxu2  ;;  %v2573_v13 = vpop.f32.mrf.mxu1 }
 0x250   : > { %v11147_v32 = vadd.f32 %v2620_v30, %v2572_v18  ;;  %v2708_v30 = vpop.f32.mrf.mxu0  ;;  %v7520_v13 = vld [vmem:[#allocation4 + $0x218] sm:$0xf] }
 0x254   : > { %v2661_v18 = vpop.f32.mrf.mxu3 }
 0x255   : > { %v10455_v18 = vld [vmem:[#allocation2] sm:$0xff] }
 0x256   : > { %v2979_v28 = vpack.c.bf16 %v10455_v18, %v10455_v18 }
 0x257   : > { %v2622_v34 = vpop.f32.mrf.mxu2  ;;  %v2576_v36 = vpop.f32.mrf.mxu1 }
 0x258   : > { %v2577_v39 = vadd.f32 %v2576_v36, %v11082_v52  ;;  %v7413_v52 = vor.u32 %v9817_v49, %v7412_v53  ;;  %2983 = vst [vmem:[#allocation5 + $0x4] sm:$0xf] %v2979_v28 }
 0x259   : > { %3058 = vst [vmem:[#allocation5 + $0x88] sm:$0xf] %v2979_v28  ;;  %v9968_v28 = vld [vmem:[%s14019_s5 + $0x108] sm:$0xff] }
 0x25a   : > { %2771 = vmatmul.bf16.gmra.mxu1 %v7373_v6  ;;  %v2710_v6 = vpop.f32.mrf.mxu0 }
 0x25c   : > { %2820 = vmatmul.bf16.gmra.mxu2 %v7377_v22 }
 0x25f   : > { %v2625_v41 = vpop.f32.mrf.mxu2  ;;  %v2578_v43 = vpop.f32.mrf.mxu1 }
 0x260   : > { %v11150_v44 = vadd.f32 %v2625_v41, %v2577_v39  ;;  %v2664_v39 = vpop.f32.mrf.mxu3 }
 0x267   : > { %v2627_v47 = vpop.f32.mrf.mxu2  ;;  %v2581_v48 = vpop.f32.mrf.mxu1 }
 0x268   : > { %v2582_v50 = vadd.f32 %v2581_v48, %v11093_v33  ;;  %v7449_v33 = vor.u32 %v9826_v59, %v7448_v63  ;;  %v2666_v43 = vpop.f32.mrf.mxu3  ;;  %v2713_v47 = vpop.f32.mrf.mxu0  ;;  %v2660_v48 = vadd.f32 %v2659_v14, %v11139_v61  ;;  %v9941_v59 = vld [vmem:[%s14019_s5 + $0x30] sm:$0xff]  ;;  %v2665_v63 = vadd.f32 %v2664_v39, %v11144_v20  ;;  %v9938_v14 = vld [vmem:[%s14019_s5 + $0x18] sm:$0xff] }
 0x269   : > { %v9935_v43 = vld [vmem:[%s14019_s5] sm:$0xff] }
 0x26a   : > { %2776 = vmatmul.bf16.gmra.mxu1 %v7409_v51  ;;  %v2709_v49 = vadd.f32 %v2708_v30, %v2660_v48  ;;  %v2714_v2 = vadd.f32 %v2713_v47, %v2665_v63  ;;  %v9974_v48 = vld [vmem:[%s14019_s5 + $0x138] sm:$0xff] }
 0x26b   : > { %3835 = vmatpush.bf16.msra.mxu0 %v9974_v48 }
 0x26c   : > { %2825 = vmatmul.bf16.gmra.mxu2 %v7413_v52 }
 0x26f   : > { %v2630_v54 = vpop.f32.mrf.mxu2  ;;  %v2583_v55 = vpop.f32.mrf.mxu1 }
 0x270   : > { %v11153_v56 = vadd.f32 %v2630_v54, %v2582_v50  ;;  %v2669_v50 = vpop.f32.mrf.mxu3  ;;  %v11173_v55 = vld [vmem:[%s14018_s4 + $0x1] ss:$0 sm:$0xff]  ;;  %v2715_v35 = vpop.f32.mrf.mxu0 }
 0x277   : > { %v2632_v58 = vpop.f32.mrf.mxu2  ;;  %v2586_v38 = vpop.f32.mrf.mxu1 }
 0x278   : > { %v2587_v60 = vadd.f32 %v2586_v38, %v11116_v1  ;;  %v9942_v58 = vld [vmem:[%s14019_s5 + $0x38] sm:$0xff]  ;;  %v2718_v0 = vpop.f32.mrf.mxu0 }
 0x279   : > { %3759 = vmatpush.bf16.msra.mxu3 %v9942_v58 }
 0x27a   : > { %2781 = vmatmul.bf16.gmra.mxu1 %v7445_v62 }
 0x27c   : > { %2830 = vmatmul.bf16.gmra.mxu2 %v7449_v33  ;;  %v2671_v33 = vpop.f32.mrf.mxu3 }
 0x27d   : > { %3760 = vmatpush.bf16.msra.mxu3 %v9941_v59 }
 0x27f   : > { %v2635_v7 = vpop.f32.mrf.mxu2  ;;  %v2588_v8 = vpop.f32.mrf.mxu1 }
 0x280   : > { %v11156_v9 = vadd.f32 %v2635_v7, %v2587_v60 }
 0x281   : > { %3761 = vmatpush.bf16.msra.mxu3 %v9940_v3 }
 0x284   : > { %v2674_v20 = vpop.f32.mrf.mxu3 }
 0x285   : > { %3762 = vmatpush.bf16.msra.mxu3 %v9939_v11  ;;  %v2675_v35 = vadd.f32 %v2674_v20, %v11150_v44  ;;  %v9970_v11 = vld [vmem:[%s14019_s5 + $0x118] sm:$0xff] }
 0x287   : > { %v2637_v1 = vpop.f32.mrf.mxu2  ;;  %v2591_v16 = vpop.f32.mrf.mxu1 }
 0x288   : > { %v2592_v21 = vadd.f32 %v2591_v16, %v11136_v42  ;;  %v7521_v42 = vor.u32 %v9844_v27, %v7520_v13  ;;  %v2720_v16 = vpop.f32.mrf.mxu0 }
 0x289   : > { %3763 = vmatpush.bf16.msra.mxu3 %v9938_v14 }
 0x28a   : > { %2786 = vmatmul.bf16.gmra.mxu1 %v7481_v23  ;;  %v9937_v23 = vld [vmem:[%s14019_s5 + $0x10] sm:$0xff] }
 0x28c   : > { %2835 = vmatmul.bf16.gmra.mxu2 %v7485_v5  ;;  %v2670_v5 = vadd.f32 %v2669_v50, %v11147_v32  ;;  %v2676_v29 = vpop.f32.mrf.mxu3 }
 0x28d   : > { %3764 = vmatpush.bf16.msra.mxu3 %v9937_v23 }
 0x28e   : > { %v2719_v13 = vadd.f32 %v2718_v0, %v2670_v5 }
 0x28f   : > { %v2640_v24 = vpop.f32.mrf.mxu2  ;;  %v2593_v25 = vpop.f32.mrf.mxu1 }
 0x290   : > { %v11159_v26 = vadd.f32 %v2640_v24, %v2592_v21  ;;  %v2963_v24 = vld [vmem:[#allocation3 + $0x7] sm:$0xff] }
 0x291   : > { %v2967_v25 = vpack.c.bf16 %v2963_v24, %v2963_v24 }
 0x293   : > { %2971 = vst [vmem:[#allocation5] sm:$0xf] %v2967_v25 }
 0x297   : > { %v2642_v34 = vpop.f32.mrf.mxu2  ;;  %v2596_v36 = vpop.f32.mrf.mxu1 }
 0x298   : > { %v2597_v37 = vadd.f32 %v2596_v36, %v11142_v17  ;;  %v11168_v17 = vld [vmem:[%s14018_s4] ss:$0 sm:$0xff]  ;;  %v2723_v34 = vpop.f32.mrf.mxu0 }
 0x299   : > { %v2724_v58 = vadd.f32 %v2723_v34, %v2675_v35 }
 0x29a   : > { %2791 = vmatmul.bf16.gmra.mxu1 %v7517_v31  ;;  %v9936_v31 = vld [vmem:[%s14019_s5 + $0x8] sm:$0xff] }
 0x29b   : > { %3765 = vmatpush.bf16.msra.mxu3 %v9936_v31 }
 0x29c   : > { %2840 = vmatmul.bf16.gmra.mxu2 %v7521_v42 }
 0x29f   : > { %v2645_v40 = vpop.f32.mrf.mxu2  ;;  %v2598_v22 = vpop.f32.mrf.mxu1  ;;  %3766 = vmatpush.bf16.msra.mxu3 %v9935_v43  ;;  %v9990_v43 = vld [vmem:[%s14019_s5 + $0x1b8] sm:$0xff] }
 0x2a0   : > { %v11162_v41 = vadd.f32 %v2645_v40, %v2597_v37  ;;  %3873 = vmatpush.bf16.msrb.mxu2 %v9990_v43 }
 0x2a7   : > { %v2647_v45 = vpop.f32.mrf.mxu2  ;;  %v2757_v46 = vpop.f32.mrf.mxu1 }
 0x2a8   : > { %v2758_v51 = vadd.f32 %v2757_v46, %v2709_v49  ;;  %v2679_v49 = vpop.f32.mrf.mxu3 }
 0x2af   : > { %v2806_v53 = vpop.f32.mrf.mxu2  ;;  %v2759_v52 = vpop.f32.mrf.mxu1 }
 0x2b0   : > { %v2807_v54 = vadd.f32 %v2806_v53, %v2758_v51  ;;  %v9973_v51 = vld [vmem:[%s14019_s5 + $0x130] sm:$0xff]  ;;  %v2681_v3 = vpop.f32.mrf.mxu3 }
 0x2b1   : > { %3836 = vmatpush.bf16.msra.mxu0 %v9973_v51 }
 0x2b2   : > { %v2848_v57 = vmul.f32 %v11168_v17, %v2807_v54  ;;  %v2725_v54 = vpop.f32.mrf.mxu0 }
 0x2b4   : > { %v2866_v61 = vadd.f32 %v11173_v55, %v2848_v57 }
 0x2b6   : > { %v2882_v38 = vmax.f32 %v2866_v61, 0.0 }
 0x2b7   : > { %v2808_v60 = vpop.f32.mrf.mxu2  ;;  %v2762_v62 = vpop.f32.mrf.mxu1 }
 0x2b8   : > { %2899 = vst.msk [vmem:[#allocation7] sm:$0xff] %vm2898_vm3, %v2882_v38  ;;  %v2763_v10 = vadd.f32 %v2762_v62, %v2714_v2  ;;  %v9972_v60 = vld [vmem:[%s14019_s5 + $0x128] sm:$0xff]  ;;  %v2684_v5 = vpop.f32.mrf.mxu3 }
 0x2b9   : > { %3837 = vmatpush.bf16.msra.mxu0 %v9972_v60 }
 0x2ba   : > { %v2728_v44 = vpop.f32.mrf.mxu0 }
 0x2bf   : > { %v2811_v4 = vpop.f32.mrf.mxu2  ;;  %v2764_v7 = vpop.f32.mrf.mxu1  ;;  %v2915_v30 = vld [vmem:[#allocation7] ss:$2 sm:$0xf]  ;;  %v2917_v27 = vld [vmem:[#allocation7 + $0x1] ss:$2 sm:$0xf] }
 0x2c0   : > { %v2812_v8 = vadd.f32 %v2811_v4, %v2763_v10  ;;  %v2918_v6 = vmax.f32 %v2915_v30, %v2917_v27  ;;  %v9971_v4 = vld [vmem:[%s14019_s5 + $0x120] sm:$0xff] }
 0x2c1   : > { %3838 = vmatpush.bf16.msra.mxu0 %v9971_v4  ;;  %v9978_v4 = vld [vmem:[%s14019_s5 + $0x158] sm:$0xff] }
 0x2c2   : > { %v2850_v12 = vmul.f32 %v11168_v17, %v2812_v8  ;;  %v7812_v8 = vld [vmem:[#allocation5] sm:$0xf]  ;;  %v2730_v23 = vpop.f32.mrf.mxu0 }
 0x2c4   : > { %v2868_v1 = vadd.f32 %v11173_v55, %v2850_v12 }
 0x2c5   : > { %3839 = vmatpush.bf16.msra.mxu0 %v9970_v11 }
 0x2c6   : > { %v2884_v15 = vmax.f32 %v2868_v1, 0.0 }
 0x2c7   : > { %v2813_v19 = vpop.f32.mrf.mxu2  ;;  %v2767_v21 = vpop.f32.mrf.mxu1 }
 0x2c8   : > { %2901 = vst.msk [vmem:[#allocation7 + $0x10] sm:$0xff] %vm2898_vm3, %v2884_v15  ;;  %v2768_v36 = vadd.f32 %v2767_v21, %v2719_v13  ;;  %v9969_v19 = vld [vmem:[%s14019_s5 + $0x110] sm:$0xff]  ;;  %v2680_v21 = vadd.f32 %v2679_v49, %v11153_v56 }
 0x2c9   : > { %3840 = vmatpush.bf16.msra.mxu0 %v9969_v19  ;;  %v9977_v19 = vld [vmem:[%s14019_s5 + $0x150] sm:$0xff] }
 0x2ca   : > { %v2729_v25 = vadd.f32 %v2728_v44, %v2680_v21  ;;  %v9950_v44 = vld [vmem:[%s14019_s5 + $0x78] sm:$0xff]  ;;  %v9985_v21 = vld [vmem:[%s14019_s5 + $0x190] sm:$0xff] }
 0x2cb   : > { %3778 = vmatpush.bf16.msrb.mxu3 %v9950_v44  ;;  %v9958_v44 = vld [vmem:[%s14019_s5 + $0xb8] sm:$0xff] }
 0x2cd   : > { %3841 = vmatpush.bf16.msra.mxu0 %v9968_v28  ;;  %v9948_v28 = vld [vmem:[%s14019_s5 + $0x68] sm:$0xff] }
 0x2cf   : > { %v2920_v32 = vld [vmem:[#allocation7 + $0x10] ss:$2 sm:$0xf]  ;;  %v2922_v37 = vld [vmem:[#allocation7 + $0x11] ss:$2 sm:$0xf]  ;;  %v2816_v42 = vpop.f32.mrf.mxu2  ;;  %v2769_v39 = vpop.f32.mrf.mxu1 }
 0x2d0   : > { %v2923_v40 = vmax.f32 %v2920_v32, %v2922_v37  ;;  %v2817_v22 = vadd.f32 %v2816_v42, %v2768_v36  ;;  %v9967_v32 = vld [vmem:[%s14019_s5 + $0x100] sm:$0xff]  ;;  %v2733_v37 = vpop.f32.mrf.mxu0 }
 0x2d1   : > { %3842 = vmatpush.bf16.msra.mxu0 %v9967_v32 }
 0x2d2   : > { %v2924_v45 = vmax.f32 %v2918_v6, %v2923_v40  ;;  %v2852_v46 = vmul.f32 %v11168_v17, %v2817_v22  ;;  %v2686_v6 = vpop.f32.mrf.mxu3  ;;  %v9982_v22 = vld [vmem:[%s14019_s5 + $0x178] sm:$0xff] }
 0x2d3   : > { %3854 = vmatpush.bf16.msrb.mxu1 %v9982_v22  ;;  %v9983_v6 = vld [vmem:[%s14019_s5 + $0x180] sm:$0xff] }
 0x2d4   : > { %2926 = vst.msk [vmem:[#allocation3 + $0x10] sm:$0xf] %vm2925_vm4, %v2924_v45  ;;  %v2870_v47 = vadd.f32 %v11173_v55, %v2852_v46  ;;  %v9981_v46 = vld [vmem:[%s14019_s5 + $0x170] sm:$0xff] }
 0x2d6   : > { %v2886_v50 = vmax.f32 %v2870_v47, 0.0  ;;  %v9989_v47 = vld [vmem:[%s14019_s5 + $0x1b0] sm:$0xff] }
 0x2d7   : > { %v2818_v53 = vpop.f32.mrf.mxu2  ;;  %v2772_v52 = vpop.f32.mrf.mxu1  ;;  %3855 = vmatpush.bf16.msrb.mxu1 %v9981_v46  ;;  %3874 = vmatpush.bf16.msrb.mxu2 %v9989_v47  ;;  %v9946_v46 = vld [vmem:[%s14019_s5 + $0x58] sm:$0xff] }
 0x2d8   : > { %2903 = vst.msk [vmem:[#allocation7 + $0x20] sm:$0xff] %vm2898_vm3, %v2886_v50  ;;  %v2773_v63 = vadd.f32 %v2772_v52, %v2724_v58  ;;  %v2685_v50 = vadd.f32 %v2684_v5, %v11156_v9  ;;  %v2735_v54 = vpop.f32.mrf.mxu0  ;;  %v9988_v58 = vld [vmem:[%s14019_s5 + $0x1a8] sm:$0xff] }
 0x2d9   : > { %v10005_v54 = vld [vmem:[%s14019_s5 + $0x230] sm:$0xff] }
 0x2da   : > { %v2734_v35 = vadd.f32 %v2733_v37, %v2685_v50  ;;  %v2689_v9 = vpop.f32.mrf.mxu3  ;;  %v9945_v50 = vld [vmem:[%s14019_s5 + $0x50] sm:$0xff] }
 0x2db   : > { %v2964_v57 = vld [vmem:[#allocation3 + $0xf] sm:$0xff]  ;;  %3875 = vmatpush.bf16.msrb.mxu2 %v9988_v58  ;;  %v2690_v23 = vadd.f32 %v2689_v9, %v11159_v26  ;;  %v9984_v26 = vld [vmem:[%s14019_s5 + $0x188] sm:$0xff] }
 0x2dc   : > { %v3011_v61 = vld [vmem:[#allocation3 + $0x10] sm:$0xff]  ;;  %v2968_v38 = vpack.c.bf16 %v2964_v57, %v2964_v57 }
 0x2dd   : > { %v2987_v59 = vld [vmem:[#allocation3 + $0x9] sm:$0xff]  ;;  %v3015_v62 = vpack.c.bf16 %v3011_v61, %v3011_v61  ;;  %v9980_v61 = vld [vmem:[%s14019_s5 + $0x168] sm:$0xff] }
 0x2de   : > { %2972 = vst [vmem:[#allocation5 + $0x24] sm:$0xf] %v2968_v38  ;;  %v2991_v2 = vpack.c.bf16 %v2987_v59, %v2987_v59  ;;  %3856 = vmatpush.bf16.msrb.mxu1 %v9980_v61  ;;  %v9944_v61 = vld [vmem:[%s14019_s5 + $0x48] sm:$0xff] }
 0x2df   : > { %v2821_v33 = vpop.f32.mrf.mxu2  ;;  %v2774_v0 = vpop.f32.mrf.mxu1  ;;  %3019 = vst [vmem:[#allocation5 + $0x10] sm:$0xf] %v3015_v62  ;;  %v2928_v24 = vld [vmem:[#allocation7 + $0x20] ss:$2 sm:$0xf] }
 0x2e0   : > { %v2822_v10 = vadd.f32 %v2821_v33, %v2773_v63  ;;  %2984 = vst [vmem:[#allocation5 + $0x28] sm:$0xf] %v3015_v62  ;;  %v2930_v18 = vld [vmem:[#allocation7 + $0x21] ss:$2 sm:$0xf] }
 0x2e1   : > { %2995 = vst [vmem:[#allocation5 + $0x8] sm:$0xf] %v2991_v2  ;;  %v2931_v56 = vmax.f32 %v2928_v24, %v2930_v18  ;;  %v9979_v0 = vld [vmem:[%s14019_s5 + $0x160] sm:$0xff] }
 0x2e2   : > { %v2854_v7 = vmul.f32 %v11168_v17, %v2822_v10  ;;  %3007 = vst [vmem:[#allocation5 + $0xc] sm:$0xf] %v2968_v38  ;;  %v9987_v2 = vld [vmem:[%s14019_s5 + $0x1a0] sm:$0xff]  ;;  %v9949_v10 = vld [vmem:[%s14019_s5 + $0x70] sm:$0xff]  ;;  %3857 = vmatpush.bf16.msrb.mxu1 %v9979_v0  ;;  %v2691_v5 = vpop.f32.mrf.mxu3 }
 0x2e3   : > { %3876 = vmatpush.bf16.msrb.mxu2 %v9987_v2  ;;  %3779 = vmatpush.bf16.msrb.mxu3 %v9949_v10  ;;  %v3038_v5 = vld [vmem:[#allocation3 + $0x2f] sm:$0xff] }
 0x2e4   : > { %v2872_v20 = vadd.f32 %v11173_v55, %v2854_v7  ;;  %v9986_v7 = vld [vmem:[%s14019_s5 + $0x198] sm:$0xff] }
 0x2e5   : > { %v9921_v12 = vld [vmem:[#allocation5 + $0x20] sm:$0xf0] }
 0x2e6   : > { %v2888_v14 = vmax.f32 %v2872_v20, 0.0  ;;  %v7813_v1 = vor.u32 %v9921_v12, %v7812_v8  ;;  %v2738_v8 = vpop.f32.mrf.mxu0  ;;  %v7828_v20 = vld [vmem:[#allocation5 + $0x10] sm:$0xf]  ;;  %3858 = vmatpush.bf16.msrb.mxu1 %v9978_v4 }
 0x2e7   : > { %v2823_v16 = vpop.f32.mrf.mxu2  ;;  %v2777_v15 = vpop.f32.mrf.mxu1  ;;  %3877 = vmatpush.bf16.msrb.mxu2 %v9986_v7  ;;  %v2739_v18 = vadd.f32 %v2738_v8, %v2690_v23  ;;  %3780 = vmatpush.bf16.msrb.mxu3 %v9948_v28  ;;  %v10003_v4 = vld [vmem:[%s14019_s5 + $0x220] sm:$0xff] }
 0x2e8   : > { %2905 = vst.msk [vmem:[#allocation7 + $0x30] sm:$0xff] %vm2898_vm3, %v2888_v14  ;;  %3767 = vmatmul.bf16.vlgmr.msra.gmra.mxu3 %v7813_v1  ;;  %v2778_v29 = vadd.f32 %v2777_v15, %v2729_v25 }
 0x2ea   : > { %3859 = vmatpush.bf16.msrb.mxu1 %v9977_v19  ;;  %v2694_v43 = vpop.f32.mrf.mxu3  ;;  %v9956_v19 = vld [vmem:[%s14019_s5 + $0xa8] sm:$0xff] }
 0x2eb   : > { %3878 = vmatpush.bf16.msrb.mxu2 %v9985_v21 }
 0x2ef   : > { %v2933_v30 = vld [vmem:[#allocation7 + $0x30] ss:$2 sm:$0xf]  ;;  %v2935_v13 = vld [vmem:[#allocation7 + $0x31] ss:$2 sm:$0xf]  ;;  %v2826_v27 = vpop.f32.mrf.mxu2  ;;  %v2779_v31 = vpop.f32.mrf.mxu1  ;;  %3879 = vmatpush.bf16.msrb.mxu2 %v9984_v26 }
 0x2f0   : > { %v2936_v34 = vmax.f32 %v2933_v30, %v2935_v13  ;;  %v2827_v36 = vadd.f32 %v2826_v27, %v2778_v29  ;;  %v9976_v29 = vld [vmem:[%s14019_s5 + $0x148] sm:$0xff]  ;;  %v2740_v30 = vpop.f32.mrf.mxu0 }
 0x2f1   : > { %3860 = vmatpush.bf16.msrb.mxu1 %v9976_v29  ;;  %v10002_v29 = vld [vmem:[%s14019_s5 + $0x218] sm:$0xff]  ;;  %v9955_v30 = vld [vmem:[%s14019_s5 + $0xa0] sm:$0xff] }
 0x2f2   : > { %v2937_v42 = vmax.f32 %v2931_v56, %v2936_v34  ;;  %v2856_v39 = vmul.f32 %v11168_v17, %v2827_v36  ;;  %v2696_v9 = vpop.f32.mrf.mxu3 }
 0x2f3   : > { %3880 = vmatpush.bf16.msrb.mxu2 %v9983_v6  ;;  %v7814_v6 = vld [vmem:[#allocation5 + $0x24] sm:$0xf0] }
 0x2f4   : > { %2938 = vst.msk [vmem:[#allocation3 + $0x18] sm:$0xf] %vm2925_vm4, %v2937_v42  ;;  %v2874_v40 = vadd.f32 %v11173_v55, %v2856_v39  ;;  %v9947_v42 = vld [vmem:[%s14019_s5 + $0x60] sm:$0xff] }
 0x2f5   : > { %v9975_v39 = vld [vmem:[%s14019_s5 + $0x140] sm:$0xff]  ;;  %3781 = vmatpush.bf16.msrb.mxu3 %v9947_v42 }
 0x2f6   : > { %v2890_v45 = vmax.f32 %v2874_v40, 0.0  ;;  %3861 = vmatpush.bf16.msrb.mxu1 %v9975_v39  ;;  %v9917_v39 = vld [vmem:[#allocation5 + $0x4] sm:$0xf] }
 0x2f7   : > { %v2828_v48 = vpop.f32.mrf.mxu2  ;;  %v2782_v49 = vpop.f32.mrf.mxu1 }
 0x2f8   : > { %2907 = vst.msk [vmem:[#allocation7 + $0x40] sm:$0xff] %vm2898_vm3, %v2890_v45  ;;  %v2783_v59 = vadd.f32 %v2782_v49, %v2734_v35  ;;  %v2743_v48 = vpop.f32.mrf.mxu0 }
 0x2f9   : > { %3782 = vmatpush.bf16.msrb.mxu3 %v9946_v46 }
 0x2fb   : > { %v3012_v51 = vld [vmem:[#allocation3 + $0x18] sm:$0xff] }
 0x2fc   : > { %v2965_v53 = vld [vmem:[#allocation3 + $0x17] sm:$0xff]  ;;  %v3016_v57 = vpack.c.bf16 %v3012_v51, %v3012_v51  ;;  %v2695_v51 = vadd.f32 %v2694_v43, %v11162_v41  ;;  %v7817_v43 = vor.u32 %v9917_v39, %v7814_v6 }
 0x2fd   : > { %v3023_v52 = vld [vmem:[#allocation3 + $0x11] sm:$0xff]  ;;  %v2969_v38 = vpack.c.bf16 %v2965_v53, %v2965_v53  ;;  %v10006_v53 = vld [vmem:[%s14019_s5 + $0x238] sm:$0xff]  ;;  %3783 = vmatpush.bf16.msrb.mxu3 %v9945_v50 }
 0x2fe   : > { %3020 = vst [vmem:[#allocation5 + $0x34] sm:$0xf] %v3016_v57  ;;  %v3027_v60 = vpack.c.bf16 %v3023_v52, %v3023_v52  ;;  %3911 = vmatpush.bf16.msrb.mxu0 %v10006_v53  ;;  %v2744_v41 = vadd.f32 %v2743_v48, %v2695_v51 }
 0x2ff   : > { %v2831_v62 = vpop.f32.mrf.mxu2  ;;  %v2784_v63 = vpop.f32.mrf.mxu1  ;;  %2973 = vst [vmem:[#allocation5 + $0x48] sm:$0xf] %v2969_v38  ;;  %v2940_v24 = vld [vmem:[#allocation7 + $0x40] ss:$2 sm:$0xf] }
 0x300   : > { %v2832_v33 = vadd.f32 %v2831_v62, %v2783_v59  ;;  %3031 = vst [vmem:[#allocation5 + $0x14] sm:$0xf] %v3027_v60  ;;  %v2942_v25 = vld [vmem:[#allocation7 + $0x41] ss:$2 sm:$0xf]  ;;  %v10004_v62 = vld [vmem:[%s14019_s5 + $0x228] sm:$0xff] }
 0x301   : > { %3043 = vst [vmem:[#allocation5 + $0x18] sm:$0xf] %v2969_v38  ;;  %v2943_v36 = vmax.f32 %v2940_v24, %v2942_v25  ;;  %3784 = vmatpush.bf16.msrb.mxu3 %v9944_v61  ;;  %v3062_v24 = vld [vmem:[#allocation3 + $0x31] sm:$0xff] }
 0x302   : > { %v2858_v3 = vmul.f32 %v11168_v17, %v2832_v33  ;;  %2985 = vst [vmem:[#allocation5 + $0x4c] sm:$0xf] %v3016_v57  ;;  %3912 = vmatpush.bf16.msrb.mxu0 %v10005_v54  ;;  %v9943_v33 = vld [vmem:[%s14019_s5 + $0x40] sm:$0xff]  ;;  %v3066_v28 = vpack.c.bf16 %v3062_v24, %v3062_v24 }
 0x303   : > { %2996 = vst [vmem:[#allocation5 + $0x2c] sm:$0xf] %v3027_v60  ;;  %v9951_v54 = vld [vmem:[%s14019_s5 + $0x80] sm:$0xff] }
 0x304   : > { %v2876_v11 = vadd.f32 %v11173_v55, %v2858_v3  ;;  %3008 = vst [vmem:[#allocation5 + $0x30] sm:$0xf] %v2969_v38  ;;  %v2745_v3 = vpop.f32.mrf.mxu0 }
 0x305   : > { %v9923_v12 = vld [vmem:[#allocation5 + $0x30] sm:$0xf0]  ;;  %3055 = vst [vmem:[#allocation5 + $0x1c] sm:$0xf] %v3016_v57  ;;  %3785 = vmatpush.bf16.msrb.mxu3 %v9943_v33 }
 0x306   : > { %v2892_v14 = vmax.f32 %v2876_v11, 0.0  ;;  %v7829_v1 = vor.u32 %v9923_v12, %v7828_v20  ;;  %3913 = vmatpush.bf16.msrb.mxu0 %v10004_v62  ;;  %v7848_v11 = vld [vmem:[#allocation5 + $0x48] sm:$0xf]  ;;  %v9957_v12 = vld [vmem:[%s14019_s5 + $0xb0] sm:$0xff]  ;;  %3070 = vst [vmem:[#allocation5 + $0x8c] sm:$0xf] %v3066_v28 }
 0x307   : > { %v2833_v16 = vpop.f32.mrf.mxu2  ;;  %v2787_v15 = vpop.f32.mrf.mxu1  ;;  %v9963_v3 = vld [vmem:[%s14019_s5 + $0xe0] sm:$0xff]  ;;  %v9994_v28 = vld [vmem:[%s14019_s5 + $0x1d8] sm:$0xff] }
 0x308   : > { %2909 = vst.msk [vmem:[#allocation7 + $0x50] sm:$0xff] %vm2898_vm3, %v2892_v14  ;;  %3843 = vmatmul.bf16.vlgmr.msra.gmra.mxu0 %v7829_v1  ;;  %v2788_v13 = vadd.f32 %v2787_v15, %v2739_v18  ;;  %v9919_v16 = vld [vmem:[#allocation5 + $0x14] sm:$0xf]  ;;  %v7836_v15 = vld [vmem:[#allocation5 + $0x18] sm:$0xf]  ;;  %v3042_v18 = vpack.c.bf16 %v3038_v5, %v3038_v5 }
 0x309   : > { %3797 = vmatpush.bf16.msra.mxu3 %v9958_v44 }
 0x30a   : > { %3914 = vmatpush.bf16.msrb.mxu0 %v10003_v4  ;;  %3046 = vst [vmem:[#allocation5 + $0x84] sm:$0xf] %v3042_v18  ;;  %v9961_v4 = vld [vmem:[%s14019_s5 + $0xd0] sm:$0xff]  ;;  %v9995_v18 = vld [vmem:[%s14019_s5 + $0x1e0] sm:$0xff] }
 0x30d   : > { %3798 = vmatpush.bf16.msra.mxu3 %v9957_v12 }
 0x30e   : > { %3915 = vmatpush.bf16.msrb.mxu0 %v10002_v29  ;;  %v9993_v29 = vld [vmem:[%s14019_s5 + $0x1d0] sm:$0xff] }
 0x30f   : > { %v2945_v27 = vld [vmem:[#allocation7 + $0x50] ss:$2 sm:$0xf]  ;;  %v2947_v31 = vld [vmem:[#allocation7 + $0x51] ss:$2 sm:$0xf]  ;;  %v2836_v56 = vpop.f32.mrf.mxu2  ;;  %v2789_v34 = vpop.f32.mrf.mxu1 }
 0x310   : > { %v2948_v32 = vmax.f32 %v2945_v27, %v2947_v31  ;;  %v2837_v37 = vadd.f32 %v2836_v56, %v2788_v13  ;;  %v10001_v27 = vld [vmem:[%s14019_s5 + $0x210] sm:$0xff] }
 0x311   : > { %3799 = vmatpush.bf16.msra.mxu3 %v9956_v19  ;;  %v9933_v9 = vld [vmem:[#allocation5 + $0x80] sm:$0xf0] }
 0x312   : > { %v2949_v40 = vmax.f32 %v2943_v36, %v2948_v32  ;;  %v2860_v22 = vmul.f32 %v11168_v17, %v2837_v37  ;;  %v9954_v32 = vld [vmem:[%s14019_s5 + $0x98] sm:$0xff]  ;;  %3916 = vmatpush.bf16.msrb.mxu0 %v10001_v27  ;;  %v10000_v37 = vld [vmem:[%s14019_s5 + $0x208] sm:$0xff] }
 0x314   : > { %2950 = vst.msk [vmem:[#allocation3 + $0x20] sm:$0xf] %vm2925_vm4, %v2949_v40  ;;  %v2878_v45 = vadd.f32 %v11173_v55, %v2860_v22  ;;  %v9953_v40 = vld [vmem:[%s14019_s5 + $0x90] sm:$0xff]  ;;  %v9999_v22 = vld [vmem:[%s14019_s5 + $0x200] sm:$0xff] }
 0x315   : > { %3800 = vmatpush.bf16.msra.mxu3 %v9955_v30  ;;  %v9992_v30 = vld [vmem:[%s14019_s5 + $0x1c8] sm:$0xff] }
 0x316   : > { %v2894_v47 = vmax.f32 %v2878_v45, 0.0  ;;  %3917 = vmatpush.bf16.msrb.mxu0 %v10000_v37  ;;  %v9952_v45 = vld [vmem:[%s14019_s5 + $0x88] sm:$0xff] }
 0x317   : > { %v2838_v49 = vpop.f32.mrf.mxu2  ;;  %v2792_v52 = vpop.f32.mrf.mxu1  ;;  %v9920_v37 = vld [vmem:[#allocation5 + $0x1c] sm:$0xf] }
 0x318   : > { %2911 = vst.msk [vmem:[#allocation7 + $0x60] sm:$0xff] %vm2898_vm3, %v2894_v47  ;;  %v2793_v60 = vadd.f32 %v2792_v52, %v2744_v41  ;;  %v9926_v41 = vld [vmem:[#allocation5 + $0x4c] sm:$0xf] }
 0x319   : > { %3801 = vmatpush.bf16.msra.mxu3 %v9954_v32 }
 0x31a   : > { %3918 = vmatpush.bf16.msrb.mxu0 %v9999_v22  ;;  %v7874_v22 = vld [vmem:[#allocation5 + $0x84] sm:$0xf0] }
 0x31b   : > { %v2966_v35 = vld [vmem:[#allocation3 + $0x1f] sm:$0xff] }
 0x31c   : > { %v3024_v57 = vld [vmem:[#allocation3 + $0x19] sm:$0xff]  ;;  %v2970_v58 = vpack.c.bf16 %v2966_v35, %v2966_v35  ;;  %v9966_v35 = vld [vmem:[%s14019_s5 + $0xf8] sm:$0xff] }
 0x31d   : > { %v2978_v38 = vld [vmem:[#allocation3 + $0x20] sm:$0xff]  ;;  %v3028_v59 = vpack.c.bf16 %v3024_v57, %v3024_v57  ;;  %3802 = vmatpush.bf16.msra.mxu3 %v9953_v40 }
 0x31e   : > { %2974 = vst [vmem:[#allocation5 + $0x6c] sm:$0xf] %v2970_v58  ;;  %v2982_v0 = vpack.c.bf16 %v2978_v38, %v2978_v38  ;;  %v9965_v57 = vld [vmem:[%s14019_s5 + $0xf0] sm:$0xff] }
 0x31f   : > { %v2841_v63 = vpop.f32.mrf.mxu2  ;;  %3032 = vst [vmem:[#allocation5 + $0x38] sm:$0xf] %v3028_v59  ;;  %v2794_v7 = vpop.f32.mrf.mxu1  ;;  %v2952_v26 = vld [vmem:[#allocation7 + $0x60] ss:$2 sm:$0xf] }
 0x320   : > { %v2842_v2 = vadd.f32 %v2841_v63, %v2793_v60  ;;  %3044 = vst [vmem:[#allocation5 + $0x3c] sm:$0xf] %v2970_v58  ;;  %v2954_v13 = vld [vmem:[#allocation7 + $0x61] ss:$2 sm:$0xf]  ;;  %v9964_v63 = vld [vmem:[%s14019_s5 + $0xe8] sm:$0xff] }
 0x321   : > { %2986 = vst [vmem:[#allocation5 + $0x70] sm:$0xf] %v2982_v0  ;;  %v2955_v34 = vmax.f32 %v2952_v26, %v2954_v13  ;;  %3803 = vmatpush.bf16.msra.mxu3 %v9952_v45  ;;  %v9922_v7 = vld [vmem:[#allocation5 + $0x28] sm:$0xf0]  ;;  %v7822_v26 = vld [vmem:[#allocation5 + $0x2c] sm:$0xf0] }
 0x322   : > { %v2862_v10 = vmul.f32 %v11168_v17, %v2842_v2  ;;  %3021 = vst [vmem:[#allocation5 + $0x58] sm:$0xf] %v2982_v0  ;;  %v9918_v13 = vld [vmem:[#allocation5 + $0xc] sm:$0xf] }
 0x323   : > { %3067 = vst [vmem:[#allocation5 + $0x20] sm:$0xf] %v3028_v59  ;;  %v7825_v27 = vor.u32 %v9918_v13, %v7822_v26  ;;  %v8588_v26 = vld [vmem:[%s14021_s7 + $0x340] sm:$0xf] }
 0x324   : > { %v2880_v8 = vadd.f32 %v11173_v55, %v2862_v10  ;;  %2997 = vst [vmem:[#allocation5 + $0x50] sm:$0xf] %v3028_v59  ;;  %v9962_v10 = vld [vmem:[%s14019_s5 + $0xd8] sm:$0xff]  ;;  %v10115_v13 = vld [vmem:[%s14021_s7 + $0x35c] sm:$0xf0] }
 0x325   : > { %v9930_v20 = vld [vmem:[#allocation5 + $0x68] sm:$0xf0]  ;;  %3009 = vst [vmem:[#allocation5 + $0x54] sm:$0xf] %v2970_v58  ;;  %3804 = vmatpush.bf16.msra.mxu3 %v9951_v54 }
 0x326   : > { %v2896_v17 = vmax.f32 %v2880_v8, 0.0  ;;  %v7849_v14 = vor.u32 %v9930_v20, %v7848_v11  ;;  %v7830_v55 = vld [vmem:[#allocation5 + $0x34] sm:$0xf0]  ;;  %3056 = vst [vmem:[#allocation5 + $0x40] sm:$0xf] %v2982_v0 }
 0x327   : > { %v2843_v1 = vpop.f32.mrf.mxu2  ;;  %v7833_v21 = vor.u32 %v9919_v16, %v7830_v55  ;;  %v9924_v23 = vld [vmem:[#allocation5 + $0x38] sm:$0xf0]  ;;  %v7820_v11 = vld [vmem:[#allocation5 + $0x8] sm:$0xf]  ;;  %v9997_v55 = vld [vmem:[%s14019_s5 + $0x1f0] sm:$0xff] }
 0x328   : > { %2913 = vst.msk [vmem:[#allocation7 + $0x70] sm:$0xff] %vm2898_vm3, %v2896_v17  ;;  %3772 = vmatmul.bf16.gmra.mxu3 %v7849_v14  ;;  %v7837_v25 = vor.u32 %v9924_v23, %v7836_v15  ;;  %v7850_v61 = vld [vmem:[#allocation5 + $0x6c] sm:$0xf0]  ;;  %v7821_v12 = vor.u32 %v9922_v7, %v7820_v11  ;;  %v9960_v14 = vld [vmem:[%s14019_s5 + $0xc8] sm:$0xff]  ;;  %v9998_v16 = vld [vmem:[%s14019_s5 + $0x1f8] sm:$0xff] }
 0x329   : > { %3862 = vmatmul.bf16.vlgmr.msrb.gmra.mxu1 %v7833_v21  ;;  %v7864_v58 = vld [vmem:[#allocation5 + $0x58] sm:$0xf]  ;;  %v7853_v59 = vor.u32 %v9926_v41, %v7850_v61  ;;  %v9959_v1 = vld [vmem:[%s14019_s5 + $0xc0] sm:$0xff]  ;;  %v9934_v15 = vld [vmem:[#allocation5 + $0x88] sm:$0xf0] }
 0x32a   : > { %3881 = vmatmul.bf16.vlgmr.msrb.gmra.mxu2 %v7837_v25  ;;  %v7844_v20 = vld [vmem:[#allocation5 + $0x20] sm:$0xf]  ;;  %v9996_v23 = vld [vmem:[%s14019_s5 + $0x1e8] sm:$0xff]  ;;  %v8364_v11 = vld [vmem:[%s14021_s7 + $0x180] sm:$0xf] }
 0x32b   : > { %v7856_v5 = vld [vmem:[#allocation5 + $0x50] sm:$0xf] }
 0x32d   : > { %v7838_v32 = vld [vmem:[#allocation5 + $0x3c] sm:$0xf0] }
 0x32f   : > { %v2957_v31 = vld [vmem:[#allocation7 + $0x70] ss:$2 sm:$0xf]  ;;  %v2959_v56 = vld [vmem:[#allocation7 + $0x71] ss:$2 sm:$0xf] }
 0x330   : > { %v2960_v36 = vmax.f32 %v2957_v31, %v2959_v56  ;;  %v9991_v31 = vld [vmem:[%s14019_s5 + $0x1c0] sm:$0xff] }
 0x332   : > { %v2961_v42 = vmax.f32 %v2955_v34, %v2960_v36  ;;  %v9927_v34 = vld [vmem:[#allocation5 + $0x54] sm:$0xf] }
 0x334   : > { %2962 = vst.msk [vmem:[#allocation3 + $0x28] sm:$0xf] %vm2925_vm4, %v2961_v42  ;;  %v7841_v42 = vor.u32 %v9920_v37, %v7838_v32  ;;  %v9100_v32 = vld [vmem:[%s14021_s7 + $0x740] sm:$0xf] }
 0x335   : > { %v10243_v37 = vld [vmem:[%s14021_s7 + $0x75c] sm:$0xf0] }
 0x338   : > { %3786 = vmatmul.bf16.vlgmr.msrb.gmra.mxu3 %v7817_v43 }
 0x339   : > { %3816 = vmatpush.bf16.msrb.mxu3 %v9966_v35 }
 0x33b   : > { %v3014_v46 = vld [vmem:[#allocation3 + $0x28] sm:$0xff] }
 0x33c   : > { %v3025_v47 = vld [vmem:[#allocation3 + $0x21] sm:$0xff]  ;;  %v3026_v48 = vld [vmem:[#allocation3 + $0x29] sm:$0xff]  ;;  %v3018_v49 = vpack.c.bf16 %v3014_v46, %v3014_v46 }
 0x33d   : > { %v3029_v50 = vpack.c.bf16 %v3025_v47, %v3025_v47  ;;  %v3030_v51 = vpack.c.bf16 %v3026_v48, %v3026_v48  ;;  %v3037_v53 = vld [vmem:[#allocation3 + $0x27] sm:$0xff]  ;;  %3817 = vmatpush.bf16.msrb.mxu3 %v9965_v57 }
 0x33e   : > { %v3041_v52 = vpack.c.bf16 %v3037_v53, %v3037_v53  ;;  %3022 = vst [vmem:[#allocation5 + $0x7c] sm:$0xf] %v3018_v49 }
 0x33f   : > { %3033 = vst [vmem:[#allocation5 + $0x5c] sm:$0xf] %v3029_v50 }
 0x340   : > { %3034 = vst [vmem:[#allocation5 + $0x80] sm:$0xf] %v3030_v51 }
 0x341   : > { %3045 = vst [vmem:[#allocation5 + $0x60] sm:$0xf] %v3041_v52  ;;  %3818 = vmatpush.bf16.msrb.mxu3 %v9964_v63  ;;  %v10131_v63 = vld [vmem:[%s14021_s7 + $0x3dc] sm:$0xf0] }
 0x342   : > { %3068 = vst [vmem:[#allocation5 + $0x44] sm:$0xf] %v3029_v50 }
 0x343   : > { %2998 = vst [vmem:[#allocation5 + $0x74] sm:$0xf] %v3029_v50 }
 0x344   : > { %3069 = vst [vmem:[#allocation5 + $0x68] sm:$0xf] %v3030_v51 }
 0x345   : > { %v9932_v38 = vld [vmem:[#allocation5 + $0x78] sm:$0xf0]  ;;  %3010 = vst [vmem:[#allocation5 + $0x78] sm:$0xf] %v3041_v52  ;;  %3819 = vmatpush.bf16.msrb.mxu3 %v9963_v3  ;;  %v9164_v3 = vld [vmem:[%s14021_s7 + $0x7c0] sm:$0xf] }
 0x346   : > { %v7865_v60 = vor.u32 %v9932_v38, %v7864_v58  ;;  %v9928_v62 = vld [vmem:[#allocation5 + $0x5c] sm:$0xf]  ;;  %3057 = vst [vmem:[#allocation5 + $0x64] sm:$0xf] %v3018_v49 }
 0x347   : > { %v7866_v33 = vld [vmem:[#allocation5 + $0x7c] sm:$0xf0] }
 0x348   : > { %3791 = vmatmul.bf16.gmra.mxu3 %v7853_v59  ;;  %3848 = vmatmul.bf16.gmra.mxu0 %v7865_v60  ;;  %v7869_v0 = vor.u32 %v9928_v62, %v7866_v33  ;;  %v7872_v2 = vld [vmem:[#allocation5 + $0x60] sm:$0xf]  ;;  %v10067_v59 = vld [vmem:[%s14021_s7 + $0x1dc] sm:$0xf0] }
 0x349   : > { %v7873_v44 = vor.u32 %v9933_v9, %v7872_v2  ;;  %3820 = vmatpush.bf16.msrb.mxu3 %v9962_v10  ;;  %v9925_v8 = vld [vmem:[#allocation5 + $0x40] sm:$0xf0]  ;;  %v8396_v9 = vld [vmem:[%s14021_s7 + $0x1c0] sm:$0xf] }
 0x34a   : > { %3867 = vmatmul.bf16.gmra.mxu1 %v7869_v0  ;;  %v7845_v17 = vor.u32 %v9925_v8, %v7844_v20  ;;  %v9931_v19 = vld [vmem:[#allocation5 + $0x70] sm:$0xf0]  ;;  %v8652_v60 = vld [vmem:[%s14021_s7 + $0x3c0] sm:$0xf]  ;;  %v8397_v62 = vor.u32 %v10067_v59, %v8396_v9 }
 0x34b   : > { %3886 = vmatmul.bf16.gmra.mxu2 %v7873_v44  ;;  %v7880_v21 = vld [vmem:[#allocation5 + $0x68] sm:$0xf]  ;;  %v7857_v24 = vor.u32 %v9931_v19, %v7856_v5  ;;  %v8908_v33 = vld [vmem:[%s14021_s7 + $0x5c0] sm:$0xf]  ;;  %v8653_v2 = vor.u32 %v10131_v63, %v8652_v60 }
 0x34c   : > { %v7881_v25 = vor.u32 %v9934_v15, %v7880_v21  ;;  %v7858_v56 = vld [vmem:[#allocation5 + $0x74] sm:$0xf0]  ;;  %v10195_v0 = vld [vmem:[%s14021_s7 + $0x5dc] sm:$0xf0]  ;;  %5552 = vmatpush.bf16.msra.mxu1 %v8397_v62 }
 0x34d   : > { %3821 = vmatpush.bf16.msrb.mxu3 %v9961_v4  ;;  %v7861_v36 = vor.u32 %v9927_v34, %v7858_v56  ;;  %v9929_v40 = vld [vmem:[#allocation5 + $0x64] sm:$0xf]  ;;  %v8909_v44 = vor.u32 %v10195_v0, %v8908_v33  ;;  %v10259_v10 = vld [vmem:[%s14021_s7 + $0x7dc] sm:$0xf0]  ;;  %5565 = vmatpush.bf16.msra.mxu2 %v8653_v2  ;;  %v8589_v34 = vor.u32 %v10115_v13, %v8588_v26 }
 0x34e   : > { %v7877_v43 = vor.u32 %v9929_v40, %v7874_v22  ;;  %v9165_v7 = vor.u32 %v10259_v10, %v9164_v3  ;;  %v10059_v20 = vld [vmem:[%s14021_s7 + $0x19c] sm:$0xf0]  ;;  %v9101_v22 = vor.u32 %v10243_v37, %v9100_v32 }
 0x34f   : > { %v10251_v5 = vld [vmem:[%s14021_s7 + $0x79c] sm:$0xf0] }
 0x350   : > { %5591 = vmatpush.bf16.msra.mxu0 %v9165_v7  ;;  %v10456_v40 = vld [vmem:[#allocation2] sm:$0xff] }
 0x351   : > { %3822 = vmatpush.bf16.msrb.mxu3 %v9960_v14  ;;  %v8365_v14 = vor.u32 %v10059_v20, %v8364_v11  ;;  %v10235_v62 = vld [vmem:[%s14021_s7 + $0x71c] sm:$0xf0] }
 0x352   : > { %v10035_v3 = vld [vmem:[%s14021_s7 + $0xdc] sm:$0xf0] }
 0x353   : > { %5553 = vmatpush.bf16.msra.mxu1 %v8365_v14  ;;  %v8524_v10 = vld [vmem:[%s14021_s7 + $0x2c0] sm:$0xf] }
 0x354   : > { %v8780_v7 = vld [vmem:[%s14021_s7 + $0x4c0] sm:$0xf] }
 0x355   : > { %3823 = vmatpush.bf16.msrb.mxu3 %v9959_v1  ;;  %v10123_v1 = vld [vmem:[%s14021_s7 + $0x39c] sm:$0xf0] }
 0x356   : > { %v10163_v20 = vld [vmem:[%s14021_s7 + $0x4dc] sm:$0xf0] }
 0x357   : > { %v10155_v26 = vld [vmem:[%s14021_s7 + $0x49c] sm:$0xf0] }
 0x358   : > { %3805 = vmatmul.bf16.vlgmr.msra.gmra.mxu3 %v7821_v12  ;;  %3919 = vmatmul.bf16.vlgmr.msrb.gmra.mxu0 %v7845_v17  ;;  %v8620_v12 = vld [vmem:[%s14021_s7 + $0x380] sm:$0xf] }
 0x359   : > { %3892 = vmatpush.bf16.msra.mxu3 %v9998_v16  ;;  %v8876_v16 = vld [vmem:[%s14021_s7 + $0x580] sm:$0xf]  ;;  %v8621_v19 = vor.u32 %v10123_v1, %v8620_v12 }
 0x35a   : > { %v9036_v12 = vld [vmem:[%s14021_s7 + $0x6c0] sm:$0xf] }
 0x35b   : > { %5566 = vmatpush.bf16.msra.mxu2 %v8621_v19 }
 0x35d   : > { %3893 = vmatpush.bf16.msra.mxu3 %v9997_v55  ;;  %v10187_v55 = vld [vmem:[%s14021_s7 + $0x59c] sm:$0xf0] }
 0x35e   : > { %v8877_v21 = vor.u32 %v10187_v55, %v8876_v16  ;;  %v11583_v16 = vld [vmem:[%s14020_s6] ss:$0 sm:$0xff]  ;;  %v8781_v55 = vor.u32 %v10163_v20, %v8780_v7 }
 0x35f   : > { %5567 = vmatpush.bf16.msra.mxu2 %v8589_v34  ;;  %v10139_v20 = vld [vmem:[%s14021_s7 + $0x41c] sm:$0xf0] }
 0x361   : > { %3894 = vmatpush.bf16.msra.mxu3 %v9996_v23  ;;  %v9132_v23 = vld [vmem:[%s14021_s7 + $0x780] sm:$0xf] }
 0x365   : > { %3895 = vmatpush.bf16.msra.mxu3 %v9995_v18  ;;  %v468_v18 = vlaneseq }
 0x367   : > { %vm470_vm5 = vcmp.lt.s32.totalorder %v468_v18, 512  ;;  %vm11791_vm6 = vcmp.lt.s32.totalorder %v468_v18, 64  ;;  %v10223_v18 = vld [vmem:[%s14021_s7 + $0x6c4] sm:$0xf] }
 0x368   : > { %3810 = vmatmul.bf16.gmra.mxu3 %v7857_v24  ;;  %3924 = vmatmul.bf16.gmra.mxu0 %v7881_v25  ;;  %v9133_v25 = vor.u32 %v10251_v5, %v9132_v23  ;;  %472 = vst.msk [vmem:[#allocation9] sm:$0xf] %vm470_vm5, %v10456_v40  ;;  %v8460_v40 = vld [vmem:[%s14021_s7 + $0x240] sm:$0xf] }
 0x369   : > { %3896 = vmatpush.bf16.msra.mxu3 %v9994_v28  ;;  %v8332_v28 = vld [vmem:[%s14021_s7 + $0x140] sm:$0xf] }
 0x36a   : > { %5592 = vmatpush.bf16.msra.mxu0 %v9133_v25  ;;  %v8492_v25 = vld [vmem:[%s14021_s7 + $0x280] sm:$0xf] }
 0x36b   : > { %v3768_v39 = vpop.f32.mrf.mxu3 }
 0x36d   : > { %3897 = vmatpush.bf16.msra.mxu3 %v9993_v29  ;;  %v10051_v29 = vld [vmem:[%s14021_s7 + $0x15c] sm:$0xf0] }
 0x36e   : > { %5593 = vmatpush.bf16.msra.mxu0 %v9101_v22 }
 0x371   : > { %3898 = vmatpush.bf16.msra.mxu3 %v9992_v30  ;;  %v8333_v30 = vor.u32 %v10051_v29, %v8332_v28 }
 0x373   : > { %v11426_v6 = vpop.f32.mrf.mxu3  ;;  %5554 = vmatpush.bf16.msra.mxu1 %v8333_v30 }
 0x375   : > { %3899 = vmatpush.bf16.msra.mxu3 %v9991_v31  ;;  %v10179_v31 = vld [vmem:[%s14021_s7 + $0x55c] sm:$0xf0] }
 0x378   : > { %3824 = vmatmul.bf16.vlgmr.msrb.gmra.mxu3 %v7825_v27  ;;  %v8844_v27 = vld [vmem:[%s14021_s7 + $0x540] sm:$0xf] }
 0x379   : > { %5578 = vmatpush.bf16.msrb.mxu3 %v8909_v44  ;;  %v8268_v44 = vld [vmem:[%s14021_s7 + $0xc0] sm:$0xf] }
 0x37d   : > { %5579 = vmatpush.bf16.msrb.mxu3 %v8877_v21 }
 0x385   : > { %v3844_v35 = vpop.f32.mrf.mxu0 }
 0x388   : > { %3829 = vmatmul.bf16.gmra.mxu3 %v7861_v36  ;;  %v8845_v36 = vor.u32 %v10179_v31, %v8844_v27  ;;  %v9004_v31 = vld [vmem:[%s14021_s7 + $0x680] sm:$0xf] }
 0x38a   : > { %5580 = vmatpush.bf16.msrb.mxu3 %v8845_v36  ;;  %v11615_v36 = vld [vmem:[%s14020_s6 + $0x1] ss:$0 sm:$0xff] }
 0x38d   : > { %v11442_v61 = vpop.f32.mrf.mxu0 }
 0x398   : > { %3900 = vmatmul.bf16.vlgmr.msra.gmra.mxu3 %v7841_v42 }
 0x3a6   : > { %v3863_v56 = vpop.f32.mrf.mxu1 }
 0x3a8   : > { %3905 = vmatmul.bf16.gmra.mxu3 %v7877_v43 }
 0x3ab   : > { %v3773_v45 = vpop.f32.mrf.mxu3 }
 0x3ad   : > { %v3882_v9 = vpop.f32.mrf.mxu2 }
 0x3ae   : > { %v3865_v21 = vpop.f32.mrf.mxu1 }
 0x3b3   : > { %v11428_v46 = vpop.f32.mrf.mxu3 }
 0x3bb   : > { %v3787_v47 = vpop.f32.mrf.mxu3 }
 0x3bc   : > { %v3788_v4 = vadd.f32 %v3787_v47, %v3768_v39  ;;  %v10043_v47 = vld [vmem:[%s14021_s7 + $0x11c] sm:$0xf0] }
 0x3c3   : > { %v11430_v48 = vpop.f32.mrf.mxu3 }
 0x3c4   : > { %v3790_v42 = vadd.f32 %v11430_v48, %v11426_v6  ;;  %v8556_v6 = vld [vmem:[%s14021_s7 + $0x300] sm:$0xf] }
 0x3c5   : > { %v11444_v58 = vpop.f32.mrf.mxu0 }
 0x3cb   : > { %v3792_v49 = vpop.f32.mrf.mxu3 }
 0x3cc   : > { %v11432_v50 = vadd.f32 %v3792_v49, %v3773_v45  ;;  %v8300_v45 = vld [vmem:[%s14021_s7 + $0x100] sm:$0xf] }
 0x3cd   : > { %v11492_v15 = vpop.f32.mrf.mxu0  ;;  %v8301_v49 = vor.u32 %v10043_v47, %v8300_v45  ;;  %v10083_v47 = vld [vmem:[%s14021_s7 + $0x25c] sm:$0xf0] }
 0x3cf   : > { %5555 = vmatpush.bf16.msra.mxu1 %v8301_v49 }
 0x3d3   : > { %v11434_v51 = vpop.f32.mrf.mxu3 }
 0x3d4   : > { %v3795_v49 = vadd.f32 %v11434_v51, %v11428_v46 }
 0x3d5   : > { %v3920_v2 = vpop.f32.mrf.mxu0 }
 0x3db   : > { %v3806_v53 = vpop.f32.mrf.mxu3 }
 0x3dc   : > { %v3807_v17 = vadd.f32 %v3806_v53, %v3788_v4  ;;  %v10107_v53 = vld [vmem:[%s14021_s7 + $0x31c] sm:$0xf0] }
 0x3dd   : > { %v8557_v59 = vor.u32 %v10107_v53, %v8556_v6  ;;  %v10099_v4 = vld [vmem:[%s14021_s7 + $0x2dc] sm:$0xf0]  ;;  %v3922_v53 = vpop.f32.mrf.mxu0 }
 0x3de   : > { %v8525_v11 = vor.u32 %v10099_v4, %v8524_v10  ;;  %v8716_v6 = vld [vmem:[%s14021_s7 + $0x440] sm:$0xf] }
 0x3df   : > { %5568 = vmatpush.bf16.msra.mxu2 %v8557_v59  ;;  %v8972_v59 = vld [vmem:[%s14021_s7 + $0x640] sm:$0xf] }
 0x3e3   : > { %v11436_v52 = vpop.f32.mrf.mxu3  ;;  %5569 = vmatpush.bf16.msra.mxu2 %v8525_v11 }
 0x3e4   : > { %v3809_v48 = vadd.f32 %v11436_v52, %v3790_v42  ;;  %v9068_v52 = vld [vmem:[%s14021_s7 + $0x700] sm:$0xf] }
 0x3e5   : > { %v9069_v0 = vor.u32 %v10235_v62, %v9068_v52  ;;  %v8204_v42 = vld [vmem:[%s14021_s7 + $0x40] sm:$0xf] }
 0x3e7   : > { %5594 = vmatpush.bf16.msra.mxu0 %v9069_v0  ;;  %v10011_v0 = vld [vmem:[%s14021_s7 + $0x1c] sm:$0xf0] }
 0x3eb   : > { %v11438_v54 = vpop.f32.mrf.mxu3 }
 0x3ec   : > { %v3812_v23 = vadd.f32 %v11438_v54, %v11432_v50  ;;  %v10091_v50 = vld [vmem:[%s14021_s7 + $0x29c] sm:$0xf0] }
 0x3ed   : > { %v8748_v54 = vld [vmem:[%s14021_s7 + $0x480] sm:$0xf]  ;;  %v8493_v13 = vor.u32 %v10091_v50, %v8492_v25  ;;  %v10255_v50 = vld [vmem:[%s14021_s7 + $0x7c4] sm:$0xf] }
 0x3ee   : > { %v8749_v27 = vor.u32 %v10155_v26, %v8748_v54  ;;  %v9166_v54 = vld [vmem:[%s14021_s7 + $0x7e0] sm:$0xf0] }
 0x3ef   : > { %5570 = vmatpush.bf16.msra.mxu2 %v8493_v13  ;;  %v10055_v13 = vld [vmem:[%s14021_s7 + $0x184] sm:$0xf] }
 0x3f3   : > { %v11440_v57 = vpop.f32.mrf.mxu3 }
 0x3f4   : > { %v3814_v46 = vadd.f32 %v11440_v57, %v3795_v49  ;;  %v10075_v57 = vld [vmem:[%s14021_s7 + $0x21c] sm:$0xf0] }
 0x3fb   : > { %v3825_v41 = vpop.f32.mrf.mxu3 }
 0x3fc   : > { %v3826_v24 = vadd.f32 %v3825_v41, %v3807_v17  ;;  %v10171_v41 = vld [vmem:[%s14021_s7 + $0x51c] sm:$0xf0] }
 0x3fd   : > { %v10227_v17 = vld [vmem:[%s14021_s7 + $0x6dc] sm:$0xf0] }
 0x3fe   : > { %v3845_v39 = vadd.f32 %v3844_v35, %v3826_v24  ;;  %v8812_v35 = vld [vmem:[%s14021_s7 + $0x500] sm:$0xf]  ;;  %v9037_v19 = vor.u32 %v10227_v17, %v9036_v12 }
 0x3ff   : > { %v8813_v60 = vor.u32 %v10171_v41, %v8812_v35  ;;  %v8236_v24 = vld [vmem:[%s14021_s7 + $0x80] sm:$0xf]  ;;  %v8461_v41 = vor.u32 %v10083_v47, %v8460_v40  ;;  %v3925_v40 = vpop.f32.mrf.mxu0  ;;  %v10247_v47 = vld [vmem:[%s14021_s7 + $0x784] sm:$0xf] }
 0x400   : > { %v3864_v33 = vadd.f32 %v3863_v56, %v3845_v39  ;;  %5595 = vmatpush.bf16.msra.mxu0 %v9037_v19  ;;  %v10219_v56 = vld [vmem:[%s14021_s7 + $0x69c] sm:$0xf0]  ;;  %v8398_v19 = vld [vmem:[%s14021_s7 + $0x1e0] sm:$0xf0] }
 0x401   : > { %5581 = vmatpush.bf16.msrb.mxu3 %v8813_v60  ;;  %v9005_v37 = vor.u32 %v10219_v56, %v9004_v31  ;;  %v10019_v39 = vld [vmem:[%s14021_s7 + $0x5c] sm:$0xf0]  ;;  %5571 = vmatpush.bf16.msra.mxu2 %v8461_v41  ;;  %v10119_v31 = vld [vmem:[%s14021_s7 + $0x384] sm:$0xf] }
 0x402   : > { %v3883_v1 = vadd.f32 %v3882_v9, %v3864_v33  ;;  %v8205_v45 = vor.u32 %v10019_v39, %v8204_v42  ;;  %v10211_v60 = vld [vmem:[%s14021_s7 + $0x65c] sm:$0xf0]  ;;  %v3868_v33 = vpop.f32.mrf.mxu1  ;;  %v10183_v42 = vld [vmem:[%s14021_s7 + $0x584] sm:$0xf] }
 0x403   : > { %v11446_v38 = vpop.f32.mrf.mxu3  ;;  %v8940_v12 = vld [vmem:[%s14021_s7 + $0x600] sm:$0xf]  ;;  %v8878_v39 = vld [vmem:[%s14021_s7 + $0x5a0] sm:$0xf0] }
 0x404   : > { %v3828_v63 = vadd.f32 %v11446_v38, %v3809_v48  ;;  %v8269_v38 = vor.u32 %v10035_v3, %v8268_v44  ;;  %5596 = vmatpush.bf16.msra.mxu0 %v9005_v37  ;;  %v10147_v48 = vld [vmem:[%s14021_s7 + $0x45c] sm:$0xf0]  ;;  %v8334_v41 = vld [vmem:[%s14021_s7 + $0x160] sm:$0xf0] }
 0x405   : > { %5582 = vmatpush.bf16.msrb.mxu3 %v8781_v55  ;;  %v8717_v9 = vor.u32 %v10147_v48, %v8716_v6  ;;  %v10203_v17 = vld [vmem:[%s14021_s7 + $0x61c] sm:$0xf0]  ;;  %v10063_v55 = vld [vmem:[%s14021_s7 + $0x1c4] sm:$0xf] }
 0x406   : > { %v3847_v14 = vadd.f32 %v11442_v61, %v3828_v63  ;;  %5556 = vmatpush.bf16.msra.mxu1 %v8269_v38  ;;  %v10027_v61 = vld [vmem:[%s14021_s7 + $0x9c] sm:$0xf0]  ;;  %v8973_v63 = vor.u32 %v10211_v60, %v8972_v59  ;;  %v9134_v6 = vld [vmem:[%s14021_s7 + $0x7a0] sm:$0xf0] }
 0x407   : > { %v8237_v29 = vor.u32 %v10027_v61, %v8236_v24  ;;  %v8684_v38 = vld [vmem:[%s14021_s7 + $0x400] sm:$0xf]  ;;  %v8654_v24 = vld [vmem:[%s14021_s7 + $0x3e0] sm:$0xf0] }
 0x408   : > { %v3866_v32 = vadd.f32 %v3865_v21, %v3847_v14  ;;  %5597 = vmatpush.bf16.msra.mxu0 %v8973_v63  ;;  %v10191_v61 = vld [vmem:[%s14021_s7 + $0x5c4] sm:$0xf] }
 0x409   : > { %5583 = vmatpush.bf16.msrb.mxu3 %v8749_v27  ;;  %v8366_v27 = vld [vmem:[%s14021_s7 + $0x1a0] sm:$0xf0] }
 0x40a   : > { %5557 = vmatpush.bf16.msra.mxu1 %v8237_v29  ;;  %v8910_v29 = vld [vmem:[%s14021_s7 + $0x5e0] sm:$0xf0]  ;;  %v8369_v37 = vor.u32 %v10055_v13, %v8366_v27  ;;  %v3870_v59 = vpop.f32.mrf.mxu1  ;;  %v3927_v27 = vpop.f32.mrf.mxu0 }
 0x40b   : > { %v11472_v8 = vpop.f32.mrf.mxu3  ;;  %v8913_v26 = vor.u32 %v10191_v61, %v8910_v29  ;;  %v10047_v48 = vld [vmem:[%s14021_s7 + $0x144] sm:$0xf] }
 0x40c   : > { %v3831_v30 = vadd.f32 %v11472_v8, %v3812_v23  ;;  %v3884_v8 = vpop.f32.mrf.mxu2  ;;  %v8401_v23 = vor.u32 %v10063_v55, %v8398_v19  ;;  %v8337_v60 = vor.u32 %v10047_v48, %v8334_v41  ;;  %v8590_v63 = vld [vmem:[%s14021_s7 + $0x360] sm:$0xf0] }
 0x40d   : > { %v3885_v62 = vadd.f32 %v3884_v8, %v3866_v32  ;;  %5584 = vmatpush.bf16.msrb.mxu3 %v8717_v9  ;;  %v8622_v8 = vld [vmem:[%s14021_s7 + $0x3a0] sm:$0xf0] }
 0x40e   : > { %v3850_v35 = vadd.f32 %v11444_v58, %v3831_v30  ;;  %5558 = vmatpush.bf16.msra.mxu1 %v8205_v45  ;;  %v8172_v58 = vld [vmem:[%s14021_s7] sm:$0xf]  ;;  %v9169_v30 = vor.u32 %v10255_v50, %v9166_v54  ;;  %v8881_v45 = vor.u32 %v10183_v42, %v8878_v39  ;;  %v10111_v9 = vld [vmem:[%s14021_s7 + $0x344] sm:$0xf]  ;;  %v8916_v42 = vld [vmem:[%s14021_s7 + $0x5c8] sm:$0xf] }
 0x40f   : > { %v8173_v10 = vor.u32 %v10011_v0, %v8172_v58  ;;  %v10239_v58 = vld [vmem:[%s14021_s7 + $0x744] sm:$0xf] }
 0x410   : > { %v3869_v7 = vadd.f32 %v3868_v33, %v3850_v35  ;;  %v9137_v35 = vor.u32 %v10247_v47, %v9134_v6  ;;  %v8593_v33 = vor.u32 %v10111_v9, %v8590_v63  ;;  %v8270_v29 = vld [vmem:[%s14021_s7 + $0xe0] sm:$0xf0] }
 0x411   : > { %v10095_v50 = vld [vmem:[%s14021_s7 + $0x2c4] sm:$0xf] }
 0x412   : > { %5559 = vmatpush.bf16.msra.mxu1 %v8173_v10  ;;  %v9102_v10 = vld [vmem:[%s14021_s7 + $0x760] sm:$0xf0] }
 0x413   : > { %v11527_v43 = vpop.f32.mrf.mxu3  ;;  %v10159_v13 = vld [vmem:[%s14021_s7 + $0x4c4] sm:$0xf] }
 0x414   : > { %v3833_v4 = vadd.f32 %v11527_v43, %v3814_v46  ;;  %v8941_v43 = vor.u32 %v10203_v17, %v8940_v12  ;;  %v3887_v21 = vpop.f32.mrf.mxu2  ;;  %v10175_v46 = vld [vmem:[%s14021_s7 + $0x544] sm:$0xf] }
 0x415   : > { %v3888_v32 = vadd.f32 %v3887_v21, %v3869_v7  ;;  %v9105_v7 = vor.u32 %v10239_v58, %v9102_v10  ;;  %v8558_v12 = vld [vmem:[%s14021_s7 + $0x320] sm:$0xf0] }
 0x416   : > { %5598 = vmatpush.bf16.msra.mxu0 %v8941_v43  ;;  %5604 = vmatpush.bf16.msrb.mxu1 %v8401_v23  ;;  %v3852_v56 = vadd.f32 %v11492_v15, %v3833_v4  ;;  %v8625_v15 = vor.u32 %v10119_v31, %v8622_v8  ;;  %v10167_v17 = vld [vmem:[%s14021_s7 + $0x504] sm:$0xf] }
 0x417   : > { %v8814_v21 = vld [vmem:[%s14021_s7 + $0x520] sm:$0xf0] }
 0x418   : > { %v10231_v23 = vld [vmem:[%s14021_s7 + $0x704] sm:$0xf]  ;;  %v8817_v61 = vor.u32 %v10167_v17, %v8814_v21 }
 0x419   : > { %v9038_v48 = vld [vmem:[%s14021_s7 + $0x6e0] sm:$0xf0] }
 0x41a   : > { %5643 = vmatpush.bf16.msrb.mxu0 %v9169_v30  ;;  %5605 = vmatpush.bf16.msrb.mxu1 %v8369_v37  ;;  %v8526_v30 = vld [vmem:[%s14021_s7 + $0x2e0] sm:$0xf0]  ;;  %v9041_v41 = vor.u32 %v10223_v18, %v9038_v48  ;;  %v10196_v18 = vld [vmem:[%s14021_s7 + $0x5e4] sm:$0xf0] }
 0x41b   : > { %v3901_v5 = vpop.f32.mrf.mxu3  ;;  %v8238_v9 = vld [vmem:[%s14021_s7 + $0xa0] sm:$0xf0]  ;;  %v9172_v48 = vld [vmem:[%s14021_s7 + $0x7c8] sm:$0xf] }
 0x41c   : > { %v3902_v28 = vadd.f32 %v3901_v5, %v3883_v1  ;;  %v8685_v1 = vor.u32 %v10139_v20, %v8684_v38  ;;  %v10127_v5 = vld [vmem:[%s14021_s7 + $0x3c4] sm:$0xf]  ;;  %v3889_v4 = vpop.f32.mrf.mxu2 }
 0x41d   : > { %v8302_v38 = vld [vmem:[%s14021_s7 + $0x120] sm:$0xf0] }
 0x41e   : > { %v3921_v34 = vadd.f32 %v3920_v2, %v3902_v28  ;;  %v8428_v2 = vld [vmem:[%s14021_s7 + $0x200] sm:$0xf]  ;;  %5585 = vmatpush.bf16.msrb.mxu3 %v8685_v1  ;;  %v8657_v28 = vor.u32 %v10127_v5, %v8654_v24  ;;  %5644 = vmatpush.bf16.msrb.mxu0 %v9137_v35  ;;  %v10103_v20 = vld [vmem:[%s14021_s7 + $0x304] sm:$0xf] }
 0x41f   : > { %v8429_v11 = vor.u32 %v10075_v57, %v8428_v2  ;;  %v10039_v57 = vld [vmem:[%s14021_s7 + $0x104] sm:$0xf]  ;;  %5606 = vmatpush.bf16.msrb.mxu1 %v8337_v60  ;;  %v8561_v19 = vor.u32 %v10103_v20, %v8558_v12 }
 0x420   : > { %v3932_v22 = vmul.f32 %v11583_v16, %v3921_v34  ;;  %v9070_v5 = vld [vmem:[%s14021_s7 + $0x720] sm:$0xf0] }
 0x421   : > { %5572 = vmatpush.bf16.msra.mxu2 %v8429_v11  ;;  %v8305_v11 = vor.u32 %v10039_v57, %v8302_v38  ;;  %v8494_v60 = vld [vmem:[%s14021_s7 + $0x2a0] sm:$0xf0] }
 0x422   : > { %v3938_v52 = vadd.f32 %v11615_v36, %v3932_v22  ;;  %5630 = vmatpush.bf16.msra.mxu3 %v8913_v26  ;;  %5645 = vmatpush.bf16.msrb.mxu0 %v9105_v7  ;;  %v8750_v63 = vld [vmem:[%s14021_s7 + $0x4a0] sm:$0xf0] }
 0x423   : > { %v3903_v51 = vpop.f32.mrf.mxu3  ;;  %5607 = vmatpush.bf16.msrb.mxu1 %v8305_v11  ;;  %v9006_v58 = vld [vmem:[%s14021_s7 + $0x6a0] sm:$0xf0] }
 0x424   : > { %v3942_v44 = vmax.f32 %v3938_v52, 0.0  ;;  %v3904_v3 = vadd.f32 %v3903_v51, %v3885_v62  ;;  %v3871_v62 = vadd.f32 %v3870_v59, %v3852_v56  ;;  %v8846_v51 = vld [vmem:[%s14021_s7 + $0x560] sm:$0xf0] }
 0x425   : > { %5617 = vmatpush.bf16.msrb.mxu2 %v8657_v28  ;;  %v10031_v28 = vld [vmem:[%s14021_s7 + $0xc4] sm:$0xf] }
 0x426   : > { %3946 = vst.msk [vmem:[#allocation8] sm:$0xff] %vm2898_vm3, %v3942_v44  ;;  %v3923_v14 = vadd.f32 %v3922_v53, %v3904_v3  ;;  %5631 = vmatpush.bf16.msra.mxu3 %v8881_v45  ;;  %v8849_v3 = vor.u32 %v10175_v46, %v8846_v51  ;;  %v3890_v55 = vadd.f32 %v3889_v4, %v3871_v62  ;;  %v10087_v59 = vld [vmem:[%s14021_s7 + $0x284] sm:$0xf] }
 0x427   : > { %v8273_v37 = vor.u32 %v10031_v28, %v8270_v29  ;;  %v8497_v51 = vor.u32 %v10087_v59, %v8494_v60  ;;  %v8462_v57 = vld [vmem:[%s14021_s7 + $0x260] sm:$0xf0] }
 0x428   : > { %v3933_v25 = vmul.f32 %v11583_v16, %v3923_v14  ;;  %v10143_v38 = vld [vmem:[%s14021_s7 + $0x444] sm:$0xf] }
 0x429   : > { %5618 = vmatpush.bf16.msrb.mxu2 %v8625_v15  ;;  %v8782_v15 = vld [vmem:[%s14021_s7 + $0x4e0] sm:$0xf0]  ;;  %5608 = vmatpush.bf16.msrb.mxu1 %v8273_v37 }
 0x42a   : > { %v3939_v34 = vadd.f32 %v11615_v36, %v3933_v25  ;;  %5632 = vmatpush.bf16.msra.mxu3 %v8849_v3  ;;  %v9073_v25 = vor.u32 %v10231_v23, %v9070_v5  ;;  %v8785_v6 = vor.u32 %v10159_v13, %v8782_v15  ;;  %v10079_v3 = vld [vmem:[%s14021_s7 + $0x244] sm:$0xf]  ;;  %v10068_v15 = vld [vmem:[%s14021_s7 + $0x1e4] sm:$0xf0] }
 0x42b   : > { %v3906_v22 = vpop.f32.mrf.mxu3  ;;  %v8465_v7 = vor.u32 %v10079_v3, %v8462_v57  ;;  %v8718_v11 = vld [vmem:[%s14021_s7 + $0x460] sm:$0xf0]  ;;  %v9140_v3 = vld [vmem:[%s14021_s7 + $0x788] sm:$0xf] }
 0x42c   : > { %v3943_v49 = vmax.f32 %v3939_v34, 0.0  ;;  %v3907_v53 = vadd.f32 %v3906_v22, %v3888_v32  ;;  %v8529_v22 = vor.u32 %v10095_v50, %v8526_v30  ;;  %5646 = vmatpush.bf16.msrb.mxu0 %v9073_v25  ;;  %v8721_v20 = vor.u32 %v10143_v38, %v8718_v11  ;;  %v10207_v12 = vld [vmem:[%s14021_s7 + $0x644] sm:$0xf] }
 0x42d   : > { %v3950_v0 = vld [vmem:[#allocation8] sm:$0x1]  ;;  %v3951_v2 = vld [vmem:[#allocation8 + $0x1] sm:$0x1]  ;;  %v3960_v14 = vld [vmem:[#allocation8 + $0x2] sm:$0x1]  ;;  %5619 = vmatpush.bf16.msrb.mxu2 %v8593_v33 }
 0x42e   : > { %3947 = vst.msk [vmem:[#allocation8 + $0x8] sm:$0xff] %vm2898_vm3, %v3943_v49  ;;  %v3926_v52 = vadd.f32 %v3925_v40, %v3907_v53  ;;  %v3961_v1 = vld [vmem:[#allocation8 + $0x3] sm:$0x1]  ;;  %v3952_v31 = vmax.f32 %v3950_v0, %v3951_v2  ;;  %5633 = vmatpush.bf16.msra.mxu3 %v8817_v61  ;;  %v10023_v49 = vld [vmem:[%s14021_s7 + $0x84] sm:$0xf] }
 0x42f   : > { %v3962_v45 = vmax.f32 %v3960_v14, %v3961_v1  ;;  %v8241_v62 = vor.u32 %v10023_v49, %v8238_v9  ;;  %v10215_v33 = vld [vmem:[%s14021_s7 + $0x684] sm:$0xf]  ;;  %v10260_v9 = vld [vmem:[%s14021_s7 + $0x7e4] sm:$0xf0] }
 0x430   : > { %v3934_v44 = vmul.f32 %v11583_v16, %v3926_v52  ;;  %v10015_v0 = vld [vmem:[%s14021_s7 + $0x44] sm:$0xf]  ;;  %5647 = vmatpush.bf16.msrb.mxu0 %v9041_v41 }
 0x431   : > { %5620 = vmatpush.bf16.msrb.mxu2 %v8561_v19  ;;  %5609 = vmatpush.bf16.msrb.mxu1 %v8241_v62  ;;  %v8974_v17 = vld [vmem:[%s14021_s7 + $0x660] sm:$0xf0] }
 0x432   : > { %v3940_v43 = vadd.f32 %v11615_v36, %v3934_v44  ;;  %5634 = vmatpush.bf16.msra.mxu3 %v8785_v6  ;;  %v9009_v44 = vor.u32 %v10215_v33, %v9006_v58  ;;  %v10007_v14 = vld [vmem:[%s14021_s7 + $0x4] sm:$0xf]  ;;  %v8977_v1 = vor.u32 %v10207_v12, %v8974_v17  ;;  %v8372_v33 = vld [vmem:[%s14021_s7 + $0x188] sm:$0xf]  ;;  %v9173_v58 = vor.u32 %v10260_v9, %v9172_v48 }
 0x433   : > { %v3908_v24 = vpop.f32.mrf.mxu3  ;;  %v8430_v19 = vld [vmem:[%s14021_s7 + $0x220] sm:$0xf0]  ;;  %v8596_v12 = vld [vmem:[%s14021_s7 + $0x348] sm:$0xf] }
 0x434   : > { %v3944_v54 = vmax.f32 %v3940_v43, 0.0  ;;  %v3909_v26 = vadd.f32 %v3908_v24, %v3890_v55  ;;  %5648 = vmatpush.bf16.msrb.mxu0 %v9009_v44  ;;  %v8174_v43 = vld [vmem:[%s14021_s7 + $0x20] sm:$0xf0]  ;;  %v8884_v44 = vld [vmem:[%s14021_s7 + $0x588] sm:$0xf] }
 0x435   : > { %v3953_v56 = vld [vmem:[#allocation8 + $0x8] sm:$0x1]  ;;  %v3954_v34 = vld [vmem:[#allocation8 + $0x9] sm:$0x1]  ;;  %v3963_v32 = vld [vmem:[#allocation8 + $0xa] sm:$0x1]  ;;  %5621 = vmatpush.bf16.msrb.mxu2 %v8529_v22  ;;  %v8177_v21 = vor.u32 %v10007_v14, %v8174_v43 }
 0x436   : > { %v3955_v8 = vmax.f32 %v3953_v56, %v3954_v34  ;;  %v3964_v39 = vld [vmem:[#allocation8 + $0xb] sm:$0x1]  ;;  %3948 = vst.msk [vmem:[#allocation8 + $0x10] sm:$0xff] %vm2898_vm3, %v3944_v54  ;;  %v3928_v40 = vadd.f32 %v3927_v27, %v3909_v26  ;;  %v10071_v55 = vld [vmem:[%s14021_s7 + $0x204] sm:$0xf] }
 0x437   : > { %v3965_v47 = vmax.f32 %v3963_v32, %v3964_v39  ;;  %v10135_v23 = vld [vmem:[%s14021_s7 + $0x404] sm:$0xf]  ;;  %v8433_v61 = vor.u32 %v10071_v55, %v8430_v19  ;;  %v8404_v22 = vld [vmem:[%s14021_s7 + $0x1c8] sm:$0xf] }
 0x438   : > { %v3956_v53 = vmax.f32 %v3952_v31, %v3955_v8  ;;  %v3935_v35 = vmul.f32 %v11583_v16, %v3928_v40  ;;  %v10151_v16 = vld [vmem:[%s14021_s7 + $0x484] sm:$0xf]  ;;  %5649 = vmatpush.bf16.msrb.mxu0 %v8977_v1  ;;  %v8405_v59 = vor.u32 %v10068_v15, %v8404_v22  ;;  %v10116_v17 = vld [vmem:[%s14021_s7 + $0x364] sm:$0xf0] }
 0x439   : > { %v3966_v52 = vmax.f32 %v3962_v45, %v3965_v47  ;;  %v8753_v2 = vor.u32 %v10151_v16, %v8750_v63  ;;  %5622 = vmatpush.bf16.msrb.mxu2 %v8497_v51  ;;  %v8686_v5 = vld [vmem:[%s14021_s7 + $0x420] sm:$0xf0]  ;;  %v8660_v45 = vld [vmem:[%s14021_s7 + $0x3c8] sm:$0xf]  ;;  %v8917_v51 = vor.u32 %v10196_v18, %v8916_v42 }
 0x43a   : > { %3959 = vst.msk [vmem:[#allocation9] sm:$0x1] %vm11791_vm6, %v3956_v53  ;;  %v3941_v46 = vadd.f32 %v11615_v36, %v3935_v35  ;;  %v8206_v36 = vld [vmem:[%s14021_s7 + $0x60] sm:$0xf0]  ;;  %v8689_v50 = vor.u32 %v10135_v23, %v8686_v5  ;;  %v10132_v47 = vld [vmem:[%s14021_s7 + $0x3e4] sm:$0xf0] }
 0x43b   : > { %3967 = vst.msk [vmem:[#allocation9 + $0x1] sm:$0x1] %vm11791_vm6, %v3966_v52  ;;  %v8209_v4 = vor.u32 %v10015_v0, %v8206_v36  ;;  %5635 = vmatpush.bf16.msra.mxu3 %v8753_v2  ;;  %v10199_v24 = vld [vmem:[%s14021_s7 + $0x604] sm:$0xf]  ;;  %v8661_v60 = vor.u32 %v10132_v47, %v8660_v45  ;;  %v8628_v0 = vld [vmem:[%s14021_s7 + $0x388] sm:$0xf] }
 0x43c   : > { %v3945_v10 = vmax.f32 %v3941_v46, 0.0  ;;  %v8942_v25 = vld [vmem:[%s14021_s7 + $0x620] sm:$0xf0]  ;;  %v10060_v46 = vld [vmem:[%s14021_s7 + $0x1a4] sm:$0xf0] }
 0x43d   : > { %5610 = vmatpush.bf16.msrb.mxu1 %v8209_v4  ;;  %5623 = vmatpush.bf16.msrb.mxu2 %v8465_v7  ;;  %v3968_v28 = vld [vmem:[#allocation8 + $0x10] sm:$0x1]  ;;  %v3969_v29 = vld [vmem:[#allocation8 + $0x11] sm:$0x1]  ;;  %v8945_v54 = vor.u32 %v10199_v24, %v8942_v25  ;;  %v3976_v26 = vld [vmem:[#allocation8 + $0x12] sm:$0x1]  ;;  %v8373_v57 = vor.u32 %v10060_v46, %v8372_v33 }
 0x43e   : > { %3949 = vst.msk [vmem:[#allocation8 + $0x18] sm:$0xff] %vm2898_vm3, %v3945_v10  ;;  %v3977_v30 = vld [vmem:[#allocation8 + $0x13] sm:$0x1]  ;;  %v3970_v56 = vmax.f32 %v3968_v28, %v3969_v29  ;;  %v10124_v2 = vld [vmem:[%s14021_s7 + $0x3a4] sm:$0xf0] }
 0x43f   : > { %5636 = vmatpush.bf16.msra.mxu3 %v8721_v20  ;;  %v3978_v37 = vmax.f32 %v3976_v26, %v3977_v30  ;;  %5650 = vmatpush.bf16.msrb.mxu0 %v8945_v54  ;;  %v10188_v36 = vld [vmem:[%s14021_s7 + $0x5a4] sm:$0xf0]  ;;  %v8629_v38 = vor.u32 %v10124_v2, %v8628_v0 }
 0x440   : > { %v10252_v10 = vld [vmem:[%s14021_s7 + $0x7a4] sm:$0xf0]  ;;  %v8885_v11 = vor.u32 %v10188_v36, %v8884_v44 }
 0x441   : > { %5611 = vmatpush.bf16.msrb.mxu1 %v8177_v21  ;;  %5624 = vmatpush.bf16.msrb.mxu2 %v8433_v61  ;;  %v8340_v4 = vld [vmem:[%s14021_s7 + $0x148] sm:$0xf]  ;;  %v9141_v20 = vor.u32 %v10252_v10, %v9140_v3  ;;  %v8597_v21 = vor.u32 %v10116_v17, %v8596_v12 }
 0x442   : > { %v10052_v7 = vld [vmem:[%s14021_s7 + $0x164] sm:$0xf0] }
 0x443   : > { %5637 = vmatpush.bf16.msra.mxu3 %v8689_v50  ;;  %v8852_v14 = vld [vmem:[%s14021_s7 + $0x548] sm:$0xf]  ;;  %v8341_v19 = vor.u32 %v10052_v7, %v8340_v4 }
 0x444   : > { %v10180_v1 = vld [vmem:[%s14021_s7 + $0x564] sm:$0xf0] }
 0x445   : > { %v3971_v13 = vld [vmem:[#allocation8 + $0x18] sm:$0x1]  ;;  %v3972_v27 = vld [vmem:[#allocation8 + $0x19] sm:$0x1]  ;;  %v3979_v31 = vld [vmem:[#allocation8 + $0x1a] sm:$0x1]  ;;  %v8853_v24 = vor.u32 %v10180_v1, %v8852_v14 }
 0x446   : > { %v3973_v34 = vmax.f32 %v3971_v13, %v3972_v27  ;;  %v3980_v32 = vld [vmem:[#allocation8 + $0x1b] sm:$0x1]  ;;  %v9108_v43 = vld [vmem:[%s14021_s7 + $0x748] sm:$0xf] }
 0x447   : > { %v3981_v8 = vmax.f32 %v3979_v31, %v3980_v32  ;;  %v10244_v55 = vld [vmem:[%s14021_s7 + $0x764] sm:$0xf0] }
 0x448   : > { %v3974_v39 = vmax.f32 %v3970_v56, %v3973_v34  ;;  %v8308_v23 = vld [vmem:[%s14021_s7 + $0x108] sm:$0xf]  ;;  %v9109_v61 = vor.u32 %v10244_v55, %v9108_v43 }
 0x449   : > { %v3982_v40 = vmax.f32 %v3978_v37, %v3981_v8  ;;  %v10044_v5 = vld [vmem:[%s14021_s7 + $0x124] sm:$0xf0] }
 0x44a   : > { %3975 = vst.msk [vmem:[#allocation9 + $0x2] sm:$0x1] %vm11791_vm6, %v3974_v39  ;;  %v8564_v25 = vld [vmem:[%s14021_s7 + $0x308] sm:$0xf]  ;;  %v8309_v30 = vor.u32 %v10044_v5, %v8308_v23  ;;  %v10128_v23 = vld [vmem:[%s14021_s7 + $0x3cc] sm:$0xf] }
 0x44b   : > { %3983 = vst.msk [vmem:[#allocation9 + $0x3] sm:$0x1] %vm11791_vm6, %v3982_v40  ;;  %v10108_v28 = vld [vmem:[%s14021_s7 + $0x324] sm:$0xf0]  ;;  %v8662_v5 = vld [vmem:[%s14021_s7 + $0x3e8] sm:$0xf0] }
 0x44c   : > { %v8820_v29 = vld [vmem:[%s14021_s7 + $0x508] sm:$0xf]  ;;  %v8565_v13 = vor.u32 %v10108_v28, %v8564_v25  ;;  %v8918_v28 = vld [vmem:[%s14021_s7 + $0x5e8] sm:$0xf0] }
 0x44d   : > { %v10172_v50 = vld [vmem:[%s14021_s7 + $0x524] sm:$0xf0] }
 0x44e   : > { %v9076_v54 = vld [vmem:[%s14021_s7 + $0x708] sm:$0xf]  ;;  %v8821_v56 = vor.u32 %v10172_v50, %v8820_v29  ;;  %v10256_v29 = vld [vmem:[%s14021_s7 + $0x7cc] sm:$0xf] }
 0x44f   : > { %v10236_v26 = vld [vmem:[%s14021_s7 + $0x724] sm:$0xf0]  ;;  %v9174_v50 = vld [vmem:[%s14021_s7 + $0x7e8] sm:$0xf0] }
 0x450   : > { %v8276_v27 = vld [vmem:[%s14021_s7 + $0xc8] sm:$0xf]  ;;  %v9077_v34 = vor.u32 %v10236_v26, %v9076_v54 }
 0x451   : > { %v10036_v31 = vld [vmem:[%s14021_s7 + $0xe4] sm:$0xf0] }
 0x452   : > { %v3984_v6 = vld [vmem:[#allocation9] sm:$0xf]  ;;  %v8532_v32 = vld [vmem:[%s14021_s7 + $0x2c8] sm:$0xf]  ;;  %v8277_v15 = vor.u32 %v10036_v31, %v8276_v27  ;;  %v10056_v27 = vld [vmem:[%s14021_s7 + $0x18c] sm:$0xf] }
 0x453   : > { %v3986_v49 = vperm.slane %v3984_v6, 0  ;;  %v3987_v53 = vperm.slane %v3984_v6, 1  ;;  %v3988_v35 = vperm.slane %v3984_v6, 2  ;;  %v3989_v41 = vperm.slane %v3984_v6, 3  ;;  %v10100_v37 = vld [vmem:[%s14021_s7 + $0x2e4] sm:$0xf0] }
 0x454   : > { %v8788_v8 = vld [vmem:[%s14021_s7 + $0x4c8] sm:$0xf]  ;;  %v8533_v45 = vor.u32 %v10100_v37, %v8532_v32  ;;  %v8374_v31 = vld [vmem:[%s14021_s7 + $0x1a8] sm:$0xf0] }
 0x455   : > { %v11912_v52 = vpack.c.bf16 %v3986_v49, %v3986_v49  ;;  %v11914_v62 = vpack.c.bf16 %v3987_v53, %v3987_v53  ;;  %v11916_v16 = vpack.c.bf16 %v3988_v35, %v3988_v35  ;;  %v11918_v63 = vpack.c.bf16 %v3989_v41, %v3989_v41  ;;  %v10164_v39 = vld [vmem:[%s14021_s7 + $0x4e4] sm:$0xf0]  ;;  %v10120_v32 = vld [vmem:[%s14021_s7 + $0x38c] sm:$0xf] }
 0x456   : > { %v9044_v40 = vld [vmem:[%s14021_s7 + $0x6c8] sm:$0xf]  ;;  %v8789_v6 = vor.u32 %v10164_v39, %v8788_v8  ;;  %v8630_v37 = vld [vmem:[%s14021_s7 + $0x3a8] sm:$0xf0] }
 0x457   : > { %5560 = vmatmul.bf16.vlgmr.msra.gmra.mxu1 %v11912_v52  ;;  %5573 = vmatmul.bf16.vlgmr.msra.gmra.mxu2 %v11914_v62  ;;  %v10228_v22 = vld [vmem:[%s14021_s7 + $0x6e4] sm:$0xf0]  ;;  %v10184_v8 = vld [vmem:[%s14021_s7 + $0x58c] sm:$0xf] }
 0x458   : > { %5586 = vmatmul.bf16.vlgmr.msrb.gmra.mxu3 %v11916_v16  ;;  %5599 = vmatmul.bf16.vlgmr.msra.gmra.mxu0 %v11918_v63  ;;  %v8244_v47 = vld [vmem:[%s14021_s7 + $0x88] sm:$0xf]  ;;  %v9045_v18 = vor.u32 %v10228_v22, %v9044_v40  ;;  %v8886_v39 = vld [vmem:[%s14021_s7 + $0x5a8] sm:$0xf0] }
 0x459   : > { %5656 = vmatpush.bf16.msra.mxu1 %v8405_v59  ;;  %5669 = vmatpush.bf16.msra.mxu2 %v8661_v60  ;;  %v10028_v42 = vld [vmem:[%s14021_s7 + $0xa4] sm:$0xf0]  ;;  %v10248_v40 = vld [vmem:[%s14021_s7 + $0x78c] sm:$0xf] }
 0x45a   : > { %5682 = vmatpush.bf16.msrb.mxu3 %v8917_v51  ;;  %5695 = vmatpush.bf16.msra.mxu0 %v9173_v58  ;;  %v8500_v48 = vld [vmem:[%s14021_s7 + $0x288] sm:$0xf]  ;;  %v8245_v59 = vor.u32 %v10028_v42, %v8244_v47  ;;  %v9142_v22 = vld [vmem:[%s14021_s7 + $0x7a8] sm:$0xf0] }
 0x45b   : > { %v10092_v49 = vld [vmem:[%s14021_s7 + $0x2a4] sm:$0xf0]  ;;  %v10048_v47 = vld [vmem:[%s14021_s7 + $0x14c] sm:$0xf] }
 0x45c   : > { %v8756_v53 = vld [vmem:[%s14021_s7 + $0x488] sm:$0xf]  ;;  %v8501_v60 = vor.u32 %v10092_v49, %v8500_v48  ;;  %v8342_v42 = vld [vmem:[%s14021_s7 + $0x168] sm:$0xf0] }
 0x45d   : > { %5657 = vmatpush.bf16.msra.mxu1 %v8373_v57  ;;  %5670 = vmatpush.bf16.msra.mxu2 %v8629_v38  ;;  %v10156_v35 = vld [vmem:[%s14021_s7 + $0x4a4] sm:$0xf0]  ;;  %v10112_v48 = vld [vmem:[%s14021_s7 + $0x34c] sm:$0xf] }
 0x45e   : > { %5683 = vmatpush.bf16.msrb.mxu3 %v8885_v11  ;;  %5696 = vmatpush.bf16.msra.mxu0 %v9141_v20  ;;  %v9012_v41 = vld [vmem:[%s14021_s7 + $0x688] sm:$0xf]  ;;  %v8757_v51 = vor.u32 %v10156_v35, %v8756_v53  ;;  %v8598_v49 = vld [vmem:[%s14021_s7 + $0x368] sm:$0xf0] }
 0x45f   : > { %v10220_v9 = vld [vmem:[%s14021_s7 + $0x6a4] sm:$0xf0]  ;;  %v10176_v53 = vld [vmem:[%s14021_s7 + $0x54c] sm:$0xf] }
 0x460   : > { %v8212_v33 = vld [vmem:[%s14021_s7 + $0x48] sm:$0xf]  ;;  %v9013_v58 = vor.u32 %v10220_v9, %v9012_v41  ;;  %v8854_v35 = vld [vmem:[%s14021_s7 + $0x568] sm:$0xf0] }
 0x461   : > { %5658 = vmatpush.bf16.msra.mxu1 %v8341_v19  ;;  %5671 = vmatpush.bf16.msra.mxu2 %v8597_v21  ;;  %v10020_v46 = vld [vmem:[%s14021_s7 + $0x64] sm:$0xf0]  ;;  %v10064_v19 = vld [vmem:[%s14021_s7 + $0x1cc] sm:$0xf] }
 0x462   : > { %5684 = vmatpush.bf16.msrb.mxu3 %v8853_v24  ;;  %5697 = vmatpush.bf16.msra.mxu0 %v9109_v61  ;;  %v8468_v0 = vld [vmem:[%s14021_s7 + $0x248] sm:$0xf]  ;;  %v8213_v38 = vor.u32 %v10020_v46, %v8212_v33  ;;  %v8406_v21 = vld [vmem:[%s14021_s7 + $0x1e8] sm:$0xf0] }
 0x463   : > { %v10084_v2 = vld [vmem:[%s14021_s7 + $0x264] sm:$0xf0]  ;;  %v10192_v24 = vld [vmem:[%s14021_s7 + $0x5cc] sm:$0xf] }
 0x464   : > { %v8724_v44 = vld [vmem:[%s14021_s7 + $0x448] sm:$0xf]  ;;  %v8469_v4 = vor.u32 %v10084_v2, %v8468_v0  ;;  %v10240_v41 = vld [vmem:[%s14021_s7 + $0x74c] sm:$0xf] }
 0x465   : > { %5659 = vmatpush.bf16.msra.mxu1 %v8309_v30  ;;  %5672 = vmatpush.bf16.msra.mxu2 %v8565_v13  ;;  %v10148_v36 = vld [vmem:[%s14021_s7 + $0x464] sm:$0xf0]  ;;  %v8409_v30 = vor.u32 %v10064_v19, %v8406_v21  ;;  %v8665_v13 = vor.u32 %v10128_v23, %v8662_v5  ;;  %v9110_v9 = vld [vmem:[%s14021_s7 + $0x768] sm:$0xf0] }
 0x466   : > { %5685 = vmatpush.bf16.msrb.mxu3 %v8821_v56  ;;  %5698 = vmatpush.bf16.msra.mxu0 %v9077_v34  ;;  %v8980_v3 = vld [vmem:[%s14021_s7 + $0x648] sm:$0xf]  ;;  %v8725_v12 = vor.u32 %v10148_v36, %v8724_v44  ;;  %v8921_v56 = vor.u32 %v10192_v24, %v8918_v28  ;;  %v9177_v34 = vor.u32 %v10256_v29, %v9174_v50  ;;  %v10040_v33 = vld [vmem:[%s14021_s7 + $0x10c] sm:$0xf] }
 0x467   : > { %5612 = vmatmul.bf16.vlgmr.msrb.gmra.mxu1 %v11912_v52  ;;  %5625 = vmatmul.bf16.vlgmr.msrb.gmra.mxu2 %v11914_v62  ;;  %v10212_v10 = vld [vmem:[%s14021_s7 + $0x664] sm:$0xf0]  ;;  %v8310_v46 = vld [vmem:[%s14021_s7 + $0x128] sm:$0xf0] }
 0x468   : > { %5638 = vmatmul.bf16.vlgmr.msra.gmra.mxu3 %v11916_v16  ;;  %5651 = vmatmul.bf16.vlgmr.msrb.gmra.mxu0 %v11918_v63  ;;  %v8180_v57 = vld [vmem:[%s14021_s7 + $0x8] sm:$0xf]  ;;  %v8981_v17 = vor.u32 %v10212_v10, %v8980_v3  ;;  %v10104_v0 = vld [vmem:[%s14021_s7 + $0x30c] sm:$0xf] }
 0x469   : > { %5660 = vmatpush.bf16.msra.mxu1 %v8277_v15  ;;  %5673 = vmatpush.bf16.msra.mxu2 %v8533_v45  ;;  %v10012_v7 = vld [vmem:[%s14021_s7 + $0x24] sm:$0xf0]  ;;  %v8377_v15 = vor.u32 %v10056_v27, %v8374_v31  ;;  %v8633_v45 = vor.u32 %v10120_v32, %v8630_v37  ;;  %v8566_v2 = vld [vmem:[%s14021_s7 + $0x328] sm:$0xf0] }
 0x46a   : > { %5686 = vmatpush.bf16.msrb.mxu3 %v8789_v6  ;;  %5699 = vmatpush.bf16.msra.mxu0 %v9045_v18  ;;  %v8436_v11 = vld [vmem:[%s14021_s7 + $0x208] sm:$0xf]  ;;  %v8181_v61 = vor.u32 %v10012_v7, %v8180_v57  ;;  %v8889_v6 = vor.u32 %v10184_v8, %v8886_v39  ;;  %v9145_v18 = vor.u32 %v10248_v40, %v9142_v22  ;;  %v10168_v44 = vld [vmem:[%s14021_s7 + $0x50c] sm:$0xf] }
 0x46b   : > { %v10076_v20 = vld [vmem:[%s14021_s7 + $0x224] sm:$0xf0]  ;;  %v8822_v36 = vld [vmem:[%s14021_s7 + $0x528] sm:$0xf0]  ;;  %v8313_v57 = vor.u32 %v10040_v33, %v8310_v46  ;;  %v8668_v33 = vld [vmem:[%s14021_s7 + $0x3d0] sm:$0xf] }
 0x46c   : > { %v8692_v14 = vld [vmem:[%s14021_s7 + $0x408] sm:$0xf]  ;;  %v8437_v25 = vor.u32 %v10076_v20, %v8436_v11  ;;  %v10232_v3 = vld [vmem:[%s14021_s7 + $0x70c] sm:$0xf]  ;;  %v8825_v11 = vor.u32 %v10168_v44, %v8822_v36  ;;  %v10133_v46 = vld [vmem:[%s14021_s7 + $0x3ec] sm:$0xf0] }
 0x46d   : > { %5661 = vmatpush.bf16.msra.mxu1 %v8245_v59  ;;  %5674 = vmatpush.bf16.msra.mxu2 %v8501_v60  ;;  %v10140_v1 = vld [vmem:[%s14021_s7 + $0x424] sm:$0xf0]  ;;  %v8345_v59 = vor.u32 %v10048_v47, %v8342_v42  ;;  %v8601_v60 = vor.u32 %v10112_v48, %v8598_v49  ;;  %v9078_v10 = vld [vmem:[%s14021_s7 + $0x728] sm:$0xf0]  ;;  %v9180_v44 = vld [vmem:[%s14021_s7 + $0x7d0] sm:$0xf] }
 0x46e   : > { %5687 = vmatpush.bf16.msrb.mxu3 %v8757_v51  ;;  %5700 = vmatpush.bf16.msra.mxu0 %v9013_v58  ;;  %v8948_v43 = vld [vmem:[%s14021_s7 + $0x608] sm:$0xf]  ;;  %v8693_v54 = vor.u32 %v10140_v1, %v8692_v14  ;;  %v8857_v51 = vor.u32 %v10176_v53, %v8854_v35  ;;  %v9113_v58 = vor.u32 %v10240_v41, %v9110_v9  ;;  %v8278_v7 = vld [vmem:[%s14021_s7 + $0xe8] sm:$0xf0]  ;;  %v10261_v36 = vld [vmem:[%s14021_s7 + $0x7ec] sm:$0xf0] }
 0x46f   : > { %v10204_v55 = vld [vmem:[%s14021_s7 + $0x624] sm:$0xf0]  ;;  %v9081_v20 = vor.u32 %v10232_v3, %v9078_v10  ;;  %v10160_v14 = vld [vmem:[%s14021_s7 + $0x4cc] sm:$0xf] }
 0x470   : > { %v8949_v26 = vor.u32 %v10204_v55, %v8948_v43  ;;  %v8790_v1 = vld [vmem:[%s14021_s7 + $0x4e8] sm:$0xf0] }
 0x471   : > { %5662 = vmatpush.bf16.msra.mxu1 %v8213_v38  ;;  %5675 = vmatpush.bf16.msra.mxu2 %v8469_v4  ;;  %v8569_v38 = vor.u32 %v10104_v0, %v8566_v2  ;;  %v10032_v4 = vld [vmem:[%s14021_s7 + $0xcc] sm:$0xf]  ;;  %v8793_v24 = vor.u32 %v10160_v14, %v8790_v1  ;;  %v10197_v2 = vld [vmem:[%s14021_s7 + $0x5ec] sm:$0xf0] }
 0x472   : > { %5688 = vmatpush.bf16.msrb.mxu3 %v8725_v12  ;;  %5701 = vmatpush.bf16.msra.mxu0 %v8981_v17  ;;  %v10096_v12 = vld [vmem:[%s14021_s7 + $0x2cc] sm:$0xf]  ;;  %v8281_v19 = vor.u32 %v10032_v4, %v8278_v7  ;;  %v8380_v4 = vld [vmem:[%s14021_s7 + $0x190] sm:$0xf] }
 0x473   : > { %v8534_v17 = vld [vmem:[%s14021_s7 + $0x2e8] sm:$0xf0]  ;;  %v10061_v7 = vld [vmem:[%s14021_s7 + $0x1ac] sm:$0xf0] }
 0x474   : > { %v10224_v43 = vld [vmem:[%s14021_s7 + $0x6cc] sm:$0xf]  ;;  %v8537_v21 = vor.u32 %v10096_v12, %v8534_v17  ;;  %v8636_v12 = vld [vmem:[%s14021_s7 + $0x390] sm:$0xf] }
 0x475   : > { %5663 = vmatpush.bf16.msra.mxu1 %v8181_v61  ;;  %5676 = vmatpush.bf16.msra.mxu2 %v8437_v25  ;;  %v9046_v55 = vld [vmem:[%s14021_s7 + $0x6e8] sm:$0xf0]  ;;  %v10125_v17 = vld [vmem:[%s14021_s7 + $0x3ac] sm:$0xf0] }
 0x476   : > { %5689 = vmatpush.bf16.msrb.mxu3 %v8693_v54  ;;  %5702 = vmatpush.bf16.msra.mxu0 %v8949_v26  ;;  %v10024_v23 = vld [vmem:[%s14021_s7 + $0x8c] sm:$0xf]  ;;  %v9049_v61 = vor.u32 %v10224_v43, %v9046_v55  ;;  %v8892_v14 = vld [vmem:[%s14021_s7 + $0x590] sm:$0xf] }
 0x477   : > { %v8246_v5 = vld [vmem:[%s14021_s7 + $0xa8] sm:$0xf0]  ;;  %v10189_v1 = vld [vmem:[%s14021_s7 + $0x5ac] sm:$0xf0] }
 0x478   : > { %5664 = vmatmul.bf16.vlgmr.msra.gmra.mxu1 %v11912_v52  ;;  %5677 = vmatmul.bf16.vlgmr.msra.gmra.mxu2 %v11914_v62  ;;  %v10088_v25 = vld [vmem:[%s14021_s7 + $0x28c] sm:$0xf]  ;;  %v9148_v43 = vld [vmem:[%s14021_s7 + $0x790] sm:$0xf] }
 0x479   : > { %5708 = vmatpush.bf16.msrb.mxu1 %v8409_v30  ;;  %5721 = vmatpush.bf16.msrb.mxu2 %v8665_v13  ;;  %v8502_v28 = vld [vmem:[%s14021_s7 + $0x2a8] sm:$0xf0]  ;;  %v8249_v30 = vor.u32 %v10024_v23, %v8246_v5  ;;  %v10253_v55 = vld [vmem:[%s14021_s7 + $0x7ac] sm:$0xf0] }
 0x47a   : > { %5734 = vmatpush.bf16.msra.mxu3 %v8921_v56  ;;  %5747 = vmatpush.bf16.msrb.mxu0 %v9177_v34  ;;  %v10152_v29 = vld [vmem:[%s14021_s7 + $0x48c] sm:$0xf]  ;;  %v8505_v13 = vor.u32 %v10088_v25, %v8502_v28  ;;  %v8348_v23 = vld [vmem:[%s14021_s7 + $0x150] sm:$0xf] }
 0x47b   : > { %5690 = vmatmul.bf16.vlgmr.msrb.gmra.mxu3 %v11916_v16  ;;  %5703 = vmatmul.bf16.vlgmr.msra.gmra.mxu0 %v11918_v63  ;;  %v8758_v50 = vld [vmem:[%s14021_s7 + $0x4a8] sm:$0xf0]  ;;  %v10053_v5 = vld [vmem:[%s14021_s7 + $0x16c] sm:$0xf0] }
 0x47c   : > { %v10216_v54 = vld [vmem:[%s14021_s7 + $0x68c] sm:$0xf]  ;;  %v8761_v56 = vor.u32 %v10152_v29, %v8758_v50  ;;  %v8604_v25 = vld [vmem:[%s14021_s7 + $0x350] sm:$0xf] }
 0x47d   : > { %5709 = vmatpush.bf16.msrb.mxu1 %v8377_v15  ;;  %5722 = vmatpush.bf16.msrb.mxu2 %v8633_v45  ;;  %v9014_v26 = vld [vmem:[%s14021_s7 + $0x6a8] sm:$0xf0]  ;;  %v10117_v28 = vld [vmem:[%s14021_s7 + $0x36c] sm:$0xf0] }
 0x47e   : > { %5735 = vmatpush.bf16.msra.mxu3 %v8889_v6  ;;  %5748 = vmatpush.bf16.msrb.mxu0 %v9145_v18  ;;  %v10016_v27 = vld [vmem:[%s14021_s7 + $0x4c] sm:$0xf]  ;;  %v9017_v34 = vor.u32 %v10216_v54, %v9014_v26  ;;  %v8860_v29 = vld [vmem:[%s14021_s7 + $0x550] sm:$0xf] }
 0x47f   : > { %v8214_v31 = vld [vmem:[%s14021_s7 + $0x68] sm:$0xf0]  ;;  %v10181_v50 = vld [vmem:[%s14021_s7 + $0x56c] sm:$0xf0] }
 0x480   : > { %v10080_v32 = vld [vmem:[%s14021_s7 + $0x24c] sm:$0xf]  ;;  %v8217_v45 = vor.u32 %v10016_v27, %v8214_v31  ;;  %v9116_v54 = vld [vmem:[%s14021_s7 + $0x750] sm:$0xf] }
 0x481   : > { %5710 = vmatpush.bf16.msrb.mxu1 %v8345_v59  ;;  %5723 = vmatpush.bf16.msrb.mxu2 %v8601_v60  ;;  %v8470_v37 = vld [vmem:[%s14021_s7 + $0x268] sm:$0xf0]  ;;  %v8412_v59 = vld [vmem:[%s14021_s7 + $0x1d0] sm:$0xf] }
 0x482   : > { %5736 = vmatpush.bf16.msra.mxu3 %v8857_v51  ;;  %5749 = vmatpush.bf16.msrb.mxu0 %v9113_v58  ;;  %v10144_v8 = vld [vmem:[%s14021_s7 + $0x44c] sm:$0xf]  ;;  %v8473_v47 = vor.u32 %v10080_v32, %v8470_v37  ;;  %v10069_v60 = vld [vmem:[%s14021_s7 + $0x1ec] sm:$0xf0] }
 0x483   : > { %v8726_v39 = vld [vmem:[%s14021_s7 + $0x468] sm:$0xf0]  ;;  %v8924_v51 = vld [vmem:[%s14021_s7 + $0x5d0] sm:$0xf] }
 0x484   : > { %v10208_v40 = vld [vmem:[%s14021_s7 + $0x64c] sm:$0xf]  ;;  %v8729_v48 = vor.u32 %v10144_v8, %v8726_v39  ;;  %v10245_v26 = vld [vmem:[%s14021_s7 + $0x76c] sm:$0xf0] }
 0x485   : > { %5711 = vmatpush.bf16.msrb.mxu1 %v8313_v57  ;;  %5724 = vmatpush.bf16.msrb.mxu2 %v8569_v38  ;;  %v8982_v22 = vld [vmem:[%s14021_s7 + $0x668] sm:$0xf0]  ;;  %v8413_v57 = vor.u32 %v10069_v60, %v8412_v59  ;;  %v8669_v38 = vor.u32 %v10133_v46, %v8668_v33  ;;  %v8316_v27 = vld [vmem:[%s14021_s7 + $0x110] sm:$0xf] }
 0x486   : > { %5737 = vmatpush.bf16.msra.mxu3 %v8825_v11  ;;  %5750 = vmatpush.bf16.msrb.mxu0 %v9081_v20  ;;  %v10008_v15 = vld [vmem:[%s14021_s7 + $0xc] sm:$0xf]  ;;  %v8985_v49 = vor.u32 %v10208_v40, %v8982_v22  ;;  %v8925_v11 = vor.u32 %v10197_v2, %v8924_v51  ;;  %v9181_v20 = vor.u32 %v10261_v36, %v9180_v44  ;;  %v10045_v31 = vld [vmem:[%s14021_s7 + $0x12c] sm:$0xf0] }
 0x487   : > { %v8182_v42 = vld [vmem:[%s14021_s7 + $0x28] sm:$0xf0]  ;;  %v8572_v32 = vld [vmem:[%s14021_s7 + $0x310] sm:$0xf] }
 0x488   : > { %v10072_v6 = vld [vmem:[%s14021_s7 + $0x20c] sm:$0xf]  ;;  %v8185_v58 = vor.u32 %v10008_v15, %v8182_v42  ;;  %v10109_v37 = vld [vmem:[%s14021_s7 + $0x32c] sm:$0xf0]  ;;  %v8317_v15 = vor.u32 %v10045_v31, %v8316_v27  ;;  %v10129_v27 = vld [vmem:[%s14021_s7 + $0x3d4] sm:$0xf] }
 0x489   : > { %5712 = vmatpush.bf16.msrb.mxu1 %v8281_v19  ;;  %5725 = vmatpush.bf16.msrb.mxu2 %v8537_v21  ;;  %v8438_v18 = vld [vmem:[%s14021_s7 + $0x228] sm:$0xf0]  ;;  %v8381_v19 = vor.u32 %v10061_v7, %v8380_v4  ;;  %v8637_v21 = vor.u32 %v10125_v17, %v8636_v12  ;;  %v8828_v8 = vld [vmem:[%s14021_s7 + $0x510] sm:$0xf]  ;;  %v8670_v31 = vld [vmem:[%s14021_s7 + $0x3f0] sm:$0xf0] }
 0x48a   : > { %5738 = vmatpush.bf16.msra.mxu3 %v8793_v24  ;;  %5751 = vmatpush.bf16.msrb.mxu0 %v9049_v61  ;;  %v10136_v53 = vld [vmem:[%s14021_s7 + $0x40c] sm:$0xf]  ;;  %v8441_v0 = vor.u32 %v10072_v6, %v8438_v18  ;;  %v8893_v24 = vor.u32 %v10189_v1, %v8892_v14  ;;  %v9149_v61 = vor.u32 %v10253_v55, %v9148_v43  ;;  %v10173_v39 = vld [vmem:[%s14021_s7 + $0x52c] sm:$0xf0] }
 0x48b   : > { %v8694_v35 = vld [vmem:[%s14021_s7 + $0x428] sm:$0xf0]  ;;  %v9084_v40 = vld [vmem:[%s14021_s7 + $0x710] sm:$0xf]  ;;  %v8829_v6 = vor.u32 %v10173_v39, %v8828_v8  ;;  %v10257_v8 = vld [vmem:[%s14021_s7 + $0x7d4] sm:$0xf] }
 0x48c   : > { %v10200_v41 = vld [vmem:[%s14021_s7 + $0x60c] sm:$0xf]  ;;  %v8697_v3 = vor.u32 %v10136_v53, %v8694_v35  ;;  %v10237_v22 = vld [vmem:[%s14021_s7 + $0x72c] sm:$0xf0]  ;;  %v9182_v39 = vld [vmem:[%s14021_s7 + $0x7f0] sm:$0xf0] }
 0x48d   : > { %5713 = vmatpush.bf16.msrb.mxu1 %v8249_v30  ;;  %5726 = vmatpush.bf16.msrb.mxu2 %v8505_v13  ;;  %v8950_v9 = vld [vmem:[%s14021_s7 + $0x628] sm:$0xf0]  ;;  %v8349_v30 = vor.u32 %v10053_v5, %v8348_v23  ;;  %v8605_v13 = vor.u32 %v10117_v28, %v8604_v25  ;;  %v10037_v42 = vld [vmem:[%s14021_s7 + $0xec] sm:$0xf0]  ;;  %v9085_v18 = vor.u32 %v10237_v22, %v9084_v40 }
 0x48e   : > { %5739 = vmatpush.bf16.msra.mxu3 %v8761_v56  ;;  %5752 = vmatpush.bf16.msrb.mxu0 %v9017_v34  ;;  %v8953_v10 = vor.u32 %v10200_v41, %v8950_v9  ;;  %v8861_v56 = vor.u32 %v10181_v50, %v8860_v29  ;;  %v9117_v34 = vor.u32 %v10245_v26, %v9116_v54  ;;  %v8796_v53 = vld [vmem:[%s14021_s7 + $0x4d0] sm:$0xf] }
 0x48f   : > { %v10165_v35 = vld [vmem:[%s14021_s7 + $0x4ec] sm:$0xf0] }
 0x490   : > { %v9052_v41 = vld [vmem:[%s14021_s7 + $0x6d0] sm:$0xf]  ;;  %v8797_v51 = vor.u32 %v10165_v35, %v8796_v53  ;;  %v10185_v53 = vld [vmem:[%s14021_s7 + $0x594] sm:$0xf] }
 0x491   : > { %5714 = vmatpush.bf16.msrb.mxu1 %v8217_v45  ;;  %5727 = vmatpush.bf16.msrb.mxu2 %v8473_v47  ;;  %v8573_v45 = vor.u32 %v10109_v37, %v8572_v32  ;;  %v8284_v47 = vld [vmem:[%s14021_s7 + $0xd0] sm:$0xf]  ;;  %v8926_v37 = vld [vmem:[%s14021_s7 + $0x5f0] sm:$0xf0] }
 0x492   : > { %5740 = vmatpush.bf16.msra.mxu3 %v8729_v48  ;;  %5753 = vmatpush.bf16.msrb.mxu0 %v8985_v49  ;;  %v8540_v48 = vld [vmem:[%s14021_s7 + $0x2d0] sm:$0xf]  ;;  %v8285_v59 = vor.u32 %v10037_v42, %v8284_v47  ;;  %v10057_v47 = vld [vmem:[%s14021_s7 + $0x194] sm:$0xf] }
 0x493   : > { %v10101_v49 = vld [vmem:[%s14021_s7 + $0x2ec] sm:$0xf0]  ;;  %v8382_v42 = vld [vmem:[%s14021_s7 + $0x1b0] sm:$0xf0] }
 0x494   : > { %v10229_v9 = vld [vmem:[%s14021_s7 + $0x6ec] sm:$0xf0]  ;;  %v8541_v60 = vor.u32 %v10101_v49, %v8540_v48  ;;  %v10121_v48 = vld [vmem:[%s14021_s7 + $0x394] sm:$0xf] }
 0x495   : > { %5715 = vmatpush.bf16.msrb.mxu1 %v8185_v58  ;;  %5728 = vmatpush.bf16.msrb.mxu2 %v8441_v0  ;;  %v8252_v33 = vld [vmem:[%s14021_s7 + $0x90] sm:$0xf]  ;;  %v9053_v58 = vor.u32 %v10229_v9, %v9052_v41  ;;  %v8638_v49 = vld [vmem:[%s14021_s7 + $0x3b0] sm:$0xf0] }
 0x496   : > { %5741 = vmatpush.bf16.msra.mxu3 %v8697_v3  ;;  %5754 = vmatpush.bf16.msrb.mxu0 %v8953_v10  ;;  %v10029_v46 = vld [vmem:[%s14021_s7 + $0xac] sm:$0xf0]  ;;  %v8894_v35 = vld [vmem:[%s14021_s7 + $0x5b0] sm:$0xf0] }
 0x497   : > { %v8508_v0 = vld [vmem:[%s14021_s7 + $0x290] sm:$0xf]  ;;  %v10249_v41 = vld [vmem:[%s14021_s7 + $0x794] sm:$0xf] }
 0x498   : > { %5716 = vmatmul.bf16.vlgmr.msrb.gmra.mxu1 %v11912_v52  ;;  %5729 = vmatmul.bf16.vlgmr.msrb.gmra.mxu2 %v11914_v62  ;;  %v10093_v2 = vld [vmem:[%s14021_s7 + $0x2ac] sm:$0xf0]  ;;  %v9150_v9 = vld [vmem:[%s14021_s7 + $0x7b0] sm:$0xf0] }
 0x499   : > { %5760 = vmatpush.bf16.msra.mxu1 %v8413_v57  ;;  %5773 = vmatpush.bf16.msra.mxu2 %v8669_v38  ;;  %v8764_v44 = vld [vmem:[%s14021_s7 + $0x490] sm:$0xf]  ;;  %v8253_v57 = vor.u32 %v10029_v46, %v8252_v33  ;;  %v8509_v38 = vor.u32 %v10093_v2, %v8508_v0  ;;  %v10049_v33 = vld [vmem:[%s14021_s7 + $0x154] sm:$0xf] }
 0x49a   : > { %5786 = vmatpush.bf16.msrb.mxu3 %v8925_v11  ;;  %5799 = vmatpush.bf16.msra.mxu0 %v9181_v20  ;;  %v10157_v36 = vld [vmem:[%s14021_s7 + $0x4ac] sm:$0xf0]  ;;  %v8350_v46 = vld [vmem:[%s14021_s7 + $0x170] sm:$0xf0] }
 0x49b   : > { %5742 = vmatmul.bf16.vlgmr.msra.gmra.mxu3 %v11916_v16  ;;  %5755 = vmatmul.bf16.vlgmr.msrb.gmra.mxu0 %v11918_v63  ;;  %v9020_v3 = vld [vmem:[%s14021_s7 + $0x690] sm:$0xf]  ;;  %v8765_v11 = vor.u32 %v10157_v36, %v8764_v44  ;;  %v10113_v0 = vld [vmem:[%s14021_s7 + $0x354] sm:$0xf] }
 0x49c   : > { %v10221_v10 = vld [vmem:[%s14021_s7 + $0x6ac] sm:$0xf0]  ;;  %v8606_v2 = vld [vmem:[%s14021_s7 + $0x370] sm:$0xf0] }
 0x49d   : > { %5761 = vmatpush.bf16.msra.mxu1 %v8381_v19  ;;  %5774 = vmatpush.bf16.msra.mxu2 %v8637_v21  ;;  %v8220_v4 = vld [vmem:[%s14021_s7 + $0x50] sm:$0xf]  ;;  %v9021_v20 = vor.u32 %v10221_v10, %v9020_v3  ;;  %v10177_v44 = vld [vmem:[%s14021_s7 + $0x554] sm:$0xf] }
 0x49e   : > { %5787 = vmatpush.bf16.msrb.mxu3 %v8893_v24  ;;  %5800 = vmatpush.bf16.msra.mxu0 %v9149_v61  ;;  %v10021_v7 = vld [vmem:[%s14021_s7 + $0x6c] sm:$0xf0]  ;;  %v8862_v36 = vld [vmem:[%s14021_s7 + $0x570] sm:$0xf0] }
 0x49f   : > { %v8476_v12 = vld [vmem:[%s14021_s7 + $0x250] sm:$0xf]  ;;  %v8221_v21 = vor.u32 %v10021_v7, %v8220_v4  ;;  %v10241_v3 = vld [vmem:[%s14021_s7 + $0x754] sm:$0xf] }
 0x4a0   : > { %v10085_v17 = vld [vmem:[%s14021_s7 + $0x26c] sm:$0xf0]  ;;  %v9118_v10 = vld [vmem:[%s14021_s7 + $0x770] sm:$0xf0] }
 0x4a1   : > { %5762 = vmatpush.bf16.msra.mxu1 %v8349_v30  ;;  %5775 = vmatpush.bf16.msra.mxu2 %v8605_v13  ;;  %v8732_v14 = vld [vmem:[%s14021_s7 + $0x450] sm:$0xf]  ;;  %v8477_v23 = vor.u32 %v10085_v17, %v8476_v12  ;;  %v10065_v30 = vld [vmem:[%s14021_s7 + $0x1d4] sm:$0xf] }
 0x4a2   : > { %5788 = vmatpush.bf16.msrb.mxu3 %v8861_v56  ;;  %5801 = vmatpush.bf16.msra.mxu0 %v9117_v34  ;;  %v10149_v1 = vld [vmem:[%s14021_s7 + $0x46c] sm:$0xf0]  ;;  %v8414_v13 = vld [vmem:[%s14021_s7 + $0x1f0] sm:$0xf0] }
 0x4a3   : > { %v8988_v43 = vld [vmem:[%s14021_s7 + $0x650] sm:$0xf]  ;;  %v8733_v25 = vor.u32 %v10149_v1, %v8732_v14  ;;  %v10193_v56 = vld [vmem:[%s14021_s7 + $0x5d4] sm:$0xf] }
 0x4a4   : > { %v10213_v55 = vld [vmem:[%s14021_s7 + $0x66c] sm:$0xf0]  ;;  %v10041_v4 = vld [vmem:[%s14021_s7 + $0x114] sm:$0xf] }
 0x4a5   : > { %5763 = vmatpush.bf16.msra.mxu1 %v8317_v15  ;;  %5776 = vmatpush.bf16.msra.mxu2 %v8573_v45  ;;  %v8188_v19 = vld [vmem:[%s14021_s7 + $0x10] sm:$0xf]  ;;  %v8989_v28 = vor.u32 %v10213_v55, %v8988_v43  ;;  %v8417_v15 = vor.u32 %v10065_v30, %v8414_v13  ;;  %v8673_v45 = vor.u32 %v10129_v27, %v8670_v31  ;;  %v8318_v7 = vld [vmem:[%s14021_s7 + $0x130] sm:$0xf0] }
 0x4a6   : > { %5789 = vmatpush.bf16.msrb.mxu3 %v8829_v6  ;;  %5802 = vmatpush.bf16.msra.mxu0 %v9085_v18  ;;  %v10013_v5 = vld [vmem:[%s14021_s7 + $0x2c] sm:$0xf0]  ;;  %v8929_v6 = vor.u32 %v10193_v56, %v8926_v37  ;;  %v9185_v18 = vor.u32 %v10257_v8, %v9182_v39  ;;  %v10105_v12 = vld [vmem:[%s14021_s7 + $0x314] sm:$0xf] }
 0x4a7   : > { %v8444_v24 = vld [vmem:[%s14021_s7 + $0x210] sm:$0xf]  ;;  %v8189_v34 = vor.u32 %v10013_v5, %v8188_v19  ;;  %v8574_v17 = vld [vmem:[%s14021_s7 + $0x330] sm:$0xf0]  ;;  %v8321_v19 = vor.u32 %v10041_v4, %v8318_v7  ;;  %v8676_v4 = vld [vmem:[%s14021_s7 + $0x3d8] sm:$0xf] }
 0x4a8   : > { %v10077_v61 = vld [vmem:[%s14021_s7 + $0x22c] sm:$0xf0]  ;;  %v10169_v14 = vld [vmem:[%s14021_s7 + $0x514] sm:$0xf]  ;;  %v10134_v7 = vld [vmem:[%s14021_s7 + $0x3f4] sm:$0xf0] }
 0x4a9   : > { %5764 = vmatpush.bf16.msra.mxu1 %v8285_v59  ;;  %5777 = vmatpush.bf16.msra.mxu2 %v8541_v60  ;;  %v8700_v29 = vld [vmem:[%s14021_s7 + $0x410] sm:$0xf]  ;;  %v8445_v32 = vor.u32 %v10077_v61, %v8444_v24  ;;  %v8385_v59 = vor.u32 %v10057_v47, %v8382_v42  ;;  %v8641_v60 = vor.u32 %v10121_v48, %v8638_v49  ;;  %v8830_v1 = vld [vmem:[%s14021_s7 + $0x530] sm:$0xf0] }
 0x4aa   : > { %5790 = vmatpush.bf16.msrb.mxu3 %v8797_v51  ;;  %5803 = vmatpush.bf16.msra.mxu0 %v9053_v58  ;;  %v10141_v50 = vld [vmem:[%s14021_s7 + $0x42c] sm:$0xf0]  ;;  %v8897_v51 = vor.u32 %v10185_v53, %v8894_v35  ;;  %v9153_v58 = vor.u32 %v10249_v41, %v9150_v9  ;;  %v10233_v43 = vld [vmem:[%s14021_s7 + $0x714] sm:$0xf]  ;;  %v8833_v24 = vor.u32 %v10169_v14, %v8830_v1  ;;  %v9188_v14 = vld [vmem:[%s14021_s7 + $0x7d8] sm:$0xf] }
 0x4ab   : > { %v8956_v54 = vld [vmem:[%s14021_s7 + $0x610] sm:$0xf]  ;;  %v8701_v40 = vor.u32 %v10141_v50, %v8700_v29  ;;  %v9086_v55 = vld [vmem:[%s14021_s7 + $0x730] sm:$0xf0]  ;;  %v10262_v1 = vld [vmem:[%s14021_s7 + $0x7f4] sm:$0xf0] }
 0x4ac   : > { %v10205_v26 = vld [vmem:[%s14021_s7 + $0x62c] sm:$0xf0]  ;;  %v8286_v5 = vld [vmem:[%s14021_s7 + $0xf0] sm:$0xf0]  ;;  %v9089_v61 = vor.u32 %v10233_v43, %v9086_v55 }
 0x4ad   : > { %5765 = vmatpush.bf16.msra.mxu1 %v8253_v57  ;;  %5778 = vmatpush.bf16.msra.mxu2 %v8509_v38  ;;  %v8957_v22 = vor.u32 %v10205_v26, %v8956_v54  ;;  %v8353_v57 = vor.u32 %v10049_v33, %v8350_v46  ;;  %v8609_v38 = vor.u32 %v10113_v0, %v8606_v2  ;;  %v10161_v29 = vld [vmem:[%s14021_s7 + $0x4d4] sm:$0xf] }
 0x4ae   : > { %5791 = vmatpush.bf16.msrb.mxu3 %v8765_v11  ;;  %5804 = vmatpush.bf16.msra.mxu0 %v9021_v20  ;;  %v8865_v11 = vor.u32 %v10177_v44, %v8862_v36  ;;  %v9121_v20 = vor.u32 %v10241_v3, %v9118_v10  ;;  %v8798_v50 = vld [vmem:[%s14021_s7 + $0x4f0] sm:$0xf0] }
 0x4af   : > { %v10225_v54 = vld [vmem:[%s14021_s7 + $0x6d4] sm:$0xf]  ;;  %v8801_v56 = vor.u32 %v10161_v29, %v8798_v50  ;;  %v8900_v29 = vld [vmem:[%s14021_s7 + $0x598] sm:$0xf] }
 0x4b0   : > { %v9054_v26 = vld [vmem:[%s14021_s7 + $0x6f0] sm:$0xf0]  ;;  %v10190_v50 = vld [vmem:[%s14021_s7 + $0x5b4] sm:$0xf0] }
 0x4b1   : > { %5766 = vmatpush.bf16.msra.mxu1 %v8221_v21  ;;  %5779 = vmatpush.bf16.msra.mxu2 %v8477_v23  ;;  %v8577_v21 = vor.u32 %v10105_v12, %v8574_v17  ;;  %v10033_v23 = vld [vmem:[%s14021_s7 + $0xd4] sm:$0xf]  ;;  %v10198_v17 = vld [vmem:[%s14021_s7 + $0x5f4] sm:$0xf0] }
 0x4b2   : > { %5792 = vmatpush.bf16.msrb.mxu3 %v8733_v25  ;;  %5805 = vmatpush.bf16.msra.mxu0 %v8989_v28  ;;  %v10097_v25 = vld [vmem:[%s14021_s7 + $0x2d4] sm:$0xf]  ;;  %v8289_v30 = vor.u32 %v10033_v23, %v8286_v5  ;;  %v8388_v23 = vld [vmem:[%s14021_s7 + $0x198] sm:$0xf] }
 0x4b3   : > { %v8542_v28 = vld [vmem:[%s14021_s7 + $0x2f0] sm:$0xf0]  ;;  %v10062_v5 = vld [vmem:[%s14021_s7 + $0x1b4] sm:$0xf0] }
 0x4b4   : > { %v8545_v13 = vor.u32 %v10097_v25, %v8542_v28  ;;  %v10025_v27 = vld [vmem:[%s14021_s7 + $0x94] sm:$0xf]  ;;  %v8644_v25 = vld [vmem:[%s14021_s7 + $0x398] sm:$0xf] }
 0x4b5   : > { %5767 = vmatpush.bf16.msra.mxu1 %v8189_v34  ;;  %5780 = vmatpush.bf16.msra.mxu2 %v8445_v32  ;;  %v8254_v31 = vld [vmem:[%s14021_s7 + $0xb0] sm:$0xf0]  ;;  %v9057_v34 = vor.u32 %v10225_v54, %v9054_v26  ;;  %v10126_v28 = vld [vmem:[%s14021_s7 + $0x3b4] sm:$0xf0] }
 0x4b6   : > { %5793 = vmatpush.bf16.msrb.mxu3 %v8701_v40  ;;  %5806 = vmatpush.bf16.msra.mxu0 %v8957_v22  ;;  %v10089_v32 = vld [vmem:[%s14021_s7 + $0x294] sm:$0xf]  ;;  %v9156_v54 = vld [vmem:[%s14021_s7 + $0x798] sm:$0xf] }
 0x4b7   : > { %v8510_v37 = vld [vmem:[%s14021_s7 + $0x2b0] sm:$0xf0]  ;;  %v10254_v26 = vld [vmem:[%s14021_s7 + $0x7b4] sm:$0xf0] }
 0x4b8   : > { %5768 = vmatmul.bf16.vlgmr.msra.gmra.mxu1 %v11912_v52  ;;  %5781 = vmatmul.bf16.vlgmr.msra.gmra.mxu2 %v11914_v62  ;;  %v10153_v8 = vld [vmem:[%s14021_s7 + $0x494] sm:$0xf] }
 0x4b9   : > { %5812 = vmatpush.bf16.msrb.mxu1 %v8417_v15  ;;  %5825 = vmatpush.bf16.msrb.mxu2 %v8673_v45  ;;  %v8766_v39 = vld [vmem:[%s14021_s7 + $0x4b0] sm:$0xf0]  ;;  %v8257_v15 = vor.u32 %v10025_v27, %v8254_v31  ;;  %v8513_v45 = vor.u32 %v10089_v32, %v8510_v37  ;;  %v8356_v27 = vld [vmem:[%s14021_s7 + $0x158] sm:$0xf]  ;;  %v9157_v32 = vor.u32 %v10254_v26, %v9156_v54 }
 0x4ba   : > { %5838 = vmatpush.bf16.msra.mxu3 %v8929_v6  ;;  %5851 = vmatpush.bf16.msrb.mxu0 %v9185_v18  ;;  %v10217_v40 = vld [vmem:[%s14021_s7 + $0x694] sm:$0xf]  ;;  %v8769_v6 = vor.u32 %v10153_v8, %v8766_v39  ;;  %v10054_v31 = vld [vmem:[%s14021_s7 + $0x174] sm:$0xf0]  ;;  %v12750_v39 = vld [vmem:[%s14022_s8] sm:$0xff] }
 0x4bb   : > { %5794 = vmatmul.bf16.vlgmr.msrb.gmra.mxu3 %v11916_v16  ;;  %5807 = vmatmul.bf16.vlgmr.msra.gmra.mxu0 %v11918_v63  ;;  %v9022_v22 = vld [vmem:[%s14021_s7 + $0x6b0] sm:$0xf0]  ;;  %v10118_v37 = vld [vmem:[%s14021_s7 + $0x374] sm:$0xf0] }
 0x4bc   : > { %v10017_v47 = vld [vmem:[%s14021_s7 + $0x54] sm:$0xf]  ;;  %v9025_v18 = vor.u32 %v10217_v40, %v9022_v22  ;;  %v8868_v8 = vld [vmem:[%s14021_s7 + $0x558] sm:$0xf] }
 0x4bd   : > { %5813 = vmatpush.bf16.msrb.mxu1 %v8385_v59  ;;  %5826 = vmatpush.bf16.msrb.mxu2 %v8641_v60  ;;  %v8222_v42 = vld [vmem:[%s14021_s7 + $0x70] sm:$0xf0]  ;;  %v10182_v40 = vld [vmem:[%s14021_s7 + $0x574] sm:$0xf0] }
 0x4be   : > { %5839 = vmatpush.bf16.msra.mxu3 %v8897_v51  ;;  %5852 = vmatpush.bf16.msrb.mxu0 %v9153_v58  ;;  %v10081_v48 = vld [vmem:[%s14021_s7 + $0x254] sm:$0xf]  ;;  %v8225_v60 = vor.u32 %v10017_v47, %v8222_v42  ;;  %v9124_v22 = vld [vmem:[%s14021_s7 + $0x758] sm:$0xf]  ;;  %v8357_v47 = vor.u32 %v10054_v31, %v8356_v27 }
 0x4bf   : > { %v8478_v49 = vld [vmem:[%s14021_s7 + $0x270] sm:$0xf0]  ;;  %v9028_v54 = vld [vmem:[%s14021_s7 + $0x698] sm:$0xf] }
 0x4c0   : > { %v10145_v53 = vld [vmem:[%s14021_s7 + $0x454] sm:$0xf]  ;;  %v8481_v33 = vor.u32 %v10081_v48, %v8478_v49  ;;  %v8324_v48 = vld [vmem:[%s14021_s7 + $0x118] sm:$0xf] }
 0x4c1   : > { %5814 = vmatpush.bf16.msrb.mxu1 %v8353_v57  ;;  %5827 = vmatpush.bf16.msrb.mxu2 %v8609_v38  ;;  %v8734_v35 = vld [vmem:[%s14021_s7 + $0x470] sm:$0xf0]  ;;  %v8420_v57 = vld [vmem:[%s14021_s7 + $0x1d8] sm:$0xf] }
 0x4c2   : > { %5840 = vmatpush.bf16.msra.mxu3 %v8865_v11  ;;  %5853 = vmatpush.bf16.msrb.mxu0 %v9121_v20  ;;  %v10209_v41 = vld [vmem:[%s14021_s7 + $0x654] sm:$0xf]  ;;  %v8737_v0 = vor.u32 %v10145_v53, %v8734_v35  ;;  %v10070_v38 = vld [vmem:[%s14021_s7 + $0x1f4] sm:$0xf0]  ;;  %v8869_v53 = vor.u32 %v10182_v40, %v8868_v8 }
 0x4c3   : > { %v8990_v9 = vld [vmem:[%s14021_s7 + $0x670] sm:$0xf0]  ;;  %v8932_v11 = vld [vmem:[%s14021_s7 + $0x5d8] sm:$0xf] }
 0x4c4   : > { %v10009_v59 = vld [vmem:[%s14021_s7 + $0x14] sm:$0xf]  ;;  %v8993_v2 = vor.u32 %v10209_v41, %v8990_v9  ;;  %v10046_v49 = vld [vmem:[%s14021_s7 + $0x134] sm:$0xf0] }
 0x4c5   : > { %5815 = vmatpush.bf16.msrb.mxu1 %v8321_v19  ;;  %5828 = vmatpush.bf16.msrb.mxu2 %v8577_v21  ;;  %v8190_v46 = vld [vmem:[%s14021_s7 + $0x30] sm:$0xf0]  ;;  %v8421_v19 = vor.u32 %v10070_v38, %v8420_v57  ;;  %v8677_v21 = vor.u32 %v10134_v7, %v8676_v4  ;;  %v8580_v41 = vld [vmem:[%s14021_s7 + $0x318] sm:$0xf] }
 0x4c6   : > { %5841 = vmatpush.bf16.msra.mxu3 %v8833_v24  ;;  %5854 = vmatpush.bf16.msrb.mxu0 %v9089_v61  ;;  %v10073_v51 = vld [vmem:[%s14021_s7 + $0x214] sm:$0xf]  ;;  %v8193_v20 = vor.u32 %v10009_v59, %v8190_v46  ;;  %v8933_v24 = vor.u32 %v10198_v17, %v8932_v11  ;;  %v9189_v61 = vor.u32 %v10262_v1, %v9188_v14  ;;  %v10110_v9 = vld [vmem:[%s14021_s7 + $0x334] sm:$0xf0] }
 0x4c7   : > { %v8446_v58 = vld [vmem:[%s14021_s7 + $0x230] sm:$0xf0]  ;;  %v8836_v59 = vld [vmem:[%s14021_s7 + $0x518] sm:$0xf] }
 0x4c8   : > { %v10137_v44 = vld [vmem:[%s14021_s7 + $0x414] sm:$0xf]  ;;  %v8449_v12 = vor.u32 %v10073_v51, %v8446_v58  ;;  %v10238_v46 = vld [vmem:[%s14021_s7 + $0x734] sm:$0xf0]  ;;  %v8325_v58 = vor.u32 %v10046_v49, %v8324_v48 }
 0x4c9   : > { %5816 = vmatpush.bf16.msrb.mxu1 %v8289_v30  ;;  %5829 = vmatpush.bf16.msrb.mxu2 %v8545_v13  ;;  %v8702_v36 = vld [vmem:[%s14021_s7 + $0x430] sm:$0xf0]  ;;  %v8389_v30 = vor.u32 %v10062_v5, %v8388_v23  ;;  %v8645_v13 = vor.u32 %v10126_v28, %v8644_v25  ;;  %v8548_v57 = vld [vmem:[%s14021_s7 + $0x2d8] sm:$0xf] }
 0x4ca   : > { %5842 = vmatpush.bf16.msra.mxu3 %v8801_v56  ;;  %5855 = vmatpush.bf16.msrb.mxu0 %v9057_v34  ;;  %v10201_v3 = vld [vmem:[%s14021_s7 + $0x614] sm:$0xf]  ;;  %v8705_v43 = vor.u32 %v10137_v44, %v8702_v36  ;;  %v8612_v56 = vld [vmem:[%s14021_s7 + $0x358] sm:$0xf]  ;;  %v8901_v34 = vor.u32 %v10190_v50, %v8900_v29 }
 0x4cb   : > { %v8958_v10 = vld [vmem:[%s14021_s7 + $0x630] sm:$0xf0]  ;;  %v8613_v42 = vor.u32 %v10118_v37, %v8612_v56  ;;  %v10038_v44 = vld [vmem:[%s14021_s7 + $0xf4] sm:$0xf0] }
 0x4cc   : > { %v8961_v55 = vor.u32 %v10201_v3, %v8958_v10  ;;  %v10102_v38 = vld [vmem:[%s14021_s7 + $0x2f4] sm:$0xf0] }
 0x4cd   : > { %5817 = vmatpush.bf16.msrb.mxu1 %v8257_v15  ;;  %5830 = vmatpush.bf16.msrb.mxu2 %v8513_v45  ;;  %v10246_v15 = vld [vmem:[%s14021_s7 + $0x774] sm:$0xf0] }
 0x4ce   : > { %5843 = vmatpush.bf16.msra.mxu3 %v8769_v6  ;;  %5856 = vmatpush.bf16.msrb.mxu0 %v9025_v18  ;;  %v5536_v6 = vperm.slane %v12750_v39, 0  ;;  %v9125_v35 = vor.u32 %v10246_v15, %v9124_v22  ;;  %v8804_v4 = vld [vmem:[%s14021_s7 + $0x4d8] sm:$0xf] }
 0x4cf   : > { %v10230_v17 = vld [vmem:[%s14021_s7 + $0x6f4] sm:$0xf0] }
 0x4d0   : > { %v10030_v23 = vld [vmem:[%s14021_s7 + $0xb4] sm:$0xf0] }
 0x4d1   : > { %5818 = vmatpush.bf16.msrb.mxu1 %v8225_v60  ;;  %5831 = vmatpush.bf16.msrb.mxu2 %v8481_v33  ;;  %v10174_v60 = vld [vmem:[%s14021_s7 + $0x534] sm:$0xf0] }
 0x4d2   : > { %5844 = vmatpush.bf16.msra.mxu3 %v8737_v0  ;;  %5857 = vmatpush.bf16.msrb.mxu0 %v8993_v2  ;;  %v9092_v33 = vld [vmem:[%s14021_s7 + $0x718] sm:$0xf]  ;;  %v8581_v0 = vor.u32 %v10110_v9, %v8580_v41  ;;  %v8837_v36 = vor.u32 %v10174_v60, %v8836_v59 }
 0x4d3   : > { %v8292_v2 = vld [vmem:[%s14021_s7 + $0xd8] sm:$0xf]  ;;  %v9093_v3 = vor.u32 %v10238_v46, %v9092_v33 }
 0x4d4   : > { %v5561_v45 = vpop.f32.mrf.mxu1  ;;  %v10094_v25 = vld [vmem:[%s14021_s7 + $0x2b4] sm:$0xf0] }
 0x4d5   : > { %5819 = vmatpush.bf16.msrb.mxu1 %v8193_v20  ;;  %5832 = vmatpush.bf16.msrb.mxu2 %v8449_v12  ;;  %v5600_v18 = vpop.f32.mrf.mxu0  ;;  %v5562_v51 = vadd.f32 %v5561_v45, %v5536_v6  ;;  %v10166_v20 = vld [vmem:[%s14021_s7 + $0x4f4] sm:$0xf0] }
 0x4d6   : > { %5845 = vmatpush.bf16.msra.mxu3 %v8705_v43  ;;  %5858 = vmatpush.bf16.msrb.mxu0 %v8961_v55  ;;  %v9060_v12 = vld [vmem:[%s14021_s7 + $0x6d8] sm:$0xf]  ;;  %v8293_v43 = vor.u32 %v10038_v44, %v8292_v2  ;;  %v8549_v55 = vor.u32 %v10102_v38, %v8548_v57  ;;  %v8805_v5 = vor.u32 %v10166_v20, %v8804_v4  ;;  %v10130_v2 = vld [vmem:[%s14021_s7 + $0x3dc] sm:$0xf] }
 0x4d7   : > { %v8772_v28 = vld [vmem:[%s14021_s7 + $0x498] sm:$0xf]  ;;  %v8678_v44 = vld [vmem:[%s14021_s7 + $0x3f8] sm:$0xf0] }
 0x4d8   : > { %5820 = vmatmul.bf16.vlgmr.msrb.gmra.mxu1 %v11912_v52  ;;  %5833 = vmatmul.bf16.vlgmr.msrb.gmra.mxu2 %v11914_v62  ;;  %v10158_v50 = vld [vmem:[%s14021_s7 + $0x4b4] sm:$0xf0]  ;;  %v8934_v57 = vld [vmem:[%s14021_s7 + $0x5f8] sm:$0xf0] }
 0x4d9   : > { %5864 = vmatpush.bf16.msra.mxu1 %v8421_v19  ;;  %5877 = vmatpush.bf16.msra.mxu2 %v8677_v21  ;;  %v8260_v21 = vld [vmem:[%s14021_s7 + $0x98] sm:$0xf]  ;;  %v8773_v56 = vor.u32 %v10158_v50, %v8772_v28  ;;  %v10258_v38 = vld [vmem:[%s14021_s7 + $0x7dc] sm:$0xf] }
 0x4da   : > { %5890 = vmatpush.bf16.msrb.mxu3 %v8933_v24  ;;  %5903 = vmatpush.bf16.msra.mxu0 %v9189_v61  ;;  %v5574_v10 = vpop.f32.mrf.mxu2  ;;  %v9061_v24 = vor.u32 %v10230_v17, %v9060_v12  ;;  %v8516_v61 = vld [vmem:[%s14021_s7 + $0x298] sm:$0xf]  ;;  %v9190_v4 = vld [vmem:[%s14021_s7 + $0x7f8] sm:$0xf0]  ;;  %v8681_v17 = vor.u32 %v10130_v2, %v8678_v44 }
 0x4db   : > { %5846 = vmatmul.bf16.vlgmr.msra.gmra.mxu3 %v11916_v16  ;;  %5859 = vmatmul.bf16.vlgmr.msrb.gmra.mxu0 %v11918_v63  ;;  %v5575_v7 = vadd.f32 %v5574_v10, %v5562_v51  ;;  %v5587_v11 = vpop.f32.mrf.mxu3  ;;  %v10222_v26 = vld [vmem:[%s14021_s7 + $0x6b4] sm:$0xf0]  ;;  %v10250_v28 = vld [vmem:[%s14021_s7 + $0x79c] sm:$0xf] }
 0x4dc   : > { %v5563_v14 = vpop.f32.mrf.mxu1  ;;  %v8228_v27 = vld [vmem:[%s14021_s7 + $0x58] sm:$0xf]  ;;  %v9158_v50 = vld [vmem:[%s14021_s7 + $0x7b8] sm:$0xf0] }
 0x4dd   : > { %5865 = vmatpush.bf16.msra.mxu1 %v8389_v30  ;;  %5878 = vmatpush.bf16.msra.mxu2 %v8645_v13  ;;  %v5588_v1 = vadd.f32 %v5587_v11, %v5575_v7  ;;  %v5602_v19 = vpop.f32.mrf.mxu0  ;;  %v8261_v30 = vor.u32 %v10030_v23, %v8260_v21  ;;  %v8517_v13 = vor.u32 %v10094_v25, %v8516_v61  ;;  %v10022_v31 = vld [vmem:[%s14021_s7 + $0x74] sm:$0xf0]  ;;  %v10122_v23 = vld [vmem:[%s14021_s7 + $0x39c] sm:$0xf] }
 0x4de   : > { %5891 = vmatpush.bf16.msrb.mxu3 %v8901_v34  ;;  %5904 = vmatpush.bf16.msra.mxu0 %v9157_v32  ;;  %v9029_v34 = vor.u32 %v10222_v26, %v9028_v54  ;;  %v8484_v37 = vld [vmem:[%s14021_s7 + $0x258] sm:$0xf]  ;;  %v9193_v19 = vor.u32 %v10258_v38, %v9190_v4  ;;  %v8902_v25 = vld [vmem:[%s14021_s7 + $0x5b8] sm:$0xf0] }
 0x4df   : > { %v12829_v29 = vadd.f32 %v5600_v18, %v5588_v1  ;;  %v10086_v8 = vld [vmem:[%s14021_s7 + $0x274] sm:$0xf0]  ;;  %v8229_v18 = vor.u32 %v10022_v31, %v8228_v27  ;;  %v10058_v1 = vld [vmem:[%s14021_s7 + $0x19c] sm:$0xf]  ;;  %v9161_v31 = vor.u32 %v10250_v28, %v9158_v50 }
 0x4e0   : > { %v8740_v40 = vld [vmem:[%s14021_s7 + $0x458] sm:$0xf]  ;;  %v8485_v48 = vor.u32 %v10086_v8, %v8484_v37  ;;  %v8870_v37 = vld [vmem:[%s14021_s7 + $0x578] sm:$0xf0] }
 0x4e1   : > { %5866 = vmatpush.bf16.msra.mxu1 %v8357_v47  ;;  %5879 = vmatpush.bf16.msra.mxu2 %v8613_v42  ;;  %v10150_v15 = vld [vmem:[%s14021_s7 + $0x474] sm:$0xf0]  ;;  %v10242_v8 = vld [vmem:[%s14021_s7 + $0x75c] sm:$0xf] }
 0x4e2   : > { %5892 = vmatpush.bf16.msrb.mxu3 %v8869_v53  ;;  %5905 = vmatpush.bf16.msra.mxu0 %v9125_v35  ;;  %v5576_v32 = vpop.f32.mrf.mxu2  ;;  %v8996_v45 = vld [vmem:[%s14021_s7 + $0x658] sm:$0xf]  ;;  %v8741_v9 = vor.u32 %v10150_v15, %v8740_v40  ;;  %v9126_v40 = vld [vmem:[%s14021_s7 + $0x778] sm:$0xf0] }
 0x4e3   : > { %v5589_v22 = vpop.f32.mrf.mxu3  ;;  %v10214_v47 = vld [vmem:[%s14021_s7 + $0x674] sm:$0xf0]  ;;  %v10178_v32 = vld [vmem:[%s14021_s7 + $0x55c] sm:$0xf] }
 0x4e4   : > { %v12864_v42 = vpop.f32.mrf.mxu1  ;;  %v8196_v6 = vld [vmem:[%s14021_s7 + $0x18] sm:$0xf]  ;;  %v8997_v59 = vor.u32 %v10214_v47, %v8996_v45  ;;  %v10034_v2 = vld [vmem:[%s14021_s7 + $0xdc] sm:$0xf] }
 0x4e5   : > { %5867 = vmatpush.bf16.msra.mxu1 %v8325_v58  ;;  %5880 = vmatpush.bf16.msra.mxu2 %v8581_v0  ;;  %v12869_v49 = vpop.f32.mrf.mxu0  ;;  %v10014_v53 = vld [vmem:[%s14021_s7 + $0x34] sm:$0xf0]  ;;  %v10066_v58 = vld [vmem:[%s14021_s7 + $0x1dc] sm:$0xf] }
 0x4e6   : > { %5893 = vmatpush.bf16.msrb.mxu3 %v8837_v36  ;;  %5906 = vmatpush.bf16.msra.mxu0 %v9093_v3  ;;  %v8452_v35 = vld [vmem:[%s14021_s7 + $0x218] sm:$0xf]  ;;  %v8422_v0 = vld [vmem:[%s14021_s7 + $0x1f8] sm:$0xf0]  ;;  %v8197_v3 = vor.u32 %v10014_v53, %v8196_v6  ;;  %v9129_v53 = vor.u32 %v10242_v8, %v9126_v40 }
 0x4e7   : > { %v10078_v41 = vld [vmem:[%s14021_s7 + $0x234] sm:$0xf0]  ;;  %v10194_v36 = vld [vmem:[%s14021_s7 + $0x5dc] sm:$0xf]  ;;  %v8425_v12 = vor.u32 %v10066_v58, %v8422_v0 }
 0x4e8   : > { %v8708_v60 = vld [vmem:[%s14021_s7 + $0x418] sm:$0xf]  ;;  %v8453_v10 = vor.u32 %v10078_v41, %v8452_v35  ;;  %v10042_v6 = vld [vmem:[%s14021_s7 + $0x11c] sm:$0xf] }
 0x4e9   : > { %5868 = vmatpush.bf16.msra.mxu1 %v8293_v43  ;;  %5881 = vmatpush.bf16.msra.mxu2 %v8549_v55  ;;  %v10142_v33 = vld [vmem:[%s14021_s7 + $0x434] sm:$0xf0]  ;;  %v8390_v43 = vld [vmem:[%s14021_s7 + $0x1b8] sm:$0xf0]  ;;  %v8937_v55 = vor.u32 %v10194_v36, %v8934_v57 }
 0x4ea   : > { %5894 = vmatpush.bf16.msrb.mxu3 %v8805_v5  ;;  %5907 = vmatpush.bf16.msra.mxu0 %v9061_v24  ;;  %v8964_v46 = vld [vmem:[%s14021_s7 + $0x618] sm:$0xf]  ;;  %v8709_v7 = vor.u32 %v10142_v33, %v8708_v60  ;;  %v12916_v20 = vpop.f32.mrf.mxu2  ;;  %v8646_v5 = vld [vmem:[%s14021_s7 + $0x3b8] sm:$0xf0]  ;;  %v8393_v54 = vor.u32 %v10058_v1, %v8390_v43 }
 0x4eb   : > { %v10206_v51 = vld [vmem:[%s14021_s7 + $0x634] sm:$0xf0]  ;;  %v12918_v14 = vpop.f32.mrf.mxu3  ;;  %v10186_v24 = vld [vmem:[%s14021_s7 + $0x59c] sm:$0xf]  ;;  %v8649_v26 = vor.u32 %v10122_v23, %v8646_v5 }
 0x4ec   : > { %v8965_v11 = vor.u32 %v10206_v51, %v8964_v46  ;;  %v5615_v21 = vpop.f32.mrf.mxu1  ;;  %v8905_v27 = vor.u32 %v10186_v24, %v8902_v25  ;;  %v10106_v35 = vld [vmem:[%s14021_s7 + $0x31c] sm:$0xf] }
 0x4ed   : > { %5869 = vmatpush.bf16.msra.mxu1 %v8261_v30  ;;  %5882 = vmatpush.bf16.msra.mxu2 %v8517_v13  ;;  %v5654_v61 = vpop.f32.mrf.mxu0  ;;  %v10050_v30 = vld [vmem:[%s14021_s7 + $0x15c] sm:$0xf] }
 0x4ee   : > { %5895 = vmatpush.bf16.msrb.mxu3 %v8773_v56  ;;  %5908 = vmatpush.bf16.msra.mxu0 %v9029_v34  ;;  %v8358_v13 = vld [vmem:[%s14021_s7 + $0x178] sm:$0xf0] }
 0x4ef   : > { %v10114_v56 = vld [vmem:[%s14021_s7 + $0x35c] sm:$0xf]  ;;  %v8361_v15 = vor.u32 %v10050_v30, %v8358_v13 }
 0x4f0   : > { %v8614_v34 = vld [vmem:[%s14021_s7 + $0x378] sm:$0xf0] }
 0x4f1   : > { %5870 = vmatpush.bf16.msra.mxu1 %v8229_v18  ;;  %5883 = vmatpush.bf16.msra.mxu2 %v8485_v48  ;;  %v8617_v45 = vor.u32 %v10114_v56, %v8614_v34  ;;  %v8326_v18 = vld [vmem:[%s14021_s7 + $0x138] sm:$0xf0]  ;;  %v8873_v48 = vor.u32 %v10178_v32, %v8870_v37 }
 0x4f2   : > { %5896 = vmatpush.bf16.msrb.mxu3 %v8741_v9  ;;  %5909 = vmatpush.bf16.msra.mxu0 %v8997_v59  ;;  %v5628_v22 = vpop.f32.mrf.mxu2  ;;  %v8582_v41 = vld [vmem:[%s14021_s7 + $0x338] sm:$0xf0]  ;;  %v8329_v58 = vor.u32 %v10042_v6, %v8326_v18 }
 0x4f3   : > { %v5641_v47 = vpop.f32.mrf.mxu3  ;;  %v10170_v9 = vld [vmem:[%s14021_s7 + $0x51c] sm:$0xf]  ;;  %v8585_v0 = vor.u32 %v10106_v35, %v8582_v41 }
 0x4f4   : > { %v8838_v59 = vld [vmem:[%s14021_s7 + $0x538] sm:$0xf0] }
 0x4f5   : > { %5871 = vmatpush.bf16.msra.mxu1 %v8197_v3  ;;  %5884 = vmatpush.bf16.msra.mxu2 %v8453_v10  ;;  %v10234_v60 = vld [vmem:[%s14021_s7 + $0x71c] sm:$0xf]  ;;  %v12996_v46 = vpop.f32.mrf.mxu1  ;;  %v8841_v36 = vor.u32 %v10170_v9, %v8838_v59 }
 0x4f6   : > { %5897 = vmatpush.bf16.msrb.mxu3 %v8709_v7  ;;  %5910 = vmatpush.bf16.msra.mxu0 %v8965_v11  ;;  %v9094_v33 = vld [vmem:[%s14021_s7 + $0x738] sm:$0xf0] }
 0x4f7   : > { %v8294_v44 = vld [vmem:[%s14021_s7 + $0xf8] sm:$0xf0]  ;;  %v9097_v3 = vor.u32 %v10234_v60, %v9094_v33 }
 0x4f8   : > { %5872 = vmatmul.bf16.vlgmr.msra.gmra.mxu1 %v11912_v52  ;;  %5885 = vmatmul.bf16.vlgmr.msra.gmra.mxu2 %v11914_v62  ;;  %v12998_v51 = vpop.f32.mrf.mxu0  ;;  %v10098_v10 = vld [vmem:[%s14021_s7 + $0x2dc] sm:$0xf] }
 0x4f9   : > { %5916 = vmatpush.bf16.msrb.mxu1 %v8425_v12  ;;  %5929 = vmatpush.bf16.msrb.mxu2 %v8681_v17  ;;  %v8550_v57 = vld [vmem:[%s14021_s7 + $0x2f8] sm:$0xf0]  ;;  %v8297_v12 = vor.u32 %v10034_v2, %v8294_v44  ;;  %v9252_v2 = vld [vmem:[%s14023_s9 + $0x70] sm:$0xf]  ;;  %v10278_v44 = vld [vmem:[%s14023_s9 + $0x74] sm:$0xf0] }
 0x4fa   : > { %5942 = vmatpush.bf16.msra.mxu3 %v8937_v55  ;;  %5955 = vmatpush.bf16.msrb.mxu0 %v9193_v19  ;;  %v10162_v38 = vld [vmem:[%s14021_s7 + $0x4dc] sm:$0xf]  ;;  %v8553_v17 = vor.u32 %v10098_v10, %v8550_v57  ;;  %v9380_v10 = vld [vmem:[%s14023_s9 + $0x170] sm:$0xf] }
 0x4fb   : > { %5898 = vmatmul.bf16.vlgmr.msrb.gmra.mxu3 %v11916_v16  ;;  %5911 = vmatmul.bf16.vlgmr.msra.gmra.mxu0 %v11918_v63  ;;  %v8806_v4 = vld [vmem:[%s14021_s7 + $0x4f8] sm:$0xf0]  ;;  %v13030_v21 = vpop.f32.mrf.mxu2 }
 0x4fc   : > { %v10226_v7 = vld [vmem:[%s14021_s7 + $0x6dc] sm:$0xf]  ;;  %v8809_v55 = vor.u32 %v10162_v38, %v8806_v4  ;;  %v10310_v4 = vld [vmem:[%s14023_s9 + $0x174] sm:$0xf0] }
 0x4fd   : > { %5917 = vmatpush.bf16.msrb.mxu1 %v8393_v54  ;;  %5930 = vmatpush.bf16.msrb.mxu2 %v8649_v26  ;;  %v9062_v11 = vld [vmem:[%s14021_s7 + $0x6f8] sm:$0xf0]  ;;  %v5667_v54 = vpop.f32.mrf.mxu1 }
 0x4fe   : > { %5943 = vmatpush.bf16.msra.mxu3 %v8905_v27  ;;  %5956 = vmatpush.bf16.msrb.mxu0 %v9161_v31  ;;  %v10026_v1 = vld [vmem:[%s14021_s7 + $0x9c] sm:$0xf]  ;;  %v9065_v19 = vor.u32 %v10226_v7, %v9062_v11  ;;  %v13041_v61 = vpop.f32.mrf.mxu3  ;;  %v9444_v7 = vld [vmem:[%s14023_s9 + $0x1f0] sm:$0xf]  ;;  %v10326_v11 = vld [vmem:[%s14023_s9 + $0x1f4] sm:$0xf0] }
 0x4ff   : > { %v8262_v43 = vld [vmem:[%s14021_s7 + $0xb8] sm:$0xf0]  ;;  %v9436_v54 = vld [vmem:[%s14023_s9 + $0x1e0] sm:$0xf] }
 0x500   : > { %v10090_v23 = vld [vmem:[%s14021_s7 + $0x29c] sm:$0xf]  ;;  %v5706_v26 = vpop.f32.mrf.mxu0  ;;  %v8265_v30 = vor.u32 %v10026_v1, %v8262_v43  ;;  %v9253_v1 = vor.u32 %v10278_v44, %v9252_v2  ;;  %v9220_v44 = vld [vmem:[%s14023_s9 + $0x30] sm:$0xf] }
 0x501   : > { %5918 = vmatpush.bf16.msrb.mxu1 %v8361_v15  ;;  %5931 = vmatpush.bf16.msrb.mxu2 %v8617_v45  ;;  %v8518_v5 = vld [vmem:[%s14021_s7 + $0x2b8] sm:$0xf0]  ;;  %v10324_v26 = vld [vmem:[%s14023_s9 + $0x1e4] sm:$0xf0] }
 0x502   : > { %5944 = vmatpush.bf16.msra.mxu3 %v8873_v48  ;;  %5957 = vmatpush.bf16.msrb.mxu0 %v9129_v53  ;;  %v10154_v24 = vld [vmem:[%s14021_s7 + $0x49c] sm:$0xf]  ;;  %v8521_v13 = vor.u32 %v10090_v23, %v8518_v5  ;;  %v9381_v23 = vor.u32 %v10310_v4, %v9380_v10  ;;  %v9445_v5 = vor.u32 %v10326_v11, %v9444_v7  ;;  %v10286_v4 = vld [vmem:[%s14023_s9 + $0xb4] sm:$0xf0]  ;;  %v9348_v7 = vld [vmem:[%s14023_s9 + $0x130] sm:$0xf] }
 0x503   : > { %v8774_v25 = vld [vmem:[%s14021_s7 + $0x4b8] sm:$0xf0]  ;;  %v5680_v9 = vpop.f32.mrf.mxu2  ;;  %v9412_v11 = vld [vmem:[%s14023_s9 + $0x1b0] sm:$0xf] }
 0x504   : > { %v10218_v28 = vld [vmem:[%s14021_s7 + $0x69c] sm:$0xf]  ;;  %v8777_v56 = vor.u32 %v10154_v24, %v8774_v25  ;;  %v9308_v24 = vld [vmem:[%s14023_s9 + $0xe0] sm:$0xf]  ;;  %v10292_v25 = vld [vmem:[%s14023_s9 + $0xe4] sm:$0xf0] }
 0x505   : > { %5919 = vmatpush.bf16.msrb.mxu1 %v8329_v58  ;;  %5932 = vmatpush.bf16.msrb.mxu2 %v8585_v0  ;;  %v9030_v50 = vld [vmem:[%s14021_s7 + $0x6b8] sm:$0xf0]  ;;  %v10320_v9 = vld [vmem:[%s14023_s9 + $0x1c4] sm:$0xf0] }
 0x506   : > { %5945 = vmatpush.bf16.msra.mxu3 %v8841_v36  ;;  %5958 = vmatpush.bf16.msrb.mxu0 %v9097_v3  ;;  %v10018_v27 = vld [vmem:[%s14021_s7 + $0x5c] sm:$0xf]  ;;  %v9033_v34 = vor.u32 %v10218_v28, %v9030_v50  ;;  %v5693_v58 = vpop.f32.mrf.mxu3  ;;  %v9316_v36 = vld [vmem:[%s14023_s9 + $0xf0] sm:$0xf]  ;;  %v10294_v3 = vld [vmem:[%s14023_s9 + $0xf4] sm:$0xf0] }
 0x507   : > { %v8230_v31 = vld [vmem:[%s14021_s7 + $0x78] sm:$0xf0]  ;;  %v9317_v43 = vor.u32 %v10294_v3, %v9316_v36  ;;  %v9372_v28 = vld [vmem:[%s14023_s9 + $0x160] sm:$0xf]  ;;  %v10308_v50 = vld [vmem:[%s14023_s9 + $0x164] sm:$0xf0] }
 0x508   : > { %v10082_v32 = vld [vmem:[%s14021_s7 + $0x25c] sm:$0xf]  ;;  %v8233_v47 = vor.u32 %v10018_v27, %v8230_v31  ;;  %v9236_v27 = vld [vmem:[%s14023_s9 + $0x50] sm:$0xf]  ;;  %v10274_v31 = vld [vmem:[%s14023_s9 + $0x54] sm:$0xf0] }
 0x509   : > { %5920 = vmatpush.bf16.msrb.mxu1 %v8297_v12  ;;  %5933 = vmatpush.bf16.msrb.mxu2 %v8553_v17  ;;  %v8486_v37 = vld [vmem:[%s14021_s7 + $0x278] sm:$0xf0]  ;;  %v10270_v36 = vld [vmem:[%s14023_s9 + $0x34] sm:$0xf0] }
 0x50a   : > { %5946 = vmatpush.bf16.msra.mxu3 %v8809_v55  ;;  %5959 = vmatpush.bf16.msrb.mxu0 %v9065_v19  ;;  %v10146_v8 = vld [vmem:[%s14021_s7 + $0x45c] sm:$0xf]  ;;  %v8489_v6 = vor.u32 %v10082_v32, %v8486_v37  ;;  %v9244_v55 = vld [vmem:[%s14023_s9 + $0x60] sm:$0xf]  ;;  %v10276_v19 = vld [vmem:[%s14023_s9 + $0x64] sm:$0xf0] }
 0x50b   : > { %v8742_v40 = vld [vmem:[%s14021_s7 + $0x478] sm:$0xf0]  ;;  %v9300_v32 = vld [vmem:[%s14023_s9 + $0xd0] sm:$0xf]  ;;  %v10290_v37 = vld [vmem:[%s14023_s9 + $0xd4] sm:$0xf0] }
 0x50c   : > { %v10210_v22 = vld [vmem:[%s14021_s7 + $0x65c] sm:$0xf]  ;;  %v8745_v35 = vor.u32 %v10146_v8, %v8742_v40  ;;  %v9364_v8 = vld [vmem:[%s14023_s9 + $0x150] sm:$0xf]  ;;  %v10306_v40 = vld [vmem:[%s14023_s9 + $0x154] sm:$0xf0] }
 0x50d   : > { %v8998_v15 = vld [vmem:[%s14021_s7 + $0x678] sm:$0xf0]  ;;  %5921 = vmatpush.bf16.msrb.mxu1 %v8265_v30  ;;  %5934 = vmatpush.bf16.msrb.mxu2 %v8521_v13  ;;  %v9245_v30 = vor.u32 %v10276_v19, %v9244_v55  ;;  %v9309_v13 = vor.u32 %v10292_v25, %v9308_v24  ;;  %v9221_v55 = vor.u32 %v10270_v36, %v9220_v44  ;;  %v9388_v36 = vld [vmem:[%s14023_s9 + $0x180] sm:$0xf] }
 0x50e   : > { %v10010_v45 = vld [vmem:[%s14021_s7 + $0x1c] sm:$0xf]  ;;  %5947 = vmatpush.bf16.msra.mxu3 %v8777_v56  ;;  %5960 = vmatpush.bf16.msrb.mxu0 %v9033_v34  ;;  %v9001_v41 = vor.u32 %v10210_v22, %v8998_v15  ;;  %v9373_v56 = vor.u32 %v10308_v50, %v9372_v28  ;;  %v9437_v34 = vor.u32 %v10324_v26, %v9436_v54  ;;  %v9428_v22 = vld [vmem:[%s14023_s9 + $0x1d0] sm:$0xf]  ;;  %v10322_v15 = vld [vmem:[%s14023_s9 + $0x1d4] sm:$0xf0] }
 0x50f   : > { %v8198_v18 = vld [vmem:[%s14021_s7 + $0x38] sm:$0xf0]  ;;  %v9276_v28 = vld [vmem:[%s14023_s9 + $0xa0] sm:$0xf]  ;;  %v10284_v50 = vld [vmem:[%s14023_s9 + $0xa4] sm:$0xf0] }
 0x510   : > { %v10074_v48 = vld [vmem:[%s14021_s7 + $0x21c] sm:$0xf]  ;;  %v8201_v57 = vor.u32 %v10010_v45, %v8198_v18  ;;  %v9301_v45 = vor.u32 %v10290_v37, %v9300_v32  ;;  %v9365_v18 = vor.u32 %v10306_v40, %v9364_v8  ;;  %v9340_v54 = vld [vmem:[%s14023_s9 + $0x120] sm:$0xf]  ;;  %v9277_v37 = vor.u32 %v10284_v50, %v9276_v28  ;;  %v9204_v8 = vld [vmem:[%s14023_s9 + $0x10] sm:$0xf] }
 0x511   : > { %v8454_v53 = vld [vmem:[%s14021_s7 + $0x238] sm:$0xf0]  ;;  %5922 = vmatpush.bf16.msrb.mxu1 %v8233_v47  ;;  %5935 = vmatpush.bf16.msrb.mxu2 %v8489_v6  ;;  %v9228_v47 = vld [vmem:[%s14023_s9 + $0x40] sm:$0xf]  ;;  %v10272_v6 = vld [vmem:[%s14023_s9 + $0x44] sm:$0xf0] }
 0x512   : > { %v10138_v59 = vld [vmem:[%s14021_s7 + $0x41c] sm:$0xf]  ;;  %v8457_v38 = vor.u32 %v10074_v48, %v8454_v53  ;;  %5948 = vmatpush.bf16.msra.mxu3 %v8745_v35  ;;  %5961 = vmatpush.bf16.msrb.mxu0 %v9001_v41  ;;  %v10288_v48 = vld [vmem:[%s14023_s9 + $0xc4] sm:$0xf0]  ;;  %v9356_v53 = vld [vmem:[%s14023_s9 + $0x140] sm:$0xf] }
 0x513   : > { %v8710_v60 = vld [vmem:[%s14021_s7 + $0x438] sm:$0xf0]  ;;  %v10304_v35 = vld [vmem:[%s14023_s9 + $0x144] sm:$0xf0]  ;;  %v9420_v41 = vld [vmem:[%s14023_s9 + $0x1c0] sm:$0xf] }
 0x514   : > { %v10202_v33 = vld [vmem:[%s14021_s7 + $0x61c] sm:$0xf]  ;;  %v8713_v12 = vor.u32 %v10138_v59, %v8710_v60  ;;  %v5538_v59 = vperm.slane %v12750_v39, 2  ;;  %v9357_v10 = vor.u32 %v10304_v35, %v9356_v53  ;;  %v10266_v40 = vld [vmem:[%s14023_s9 + $0x14] sm:$0xf0] }
 0x515   : > { %v8966_v0 = vld [vmem:[%s14021_s7 + $0x638] sm:$0xf0]  ;;  %5923 = vmatpush.bf16.msrb.mxu1 %v8201_v57  ;;  %5936 = vmatpush.bf16.msrb.mxu2 %v8457_v38  ;;  %v5717_v60 = vpop.f32.mrf.mxu1  ;;  %v9421_v57 = vor.u32 %v10320_v9, %v9420_v41  ;;  %v9284_v38 = vld [vmem:[%s14023_s9 + $0xb0] sm:$0xf]  ;;  %v9196_v53 = vld [vmem:[%s14023_s9] sm:$0xf] }
 0x516   : > { %v8969_v17 = vor.u32 %v10202_v33, %v8966_v0  ;;  %5949 = vmatpush.bf16.msra.mxu3 %v8713_v12  ;;  %v5539_v33 = vperm.slane %v12750_v39, 3  ;;  %v9229_v0 = vor.u32 %v10272_v6, %v9228_v47  ;;  %v10318_v12 = vld [vmem:[%s14023_s9 + $0x1b4] sm:$0xf0]  ;;  %v9285_v19 = vor.u32 %v10286_v4, %v9284_v38  ;;  %v9396_v6 = vld [vmem:[%s14023_s9 + $0x190] sm:$0xf] }
 0x517   : > { %v9413_v25 = vor.u32 %v10318_v12, %v9412_v11  ;;  %v10264_v35 = vld [vmem:[%s14023_s9 + $0x4] sm:$0xf0]  ;;  %v9260_v41 = vld [vmem:[%s14023_s9 + $0x80] sm:$0xf]  ;;  %v10358_v38 = vld [vmem:[%s14023_s9 + $0x2f4] sm:$0xf0] }
 0x518   : > { %5962 = vmatpush.bf16.msrb.mxu0 %v8969_v17  ;;  %5924 = vmatmul.bf16.vlgmr.msrb.gmra.mxu1 %v11912_v52  ;;  %v5537_v52 = vperm.slane %v12750_v39, 1  ;;  %v13203_v58 = vpop.f32.mrf.mxu0  ;;  %v5968_v4 = vmax.f32 %v12829_v29, 0.0  ;;  %v10340_v29 = vld [vmem:[%s14023_s9 + $0x264] sm:$0xf0] }
 0x519   : > { %6758 = vmatpush.bf16.msra.mxu1 %v9253_v1  ;;  %6771 = vmatpush.bf16.msra.mxu2 %v9317_v43  ;;  %v5666_v1 = vadd.f32 %v12996_v46, %v5538_v59  ;;  %v5718_v43 = vadd.f32 %v5717_v60, %v5539_v33  ;;  %v10280_v33 = vld [vmem:[%s14023_s9 + $0x84] sm:$0xf0] }
 0x51a   : > { %6784 = vmatpush.bf16.msrb.mxu3 %v9381_v23  ;;  %5937 = vmatmul.bf16.vlgmr.msrb.gmra.mxu2 %v11914_v62  ;;  %v9237_v62 = vor.u32 %v10274_v31, %v9236_v27  ;;  %v5614_v3 = vadd.f32 %v12864_v42, %v5537_v52  ;;  %v10302_v42 = vld [vmem:[%s14023_s9 + $0x134] sm:$0xf0]  ;;  %v9212_v23 = vld [vmem:[%s14023_s9 + $0x20] sm:$0xf]  ;;  %v10316_v27 = vld [vmem:[%s14023_s9 + $0x1a4] sm:$0xf0] }
 0x51b   : > { %5950 = vmatmul.bf16.vlgmr.msra.gmra.mxu3 %v11916_v16  ;;  %5963 = vmatmul.bf16.vlgmr.msrb.gmra.mxu0 %v11918_v63  ;;  %v9429_v16 = vor.u32 %v10322_v15, %v9428_v22  ;;  %v9292_v63 = vld [vmem:[%s14023_s9 + $0xc0] sm:$0xf]  ;;  %v5679_v24 = vadd.f32 %v13030_v21, %v5666_v1  ;;  %v5730_v46 = vpop.f32.mrf.mxu2  ;;  %v10300_v21 = vld [vmem:[%s14023_s9 + $0x124] sm:$0xf0] }
 0x51c   : > { %6797 = vmatpush.bf16.msra.mxu0 %v9445_v5  ;;  %v9293_v2 = vor.u32 %v10288_v48, %v9292_v63  ;;  %v5627_v17 = vadd.f32 %v12916_v20, %v5614_v3  ;;  %v10268_v5 = vld [vmem:[%s14023_s9 + $0x24] sm:$0xf0]  ;;  %v9349_v20 = vor.u32 %v10302_v42, %v9348_v7  ;;  %v5731_v26 = vadd.f32 %v5730_v46, %v5718_v43  ;;  %v9500_v43 = vld [vmem:[%s14023_s9 + $0x260] sm:$0xf] }
 0x51d   : > { %6759 = vmatpush.bf16.msra.mxu1 %v9245_v30  ;;  %6772 = vmatpush.bf16.msra.mxu2 %v9309_v13  ;;  %v9404_v13 = vld [vmem:[%s14023_s9 + $0x1a0] sm:$0xf]  ;;  %v5719_v31 = vpop.f32.mrf.mxu1  ;;  %v9213_v32 = vor.u32 %v10268_v5, %v9212_v23  ;;  %v5692_v22 = vadd.f32 %v13041_v61, %v5679_v24  ;;  %v9341_v15 = vor.u32 %v10300_v21, %v9340_v54  ;;  %v10298_v61 = vld [vmem:[%s14023_s9 + $0x114] sm:$0xf0]  ;;  %v10312_v3 = vld [vmem:[%s14023_s9 + $0x184] sm:$0xf0] }
 0x51e   : > { %6785 = vmatpush.bf16.msrb.mxu3 %v9373_v56  ;;  %v5743_v30 = vpop.f32.mrf.mxu3  ;;  %v5640_v56 = vadd.f32 %v12918_v14, %v5627_v17  ;;  %v9405_v52 = vor.u32 %v10316_v27, %v9404_v13  ;;  %v9268_v14 = vld [vmem:[%s14023_s9 + $0x90] sm:$0xf]  ;;  %v9205_v63 = vor.u32 %v10266_v40, %v9204_v8  ;;  %v9197_v7 = vor.u32 %v10264_v35, %v9196_v53  ;;  %v9564_v24 = vld [vmem:[%s14023_s9 + $0x2e0] sm:$0xf]  ;;  %v10372_v31 = vld [vmem:[%s14023_s9 + $0x364] sm:$0xf0] }
 0x51f   : > { %v5744_v47 = vadd.f32 %v5743_v30, %v5731_v26  ;;  %v5705_v9 = vadd.f32 %v12998_v51, %v5692_v22  ;;  %v9261_v42 = vor.u32 %v10280_v33, %v9260_v41  ;;  %v9389_v1 = vor.u32 %v10312_v3, %v9388_v36  ;;  %v9636_v5 = vld [vmem:[%s14023_s9 + $0x370] sm:$0xf]  ;;  %v9628_v27 = vld [vmem:[%s14023_s9 + $0x360] sm:$0xf]  ;;  %v10334_v35 = vld [vmem:[%s14023_s9 + $0x234] sm:$0xf0] }
 0x520   : > { %6798 = vmatpush.bf16.msra.mxu0 %v9437_v34  ;;  %v5758_v34 = vpop.f32.mrf.mxu0  ;;  %v13341_v46 = vpack.c.bf16 %v5968_v4, %v5968_v4  ;;  %v9501_v30 = vor.u32 %v10340_v29, %v9500_v43  ;;  %v9492_v13 = vld [vmem:[%s14023_s9 + $0x250] sm:$0xf]  ;;  %v9484_v22 = vld [vmem:[%s14023_s9 + $0x240] sm:$0xf]  ;;  %v10332_v36 = vld [vmem:[%s14023_s9 + $0x224] sm:$0xf0] }
 0x521   : > { %6760 = vmatpush.bf16.msra.mxu1 %v9237_v62  ;;  %6773 = vmatpush.bf16.msra.mxu2 %v9301_v45  ;;  %v10282_v62 = vld [vmem:[%s14023_s9 + $0x94] sm:$0xf0]  ;;  %v9332_v45 = vld [vmem:[%s14023_s9 + $0x110] sm:$0xf]  ;;  %v5757_v44 = vadd.f32 %v13203_v58, %v5744_v47  ;;  %v5970_v12 = vmax.f32 %v5705_v9, 0.0  ;;  %v5540_v47 = vperm.slane %v12750_v39, 4 }
 0x522   : > { %6786 = vmatpush.bf16.msrb.mxu3 %v9365_v18  ;;  %v10314_v18 = vld [vmem:[%s14023_s9 + $0x194] sm:$0xf0]  ;;  %v9269_v48 = vor.u32 %v10282_v62, %v9268_v14  ;;  %v9572_v58 = vld [vmem:[%s14023_s9 + $0x2f0] sm:$0xf]  ;;  %v10336_v14 = vld [vmem:[%s14023_s9 + $0x244] sm:$0xf0] }
 0x523   : > { %v9397_v59 = vor.u32 %v10314_v18, %v9396_v6  ;;  %v5732_v60 = vpop.f32.mrf.mxu2  ;;  %v9573_v23 = vor.u32 %v10358_v38, %v9572_v58  ;;  %v13345_v50 = vpack.c.bf16 %v5970_v12, %v5970_v12  ;;  %v9556_v34 = vld [vmem:[%s14023_s9 + $0x2d0] sm:$0xf]  ;;  %v9548_v62 = vld [vmem:[%s14023_s9 + $0x2c0] sm:$0xf]  ;;  %v10368_v39 = vld [vmem:[%s14023_s9 + $0x344] sm:$0xf0] }
 0x524   : > { %6799 = vmatpush.bf16.msra.mxu0 %v9429_v16  ;;  %v5653_v16 = vadd.f32 %v12869_v49, %v5640_v56  ;;  %v9333_v49 = vor.u32 %v10298_v61, %v9332_v45  ;;  %v10338_v56 = vld [vmem:[%s14023_s9 + $0x254] sm:$0xf0]  ;;  %v10352_v45 = vld [vmem:[%s14023_s9 + $0x2c4] sm:$0xf0]  ;;  %v9612_v53 = vld [vmem:[%s14023_s9 + $0x340] sm:$0xf] }
 0x525   : > { %6761 = vmatpush.bf16.msra.mxu1 %v9229_v0  ;;  %6774 = vmatpush.bf16.msra.mxu2 %v9293_v2  ;;  %v9324_v0 = vld [vmem:[%s14023_s9 + $0x100] sm:$0xf]  ;;  %v10296_v2 = vld [vmem:[%s14023_s9 + $0x104] sm:$0xf0]  ;;  %v9493_v8 = vor.u32 %v10338_v56, %v9492_v13  ;;  %v9540_v41 = vld [vmem:[%s14023_s9 + $0x2b0] sm:$0xf] }
 0x526   : > { %6787 = vmatpush.bf16.msrb.mxu3 %v9357_v10  ;;  %v5745_v51 = vpop.f32.mrf.mxu3  ;;  %v9508_v10 = vld [vmem:[%s14023_s9 + $0x270] sm:$0xf]  ;;  %v5969_v11 = vmax.f32 %v5653_v16, 0.0  ;;  %v9325_v17 = vor.u32 %v10296_v2, %v9324_v0  ;;  %v9485_v16 = vor.u32 %v10336_v14, %v9484_v22  ;;  %v10350_v9 = vld [vmem:[%s14023_s9 + $0x2b4] sm:$0xf0] }
 0x527   : > { %v9541_v33 = vor.u32 %v10350_v9, %v9540_v41  ;;  %v9468_v0 = vld [vmem:[%s14023_s9 + $0x220] sm:$0xf]  ;;  %v9604_v2 = vld [vmem:[%s14023_s9 + $0x330] sm:$0xf]  ;;  %v10277_v56 = vld [vmem:[%s14023_s9 + $0x74] sm:$0xf] }
 0x528   : > { %6800 = vmatpush.bf16.msra.mxu0 %v9421_v57  ;;  %v10342_v57 = vld [vmem:[%s14023_s9 + $0x274] sm:$0xf0]  ;;  %v13343_v28 = vpack.c.bf16 %v5969_v11, %v5969_v11  ;;  %v9532_v3 = vld [vmem:[%s14023_s9 + $0x2a0] sm:$0xf]  ;;  %v9460_v12 = vld [vmem:[%s14023_s9 + $0x210] sm:$0xf] }
 0x529   : > { %6762 = vmatpush.bf16.msra.mxu1 %v9221_v55  ;;  %6775 = vmatpush.bf16.msra.mxu2 %v9285_v19  ;;  %v5971_v55 = vmax.f32 %v5757_v44, 0.0  ;;  %v9509_v19 = vor.u32 %v10342_v57, %v9508_v10  ;;  %v10366_v44 = vld [vmem:[%s14023_s9 + $0x334] sm:$0xf0]  ;;  %v10348_v10 = vld [vmem:[%s14023_s9 + $0x2a4] sm:$0xf0] }
 0x52a   : > { %6788 = vmatpush.bf16.msrb.mxu3 %v9349_v20  ;;  %v10356_v20 = vld [vmem:[%s14023_s9 + $0x2e4] sm:$0xf0]  ;;  %v9605_v4 = vor.u32 %v10366_v44, %v9604_v2  ;;  %v9533_v11 = vor.u32 %v10348_v10, %v9532_v3  ;;  %v9524_v43 = vld [vmem:[%s14023_s9 + $0x290] sm:$0xf]  ;;  %v9452_v29 = vld [vmem:[%s14023_s9 + $0x200] sm:$0xf] }
 0x52b   : > { %v13347_v26 = vpack.c.bf16 %v5971_v55, %v5971_v55  ;;  %v9565_v21 = vor.u32 %v10356_v20, %v9564_v24  ;;  %v10346_v55 = vld [vmem:[%s14023_s9 + $0x294] sm:$0xf0]  ;;  %v9246_v14 = vld [vmem:[%s14023_s9 + $0x68] sm:$0xf0]  ;;  %v10273_v2 = vld [vmem:[%s14023_s9 + $0x54] sm:$0xf] }
 0x52c   : > { %6801 = vmatpush.bf16.msra.mxu0 %v9413_v25  ;;  %v10374_v25 = vld [vmem:[%s14023_s9 + $0x374] sm:$0xf0]  ;;  %v9525_v20 = vor.u32 %v10346_v55, %v9524_v43  ;;  %v10307_v44 = vld [vmem:[%s14023_s9 + $0x164] sm:$0xf]  ;;  %v10289_v3 = vld [vmem:[%s14023_s9 + $0xd4] sm:$0xf] }
 0x52d   : > { %6763 = vmatpush.bf16.msra.mxu1 %v9213_v32  ;;  %6776 = vmatpush.bf16.msra.mxu2 %v9277_v37  ;;  %v9637_v54 = vor.u32 %v10374_v25, %v9636_v5  ;;  %v10354_v32 = vld [vmem:[%s14023_s9 + $0x2d4] sm:$0xf0]  ;;  %v9629_v37 = vor.u32 %v10372_v31, %v9628_v27  ;;  %v10328_v25 = vld [vmem:[%s14023_s9 + $0x204] sm:$0xf0]  ;;  %v9516_v27 = vld [vmem:[%s14023_s9 + $0x280] sm:$0xf] }
 0x52e   : > { %6789 = vmatpush.bf16.msrb.mxu3 %v9341_v15  ;;  %v9557_v40 = vor.u32 %v10354_v32, %v9556_v34  ;;  %v9620_v15 = vld [vmem:[%s14023_s9 + $0x350] sm:$0xf]  ;;  %v10344_v31 = vld [vmem:[%s14023_s9 + $0x284] sm:$0xf0]  ;;  %v9254_v32 = vld [vmem:[%s14023_s9 + $0x78] sm:$0xf0]  ;;  %v9453_v22 = vor.u32 %v10328_v25, %v9452_v29 }
 0x52f   : > { %v9302_v10 = vld [vmem:[%s14023_s9 + $0xd8] sm:$0xf0]  ;;  %v10287_v43 = vld [vmem:[%s14023_s9 + $0xc4] sm:$0xf]  ;;  %v9294_v55 = vld [vmem:[%s14023_s9 + $0xc8] sm:$0xf0] }
 0x530   : > { %6802 = vmatpush.bf16.msra.mxu0 %v9405_v52  ;;  %v10370_v52 = vld [vmem:[%s14023_s9 + $0x354] sm:$0xf0] }
 0x531   : > { %6764 = vmatpush.bf16.msra.mxu1 %v9205_v63  ;;  %6777 = vmatpush.bf16.msra.mxu2 %v9269_v48  ;;  %v9621_v6 = vor.u32 %v10370_v52, %v9620_v15  ;;  %v9549_v63 = vor.u32 %v10352_v45, %v9548_v62  ;;  %v9476_v48 = vld [vmem:[%s14023_s9 + $0x230] sm:$0xf]  ;;  %v9517_v15 = vor.u32 %v10344_v31, %v9516_v27  ;;  %v10275_v52 = vld [vmem:[%s14023_s9 + $0x64] sm:$0xf]  ;;  %v9580_v45 = vld [vmem:[%s14023_s9 + $0x300] sm:$0xf] }
 0x532   : > { %6790 = vmatpush.bf16.msrb.mxu3 %v9333_v49  ;;  %v9613_v49 = vor.u32 %v10368_v39, %v9612_v53  ;;  %v9477_v60 = vor.u32 %v10334_v35, %v9476_v48  ;;  %v10291_v62 = vld [vmem:[%s14023_s9 + $0xe4] sm:$0xf]  ;;  %v10390_v48 = vld [vmem:[%s14023_s9 + $0x3f4] sm:$0xf0]  ;;  %v10309_v53 = vld [vmem:[%s14023_s9 + $0x174] sm:$0xf] }
 0x533   : > { %v9382_v39 = vld [vmem:[%s14023_s9 + $0x178] sm:$0xf0]  ;;  %v9358_v27 = vld [vmem:[%s14023_s9 + $0x148] sm:$0xf0] }
 0x534   : > { %6803 = vmatpush.bf16.msra.mxu0 %v9397_v59  ;;  %v9385_v9 = vor.u32 %v10309_v53, %v9382_v39 }
 0x535   : > { %6765 = vmatpush.bf16.msra.mxu1 %v9197_v7  ;;  %6778 = vmatpush.bf16.msra.mxu2 %v9261_v42  ;;  %v5769_v61 = vpop.f32.mrf.mxu1  ;;  %v9469_v42 = vor.u32 %v10332_v36, %v9468_v0  ;;  %v9238_v36 = vld [vmem:[%s14023_s9 + $0x58] sm:$0xf0] }
 0x536   : > { %6791 = vmatpush.bf16.msrb.mxu3 %v9325_v17  ;;  %v5770_v59 = vadd.f32 %v5769_v61, %v5540_v47  ;;  %v10360_v47 = vld [vmem:[%s14023_s9 + $0x304] sm:$0xf0] }
 0x537   : > { %v9581_v35 = vor.u32 %v10360_v47, %v9580_v45  ;;  %v9350_v45 = vld [vmem:[%s14023_s9 + $0x138] sm:$0xf0] }
 0x538   : > { %6804 = vmatpush.bf16.msra.mxu0 %v9389_v1  ;;  %6766 = vmatmul.bf16.vlgmr.msra.gmra.mxu1 %v13341_v46  ;;  %v5808_v18 = vpop.f32.mrf.mxu0  ;;  %v10330_v1 = vld [vmem:[%s14023_s9 + $0x214] sm:$0xf0] }
 0x539   : > { %6810 = vmatpush.bf16.msrb.mxu1 %v9509_v19  ;;  %6823 = vmatpush.bf16.msrb.mxu2 %v9573_v23  ;;  %v9596_v19 = vld [vmem:[%s14023_s9 + $0x320] sm:$0xf]  ;;  %v10364_v23 = vld [vmem:[%s14023_s9 + $0x324] sm:$0xf0]  ;;  %v9461_v24 = vor.u32 %v10330_v1, %v9460_v12  ;;  %v10305_v12 = vld [vmem:[%s14023_s9 + $0x154] sm:$0xf] }
 0x53a   : > { %6779 = vmatmul.bf16.vlgmr.msra.gmra.mxu2 %v13343_v28  ;;  %6792 = vmatmul.bf16.vlgmr.msrb.gmra.mxu3 %v13345_v50  ;;  %v9597_v5 = vor.u32 %v10364_v23, %v9596_v19  ;;  %v9230_v1 = vld [vmem:[%s14023_s9 + $0x48] sm:$0xf0]  ;;  %v13558_v23 = vld [vmem:[%s14022_s8] sm:$0xff] }
 0x53b   : > { %6805 = vmatmul.bf16.vlgmr.msra.gmra.mxu0 %v13347_v26  ;;  %6836 = vmatpush.bf16.msra.mxu3 %v9637_v54  ;;  %v5782_v51 = vpop.f32.mrf.mxu2  ;;  %v9588_v54 = vld [vmem:[%s14023_s9 + $0x310] sm:$0xf]  ;;  %v5541_v29 = vperm.slane %v13558_v23, 5 }
 0x53c   : > { %v5783_v57 = vadd.f32 %v5782_v51, %v5770_v59  ;;  %v10388_v59 = vld [vmem:[%s14023_s9 + $0x3e4] sm:$0xf0]  ;;  %v9374_v51 = vld [vmem:[%s14023_s9 + $0x168] sm:$0xf0] }
 0x53d   : > { %6811 = vmatpush.bf16.msrb.mxu1 %v9501_v30  ;;  %6824 = vmatpush.bf16.msrb.mxu2 %v9565_v21  ;;  %v5771_v38 = vpop.f32.mrf.mxu1  ;;  %v10362_v30 = vld [vmem:[%s14023_s9 + $0x314] sm:$0xf0] }
 0x53e   : > { %v5795_v58 = vpop.f32.mrf.mxu3  ;;  %v10386_v38 = vld [vmem:[%s14023_s9 + $0x3d4] sm:$0xf0] }
 0x53f   : > { %6837 = vmatpush.bf16.msra.mxu3 %v9629_v37  ;;  %v5796_v17 = vadd.f32 %v5795_v58, %v5783_v57  ;;  %v10293_v37 = vld [vmem:[%s14023_s9 + $0xf4] sm:$0xf]  ;;  %v9684_v58 = vld [vmem:[%s14023_s9 + $0x3d0] sm:$0xf] }
 0x540   : > { %v5810_v7 = vpop.f32.mrf.mxu0  ;;  %v9685_v19 = vor.u32 %v10386_v38, %v9684_v58  ;;  %v9198_v58 = vld [vmem:[%s14023_s9 + $0x8] sm:$0xf0]  ;;  %v10279_v38 = vld [vmem:[%s14023_s9 + $0x84] sm:$0xf] }
 0x541   : > { %6812 = vmatpush.bf16.msrb.mxu1 %v9493_v8  ;;  %6825 = vmatpush.bf16.msrb.mxu2 %v9557_v40  ;;  %v5809_v21 = vadd.f32 %v5808_v18, %v5796_v17  ;;  %v9318_v8 = vld [vmem:[%s14023_s9 + $0xf8] sm:$0xf0]  ;;  %v9589_v40 = vor.u32 %v10362_v30, %v9588_v54  ;;  %v9241_v7 = vor.u32 %v10273_v2, %v9238_v36  ;;  %v10281_v2 = vld [vmem:[%s14023_s9 + $0x94] sm:$0xf]  ;;  %v10380_v36 = vld [vmem:[%s14023_s9 + $0x3a4] sm:$0xf0] }
 0x542   : > { %v9321_v18 = vor.u32 %v10293_v37, %v9318_v8  ;;  %v9366_v17 = vld [vmem:[%s14023_s9 + $0x158] sm:$0xf0]  ;;  %v9297_v30 = vor.u32 %v10287_v43, %v9294_v55  ;;  %v9668_v8 = vld [vmem:[%s14023_s9 + $0x3b0] sm:$0xf]  ;;  %v10357_v43 = vld [vmem:[%s14023_s9 + $0x2f4] sm:$0xf] }
 0x543   : > { %6838 = vmatpush.bf16.msra.mxu3 %v9621_v6  ;;  %v5784_v13 = vpop.f32.mrf.mxu2  ;;  %v5972_v61 = vmax.f32 %v5809_v21, 0.0  ;;  %v9257_v6 = vor.u32 %v10277_v56, %v9254_v32  ;;  %v10269_v21 = vld [vmem:[%s14023_s9 + $0x34] sm:$0xf]  ;;  %v9222_v56 = vld [vmem:[%s14023_s9 + $0x38] sm:$0xf0] }
 0x544   : > { %v10303_v13 = vld [vmem:[%s14023_s9 + $0x144] sm:$0xf]  ;;  %v9286_v32 = vld [vmem:[%s14023_s9 + $0xb8] sm:$0xf0] }
 0x545   : > { %6813 = vmatpush.bf16.msrb.mxu1 %v9485_v16  ;;  %6826 = vmatpush.bf16.msrb.mxu2 %v9549_v63  ;;  %v9310_v16 = vld [vmem:[%s14023_s9 + $0xe8] sm:$0xf0]  ;;  %v9700_v63 = vld [vmem:[%s14023_s9 + $0x3f0] sm:$0xf] }
 0x546   : > { %v5797_v34 = vpop.f32.mrf.mxu3  ;;  %v9701_v41 = vor.u32 %v10390_v48, %v9700_v63  ;;  %v9313_v0 = vor.u32 %v10291_v62, %v9310_v16  ;;  %v10301_v62 = vld [vmem:[%s14023_s9 + $0x134] sm:$0xf] }
 0x547   : > { %6839 = vmatpush.bf16.msra.mxu3 %v9613_v49  ;;  %v9692_v49 = vld [vmem:[%s14023_s9 + $0x3e0] sm:$0xf]  ;;  %v10285_v34 = vld [vmem:[%s14023_s9 + $0xb4] sm:$0xf]  ;;  %v9353_v39 = vor.u32 %v10301_v62, %v9350_v45  ;;  %v9566_v62 = vld [vmem:[%s14023_s9 + $0x2e8] sm:$0xf0] }
 0x548   : > { %6849 = vmatpush.bf16.msrb.mxu0 %v9701_v41  ;;  %v9693_v57 = vor.u32 %v10388_v59, %v9692_v49  ;;  %v10265_v49 = vld [vmem:[%s14023_s9 + $0x14] sm:$0xf] }
 0x549   : > { %6814 = vmatpush.bf16.msrb.mxu1 %v9477_v60  ;;  %6827 = vmatpush.bf16.msrb.mxu2 %v9541_v33  ;;  %v13510_v60 = vpack.c.bf16 %v5972_v61, %v5972_v61  ;;  %v9249_v33 = vor.u32 %v10275_v52, %v9246_v14  ;;  %v9289_v52 = vor.u32 %v10285_v34, %v9286_v32  ;;  %v10267_v14 = vld [vmem:[%s14023_s9 + $0x24] sm:$0xf]  ;;  %v9214_v61 = vld [vmem:[%s14023_s9 + $0x28] sm:$0xf0]  ;;  %v9644_v34 = vld [vmem:[%s14023_s9 + $0x380] sm:$0xf] }
 0x54a   : > { %v9217_v41 = vor.u32 %v10267_v14, %v9214_v61  ;;  %v10376_v32 = vld [vmem:[%s14023_s9 + $0x384] sm:$0xf0]  ;;  %v10355_v14 = vld [vmem:[%s14023_s9 + $0x2e4] sm:$0xf] }
 0x54b   : > { %6840 = vmatpush.bf16.msra.mxu3 %v9605_v4  ;;  %v9377_v4 = vor.u32 %v10307_v44, %v9374_v51  ;;  %v9270_v44 = vld [vmem:[%s14023_s9 + $0x98] sm:$0xf0]  ;;  %v9660_v51 = vld [vmem:[%s14023_s9 + $0x3a0] sm:$0xf]  ;;  %v9645_v45 = vor.u32 %v10376_v32, %v9644_v34  ;;  %v10329_v32 = vld [vmem:[%s14023_s9 + $0x214] sm:$0xf] }
 0x54c   : > { %6850 = vmatpush.bf16.msrb.mxu0 %v9693_v57  ;;  %v10263_v57 = vld [vmem:[%s14023_s9 + $0x4] sm:$0xf] }
 0x54d   : > { %6815 = vmatpush.bf16.msrb.mxu1 %v9469_v42  ;;  %6828 = vmatpush.bf16.msrb.mxu2 %v9533_v11  ;;  %v9305_v42 = vor.u32 %v10289_v3, %v9302_v10  ;;  %v10271_v11 = vld [vmem:[%s14023_s9 + $0x44] sm:$0xf] }
 0x54e   : > { %v9233_v54 = vor.u32 %v10271_v11, %v9230_v1  ;;  %v10299_v3 = vld [vmem:[%s14023_s9 + $0x124] sm:$0xf]  ;;  %v9510_v1 = vld [vmem:[%s14023_s9 + $0x278] sm:$0xf0] }
 0x54f   : > { %6841 = vmatpush.bf16.msra.mxu3 %v9597_v5  ;;  %v9369_v5 = vor.u32 %v10305_v12, %v9366_v17  ;;  %v9273_v12 = vor.u32 %v10281_v2, %v9270_v44  ;;  %v10341_v17 = vld [vmem:[%s14023_s9 + $0x274] sm:$0xf]  ;;  %v9430_v44 = vld [vmem:[%s14023_s9 + $0x1d8] sm:$0xf0] }
 0x550   : > { %6851 = vmatpush.bf16.msrb.mxu0 %v9685_v19  ;;  %v10321_v2 = vld [vmem:[%s14023_s9 + $0x1d4] sm:$0xf] }
 0x551   : > { %6816 = vmatpush.bf16.msrb.mxu1 %v9461_v24  ;;  %6829 = vmatpush.bf16.msrb.mxu2 %v9525_v20  ;;  %v9676_v24 = vld [vmem:[%s14023_s9 + $0x3c0] sm:$0xf]  ;;  %v10384_v20 = vld [vmem:[%s14023_s9 + $0x3c4] sm:$0xf0] }
 0x552   : > { %v9677_v37 = vor.u32 %v10384_v20, %v9676_v24  ;;  %v9574_v20 = vld [vmem:[%s14023_s9 + $0x2f8] sm:$0xf0] }
 0x553   : > { %6842 = vmatpush.bf16.msra.mxu3 %v9589_v40  ;;  %v10382_v40 = vld [vmem:[%s14023_s9 + $0x3b4] sm:$0xf0] }
 0x554   : > { %6852 = vmatpush.bf16.msrb.mxu0 %v9677_v37  ;;  %v9669_v16 = vor.u32 %v10382_v40, %v9668_v8  ;;  %v10295_v37 = vld [vmem:[%s14023_s9 + $0x104] sm:$0xf]  ;;  %v9513_v8 = vor.u32 %v10341_v17, %v9510_v1  ;;  %v9577_v40 = vor.u32 %v10357_v43, %v9574_v20  ;;  %v5542_v17 = vperm.slane %v13558_v23, 6  ;;  %v9470_v20 = vld [vmem:[%s14023_s9 + $0x228] sm:$0xf0] }
 0x555   : > { %6817 = vmatpush.bf16.msrb.mxu1 %v9453_v22  ;;  %6830 = vmatpush.bf16.msrb.mxu2 %v9517_v15  ;;  %v5821_v25 = vpop.f32.mrf.mxu1  ;;  %v9361_v22 = vor.u32 %v10303_v13, %v9358_v27  ;;  %v9225_v15 = vor.u32 %v10269_v21, %v9222_v56 }
 0x556   : > { %v5822_v47 = vadd.f32 %v5821_v25, %v5541_v29  ;;  %v9652_v29 = vld [vmem:[%s14023_s9 + $0x390] sm:$0xf] }
 0x557   : > { %6843 = vmatpush.bf16.msra.mxu3 %v9581_v35 }
 0x558   : > { %6818 = vmatmul.bf16.vlgmr.msrb.gmra.mxu1 %v13510_v60  ;;  %v5860_v31 = vpop.f32.mrf.mxu0  ;;  %6853 = vmatpush.bf16.msrb.mxu0 %v9669_v16 }
 0x559   : > { %6862 = vmatpush.bf16.msra.mxu1 %v9257_v6  ;;  %6875 = vmatpush.bf16.msra.mxu2 %v9321_v18  ;;  %v10283_v6 = vld [vmem:[%s14023_s9 + $0xa4] sm:$0xf]  ;;  %v9278_v18 = vld [vmem:[%s14023_s9 + $0xa8] sm:$0xf0] }
 0x55b   : > { %6888 = vmatpush.bf16.msrb.mxu3 %v9385_v9  ;;  %v5834_v63 = vpop.f32.mrf.mxu2  ;;  %v9281_v9 = vor.u32 %v10283_v6, %v9278_v18  ;;  %v9446_v6 = vld [vmem:[%s14023_s9 + $0x1f8] sm:$0xf0] }
 0x55c   : > { %v5835_v48 = vadd.f32 %v5834_v63, %v5822_v47  ;;  %v10325_v47 = vld [vmem:[%s14023_s9 + $0x1f4] sm:$0xf]  ;;  %v9569_v63 = vor.u32 %v10355_v14, %v9566_v62  ;;  %v10315_v14 = vld [vmem:[%s14023_s9 + $0x1a4] sm:$0xf]  ;;  %v9406_v62 = vld [vmem:[%s14023_s9 + $0x1a8] sm:$0xf0] }
 0x55d   : > { %6863 = vmatpush.bf16.msra.mxu1 %v9249_v33  ;;  %6876 = vmatpush.bf16.msra.mxu2 %v9313_v0  ;;  %v5823_v35 = vpop.f32.mrf.mxu1  ;;  %v9206_v0 = vld [vmem:[%s14023_s9 + $0x18] sm:$0xf0]  ;;  %v9449_v18 = vor.u32 %v10325_v47, %v9446_v6 }
 0x55e   : > { %v5847_v53 = vpop.f32.mrf.mxu3  ;;  %v9209_v11 = vor.u32 %v10265_v49, %v9206_v0  ;;  %v9494_v35 = vld [vmem:[%s14023_s9 + $0x258] sm:$0xf0]  ;;  %v10335_v0 = vld [vmem:[%s14023_s9 + $0x244] sm:$0xf] }
 0x55f   : > { %6889 = vmatpush.bf16.msrb.mxu3 %v9377_v4  ;;  %v5848_v59 = vadd.f32 %v5847_v53, %v5835_v48  ;;  %v9262_v4 = vld [vmem:[%s14023_s9 + $0x88] sm:$0xf0]  ;;  %v10337_v48 = vld [vmem:[%s14023_s9 + $0x254] sm:$0xf]  ;;  %v10323_v53 = vld [vmem:[%s14023_s9 + $0x1e4] sm:$0xf] }
 0x560   : > { %v5862_v33 = vpop.f32.mrf.mxu0  ;;  %v9265_v56 = vor.u32 %v10279_v38, %v9262_v4  ;;  %v10319_v38 = vld [vmem:[%s14023_s9 + $0x1c4] sm:$0xf]  ;;  %v9422_v4 = vld [vmem:[%s14023_s9 + $0x1c8] sm:$0xf0] }
 0x561   : > { %6864 = vmatpush.bf16.msra.mxu1 %v9241_v7  ;;  %6877 = vmatpush.bf16.msra.mxu2 %v9305_v42  ;;  %v5861_v10 = vadd.f32 %v5860_v31, %v5848_v59  ;;  %v9661_v7 = vor.u32 %v10380_v36, %v9660_v51  ;;  %v9342_v42 = vld [vmem:[%s14023_s9 + $0x128] sm:$0xf0]  ;;  %v9201_v31 = vor.u32 %v10263_v57, %v9198_v58  ;;  %v10351_v51 = vld [vmem:[%s14023_s9 + $0x2c4] sm:$0xf]  ;;  %v10333_v58 = vld [vmem:[%s14023_s9 + $0x234] sm:$0xf] }
 0x562   : > { %v9345_v55 = vor.u32 %v10299_v3, %v9342_v42  ;;  %v9497_v59 = vor.u32 %v10337_v48, %v9494_v35  ;;  %v9550_v36 = vld [vmem:[%s14023_s9 + $0x2c8] sm:$0xf0]  ;;  %v9433_v3 = vor.u32 %v10321_v2, %v9430_v44  ;;  %v9478_v42 = vld [vmem:[%s14023_s9 + $0x238] sm:$0xf0]  ;;  %v9425_v43 = vor.u32 %v10319_v38, %v9422_v4  ;;  %v10369_v38 = vld [vmem:[%s14023_s9 + $0x354] sm:$0xf] }
 0x563   : > { %6890 = vmatpush.bf16.msrb.mxu3 %v9369_v5  ;;  %v5973_v19 = vmax.f32 %v5861_v10, 0.0  ;;  %6854 = vmatpush.bf16.msrb.mxu0 %v9661_v7  ;;  %v10378_v5 = vld [vmem:[%s14023_s9 + $0x394] sm:$0xf0]  ;;  %v5836_v24 = vpop.f32.mrf.mxu2  ;;  %v9553_v57 = vor.u32 %v10351_v51, %v9550_v36  ;;  %v9454_v48 = vld [vmem:[%s14023_s9 + $0x208] sm:$0xf0] }
 0x564   : > { %v9653_v25 = vor.u32 %v10378_v5, %v9652_v29  ;;  %v10331_v29 = vld [vmem:[%s14023_s9 + $0x224] sm:$0xf]  ;;  %v10317_v5 = vld [vmem:[%s14023_s9 + $0x1b4] sm:$0xf]  ;;  %v9414_v24 = vld [vmem:[%s14023_s9 + $0x1b8] sm:$0xf0] }
 0x565   : > { %6865 = vmatpush.bf16.msra.mxu1 %v9233_v54  ;;  %6878 = vmatpush.bf16.msra.mxu2 %v9297_v30  ;;  %v10297_v54 = vld [vmem:[%s14023_s9 + $0x114] sm:$0xf]  ;;  %v9334_v30 = vld [vmem:[%s14023_s9 + $0x118] sm:$0xf0]  ;;  %v13669_v21 = vpack.c.bf16 %v5973_v19, %v5973_v19  ;;  %v10371_v51 = vld [vmem:[%s14023_s9 + $0x364] sm:$0xf] }
 0x566   : > { %v5849_v13 = vpop.f32.mrf.mxu3  ;;  %v9337_v27 = vor.u32 %v10297_v54, %v9334_v30  ;;  %v9534_v54 = vld [vmem:[%s14023_s9 + $0x2a8] sm:$0xf0]  ;;  %v9622_v4 = vld [vmem:[%s14023_s9 + $0x358] sm:$0xf0] }
 0x567   : > { %6891 = vmatpush.bf16.msrb.mxu3 %v9361_v22  ;;  %6831 = vmatmul.bf16.vlgmr.msrb.gmra.mxu2 %v13669_v21  ;;  %v10339_v22 = vld [vmem:[%s14023_s9 + $0x264] sm:$0xf]  ;;  %v9630_v36 = vld [vmem:[%s14023_s9 + $0x368] sm:$0xf0] }
 0x568   : > { %6855 = vmatpush.bf16.msrb.mxu0 %v9653_v25  ;;  %v10347_v25 = vld [vmem:[%s14023_s9 + $0x2a4] sm:$0xf] }
 0x569   : > { %6866 = vmatpush.bf16.msra.mxu1 %v9225_v15  ;;  %6879 = vmatpush.bf16.msra.mxu2 %v9289_v52  ;;  %v9502_v15 = vld [vmem:[%s14023_s9 + $0x268] sm:$0xf0]  ;;  %v9537_v34 = vor.u32 %v10347_v25, %v9534_v54  ;;  %v9590_v25 = vld [vmem:[%s14023_s9 + $0x318] sm:$0xf0] }
 0x56a   : > { %v9326_v52 = vld [vmem:[%s14023_s9 + $0x108] sm:$0xf0]  ;;  %v9505_v16 = vor.u32 %v10339_v22, %v9502_v15  ;;  %v9526_v22 = vld [vmem:[%s14023_s9 + $0x298] sm:$0xf0] }
 0x56b   : > { %6892 = vmatpush.bf16.msrb.mxu3 %v9353_v39  ;;  %v9329_v61 = vor.u32 %v10295_v37, %v9326_v52  ;;  %v9438_v39 = vld [vmem:[%s14023_s9 + $0x1e8] sm:$0xf0] }
 0x56c   : > { %6856 = vmatpush.bf16.msrb.mxu0 %v9645_v45  ;;  %v9441_v49 = vor.u32 %v10323_v53, %v9438_v39  ;;  %v9409_v45 = vor.u32 %v10315_v14, %v9406_v62  ;;  %v10343_v53 = vld [vmem:[%s14023_s9 + $0x284] sm:$0xf]  ;;  %v9518_v39 = vld [vmem:[%s14023_s9 + $0x288] sm:$0xf0] }
 0x56d   : > { %6867 = vmatpush.bf16.msra.mxu1 %v9217_v41  ;;  %6880 = vmatpush.bf16.msra.mxu2 %v9281_v9  ;;  %v10353_v41 = vld [vmem:[%s14023_s9 + $0x2d4] sm:$0xf]  ;;  %v9558_v9 = vld [vmem:[%s14023_s9 + $0x2d8] sm:$0xf0]  ;;  %v10387_v62 = vld [vmem:[%s14023_s9 + $0x3e4] sm:$0xf] }
 0x56e   : > { %v9561_v33 = vor.u32 %v10353_v41, %v9558_v9  ;;  %v10313_v41 = vld [vmem:[%s14023_s9 + $0x194] sm:$0xf]  ;;  %v9398_v9 = vld [vmem:[%s14023_s9 + $0x198] sm:$0xf0] }
 0x56f   : > { %6893 = vmatpush.bf16.msrb.mxu3 %v9345_v55  ;;  %v9481_v55 = vor.u32 %v10333_v58, %v9478_v42  ;;  %v10367_v42 = vld [vmem:[%s14023_s9 + $0x344] sm:$0xf] }
 0x570   : > { %6901 = vmatpush.bf16.msra.mxu0 %v9449_v18  ;;  %v10327_v18 = vld [vmem:[%s14023_s9 + $0x204] sm:$0xf] }
 0x571   : > { %6868 = vmatpush.bf16.msra.mxu1 %v9209_v11  ;;  %6881 = vmatpush.bf16.msra.mxu2 %v9273_v12  ;;  %v10349_v11 = vld [vmem:[%s14023_s9 + $0x2b4] sm:$0xf]  ;;  %v9542_v12 = vld [vmem:[%s14023_s9 + $0x2b8] sm:$0xf0]  ;;  %v9457_v44 = vor.u32 %v10327_v18, %v9454_v48 }
 0x572   : > { %v9545_v19 = vor.u32 %v10349_v11, %v9542_v12  ;;  %v9614_v11 = vld [vmem:[%s14023_s9 + $0x348] sm:$0xf0] }
 0x573   : > { %6894 = vmatpush.bf16.msrb.mxu3 %v9337_v27  ;;  %v9417_v27 = vor.u32 %v10317_v5, %v9414_v24  ;;  %v9617_v12 = vor.u32 %v10367_v42, %v9614_v11 }
 0x574   : > { %6902 = vmatpush.bf16.msra.mxu0 %v9441_v49 }
 0x575   : > { %6869 = vmatpush.bf16.msra.mxu1 %v9201_v31  ;;  %6882 = vmatpush.bf16.msra.mxu2 %v9265_v56  ;;  %v5873_v7 = vpop.f32.mrf.mxu1  ;;  %v9473_v56 = vor.u32 %v10331_v29, %v9470_v20  ;;  %v9598_v29 = vld [vmem:[%s14023_s9 + $0x328] sm:$0xf0] }
 0x576   : > { %v5874_v30 = vadd.f32 %v5873_v7, %v5542_v17  ;;  %v9625_v7 = vor.u32 %v10369_v38, %v9622_v4  ;;  %v10365_v17 = vld [vmem:[%s14023_s9 + $0x334] sm:$0xf] }
 0x577   : > { %6895 = vmatpush.bf16.msrb.mxu3 %v9329_v61 }
 0x578   : > { %6870 = vmatmul.bf16.vlgmr.msra.gmra.mxu1 %v13341_v46  ;;  %v9486_v46 = vld [vmem:[%s14023_s9 + $0x248] sm:$0xf0]  ;;  %v5912_v1 = vpop.f32.mrf.mxu0  ;;  %6903 = vmatpush.bf16.msra.mxu0 %v9433_v3  ;;  %v10311_v3 = vld [vmem:[%s14023_s9 + $0x184] sm:$0xf] }
 0x579   : > { %6914 = vmatpush.bf16.msrb.mxu1 %v9513_v8  ;;  %6927 = vmatpush.bf16.msrb.mxu2 %v9577_v40  ;;  %v9489_v10 = vor.u32 %v10335_v0, %v9486_v46  ;;  %v9462_v8 = vld [vmem:[%s14023_s9 + $0x218] sm:$0xf0]  ;;  %v10345_v40 = vld [vmem:[%s14023_s9 + $0x294] sm:$0xf]  ;;  %v9521_v46 = vor.u32 %v10343_v53, %v9518_v39  ;;  %v13902_v53 = vld [vmem:[%s14024_s10] sm:$0x3] }
 0x57a   : > { %6883 = vmatmul.bf16.vlgmr.msra.gmra.mxu2 %v13343_v28  ;;  %v9465_v61 = vor.u32 %v10329_v32, %v9462_v8  ;;  %v9529_v6 = vor.u32 %v10345_v40, %v9526_v22  ;;  %v10389_v32 = vld [vmem:[%s14023_s9 + $0x3f4] sm:$0xf] }
 0x57b   : > { %v5886_v13 = vpop.f32.mrf.mxu2  ;;  %v10381_v39 = vld [vmem:[%s14023_s9 + $0x3b4] sm:$0xf] }
 0x57c   : > { %6904 = vmatpush.bf16.msra.mxu0 %v9425_v43  ;;  %v5887_v31 = vadd.f32 %v5886_v13, %v5874_v30 }
 0x57d   : > { %6915 = vmatpush.bf16.msrb.mxu1 %v9505_v16  ;;  %6928 = vmatpush.bf16.msrb.mxu2 %v9569_v63  ;;  %v5875_v37 = vpop.f32.mrf.mxu1  ;;  %v10373_v16 = vld [vmem:[%s14023_s9 + $0x374] sm:$0xf]  ;;  %v9638_v63 = vld [vmem:[%s14023_s9 + $0x378] sm:$0xf0] }
 0x57e   : > { %v5899_v28 = vpop.f32.mrf.mxu3  ;;  %v9702_v37 = vld [vmem:[%s14023_s9 + $0x3f8] sm:$0xf0] }
 0x57f   : > { %v5900_v15 = vadd.f32 %v5899_v28, %v5887_v31 }
 0x580   : > { %v5914_v52 = vpop.f32.mrf.mxu0  ;;  %6905 = vmatpush.bf16.msra.mxu0 %v9417_v27 }
 0x581   : > { %6916 = vmatpush.bf16.msrb.mxu1 %v9497_v59  ;;  %6929 = vmatpush.bf16.msrb.mxu2 %v9561_v33  ;;  %v5913_v47 = vadd.f32 %v5912_v1, %v5900_v15  ;;  %v9641_v59 = vor.u32 %v10373_v16, %v9638_v63  ;;  %v9401_v33 = vor.u32 %v10313_v41, %v9398_v9  ;;  %v5543_v1 = vperm.slane %v13558_v23, 7  ;;  %v10361_v23 = vld [vmem:[%s14023_s9 + $0x314] sm:$0xf]  ;;  %v10383_v16 = vld [vmem:[%s14023_s9 + $0x3c4] sm:$0xf] }
 0x582   : > { %v9593_v28 = vor.u32 %v10361_v23, %v9590_v25  ;;  %v9705_v15 = vor.u32 %v10389_v32, %v9702_v37  ;;  %v9678_v63 = vld [vmem:[%s14023_s9 + $0x3c8] sm:$0xf0]  ;;  %v6754_v9 = vperm.slane %v13902_v53, 0  ;;  %v10395_v23 = vld [vmem:[%s14025_s11 + $0x20] sm:$0xff]  ;;  %v10394_v25 = vld [vmem:[%s14025_s11 + $0x18] sm:$0xff] }
 0x583   : > { %v5974_v35 = vmax.f32 %v5913_v47, 0.0  ;;  %v5888_v49 = vpop.f32.mrf.mxu2  ;;  %v9681_v48 = vor.u32 %v10383_v16, %v9678_v63  ;;  %v10400_v63 = vld [vmem:[%s14025_s11 + $0x48] sm:$0xff] }
 0x584   : > { %6906 = vmatpush.bf16.msra.mxu0 %v9409_v45  ;;  %v9694_v45 = vld [vmem:[%s14023_s9 + $0x3e8] sm:$0xf0] }
 0x585   : > { %6917 = vmatpush.bf16.msrb.mxu1 %v9489_v10  ;;  %6930 = vmatpush.bf16.msrb.mxu2 %v9553_v57  ;;  %v13819_v0 = vpack.c.bf16 %v5974_v35, %v5974_v35  ;;  %v9390_v10 = vld [vmem:[%s14023_s9 + $0x188] sm:$0xf0]  ;;  %v9633_v57 = vor.u32 %v10371_v51, %v9630_v36  ;;  %v9697_v47 = vor.u32 %v10387_v62, %v9694_v45  ;;  %v9670_v35 = vld [vmem:[%s14023_s9 + $0x3b8] sm:$0xf0]  ;;  %v10377_v51 = vld [vmem:[%s14023_s9 + $0x394] sm:$0xf] }
 0x586   : > { %v5901_v2 = vpop.f32.mrf.mxu3  ;;  %v9393_v58 = vor.u32 %v10311_v3, %v9390_v10  ;;  %v9654_v36 = vld [vmem:[%s14023_s9 + $0x398] sm:$0xf0]  ;;  %v10401_v45 = vld [vmem:[%s14025_s11 + $0x50] sm:$0xff] }
 0x587   : > { %6844 = vmatmul.bf16.vlgmr.msra.gmra.mxu3 %v13819_v0  ;;  %v9657_v4 = vor.u32 %v10377_v51, %v9654_v36 }
 0x588   : > { %6940 = vmatpush.bf16.msra.mxu3 %v9641_v59  ;;  %6907 = vmatpush.bf16.msra.mxu0 %v9401_v33  ;;  %v9673_v59 = vor.u32 %v10381_v39, %v9670_v35  ;;  %v10379_v33 = vld [vmem:[%s14023_s9 + $0x3a4] sm:$0xf] }
 0x589   : > { %6918 = vmatpush.bf16.msrb.mxu1 %v9481_v55  ;;  %6931 = vmatpush.bf16.msrb.mxu2 %v9545_v19  ;;  %v10363_v19 = vld [vmem:[%s14023_s9 + $0x324] sm:$0xf] }
 0x58a   : > { %v9601_v24 = vor.u32 %v10363_v19, %v9598_v29  ;;  %v10397_v29 = vld [vmem:[%s14025_s11 + $0x30] sm:$0xff]  ;;  %v10399_v39 = vld [vmem:[%s14025_s11 + $0x40] sm:$0xff] }
 0x58c   : > { %6941 = vmatpush.bf16.msra.mxu3 %v9633_v57  ;;  %6908 = vmatpush.bf16.msra.mxu0 %v9393_v58 }
 0x58d   : > { %6919 = vmatpush.bf16.msrb.mxu1 %v9473_v56  ;;  %6932 = vmatpush.bf16.msrb.mxu2 %v9537_v34  ;;  %v9582_v56 = vld [vmem:[%s14023_s9 + $0x308] sm:$0xf0] }
 0x590   : > { %6942 = vmatpush.bf16.msra.mxu3 %v9625_v7  ;;  %v9646_v7 = vld [vmem:[%s14023_s9 + $0x388] sm:$0xf0] }
 0x591   : > { %6920 = vmatpush.bf16.msrb.mxu1 %v9465_v61  ;;  %6933 = vmatpush.bf16.msrb.mxu2 %v9529_v6  ;;  %v10385_v61 = vld [vmem:[%s14023_s9 + $0x3d4] sm:$0xf]  ;;  %v9686_v6 = vld [vmem:[%s14023_s9 + $0x3d8] sm:$0xf0] }
 0x592   : > { %v9689_v18 = vor.u32 %v10385_v61, %v9686_v6 }
 0x594   : > { %6943 = vmatpush.bf16.msra.mxu3 %v9617_v12 }
 0x595   : > { %6921 = vmatpush.bf16.msrb.mxu1 %v9457_v44  ;;  %6934 = vmatpush.bf16.msrb.mxu2 %v9521_v46 }
 0x597   : > { %6896 = vmatmul.bf16.vlgmr.msrb.gmra.mxu3 %v13345_v50  ;;  %v10359_v50 = vld [vmem:[%s14023_s9 + $0x304] sm:$0xf] }
 0x598   : > { %6922 = vmatmul.bf16.vlgmr.msrb.gmra.mxu1 %v13510_v60  ;;  %6935 = vmatmul.bf16.vlgmr.msrb.gmra.mxu2 %v13669_v21  ;;  %v9606_v60 = vld [vmem:[%s14023_s9 + $0x338] sm:$0xf0]  ;;  %v5925_v21 = vpop.f32.mrf.mxu1  ;;  %v5964_v43 = vpop.f32.mrf.mxu0  ;;  %v9585_v40 = vor.u32 %v10359_v50, %v9582_v56 }
 0x599   : > { %v9609_v55 = vor.u32 %v10365_v17, %v9606_v60  ;;  %v5926_v5 = vadd.f32 %v5925_v21, %v5543_v1  ;;  %v10406_v56 = vld [vmem:[%s14025_s11 + $0x78] sm:$0xff] }
 0x59a   : > { %7112 = vmatpush.bf16.msra.mxu2 %v10406_v56 }
 0x59b   : > { %6944 = vmatpush.bf16.msra.mxu3 %v9609_v55 }
 0x59d   : > { %v5938_v20 = vpop.f32.mrf.mxu2 }
 0x59e   : > { %v5939_v54 = vadd.f32 %v5938_v20, %v5926_v5  ;;  %v5951_v30 = vpop.f32.mrf.mxu3  ;;  %v10396_v5 = vld [vmem:[%s14025_s11 + $0x28] sm:$0xff] }
 0x59f   : > { %6945 = vmatpush.bf16.msra.mxu3 %v9601_v24 }
 0x5a0   : > { %v5927_v13 = vpop.f32.mrf.mxu1  ;;  %v5952_v27 = vadd.f32 %v5951_v30, %v5939_v54  ;;  %v5966_v31 = vpop.f32.mrf.mxu0  ;;  %v10393_v30 = vld [vmem:[%s14025_s11 + $0x10] sm:$0xff] }
 0x5a1   : > { %v10391_v31 = vld [vmem:[%s14025_s11] sm:$0xff] }
 0x5a2   : > { %v5965_v34 = vadd.f32 %v5964_v43, %v5952_v27  ;;  %v10398_v43 = vld [vmem:[%s14025_s11 + $0x38] sm:$0xff]  ;;  %v10392_v27 = vld [vmem:[%s14025_s11 + $0x8] sm:$0xff] }
 0x5a3   : > { %6946 = vmatpush.bf16.msra.mxu3 %v9593_v28  ;;  %7099 = vmatpush.bf16.msra.mxu1 %v10398_v43 }
 0x5a4   : > { %v5975_v8 = vmax.f32 %v5965_v34, 0.0  ;;  %v10405_v34 = vld [vmem:[%s14025_s11 + $0x70] sm:$0xff] }
 0x5a5   : > { %v5940_v22 = vpop.f32.mrf.mxu2  ;;  %7113 = vmatpush.bf16.msra.mxu2 %v10405_v34 }
 0x5a6   : > { %v5983_v52 = vpack.c.bf16 %v5975_v8, %v5975_v8  ;;  %v5953_v14 = vpop.f32.mrf.mxu3 }
 0x5a7   : > { %6947 = vmatpush.bf16.msra.mxu3 %v9585_v40  ;;  %7100 = vmatpush.bf16.msra.mxu1 %v10397_v29  ;;  %v10404_v40 = vld [vmem:[%s14025_s11 + $0x68] sm:$0xff]  ;;  %v10402_v14 = vld [vmem:[%s14025_s11 + $0x58] sm:$0xff] }
 0x5a8   : > { %6857 = vmatmul.bf16.vlgmr.msrb.gmra.mxu0 %v5983_v52 }
 0x5a9   : > { %6953 = vmatpush.bf16.msrb.mxu0 %v9705_v15  ;;  %7114 = vmatpush.bf16.msra.mxu2 %v10404_v40  ;;  %v10403_v15 = vld [vmem:[%s14025_s11 + $0x60] sm:$0xff] }
 0x5aa   : > { %6948 = vmatmul.bf16.vlgmr.msra.gmra.mxu3 %v13819_v0  ;;  %v9662_v0 = vld [vmem:[%s14023_s9 + $0x3a8] sm:$0xf0] }
 0x5ab   : > { %v9665_v44 = vor.u32 %v10379_v33, %v9662_v0  ;;  %7101 = vmatpush.bf16.msra.mxu1 %v10396_v5 }
 0x5ad   : > { %6954 = vmatpush.bf16.msrb.mxu0 %v9697_v47  ;;  %7115 = vmatpush.bf16.msra.mxu2 %v10403_v15 }
 0x5af   : > { %7102 = vmatpush.bf16.msra.mxu1 %v10395_v23 }
 0x5b1   : > { %6955 = vmatpush.bf16.msrb.mxu0 %v9689_v18  ;;  %7116 = vmatpush.bf16.msra.mxu2 %v10402_v14 }
 0x5b3   : > { %7103 = vmatpush.bf16.msra.mxu1 %v10394_v25 }
 0x5b5   : > { %v6767_v41 = vpop.f32.mrf.mxu1  ;;  %6956 = vmatpush.bf16.msrb.mxu0 %v9681_v48  ;;  %7117 = vmatpush.bf16.msra.mxu2 %v10401_v45 }
 0x5b6   : > { %v6768_v2 = vadd.f32 %v6767_v41, %v6754_v9  ;;  %v6755_v41 = vperm.slane %v13902_v53, 1 }
 0x5b7   : > { %7104 = vmatpush.bf16.msra.mxu1 %v10393_v30 }
 0x5b8   : > { %v6806_v49 = vpop.f32.mrf.mxu0  ;;  %6909 = vmatmul.bf16.vlgmr.msra.gmra.mxu0 %v13347_v26  ;;  %v10375_v26 = vld [vmem:[%s14023_s9 + $0x384] sm:$0xf] }
 0x5b9   : > { %6957 = vmatpush.bf16.msrb.mxu0 %v9673_v59  ;;  %v9649_v11 = vor.u32 %v10375_v26, %v9646_v7  ;;  %7118 = vmatpush.bf16.msra.mxu2 %v10400_v63  ;;  %v7002_v7 = vld [vmem:[%s14026_s12] sm:$0x1] }
 0x5bb   : > { %7105 = vmatpush.bf16.msra.mxu1 %v10392_v27 }
 0x5bd   : > { %v6780_v46 = vpop.f32.mrf.mxu2  ;;  %v6793_v10 = vpop.f32.mrf.mxu3  ;;  %6958 = vmatpush.bf16.msrb.mxu0 %v9665_v44  ;;  %7119 = vmatpush.bf16.msra.mxu2 %v10399_v39 }
 0x5be   : > { %v6781_v3 = vadd.f32 %v6780_v46, %v6768_v2  ;;  %v6769_v57 = vpop.f32.mrf.mxu1 }
 0x5bf   : > { %7106 = vmatpush.bf16.msra.mxu1 %v10391_v31 }
 0x5c0   : > { %v6794_v58 = vadd.f32 %v6793_v10, %v6781_v3  ;;  %v6808_v38 = vpop.f32.mrf.mxu0 }
 0x5c1   : > { %6959 = vmatpush.bf16.msrb.mxu0 %v9657_v4 }
 0x5c2   : > { %v6807_v42 = vadd.f32 %v6806_v49, %v6794_v58 }
 0x5c5   : > { %v6782_v12 = vpop.f32.mrf.mxu2  ;;  %v6795_v17 = vpop.f32.mrf.mxu3  ;;  %6960 = vmatpush.bf16.msrb.mxu0 %v9649_v11 }
 0x5c8   : > { %6961 = vmatmul.bf16.vlgmr.msrb.gmra.mxu0 %v5983_v52 }
 0x5d5   : > { %v6819_v60 = vpop.f32.mrf.mxu1 }
 0x5d6   : > { %v6820_v21 = vadd.f32 %v6819_v60, %v6807_v42 }
 0x5dd   : > { %v6821_v1 = vpop.f32.mrf.mxu1 }
 0x5ea   : > { %v6832_v19 = vpop.f32.mrf.mxu2 }
 0x5eb   : > { %v6833_v62 = vadd.f32 %v6832_v19, %v6820_v21 }
 0x5f2   : > { %v6834_v20 = vpop.f32.mrf.mxu2 }
 0x5f5   : > { %v6871_v55 = vpop.f32.mrf.mxu1 }
 0x5f6   : > { %v6872_v49 = vadd.f32 %v6871_v55, %v6755_v41 }
 0x5fd   : > { %v6873_v24 = vpop.f32.mrf.mxu1  ;;  %v6884_v54 = vpop.f32.mrf.mxu2 }
 0x5fe   : > { %v6885_v59 = vadd.f32 %v6884_v54, %v6872_v49 }
 0x605   : > { %v6886_v13 = vpop.f32.mrf.mxu2 }
 0x60a   : > { %v6845_v50 = vpop.f32.mrf.mxu3 }
 0x60b   : > { %v6846_v47 = vadd.f32 %v6845_v50, %v6833_v62 }
 0x612   : > { %v6847_v8 = vpop.f32.mrf.mxu3 }
 0x615   : > { %v6923_v28 = vpop.f32.mrf.mxu1 }
 0x61a   : > { %v6897_v52 = vpop.f32.mrf.mxu3 }
 0x61b   : > { %v6936_v32 = vpop.f32.mrf.mxu2  ;;  %v6898_v0 = vadd.f32 %v6897_v52, %v6885_v59 }
 0x61d   : > { %v6925_v37 = vpop.f32.mrf.mxu1 }
 0x622   : > { %v6899_v6 = vpop.f32.mrf.mxu3 }
 0x623   : > { %v6938_v22 = vpop.f32.mrf.mxu2 }
 0x625   : > { %v6858_v61 = vpop.f32.mrf.mxu0 }
 0x626   : > { %v6859_v18 = vadd.f32 %v6858_v61, %v6846_v47 }
 0x628   : > { %v6966_v16 = vmax.f32 %v6859_v18, 0.0 }
 0x62a   : > { %v6968_v48 = vpack.c.bf16 %v6966_v16, %v6966_v16 }
 0x62c   : > { %7107 = vmatmul.bf16.vlgmr.msra.gmra.mxu1 %v6968_v48 }
 0x62d   : > { %v6860_v35 = vpop.f32.mrf.mxu0  ;;  %v6949_v9 = vpop.f32.mrf.mxu3 }
 0x635   : > { %v6910_v33 = vpop.f32.mrf.mxu0  ;;  %v6951_v2 = vpop.f32.mrf.mxu3 }
 0x636   : > { %v6911_v44 = vadd.f32 %v6910_v33, %v6898_v0 }
 0x638   : > { %v6924_v46 = vadd.f32 %v6923_v28, %v6911_v44 }
 0x63a   : > { %v6937_v36 = vadd.f32 %v6936_v32, %v6924_v46 }
 0x63c   : > { %v6950_v3 = vadd.f32 %v6949_v9, %v6937_v36 }
 0x63d   : > { %v6912_v51 = vpop.f32.mrf.mxu0 }
 0x645   : > { %v6962_v10 = vpop.f32.mrf.mxu0 }
 0x646   : > { %v6963_v57 = vadd.f32 %v6962_v10, %v6950_v3 }
 0x648   : > { %v6967_v58 = vmax.f32 %v6963_v57, 0.0 }
 0x64a   : > { %v6969_v38 = vpack.c.bf16 %v6967_v58, %v6967_v58 }
 0x64c   : > { %7120 = vmatmul.bf16.vlgmr.msra.gmra.mxu2 %v6969_v38 }
 0x64d   : > { %v6964_v53 = vpop.f32.mrf.mxu0 }
 0x6a9   : > { %v7108_v4 = vpop.f32.mrf.mxu1 }
 0x6aa   : > { %v7109_v42 = vadd.f32 %v7108_v4, %v7002_v7 }
 0x6b1   : > { %v7110_v26 = vpop.f32.mrf.mxu1 }
 0x6cf   : > { %v7121_v11 = vpop.f32.mrf.mxu2 }
 0x6d0   : > { %v7122_v12 = vadd.f32 %v7121_v11, %v7109_v42 }
 0x6d2   : > { %7126 = vst.msk [vmem:[%s432_s22] sm:$0x1] %vm7125_vm7, %v7122_v12 }
 0x6d3   : > { %10485 = shalt.err (!%p10482_p3)
}
 0x6d4   : > { %10407 = dma.vmem_to_hbm [thread:$0]  (%p10632_p5), %s7139_s0, 16, %s7141_s2, %s7128_s23  }
 0x6d7   : > { %v7123_v17 = vpop.f32.mrf.mxu2 }
 0x6d8 PF: > { %p10413_p4 = scmp.ge.s32.totalorder %s10520_s28, 2  ;;  %s7152_s30 = sand.u32 1, %s10508_s25  }
 0x6d9   : > { %s7153_s21 = scalar_lea.sflag [#allocation11], %s7152_s30 }
 0x6da   : > { %p10410_p7 = pnand %p10413_p4, %p10636_p6 }
 0x6dc   : > { %p10411_p8 = pneg %p10410_p7 }
 0x6de   : > { %10503 = dma.done.wait (%p10411_p8), %s7153_s21, 16  }
 0x6df   : > { %10505 = vsyncadd (%p10411_p8), %s7153_s21, 4294967280  ;;  %s14039_s22 = sld [smem:[#allocation13_spill]]  ;;  %p23_p9 = scmp.ge.s32.totalorder %s10619_s14, 4  }
 0x6e0   : > { %s14040_s25 = smov %s10512_s26  ;;  %s14041_s26 = smov %s10516_s27 }
 0x6e1   : > { %s14043_s28 = smov %s10619_s14  ;;  %25 = sbr.rel (!%p23_p9) target bundleno = 7 (0x7), region = 153 }
 0x6e5   : > { %s14042_s27 = smov %s14039_s22 }
 0x6e6   :  { %7158 = vsyncpa [#allocation11], 1 }
 0x6e7   :  { %7160 = vsyncpa [#allocation11 + $0x1], 1 }

</bundles_post_ra>
